<compile_context>
chip_gen: v6e
topology: v6e:2x2x1
jax: 0.10.0
libtpu: 0.0.40
codegen_flags: <defaults>
</compile_context>

<pallas_src>
import functools

import jax
import jax.numpy as jnp
from jax.experimental import pallas as pl
from jax.experimental.pallas import tpu as pltpu

STEM_C = 32        # efficientnet_b0 stem output channels
DIM_IN = 1280      # efficientnet_b0 feature dim (model_dict['efficientnet_b0'][1])
FEAT_DIM = 128     # SupCon head output dim
K_IM2COL = 3 * 3 * 3


def _round_up(x, m):
    return (x + m - 1) // m * m


# ---------------------------------------------------------------------------
# Pallas kernels
# ---------------------------------------------------------------------------

def _encoder_kernel(patches_ref, w_stem_ref, b_stem_ref, w_proj_ref, b_proj_ref,
                    feat_ref, acc_ref, *, hw, tile_hw, need_mask):
    """Fused stem conv + SiLU + 1x1 expand + SiLU + global-average-pool accumulate.

    grid = (N, HW_tiles); acc_ref is a per-batch-row [1, DIM_IN] f32 accumulator that
    persists across the HW (reduction) axis.
    """
    j = pl.program_id(1)

    @pl.when(j == 0)
    def _():
        acc_ref[...] = jnp.zeros_like(acc_ref)

    # Stem 3x3/s2 conv as im2col matmul (BN folded into w/b), fused SiLU.
    p = patches_ref[0]                                            # [tile_hw, 27] bf16
    h = jnp.dot(p, w_stem_ref[...], preferred_element_type=jnp.float32)
    h = h + b_stem_ref[...]
    h = h * jax.nn.sigmoid(h)                                     # SiLU (EUP sigmoid)

    # 1x1 "head conv" expand to DIM_IN, fused SiLU (bf16 MXU, f32 accumulate).
    h = jnp.dot(h.astype(jnp.bfloat16), w_proj_ref[...],
                preferred_element_type=jnp.float32)
    h = h + b_proj_ref[...]
    h = h * jax.nn.sigmoid(h)                                     # SiLU

    if need_mask:  # zero out rows past the true spatial extent (zero-padded rows)
        row = j * tile_hw + jax.lax.broadcasted_iota(jnp.int32, (tile_hw, 1), 0)
        h = jnp.where(row < hw, h, 0.0)

    # Global-average-pool: accumulate per-tile sum; normalize on the last tile only.
    acc_ref[...] += jnp.sum(h, axis=0, keepdims=True)

    @pl.when(j == pl.num_programs(1) - 1)
    def _():
        feat_ref[0] = acc_ref[...] * (1.0 / hw)


def _head_kernel(f_ref, w1_ref, b1_ref, w2_ref, b2_ref, o_ref):
    """MLP head: Linear -> ReLU -> Linear, fused with F.normalize(dim=1)."""
    f = f_ref[...].astype(jnp.bfloat16)
    h = jnp.dot(f, w1_ref[...], preferred_element_type=jnp.float32) + b1_ref[...]
    h = jnp.maximum(h, 0.0)                                       # ReLU
    z = jnp.dot(h.astype(jnp.bfloat16), w2_ref[...],
                preferred_element_type=jnp.float32) + b2_ref[...]
    ssq = jnp.sum(z * z, axis=1, keepdims=True)
    # F.normalize: z / max(||z||, 1e-12)  ==  z * rsqrt(max(||z||^2, 1e-24))
    o_ref[...] = z * jax.lax.rsqrt(jnp.maximum(ssq, 1e-24))


# ---------------------------------------------------------------------------
# Glue: im2col, parameters, forward wrapper
# ---------------------------------------------------------------------------

def _im2col(x_nhwc, kh, kw, stride, pad):
    n, h, w, c = x_nhwc.shape
    xp = jnp.pad(x_nhwc, ((0, 0), (pad, pad), (pad, pad), (0, 0)))
    ho = (h + 2 * pad - kh) // stride + 1
    wo = (w + 2 * pad - kw) // stride + 1
    cols = []
    for i in range(kh):
        for j in range(kw):
            cols.append(xp[:, i:i + stride * ho:stride, j:j + stride * wo:stride, :])
    patches = jnp.stack(cols, axis=-2)                    # [N, Ho, Wo, kh*kw, C]
    return patches.reshape(n, ho * wo, kh * kw * c), ho, wo


def init_params(key):
    k1, k2, k3, k4 = jax.random.split(key, 4)
    return {
        # stem conv 3x3: 3 -> 32 (BN folded: identity scale, zero shift); bf16 for the MXU
        "w_stem": (0.1 * jax.random.normal(k1, (K_IM2COL, STEM_C), jnp.float32)).astype(jnp.bfloat16),
        "b_stem": jnp.zeros((1, STEM_C), jnp.float32),
        # head conv 1x1: 32 -> 1280
        "w_proj": (0.05 * jax.random.normal(k2, (STEM_C, DIM_IN), jnp.float32)).astype(jnp.bfloat16),
        "b_proj": jnp.zeros((1, DIM_IN), jnp.float32),
        # MLP head
        "w1": (0.02 * jax.random.normal(k3, (DIM_IN, DIM_IN), jnp.float32)).astype(jnp.bfloat16),
        "b1": jnp.zeros((1, DIM_IN), jnp.float32),
        "w2": (0.02 * jax.random.normal(k4, (DIM_IN, FEAT_DIM), jnp.float32)).astype(jnp.bfloat16),
        "b2": jnp.zeros((1, FEAT_DIM), jnp.float32),
    }


@jax.jit
def supcon_efficientnet_forward(params, x_nchw):
    # NCHW (PyTorch) -> NHWC
    x = jnp.transpose(x_nchw, (0, 2, 3, 1)).astype(jnp.float32)
    n = x.shape[0]

    # im2col for the 3x3/s2 stem (plain JAX); bf16 halves HBM traffic into the kernel.
    patches, ho, wo = _im2col(x, 3, 3, stride=2, pad=1)   # [N, HW, 27]
    hw = ho * wo
    # Biggest tile that comfortably fits the default VMEM budget on all of v5e/v6e/v7x:
    # per-tile f32 intermediates are [tile_hw, 1280] ~= 5 MiB at tile_hw=1024.
    tile_hw = min(1024, _round_up(hw, 8))
    hw_pad = _round_up(hw, tile_hw)
    if hw_pad != hw:
        patches = jnp.pad(patches, ((0, 0), (0, hw_pad - hw), (0, 0)))
    patches = patches.astype(jnp.bfloat16)

    # ---- fused encoder: stem + expand + SiLU + global average pool ----
    enc_kernel = functools.partial(
        _encoder_kernel, hw=hw, tile_hw=tile_hw, need_mask=(hw_pad != hw))
    feat = pl.pallas_call(
        enc_kernel,
        out_shape=jax.ShapeDtypeStruct((n, 1, DIM_IN), jnp.float32),
        grid=(n, hw_pad // tile_hw),
        in_specs=[
            pl.BlockSpec((1, tile_hw, K_IM2COL), lambda i, j: (i, j, 0)),
            pl.BlockSpec((K_IM2COL, STEM_C), lambda i, j: (0, 0)),   # weights stay resident
            pl.BlockSpec((1, STEM_C), lambda i, j: (0, 0)),
            pl.BlockSpec((STEM_C, DIM_IN), lambda i, j: (0, 0)),
            pl.BlockSpec((1, DIM_IN), lambda i, j: (0, 0)),
        ],
        out_specs=pl.BlockSpec((1, 1, DIM_IN), lambda i, j: (i, 0, 0)),
        scratch_shapes=[pltpu.VMEM((1, DIM_IN), jnp.float32)],
        compiler_params=pltpu.CompilerParams(
            dimension_semantics=("parallel", "arbitrary")),
    )(patches, params["w_stem"], params["b_stem"], params["w_proj"], params["b_proj"])
    feat = feat.reshape(n, DIM_IN)                        # == torch.flatten(encoder(x), 1)

    # ---- MLP head + L2 normalize, tiled over batch rows (weights VMEM-resident) ----
    tile_n = min(128, _round_up(n, 8))
    n_pad = _round_up(n, tile_n)
    feat_pad = jnp.pad(feat, ((0, n_pad - n), (0, 0))) if n_pad != n else feat

    out = pl.pallas_call(
        _head_kernel,
        out_shape=jax.ShapeDtypeStruct((n_pad, FEAT_DIM), jnp.float32),
        grid=(n_pad // tile_n,),
        in_specs=[
            pl.BlockSpec((tile_n, DIM_IN), lambda i: (i, 0)),
            pl.BlockSpec((DIM_IN, DIM_IN), lambda i: (0, 0)),        # w1 resident
            pl.BlockSpec((1, DIM_IN), lambda i: (0, 0)),
            pl.BlockSpec((DIM_IN, FEAT_DIM), lambda i: (0, 0)),      # w2 resident
            pl.BlockSpec((1, FEAT_DIM), lambda i: (0, 0)),
        ],
        out_specs=pl.BlockSpec((tile_n, FEAT_DIM), lambda i: (i, 0)),
        compiler_params=pltpu.CompilerParams(
            dimension_semantics=("parallel",)),
    )(feat_pad, params["w1"], params["b1"], params["w2"], params["b2"])
    return out[:n]                                        # [N, 128], unit L2 norm per row


if __name__ == "__main__":
    x = jax.random.normal(jax.random.PRNGKey(0), (2, 3, 32, 32), jnp.float32)
    params = init_params(jax.random.PRNGKey(42))

    out = jax.block_until_ready(supcon_efficientnet_forward(params, x))

    assert out.shape == (2, FEAT_DIM), out.shape
    assert bool(jnp.all(jnp.isfinite(out)))
    norms = jnp.linalg.norm(out, axis=1)
    assert bool(jnp.all(jnp.abs(norms - 1.0) < 1e-3)), norms
    print("KERNEL_OK")
</pallas_src>

<mosaic_0001>
module attributes {stable_mosaic.version = 11 : i64} {
  func.func @_encoder_kernel(%arg0: i32, %arg1: i32, %arg2: memref<1x256x27xbf16, #tpu.memory_space<vmem>>, %arg3: memref<27x32xbf16, #tpu.memory_space<vmem>>, %arg4: memref<1x32xf32, #tpu.memory_space<vmem>>, %arg5: memref<32x1280xbf16, #tpu.memory_space<vmem>>, %arg6: memref<1x1280xf32, #tpu.memory_space<vmem>>, %arg7: memref<1x1x1280xf32, #tpu.memory_space<vmem>>, %arg8: memref<1x1280xf32, #tpu.memory_space<vmem>>) attributes {dimension_semantics = [#tpu.dimension_semantics<parallel>, #tpu.dimension_semantics<arbitrary>], iteration_bounds = array<i64: 2, 1>, scalar_prefetch = 0 : i64, scratch_operands = 1 : i64, tpu.core_type = #tpu.core_type<tc>, window_params = [{transform_indices = @transform_0, window_bounds = array<i64: 1, 256, 27>}, {pipeline_mode = #tpu.pipeline_mode<synchronous>, transform_indices = @transform_1, window_bounds = array<i64: 27, 32>}, {pipeline_mode = #tpu.pipeline_mode<synchronous>, transform_indices = @transform_2, window_bounds = array<i64: 1, 32>}, {pipeline_mode = #tpu.pipeline_mode<synchronous>, transform_indices = @transform_3, window_bounds = array<i64: 32, 1280>}, {pipeline_mode = #tpu.pipeline_mode<synchronous>, transform_indices = @transform_4, window_bounds = array<i64: 1, 1280>}, {transform_indices = @transform_5, window_bounds = array<i64: 1, 1, 1280>}]} {
    %c0_i32 = arith.constant 0 : i32
    %0 = arith.cmpi eq, %arg1, %c0_i32 : i32
    %1 = arith.extui %0 : i1 to i32
    %c0_i32_0 = arith.constant 0 : i32
    %2 = arith.cmpi ne, %1, %c0_i32_0 : i32
    scf.if %2 {
      %cst_21 = arith.constant 0.000000e+00 : f32
      %36 = vector.broadcast %cst_21 : f32 to vector<1x1280xf32>
      %c0_22 = arith.constant 0 : index
      %c0_23 = arith.constant 0 : index
      %37 = vector.load %arg8[%c0_22, %c0_23] : memref<1x1280xf32, #tpu.memory_space<vmem>>, vector<1x1280xf32>
      tpu.vector_store %arg8[%c0_22, %c0_23], %36 {strides = array<i32>} : memref<1x1280xf32, #tpu.memory_space<vmem>>, vector<1x1280xf32>,
    } else {
    }
    %c0 = arith.constant 0 : index
    %c0_1 = arith.constant 0 : index
    %c0_2 = arith.constant 0 : index
    %3 = vector.load %arg2[%c0, %c0_1, %c0_2] : memref<1x256x27xbf16, #tpu.memory_space<vmem>>, vector<1x256x27xbf16>
    %4 = vector.shape_cast %3 : vector<1x256x27xbf16> to vector<256x27xbf16>
    %c0_3 = arith.constant 0 : index
    %c0_4 = arith.constant 0 : index
    %5 = vector.load %arg3[%c0_3, %c0_4] : memref<27x32xbf16, #tpu.memory_space<vmem>>, vector<27x32xbf16>
    %cst = arith.constant dense<0.000000e+00> : vector<256x32xf32>
    %6 = tpu.matmul %4, %5, %cst {dimension_numbers = #tpu.dot_dimension_numbers<[1], [0], [0], [1], [0, 0, 1, 1], [], []>} : vector<256x27xbf16>, vector<27x32xbf16>, vector<256x32xf32> -> vector<256x32xf32>
    %c0_5 = arith.constant 0 : index
    %c0_6 = arith.constant 0 : index
    %7 = vector.load %arg4[%c0_5, %c0_6] : memref<1x32xf32, #tpu.memory_space<vmem>>, vector<1x32xf32>
    %8 = vector.broadcast %7 : vector<1x32xf32> to vector<256x32xf32>
    %9 = arith.addf %6, %8 : vector<256x32xf32>
    %10 = arith.negf %9 : vector<256x32xf32>
    %11 = math.exp %10 : vector<256x32xf32>
    %cst_7 = arith.constant 1.000000e+00 : f32
    %12 = vector.broadcast %cst_7 : f32 to vector<256x32xf32>
    %13 = arith.addf %12, %11 : vector<256x32xf32>
    %14 = arith.divf %12, %13 : vector<256x32xf32>
    %15 = arith.mulf %9, %14 : vector<256x32xf32>
    %16 = arith.truncf %15 : vector<256x32xf32> to vector<256x32xbf16>
    %c0_8 = arith.constant 0 : index
    %c0_9 = arith.constant 0 : index
    %17 = vector.load %arg5[%c0_8, %c0_9] : memref<32x1280xbf16, #tpu.memory_space<vmem>>, vector<32x1280xbf16>
    %cst_10 = arith.constant dense<0.000000e+00> : vector<256x1280xf32>
    %18 = tpu.matmul %16, %17, %cst_10 {dimension_numbers = #tpu.dot_dimension_numbers<[1], [0], [0], [1], [0, 0, 1, 1], [], []>} : vector<256x32xbf16>, vector<32x1280xbf16>, vector<256x1280xf32> -> vector<256x1280xf32>
    %c0_11 = arith.constant 0 : index
    %c0_12 = arith.constant 0 : index
    %19 = vector.load %arg6[%c0_11, %c0_12] : memref<1x1280xf32, #tpu.memory_space<vmem>>, vector<1x1280xf32>
    %20 = vector.broadcast %19 : vector<1x1280xf32> to vector<256x1280xf32>
    %21 = arith.addf %18, %20 : vector<256x1280xf32>
    %22 = arith.negf %21 : vector<256x1280xf32>
    %23 = math.exp %22 : vector<256x1280xf32>
    %cst_13 = arith.constant 1.000000e+00 : f32
    %24 = vector.broadcast %cst_13 : f32 to vector<256x1280xf32>
    %25 = arith.addf %24, %23 : vector<256x1280xf32>
    %26 = arith.divf %24, %25 : vector<256x1280xf32>
    %27 = arith.mulf %21, %26 : vector<256x1280xf32>
    %c0_14 = arith.constant 0 : index
    %c0_15 = arith.constant 0 : index
    %28 = vector.load %arg8[%c0_14, %c0_15] : memref<1x1280xf32, #tpu.memory_space<vmem>>, vector<1x1280xf32>
    %cst_16 = arith.constant dense<0.000000e+00> : vector<1280xf32>
    %29 = vector.multi_reduction <add>, %27, %cst_16 [0] : vector<256x1280xf32> to vector<1280xf32>
    %30 = vector.shape_cast %29 : vector<1280xf32> to vector<1x1280xf32>
    %31 = arith.addf %28, %30 : vector<1x1280xf32>
    %c0_17 = arith.constant 0 : index
    %c0_18 = arith.constant 0 : index
    %32 = vector.load %arg8[%c0_17, %c0_18] : memref<1x1280xf32, #tpu.memory_space<vmem>>, vector<1x1280xf32>
    tpu.vector_store %arg8[%c0_17, %c0_18], %31 {strides = array<i32>} : memref<1x1280xf32, #tpu.memory_space<vmem>>, vector<1x1280xf32>,
    %c0_i32_19 = arith.constant 0 : i32
    %33 = arith.cmpi eq, %arg1, %c0_i32_19 : i32
    %34 = arith.extui %33 : i1 to i32
    %c0_i32_20 = arith.constant 0 : i32
    %35 = arith.cmpi ne, %34, %c0_i32_20 : i32
    scf.if %35 {
      %c0_21 = arith.constant 0 : index
      %c0_22 = arith.constant 0 : index
      %36 = vector.load %arg8[%c0_21, %c0_22] : memref<1x1280xf32, #tpu.memory_space<vmem>>, vector<1x1280xf32>
      %cst_23 = arith.constant 3.906250e-03 : f32
      %37 = vector.broadcast %cst_23 : f32 to vector<1x1280xf32>
      %38 = arith.mulf %36, %37 : vector<1x1280xf32>
      %c0_24 = arith.constant 0 : index
      %c0_25 = arith.constant 0 : index
      %c0_26 = arith.constant 0 : index
      %39 = vector.load %arg7[%c0_24, %c0_25, %c0_26] : memref<1x1x1280xf32, #tpu.memory_space<vmem>>, vector<1x1x1280xf32>
      %40 = vector.shape_cast %39 : vector<1x1x1280xf32> to vector<1x1280xf32>
      %41 = vector.shape_cast %38 : vector<1x1280xf32> to vector<1x1x1280xf32>
      tpu.vector_store %arg7[%c0_24, %c0_25, %c0_26], %41 {strides = array<i32>} : memref<1x1x1280xf32, #tpu.memory_space<vmem>>, vector<1x1x1280xf32>,
    } else {
    }
    return
  }
  func.func @transform_0(%arg0: i32, %arg1: i32) -> (i32, i32, i32) {
    %c0_i32 = arith.constant 0 : i32
    %c0_i32_0 = arith.constant 0 : i32
    return %arg0, %arg1, %c0_i32 : i32, i32, i32
  }
  func.func @transform_1(%arg0: i32, %arg1: i32) -> (i32, i32) {
    %c0_i32 = arith.constant 0 : i32
    %c0_i32_0 = arith.constant 0 : i32
    %c0_i32_1 = arith.constant 0 : i32
    return %c0_i32, %c0_i32_0 : i32, i32
  }
  func.func @transform_2(%arg0: i32, %arg1: i32) -> (i32, i32) {
    %c0_i32 = arith.constant 0 : i32
    %c0_i32_0 = arith.constant 0 : i32
    %c0_i32_1 = arith.constant 0 : i32
    return %c0_i32, %c0_i32_0 : i32, i32
  }
  func.func @transform_3(%arg0: i32, %arg1: i32) -> (i32, i32) {
    %c0_i32 = arith.constant 0 : i32
    %c0_i32_0 = arith.constant 0 : i32
    %c0_i32_1 = arith.constant 0 : i32
    return %c0_i32, %c0_i32_0 : i32, i32
  }
  func.func @transform_4(%arg0: i32, %arg1: i32) -> (i32, i32) {
    %c0_i32 = arith.constant 0 : i32
    %c0_i32_0 = arith.constant 0 : i32
    %c0_i32_1 = arith.constant 0 : i32
    return %c0_i32, %c0_i32_0 : i32, i32
  }
  func.func @transform_5(%arg0: i32, %arg1: i32) -> (i32, i32, i32) {
    %c0_i32 = arith.constant 0 : i32
    %c0_i32_0 = arith.constant 0 : i32
    %c0_i32_1 = arith.constant 0 : i32
    return %arg0, %c0_i32, %c0_i32_0 : i32, i32, i32
  }
}

module attributes {stable_mosaic.version = 11 : i64} {
  func.func @_head_kernel(%arg0: i32, %arg1: memref<8x1280xf32, #tpu.memory_space<vmem>>, %arg2: memref<1280x1280xbf16, #tpu.memory_space<vmem>>, %arg3: memref<1x1280xf32, #tpu.memory_space<vmem>>, %arg4: memref<1280x128xbf16, #tpu.memory_space<vmem>>, %arg5: memref<1x128xf32, #tpu.memory_space<vmem>>, %arg6: memref<8x128xf32, #tpu.memory_space<vmem>>) attributes {dimension_semantics = [#tpu.dimension_semantics<parallel>], iteration_bounds = array<i64: 1>, scalar_prefetch = 0 : i64, scratch_operands = 0 : i64, tpu.core_type = #tpu.core_type<tc>, window_params = [{transform_indices = @transform_0, window_bounds = array<i64: 8, 1280>}, {pipeline_mode = #tpu.pipeline_mode<synchronous>, transform_indices = @transform_1, window_bounds = array<i64: 1280, 1280>}, {pipeline_mode = #tpu.pipeline_mode<synchronous>, transform_indices = @transform_2, window_bounds = array<i64: 1, 1280>}, {pipeline_mode = #tpu.pipeline_mode<synchronous>, transform_indices = @transform_3, window_bounds = array<i64: 1280, 128>}, {pipeline_mode = #tpu.pipeline_mode<synchronous>, transform_indices = @transform_4, window_bounds = array<i64: 1, 128>}, {transform_indices = @transform_5, window_bounds = array<i64: 8, 128>}]} {
    %c0 = arith.constant 0 : index
    %c0_0 = arith.constant 0 : index
    %0 = vector.load %arg1[%c0, %c0_0] : memref<8x1280xf32, #tpu.memory_space<vmem>>, vector<8x1280xf32>
    %1 = arith.truncf %0 : vector<8x1280xf32> to vector<8x1280xbf16>
    %c0_1 = arith.constant 0 : index
    %c0_2 = arith.constant 0 : index
    %2 = vector.load %arg2[%c0_1, %c0_2] : memref<1280x1280xbf16, #tpu.memory_space<vmem>>, vector<1280x1280xbf16>
    %cst = arith.constant dense<0.000000e+00> : vector<8x1280xf32>
    %3 = tpu.matmul %1, %2, %cst {dimension_numbers = #tpu.dot_dimension_numbers<[1], [0], [0], [1], [0, 0, 1, 1], [], []>} : vector<8x1280xbf16>, vector<1280x1280xbf16>, vector<8x1280xf32> -> vector<8x1280xf32>
    %c0_3 = arith.constant 0 : index
    %c0_4 = arith.constant 0 : index
    %4 = vector.load %arg3[%c0_3, %c0_4] : memref<1x1280xf32, #tpu.memory_space<vmem>>, vector<1x1280xf32>
    %5 = vector.broadcast %4 : vector<1x1280xf32> to vector<8x1280xf32>
    %6 = arith.addf %3, %5 : vector<8x1280xf32>
    %cst_5 = arith.constant 0.000000e+00 : f32
    %7 = vector.broadcast %cst_5 : f32 to vector<8x1280xf32>
    %8 = arith.maximumf %6, %7 : vector<8x1280xf32>
    %9 = arith.truncf %8 : vector<8x1280xf32> to vector<8x1280xbf16>
    %c0_6 = arith.constant 0 : index
    %c0_7 = arith.constant 0 : index
    %10 = vector.load %arg4[%c0_6, %c0_7] : memref<1280x128xbf16, #tpu.memory_space<vmem>>, vector<1280x128xbf16>
    %cst_8 = arith.constant dense<0.000000e+00> : vector<8x128xf32>
    %11 = tpu.matmul %9, %10, %cst_8 {dimension_numbers = #tpu.dot_dimension_numbers<[1], [0], [0], [1], [0, 0, 1, 1], [], []>} : vector<8x1280xbf16>, vector<1280x128xbf16>, vector<8x128xf32> -> vector<8x128xf32>
    %c0_9 = arith.constant 0 : index
    %c0_10 = arith.constant 0 : index
    %12 = vector.load %arg5[%c0_9, %c0_10] : memref<1x128xf32, #tpu.memory_space<vmem>>, vector<1x128xf32>
    %13 = vector.broadcast %12 : vector<1x128xf32> to vector<8x128xf32>
    %14 = arith.addf %11, %13 : vector<8x128xf32>
    %15 = arith.mulf %14, %14 : vector<8x128xf32>
    %cst_11 = arith.constant dense<0.000000e+00> : vector<8xf32>
    %16 = vector.multi_reduction <add>, %15, %cst_11 [1] : vector<8x128xf32> to vector<8xf32>
    %17 = vector.shape_cast %16 : vector<8xf32> to vector<8x1xf32>
    %cst_12 = arith.constant 1.000000e-24 : f32
    %18 = vector.broadcast %cst_12 : f32 to vector<8x1xf32>
    %19 = arith.maximumf %17, %18 : vector<8x1xf32>
    %20 = math.rsqrt %19 : vector<8x1xf32>
    %21 = vector.broadcast %20 : vector<8x1xf32> to vector<8x128xf32>
    %22 = arith.mulf %14, %21 : vector<8x128xf32>
    %c0_13 = arith.constant 0 : index
    %c0_14 = arith.constant 0 : index
    %23 = vector.load %arg6[%c0_13, %c0_14] : memref<8x128xf32, #tpu.memory_space<vmem>>, vector<8x128xf32>
    tpu.vector_store %arg6[%c0_13, %c0_14], %22 {strides = array<i32>} : memref<8x128xf32, #tpu.memory_space<vmem>>, vector<8x128xf32>,
    return
  }
  func.func @transform_0(%arg0: i32) -> (i32, i32) {
    %c0_i32 = arith.constant 0 : i32
    %c0_i32_0 = arith.constant 0 : i32
    return %arg0, %c0_i32 : i32, i32
  }
  func.func @transform_1(%arg0: i32) -> (i32, i32) {
    %c0_i32 = arith.constant 0 : i32
    %c0_i32_0 = arith.constant 0 : i32
    %c0_i32_1 = arith.constant 0 : i32
    return %c0_i32, %c0_i32_0 : i32, i32
  }
  func.func @transform_2(%arg0: i32) -> (i32, i32) {
    %c0_i32 = arith.constant 0 : i32
    %c0_i32_0 = arith.constant 0 : i32
    %c0_i32_1 = arith.constant 0 : i32
    return %c0_i32, %c0_i32_0 : i32, i32
  }
  func.func @transform_3(%arg0: i32) -> (i32, i32) {
    %c0_i32 = arith.constant 0 : i32
    %c0_i32_0 = arith.constant 0 : i32
    %c0_i32_1 = arith.constant 0 : i32
    return %c0_i32, %c0_i32_0 : i32, i32
  }
  func.func @transform_4(%arg0: i32) -> (i32, i32) {
    %c0_i32 = arith.constant 0 : i32
    %c0_i32_0 = arith.constant 0 : i32
    %c0_i32_1 = arith.constant 0 : i32
    return %c0_i32, %c0_i32_0 : i32, i32
  }
  func.func @transform_5(%arg0: i32) -> (i32, i32) {
    %c0_i32 = arith.constant 0 : i32
    %c0_i32_0 = arith.constant 0 : i32
    return %arg0, %c0_i32 : i32, i32
  }
}

</mosaic_0001>

<bundles_post_ra>
// kernel: supcon_efficientnet_forward.2
= control target key start
LH: loop header
LB: loop body
LE: loop exit
PB: predicated region body
PF: predicated region fallthrough
CT: control target
= control target key end

     0   :  { %10 = vsyncpa [#allocation4], 0  ;;  %s10792_s0 = inlined_call_operand.vmem [shape: bf16[2,256,27], index: 0, kind: input, shape index: {}]   ;;  %s10793_s1 = inlined_call_operand.hbm [shape: bf16[27,32], index: 1, kind: input, shape index: {}]   ;;  %s10794_s2 = inlined_call_operand.hbm [shape: f32[1,32], index: 2, kind: input, shape index: {}]   ;;  %s10795_s3 = inlined_call_operand.hbm [shape: bf16[32,1280], index: 3, kind: input, shape index: {}]   ;;  %s10796_s4 = inlined_call_operand.hbm [shape: f32[1,1280], index: 4, kind: input, shape index: {}]   ;;  %s10797_s5 = inlined_call_operand.vmem [shape: f32[2,1,1280], index: 5, kind: output, shape index: {}]  }
   0x1   :  { %11 = vsyncpa [#allocation6], 0 }
   0x2   :  { %12 = vsyncpa [#allocation9], 0  ;;  %s7187_s18 = smov 0   ;;  %s7189_s19 = smov 0  }
   0x3   :  { %s7191_s20 = smov 0  }
   0x4 LB: > { %s7145_s21 = smov [#allocation5]   ;;  %s4910_s23 = sadd.s32 4294967295, %s7143_s20   ;;  %s7143_s20 = sphi %s7191_s20, %s18_s20   ;;  %s7139_s19 = sphi %s7189_s19, %s11460_s19   ;;  %s7135_s18 = sphi %s7187_s18, %s11459_s18  }
   0x5   : > { %s199_s22 = sshll.u32 %s7145_s21, 4  ;;  %p4912_p0 = scmp.ge.s32.totalorder %s7143_s20, 1  ;;  %s200_s22 = int_to_ptr.vmem [resolvable:$true] %s199_s22 }
   0x6   : > { %p173_p1 = scmp.lt.s32.totalorder %s7143_s20, 3  ;;  %p7205_p2 = scmp.eq.s32.totalorder %s4910_s23, 0 }
   0x7   : > { %s30_s26 = sadd.s32 1, %s7139_s19  ;;  %s7146_s29 = smov [#allocation3]  }
   0x8   : > { %p7209_p3 = pnand %p4912_p0, %p173_p1  ;;  %p7222_p6 = scmp.ge.s32.totalorder %s30_s26, 2 }
   0x9   : > { %s185_s30 = sshll.u32 %s7146_s29, 4  ;;  %s7016_s6 = scalar_lea.vmem %s200_s22, 16  ;;  %s186_s30 = int_to_ptr.vmem [resolvable:$true] %s185_s30 }
   0xa   : > { %p5490_p4 = pneg %p7209_p3  ;;  %p7017_p8 = scmp.ne.s32.totalorder %s200_s22, %s7016_s6 }
   0xb   : > { %s7023_s7 = scalar_lea.vmem %s200_s22, 32  ;;  %p7024_p11 = scmp.lt.s32.totalorder %s200_s22, %s200_s22 }
   0xc   : > { %p7218_p5 = pnand %p7205_p2, %p5490_p4  ;;  %p7025_p12 = scmp.lt.s32.totalorder %s7023_s7, %s7016_s6 }
   0xe   : > { %p7007_p7 = pneg %p7218_p5  ;;  %p7026_p13 = por %p7025_p12, %p7024_p11 }
  0x10   : > { %p7019_p9 = pnand %p7017_p8, %p7007_p7 }
  0x12   : > { %p7020_p10 = pneg %p7019_p9 }
  0x14   : > { %p7027_p0 = pnand %p7026_p13, %p7020_p10 }
  0x16   : > { %7030 = shalt.err (!%p7027_p0)
}
  0x17   : > { %5496 = dma.hbm_to_vmem [thread:$0]  (!%p7218_p5), %s10794_s2, 16, %s200_s22, [#allocation6]  }
  0x18   : > { %s11462_s26 = smov (%p7222_p6, %s30_s26), 0  ;;  %s7042_s10 = scalar_lea.vmem %s186_s30, 256 }
  0x19   : > { %p7043_p1 = scmp.ne.s32.totalorder %s186_s30, %s7042_s10  ;;  %p7050_p9 = scmp.lt.s32.totalorder %s186_s30, %s186_s30 }
  0x1a   : > { %p7051_p10 = scmp.lt.s32.totalorder %s7042_s10, %s7042_s10 }
  0x1b   : > { %p7045_p4 = pnand %p7043_p1, %p7007_p7 }
  0x1c   : > { %p7052_p11 = por %p7051_p10, %p7050_p9 }
  0x1d   : > { %p7046_p8 = pneg %p7045_p4 }
  0x1f   : > { %p7053_p12 = pnand %p7052_p11, %p7046_p8 }
  0x21   : > { %7056 = shalt.err (!%p7053_p12)
}
  0x22   : > { %s7147_s11 = smov 64   ;;  %s7148_s12 = smov 4  }
  0x23   : > { %5493 = dma.hbm_to_vmem [thread:$0]  (!%p7218_p5), %s10793_s1, 256, %s186_s30, [#allocation4], %s7147_s11, %s7147_s11, %s7148_s12  }
  0x24   : > { %s7149_s15 = smov [#allocation7]  }
  0x25   : > { %s209_s16 = sshll.u32 %s7149_s15, 4  ;;  %s210_s16 = int_to_ptr.vmem [resolvable:$true] %s209_s16 }
  0x26   : > { %s7068_s17 = scalar_lea.vmem %s210_s16, 2560  ;;  %p7076_p1 = scmp.lt.s32.totalorder %s210_s16, %s210_s16 }
  0x27   : > { %p7069_p6 = scmp.ne.s32.totalorder %s210_s16, %s7068_s17  ;;  %p7077_p4 = scmp.lt.s32.totalorder %s7068_s17, %s7068_s17 }
  0x29   : > { %p7071_p13 = pnand %p7069_p6, %p7007_p7  ;;  %p7078_p8 = por %p7077_p4, %p7076_p1 }
  0x2b   : > { %p7072_p0 = pneg %p7071_p13 }
  0x2d   : > { %p7079_p9 = pnand %p7078_p8, %p7072_p0 }
  0x2f   : > { %7082 = shalt.err (!%p7079_p9)
}
  0x30   : > { %s7150_s21 = smov 640   ;;  %s7151_s22 = smov 40  }
  0x31   : > { %5499 = dma.hbm_to_vmem [thread:$0]  (!%p7218_p5), %s10795_s3, 2560, %s210_s16, [#allocation6], %s7150_s21, %s7150_s21, %s7151_s22  }
  0x32   : > { %s7152_s29 = smov [#allocation8]  }
  0x33   : > { %s223_s30 = sshll.u32 %s7152_s29, 4  ;;  %s224_s30 = int_to_ptr.vmem [resolvable:$true] %s223_s30 }
  0x34   : > { %s7094_s6 = scalar_lea.vmem %s224_s30, 160  ;;  %p7102_p6 = scmp.lt.s32.totalorder %s224_s30, %s224_s30 }
  0x35   : > { %p7095_p10 = scmp.ne.s32.totalorder %s224_s30, %s7094_s6  ;;  %p7103_p13 = scmp.lt.s32.totalorder %s7094_s6, %s7094_s6 }
  0x37   : > { %p7097_p11 = pnand %p7095_p10, %p7007_p7  ;;  %p7104_p0 = por %p7103_p13, %p7102_p6 }
  0x39   : > { %p7098_p12 = pneg %p7097_p11 }
  0x3b   : > { %p7105_p1 = pnand %p7104_p0, %p7098_p12 }
  0x3d   : > { %7108 = shalt.err (!%p7105_p1)
}
  0x3e   : > { %5502 = dma.hbm_to_vmem [thread:$0]  (!%p7218_p5), %s10796_s4, 160, %s224_s30, [#allocation9]  }
  0x3f   : > { %249 = sbr.rel (%p7209_p3) target bundleno = 1224 (0x4c8), region = 40 }
  0x44   : > { %7122 = dma.done.wait (%p7205_p2), [#allocation4], 256  }
  0x45   : > { %7124 = vsyncadd (%p7205_p2), [#allocation4], 4294967040 }
  0x46   : > { %7126 = dma.done.wait (%p7205_p2), [#allocation6], 2576  }
  0x47   : > { %7128 = vsyncadd (%p7205_p2), [#allocation6], 4294964720 }
  0x48   : > { %7130 = dma.done.wait (%p7205_p2), [#allocation9], 160  }
  0x49   : > { %7132 = vsyncadd (%p7205_p2), [#allocation9], 4294967136  ;;  %vm500_vm0 = vcmask 1044480   ;;  %p293_p3 = scmp.lt.s32.totalorder %s7135_s18, 1  ;;  %vm501_vm1 = vcmask 1045504   ;;  %v7153_v0 = vmov 65535  }
  0x4a   : > { %v502_v1 = vsel %vm500_vm0, 4294967295, %v7153_v0  ;;  %v5547_v3 = vld [vmem:[#allocation3 + $0x8] sm:$0x3f]   ;;  %v5548_v4 = vld [vmem:[#allocation3] sm:$0xff]   ;;  %vm451_vm2 = vcmask 220160   ;;  %v10801_v26 = vmov 0  }
  0x4b   : > { %s11464_s18 = smov (!%p293_p3, %s7135_s18), 1  ;;  %v503_v2 = vsel %vm501_vm1, %v502_v1, 0  ;;  %v5567_v22 = vld [vmem:[#allocation7 + $0x54] ss:$40 sps:$4 sm:$0xff]   ;;  %v5565_v23 = vld [vmem:[#allocation7 + $0x50] ss:$40 sps:$4 sm:$0xff]   ;;  %1203 = vmatprep.mubr.bf16.mxu1 %v10801_v26 }
  0x4c   : > { %s5414_s25 = sshll.u32 %s11464_s18, 7  ;;  %v505_v5 = vand.u32 %v5547_v3, %v503_v2  ;;  %5469 = vmatprep.subr.bf16.mxu1 %v5567_v22  ;;  %v5570_v24 = vld [vmem:[#allocation7 + $0x4] ss:$40 sps:$4 sm:$0xff]   ;;  %v5568_v25 = vld [vmem:[#allocation7] ss:$40 sps:$4 sm:$0xff]   ;;  %vm1082_vm3 = vcmask 261120  }
  0x4d   : > { %s7286_s10 = scalar_lea.vmem %s10792_s0, %s5414_s25  ;;  %5471 = vmatpush1.bf16.msra.mxu1 %v5565_v23  ;;  %v5576_v27 = vld [vmem:[#allocation7 + $0x5c] ss:$40 sps:$4 sm:$0xff]   ;;  %s5473_s24 = smul.u32 10, %s11464_s18 }
  0x4e   : > { %v5549_v6 = vld [vmem:[%s7286_s10] sm:$0xff]   ;;  %5433 = vmatprep.subr.bf16.mxu0 %v505_v5  ;;  %v5550_v7 = vld [vmem:[%s7286_s10 + $0x8] sm:$0xff]   ;;  %v5551_v8 = vld [vmem:[%s7286_s10 + $0x10] sm:$0xff]   ;;  %5470 = vmatprep.subr.bf16.mxu1 %v5570_v24 }
  0x4f   : > { %5437 = vmatprep.mubr.msk.bf16.mxu0 %vm451_vm2, %v5549_v6  ;;  %5434 = vmatpush3.bf16.msra.mxu0 %v505_v5  ;;  %v5552_v9 = vld [vmem:[%s7286_s10 + $0x18] sm:$0xff]   ;;  %v5553_v10 = vld [vmem:[%s7286_s10 + $0x20] sm:$0xff]   ;;  %v5554_v11 = vld [vmem:[%s7286_s10 + $0x28] sm:$0xff]   ;;  %s10630_s12 = scalar_lea.vmem %s10797_s5, %s5473_s24 }
  0x50   : > { %5435 = vmatprep.subr.bf16.mxu0 %v5548_v4  ;;  %v5555_v12 = vld [vmem:[%s7286_s10 + $0x30] sm:$0xff]   ;;  %v5556_v13 = vld [vmem:[%s7286_s10 + $0x38] sm:$0xff]   ;;  %v5557_v14 = vld [vmem:[%s7286_s10 + $0x40] sm:$0xff]  }
  0x51   : > { %v5558_v15 = vld [vmem:[%s7286_s10 + $0x48] sm:$0xff]   ;;  %v5559_v16 = vld [vmem:[%s7286_s10 + $0x50] sm:$0xff]   ;;  %v5560_v17 = vld [vmem:[%s7286_s10 + $0x58] sm:$0xff]   ;;  %5472 = vmatpush1.bf16.msra.mxu1 %v5568_v25 }
  0x52   : > { %v5561_v18 = vld [vmem:[%s7286_s10 + $0x60] sm:$0xff]   ;;  %v5562_v19 = vld [vmem:[%s7286_s10 + $0x68] sm:$0xff]   ;;  %v5563_v20 = vld [vmem:[%s7286_s10 + $0x70] sm:$0xff]  }
  0x53   : > { %5436 = vmatpush3.bf16.msra.mxu0 %v5548_v4  ;;  %v5564_v21 = vld [vmem:[%s7286_s10 + $0x78] sm:$0xff]   ;;  %v5573_v28 = vld [vmem:[#allocation7 + $0x64] ss:$40 sps:$4 sm:$0xff]  }
  0x54   : > { %1143 = vmatprep.subr.bf16.mxu0 %v5567_v22  ;;  %1529 = vmatprep.subr.bf16.mxu1 %v5573_v28  ;;  %v7322_v30 = vld [vmem:[#allocation5] ss:$0 sm:$0xff] }
  0x56   : > { %5438 = vmatmul.mubr.msk.bf16.vlgmr.msra.gmra.mxu0 %vm451_vm2, %v5550_v7 }
  0x57   : > { %5441 = vmatprep.mubr.msk.bf16.mxu0 %vm451_vm2, %v5551_v8  ;;  %1144 = vmatpush1.bf16.msra.mxu0 %v5565_v23 }
  0x58   : > { %1145 = vmatprep.subr.bf16.mxu0 %v5570_v24 }
  0x5b   : > { %1146 = vmatpush1.bf16.msra.mxu0 %v5568_v25 }
  0x5c   : > { %1336 = vmatprep.subr.bf16.mxu0 %v5576_v27 }
  0x5e   : > { %5442 = vmatmul.mubr.msk.bf16.gmra.mxu0 %vm451_vm2, %v5552_v9 }
  0x5f   : > { %5445 = vmatprep.mubr.msk.bf16.mxu0 %vm451_vm2, %v5553_v10 }
  0x66   : > { %5446 = vmatmul.mubr.msk.bf16.gmra.mxu0 %vm451_vm2, %v5554_v11 }
  0x67   : > { %5449 = vmatprep.mubr.msk.bf16.mxu0 %vm451_vm2, %v5555_v12 }
  0x6e   : > { %5450 = vmatmul.mubr.msk.bf16.gmra.mxu0 %vm451_vm2, %v5556_v13 }
  0x6f   : > { %5453 = vmatprep.mubr.msk.bf16.mxu0 %vm451_vm2, %v5557_v14 }
  0x76   : > { %5454 = vmatmul.mubr.msk.bf16.gmra.mxu0 %vm451_vm2, %v5558_v15 }
  0x77   : > { %5457 = vmatprep.mubr.msk.bf16.mxu0 %vm451_vm2, %v5559_v16 }
  0x7e   : > { %5458 = vmatmul.mubr.msk.bf16.gmra.mxu0 %vm451_vm2, %v5560_v17 }
  0x7f   : > { %5461 = vmatprep.mubr.msk.bf16.mxu0 %vm451_vm2, %v5561_v18 }
  0x86   : > { %5462 = vmatmul.mubr.msk.bf16.gmra.mxu0 %vm451_vm2, %v5562_v19 }
  0x87   : > { %5465 = vmatprep.mubr.msk.bf16.mxu0 %vm451_vm2, %v5563_v20 }
  0x8e   : > { %5466 = vmatmul.mubr.msk.bf16.gmra.mxu0 %vm451_vm2, %v5564_v21 }
  0x8f   : > { %1163 = vmatprep.mubr.bf16.mxu0 %v10801_v26 }
 0x116   : > { %v5439_v29 = vpop.f32.mrf.mxu0 }
 0x117   : > { %v7328_v34 = vadd.f32 %v5439_v29, %v7322_v30 }
 0x118   : > { %v541_v31 = vpop.f32.mrf.mxu0 }
 0x119   : > { %v7325_v32 = vadd.f32 %v7322_v30, %v541_v31  ;;  %v4962_v41 = vmul.f32 -1.442695, %v7328_v34 }
 0x11a   : > { %v5440_v33 = vpop.f32.mrf.mxu0 }
 0x11b   : > { %v4960_v35 = vmul.f32 -1.442695, %v7325_v32  ;;  %v7332_v36 = vadd.f32 %v5440_v33, %v7322_v30 }
 0x11c   : > { %v544_v37 = vpop.f32.mrf.mxu0 }
 0x11d   : > { %5595 = vpow2.f32 %v4960_v35  ;;  %v4963_v38 = vmul.f32 -1.442695, %v7332_v36  ;;  %v7336_v39 = vadd.f32 %v7322_v30, %v544_v37 }
 0x11e   : > { %v5443_v40 = vpop.f32.mrf.mxu0 }
 0x11f   : > { %v4961_v42 = vmul.f32 -1.442695, %v7336_v39  ;;  %5597 = vpow2.f32 %v4963_v38  ;;  %v7356_v56 = vadd.f32 %v5443_v40, %v7322_v30 }
 0x120   : > { %v557_v43 = vpop.f32.mrf.mxu0 }
 0x121   : > { %5599 = vpow2.f32 %v4961_v42  ;;  %v7341_v45 = vadd.f32 %v7322_v30, %v557_v43  ;;  %v4966_v5 = vmul.f32 -1.442695, %v7356_v56 }
 0x122   : > { %v5444_v44 = vpop.f32.mrf.mxu0  ;;  %5601 = vpow2.f32 %v4962_v41 }
 0x123   : > { %v7344_v47 = vadd.f32 %v5444_v44, %v7322_v30  ;;  %v4964_v50 = vmul.f32 -1.442695, %v7341_v45 }
 0x124   : > { %v560_v46 = vpop.f32.mrf.mxu0 }
 0x125   : > { %v7347_v48 = vadd.f32 %v7322_v30, %v560_v46  ;;  %v4967_v53 = vmul.f32 -1.442695, %v7344_v47 }
 0x126   : > { %v5447_v49 = vpop.f32.mrf.mxu0 }
 0x127   : > { %v4965_v51 = vmul.f32 -1.442695, %v7347_v48  ;;  %v7363_v61 = vadd.f32 %v5447_v49, %v7322_v30 }
 0x128   : > { %v573_v52 = vpop.f32.mrf.mxu0 }
 0x129   : > { %5603 = vpow2.f32 %v4965_v51  ;;  %v7353_v54 = vadd.f32 %v7322_v30, %v573_v52  ;;  %v4970_v8 = vmul.f32 -1.442695, %v7363_v61 }
 0x12a   : > { %v5596_v55 = vpop.eup %5595  ;;  %v5448_v57 = vpop.f32.mrf.mxu0  ;;  %5605 = vpow2.f32 %v4964_v50  ;;  %v5574_v50 = vld [vmem:[#allocation7 + $0x58] ss:$40 sps:$4 sm:$0xff]  }
 0x12b   : > { %v764_v58 = vadd.f32 1.0, %v5596_v55  ;;  %v4968_v59 = vmul.f32 -1.442695, %v7353_v54  ;;  %v7360_v60 = vadd.f32 %v5448_v57, %v7322_v30  ;;  %5607 = vpow2.f32 %v4967_v53  ;;  %v5579_v55 = vld [vmem:[#allocation7 + $0xc] ss:$40 sps:$4 sm:$0xff]  }
 0x12c   : > { %v576_v62 = vpop.f32.mrf.mxu0  ;;  %v5598_v63 = vpop.eup %5597 }
 0x12d   : > { %v4971_v0 = vmul.f32 -1.442695, %v7360_v60  ;;  %v7367_v1 = vadd.f32 %v7322_v30, %v576_v62  ;;  %5609 = vpow2.f32 %v4968_v59  ;;  %v767_v10 = vadd.f32 1.0, %v5598_v63 }
 0x12e   : > { %v5600_v2 = vpop.eup %5599  ;;  %v5451_v3 = vpop.f32.mrf.mxu0  ;;  %5611 = vrcp.f32 %v764_v58 }
 0x12f   : > { %v765_v4 = vadd.f32 1.0, %v5600_v2  ;;  %v4969_v6 = vmul.f32 -1.442695, %v7367_v1  ;;  %v5602_v7 = vpop.eup %5601  ;;  %5613 = vpow2.f32 %v4971_v0  ;;  %v7386_v33 = vadd.f32 %v5451_v3, %v7322_v30  ;;  %v5577_v2 = vld [vmem:[#allocation7 + $0x8] ss:$40 sps:$4 sm:$0xff]  }
 0x130   : > { %v589_v9 = vpop.f32.mrf.mxu0  ;;  %v766_v12 = vadd.f32 1.0, %v5602_v7 }
 0x131   : > { %5615 = vrcp.f32 %v765_v4  ;;  %v7373_v13 = vadd.f32 %v7322_v30, %v589_v9  ;;  %v4974_v49 = vmul.f32 -1.442695, %v7386_v33  ;;  %v5585_v4 = vld [vmem:[#allocation7 + $0x6c] ss:$40 sps:$4 sm:$0xff]  }
 0x132   : > { %5617 = vpow2.f32 %v4969_v6  ;;  %v5452_v11 = vpop.f32.mrf.mxu0 }
 0x133   : > { %5619 = vpow2.f32 %v4966_v5  ;;  %v4972_v20 = vmul.f32 -1.442695, %v7373_v13  ;;  %v7383_v23 = vadd.f32 %v5452_v11, %v7322_v30 }
 0x134   : > { %5621 = vpow2.f32 %v4970_v8  ;;  %v592_v14 = vpop.f32.mrf.mxu0 }
 0x135   : > { %5623 = vrcp.f32 %v767_v10  ;;  %v7376_v15 = vadd.f32 %v7322_v30, %v592_v14  ;;  %v4975_v37 = vmul.f32 -1.442695, %v7383_v23 }
 0x136   : > { %v5604_v16 = vpop.eup %5603  ;;  %v7378_v17 = vpop.f32.mrf.mxu0  ;;  %5625 = vrcp.f32 %v766_v12 }
 0x137   : > { %v4973_v18 = vmul.f32 -1.442695, %v7376_v15  ;;  %v5606_v19 = vpop.eup %5605  ;;  %v769_v22 = vadd.f32 1.0, %v5604_v16 }
 0x138   : > { %v605_v21 = vpop.f32.mrf.mxu0  ;;  %v5608_v24 = vpop.eup %5607  ;;  %v768_v27 = vadd.f32 1.0, %v5606_v19  ;;  %v7418_v19 = vadd.f32 %v7378_v17, %v7322_v30 }
 0x139   : > { %5627 = vpow2.f32 %v4973_v18  ;;  %v771_v53 = vadd.f32 1.0, %v5608_v24  ;;  %v7402_v0 = vadd.f32 %v7322_v30, %v605_v21 }
 0x13a   : > { %v5610_v25 = vpop.eup %5609  ;;  %v5456_v28 = vpop.f32.mrf.mxu0  ;;  %5629 = vpow2.f32 %v4972_v20  ;;  %v4978_v17 = vmul.f32 -1.442695, %v7418_v19 }
 0x13b   : > { %v5612_v29 = vpop.eup %5611  ;;  %v772_v31 = vadd.f32 1.0, %v5610_v25  ;;  %5631 = vrcp.f32 %v769_v22  ;;  %v4976_v9 = vmul.f32 -1.442695, %v7402_v0  ;;  %v7412_v14 = vadd.f32 %v5456_v28, %v7322_v30 }
 0x13c   : > { %v5614_v35 = vpop.eup %5613  ;;  %v860_v41 = vmul.f32 %v5612_v29, %v7325_v32  ;;  %5633 = vrcp.f32 %v768_v27  ;;  %v608_v43 = vpop.f32.mrf.mxu0 }
 0x13d   : > { %5635 = vrcp.f32 %v772_v31  ;;  %v775_v58 = vadd.f32 1.0, %v5614_v35  ;;  %v7395_v32 = vadd.f32 %v7322_v30, %v608_v43  ;;  %v4979_v24 = vmul.f32 -1.442695, %v7412_v14 }
 0x13e   : > { %v5616_v38 = vpop.eup %5615  ;;  %5637 = vpow2.f32 %v4975_v37  ;;  %v7397_v59 = vpop.f32.mrf.mxu0 }
 0x13f   : > { %v5618_v40 = vpop.eup %5617  ;;  %v861_v42 = vmul.f32 %v5616_v38, %v7336_v39  ;;  %v4977_v5 = vmul.f32 -1.442695, %v7395_v32  ;;  %v5571_v38 = vld [vmem:[#allocation7 + $0x60] ss:$40 sps:$4 sm:$0xff]  }
 0x140   : > { %v5620_v44 = vpop.eup %5619  ;;  %v773_v46 = vadd.f32 1.0, %v5618_v40  ;;  %v621_v8 = vpop.f32.mrf.mxu0 }
 0x141   : > { %v5622_v51 = vpop.eup %5621  ;;  %v7392_v52 = vpack.c.bf16 %v861_v42, %v860_v41  ;;  %v770_v39 = vadd.f32 1.0, %v5620_v44 }
 0x142   : > { %v5624_v57 = vpop.eup %5623  ;;  %5639 = vrcp.f32 %v773_v46  ;;  %v774_v63 = vadd.f32 1.0, %v5622_v51  ;;  %v5460_v16 = vpop.f32.mrf.mxu0  ;;  %v7439_v46 = vadd.f32 %v7322_v30, %v621_v8  ;;  %v5580_v51 = vld [vmem:[#allocation7 + $0x10] ss:$40 sps:$4 sm:$0xff]  }
 0x143   : > { %5012 = vmatmul.mubr.msk.bf16.vlgmr.msra.gmra.mxu0 %vm1082_vm3, %v7392_v52  ;;  %v5626_v62 = vpop.eup %5625  ;;  %5641 = vpow2.f32 %v4974_v49  ;;  %v863_v3 = vmul.f32 %v5624_v57, %v7332_v36  ;;  %v5588_v57 = vld [vmem:[#allocation7 + $0x74] ss:$40 sps:$4 sm:$0xff]  }
 0x144   : > { %1173 = vmatprep.mubr.bf16.mxu0 %v10801_v26  ;;  %1337 = vmatpush1.bf16.msra.mxu0 %v5574_v50  ;;  %5643 = vrcp.f32 %v771_v53  ;;  %v862_v7 = vmul.f32 %v5626_v62, %v7328_v34  ;;  %v624_v28 = vpop.f32.mrf.mxu0 }
 0x145   : > { %1338 = vmatprep.subr.bf16.mxu0 %v5579_v55  ;;  %5645 = vrcp.f32 %v775_v58  ;;  %v7432_v42 = vadd.f32 %v7322_v30, %v624_v28 }
 0x146   : > { %v5628_v6 = vpop.eup %5627  ;;  %5647 = vrcp.f32 %v770_v39  ;;  %v7409_v11 = vpack.c.bf16 %v863_v3, %v862_v7  ;;  %v7462_v7 = vadd.f32 %v7397_v59, %v7322_v30 }
 0x147   : > { %5649 = vrcp.f32 %v774_v63  ;;  %v5630_v10 = vpop.eup %5629  ;;  %v777_v12 = vadd.f32 1.0, %v5628_v6  ;;  %v4981_v55 = vmul.f32 -1.442695, %v7432_v42 }
 0x148   : > { %1339 = vmatpush1.bf16.msra.mxu0 %v5577_v2  ;;  %v5632_v36 = vpop.eup %5631  ;;  %5651 = vpow2.f32 %v4977_v5  ;;  %v776_v18 = vadd.f32 1.0, %v5630_v10  ;;  %v7456_v5 = vadd.f32 %v5460_v16, %v7322_v30  ;;  %v4982_v59 = vmul.f32 -1.442695, %v7462_v7 }
 0x149   : > { %1722 = vmatprep.subr.bf16.mxu0 %v5585_v4  ;;  %v5634_v34 = vpop.eup %5633  ;;  %5653 = vpow2.f32 %v4976_v9  ;;  %v865_v21 = vmul.f32 %v5632_v36, %v7347_v48 }
 0x14a   : > { %v5636_v20 = vpop.eup %5635  ;;  %5655 = vrcp.f32 %v777_v12  ;;  %v864_v27 = vmul.f32 %v5634_v34, %v7341_v45  ;;  %v5582_v45 = vld [vmem:[#allocation7 + $0x14] ss:$40 sps:$4 sm:$0xff]   ;;  %v4983_v10 = vmul.f32 -1.442695, %v7456_v5 }
 0x14b   : > { %5013 = vmatmul.mubr.msk.bf16.gmra.mxu0 %vm1082_vm3, %v7409_v11  ;;  %v5638_v22 = vpop.eup %5637  ;;  %v868_v29 = vmul.f32 %v5636_v20, %v7353_v54  ;;  %5657 = vrcp.f32 %v776_v18  ;;  %v7434_v54 = vpop.f32.mrf.mxu0  ;;  %v5583_v18 = vld [vmem:[#allocation7 + $0x68] ss:$40 sps:$4 sm:$0xff]  }
 0x14c   : > { %1183 = vmatprep.mubr.bf16.mxu0 %v10801_v26  ;;  %v7427_v37 = vpack.c.bf16 %v865_v21, %v864_v27  ;;  %v779_v41 = vadd.f32 1.0, %v5638_v22  ;;  %5659 = vpow2.f32 %v4979_v24 }
 0x14d   : > { %5661 = vpow2.f32 %v4978_v17  ;;  %v637_v62 = vpop.f32.mrf.mxu0 }
 0x14e   : > { %5663 = vrcp.f32 %v779_v41  ;;  %v7482_v27 = vadd.f32 %v7322_v30, %v637_v62 }
 0x14f   : > { %v5640_v25 = vpop.eup %5639 }
 0x150   : > { %v869_v31 = vmul.f32 %v5640_v25, %v7367_v1  ;;  %v5642_v35 = vpop.eup %5641  ;;  %v4984_v41 = vmul.f32 -1.442695, %v7482_v27 }
 0x151   : > { %v5644_v48 = vpop.eup %5643  ;;  %v778_v44 = vadd.f32 1.0, %v5642_v35 }
 0x152   : > { %v7429_v40 = vpack.c.bf16 %v869_v31, %v868_v29  ;;  %v5646_v43 = vpop.eup %5645  ;;  %v867_v50 = vmul.f32 %v5644_v48, %v7344_v47  ;;  %v4980_v47 = vmul.f32 -1.442695, %v7439_v46  ;;  %v5589_v29 = vld [vmem:[#allocation7 + $0x18] ss:$40 sps:$4 sm:$0xff]  }
 0x153   : > { %5014 = vmatmul.mubr.msk.bf16.gmra.mxu0 %vm1082_vm3, %v7427_v37  ;;  %v5648_v1 = vpop.eup %5647  ;;  %v871_v53 = vmul.f32 %v5646_v43, %v7360_v60  ;;  %5665 = vrcp.f32 %v778_v44 }
 0x154   : > { %5016 = vmatmul.mubr.msk.bf16.vlgmr.msra.gmra.mxu1 %vm1082_vm3, %v7429_v40  ;;  %1193 = vmatprep.mubr.bf16.mxu0 %v10801_v26  ;;  %v5650_v49 = vpop.eup %5649  ;;  %v866_v39 = vmul.f32 %v5648_v1, %v7356_v56  ;;  %5667 = vpow2.f32 %v4981_v55  ;;  %v5464_v56 = vpop.f32.mrf.mxu0 }
 0x155   : > { %1530 = vmatpush1.bf16.msra.mxu1 %v5571_v38  ;;  %1213 = vmatprep.mubr.bf16.mxu1 %v10801_v26  ;;  %v5652_v58 = vpop.eup %5651  ;;  %v870_v63 = vmul.f32 %v5650_v49, %v7363_v61  ;;  %5669 = vpow2.f32 %v4980_v47  ;;  %v7495_v44 = vadd.f32 %v5464_v56, %v7322_v30 }
 0x156   : > { %1531 = vmatprep.subr.bf16.mxu1 %v5582_v45  ;;  %v5654_v2 = vpop.eup %5653  ;;  %v7451_v3 = vpack.c.bf16 %v867_v50, %v866_v39  ;;  %v781_v60 = vadd.f32 1.0, %v5652_v58  ;;  %v640_v12 = vpop.f32.mrf.mxu0 }
 0x157   : > { %v7453_v4 = vpack.c.bf16 %v871_v53, %v870_v63  ;;  %v5656_v6 = vpop.eup %5655  ;;  %v780_v61 = vadd.f32 1.0, %v5654_v2  ;;  %v7475_v22 = vadd.f32 %v7322_v30, %v640_v12  ;;  %v4987_v55 = vmul.f32 -1.442695, %v7495_v44 }
 0x158   : > { %v5658_v8 = vpop.eup %5657  ;;  %v873_v9 = vmul.f32 %v5656_v6, %v7376_v15  ;;  %5671 = vrcp.f32 %v781_v60  ;;  %v5591_v15 = vld [vmem:[#allocation7 + $0x1c] ss:$40 sps:$4 sm:$0xff]   ;;  %v7477_v25 = vpop.f32.mrf.mxu0 }
 0x159   : > { %1532 = vmatpush1.bf16.msra.mxu1 %v5580_v51  ;;  %10950 = vst [vmem:[#allocation13_spill] sm:$0xff] %v7453_v4  ;;  %v5660_v36 = vpop.eup %5659  ;;  %v872_v16 = vmul.f32 %v5658_v8, %v7373_v13  ;;  %5673 = vrcp.f32 %v780_v61  ;;  %v4985_v17 = vmul.f32 -1.442695, %v7475_v22  ;;  %v7531_v12 = vadd.f32 %v7477_v25, %v7322_v30 }
 0x15a   : > { %1915 = vmatprep.subr.bf16.mxu1 %v5588_v57  ;;  %v5662_v34 = vpop.eup %5661  ;;  %v783_v21 = vadd.f32 1.0, %v5660_v36  ;;  %5675 = vpow2.f32 %v4983_v10  ;;  %v653_v38 = vpop.f32.mrf.mxu0 }
 0x15b   : > { %5015 = vmatmul.mubr.msk.bf16.gmra.mxu0 %vm1082_vm3, %v7451_v3  ;;  %v7472_v20 = vpack.c.bf16 %v873_v9, %v872_v16  ;;  %v5664_v24 = vpop.eup %5663  ;;  %v782_v13 = vadd.f32 1.0, %v5662_v34  ;;  %5677 = vpow2.f32 %v4982_v59  ;;  %v7512_v63 = vadd.f32 %v7322_v30, %v653_v38 }
 0x15c   : > { %5017 = vmatmul.mubr.msk.bf16.gmra.mxu1 %vm1082_vm3, %v7453_v4  ;;  %1356 = vmatprep.mubr.bf16.mxu0 %v10801_v26  ;;  %v875_v31 = vmul.f32 %v5664_v24, %v7383_v23  ;;  %5679 = vrcp.f32 %v783_v21  ;;  %v5468_v49 = vpop.f32.mrf.mxu0  ;;  %v4990_v21 = vmul.f32 -1.442695, %v7531_v12 }
 0x15d   : > { %1223 = vmatprep.mubr.bf16.mxu1 %v10801_v26  ;;  %10951 = vst [vmem:[#allocation14_spill] sm:$0xff] %v7472_v20  ;;  %5681 = vrcp.f32 %v782_v13  ;;  %v4988_v56 = vmul.f32 -1.442695, %v7512_v63  ;;  %v7536_v34 = vadd.f32 %v5468_v49, %v7322_v30 }
 0x15e   : > { %5683 = vpow2.f32 %v4985_v17  ;;  %v656_v58 = vpop.f32.mrf.mxu0 }
 0x15f   : > { %5685 = vpow2.f32 %v4984_v41 }
 0x160   : > { %v5666_v28 = vpop.eup %5665 }
 0x161   : > { %v5668_v35 = vpop.eup %5667  ;;  %v874_v48 = vmul.f32 %v5666_v28, %v7386_v33  ;;  %v7501_v33 = vadd.f32 %v7434_v54, %v7322_v30 }
 0x162   : > { %v5670_v45 = vpop.eup %5669  ;;  %v785_v1 = vadd.f32 1.0, %v5668_v35 }
 0x163   : > { %5028 = vmatmul.mubr.msk.bf16.vlgmr.msra.gmra.mxu0 %vm1082_vm3, %v7392_v52  ;;  %v7492_v43 = vpack.c.bf16 %v875_v31, %v874_v48  ;;  %v784_v50 = vadd.f32 1.0, %v5670_v45  ;;  %v4986_v54 = vmul.f32 -1.442695, %v7501_v33 }
 0x164   : > { %5018 = vmatmul.mubr.msk.bf16.gmra.mxu1 %vm1082_vm3, %v7472_v20  ;;  %1366 = vmatprep.mubr.bf16.mxu0 %v10801_v26  ;;  %5687 = vrcp.f32 %v785_v1 }
 0x165   : > { %1233 = vmatprep.mubr.bf16.mxu1 %v10801_v26  ;;  %1723 = vmatpush1.bf16.msra.mxu0 %v5583_v18  ;;  %10952 = vst [vmem:[#allocation15_spill] sm:$0xff] %v7492_v43  ;;  %v5672_v23 = vpop.eup %5671  ;;  %5689 = vrcp.f32 %v784_v50 }
 0x166   : > { %1724 = vmatprep.subr.bf16.mxu0 %v5591_v15  ;;  %v5674_v51 = vpop.eup %5673  ;;  %v877_v53 = vmul.f32 %v5672_v23, %v7395_v32  ;;  %5691 = vpow2.f32 %v4987_v55  ;;  %v7517_v32 = vadd.f32 %v7322_v30, %v656_v58  ;;  %v4991_v30 = vmul.f32 -1.442695, %v7536_v34 }
 0x167   : > { %v5676_v57 = vpop.eup %5675  ;;  %v876_v39 = vmul.f32 %v5674_v51, %v7402_v0  ;;  %5693 = vpow2.f32 %v4986_v54 }
 0x168   : > { %v5678_v62 = vpop.eup %5677  ;;  %v787_v2 = vadd.f32 1.0, %v5676_v57  ;;  %v4989_v8 = vmul.f32 -1.442695, %v7517_v32 }
 0x169   : > { %1725 = vmatpush1.bf16.msra.mxu0 %v5589_v29  ;;  %v7514_v47 = vpack.c.bf16 %v877_v53, %v876_v39  ;;  %v5680_v60 = vpop.eup %5679  ;;  %v786_v6 = vadd.f32 1.0, %v5678_v62 }
 0x16a   : > { %v5682_v0 = vpop.eup %5681  ;;  %v879_v61 = vmul.f32 %v5680_v60, %v7412_v14  ;;  %5695 = vrcp.f32 %v787_v2 }
 0x16b   : > { %5029 = vmatmul.mubr.msk.bf16.gmra.mxu0 %vm1082_vm3, %v7409_v11  ;;  %10953 = vst [vmem:[#allocation16_spill] sm:$0xff] %v7514_v47  ;;  %v5684_v9 = vpop.eup %5683  ;;  %v878_v10 = vmul.f32 %v5682_v0, %v7418_v19  ;;  %5697 = vrcp.f32 %v786_v6 }
 0x16c   : > { %5019 = vmatmul.mubr.msk.bf16.gmra.mxu1 %vm1082_vm3, %v7492_v43  ;;  %1376 = vmatprep.mubr.bf16.mxu0 %v10801_v26  ;;  %v5686_v36 = vpop.eup %5685  ;;  %5699 = vpow2.f32 %v4988_v56  ;;  %v789_v59 = vadd.f32 1.0, %v5684_v9  ;;  %v5592_v9 = vld [vmem:[#allocation7 + $0x20] ss:$40 sps:$4 sm:$0xff]  }
 0x16d   : > { %1243 = vmatprep.mubr.bf16.mxu1 %v10801_v26  ;;  %v7533_v16 = vpack.c.bf16 %v879_v61, %v878_v10  ;;  %5701 = vpow2.f32 %v4989_v8  ;;  %v788_v18 = vadd.f32 1.0, %v5686_v36  ;;  %v5594_v8 = vld [vmem:[#allocation7 + $0x24] ss:$40 sps:$4 sm:$0xff]   ;;  %v10798_v10 = vlaneseq }
 0x16e   : > { %5703 = vrcp.f32 %v789_v59  ;;  %v7670_v59 = vld [vmem:[#allocation8] sm:$0xff] }
 0x16f   : > { %10954 = vst [vmem:[#allocation17_spill] sm:$0xff] %v7533_v16  ;;  %5705 = vrcp.f32 %v788_v18  ;;  %v7661_v36 = vshrl.u32 %v10798_v10, 7 }
 0x170   : > { %5707 = vpow2.f32 %v4990_v21 }
 0x171   : > { %v5688_v14 = vpop.eup %5687  ;;  %5709 = vpow2.f32 %v4991_v30  ;;  %10960 = vst [vmem:[#allocation23_spill] sm:$0xff] %v7661_v36 }
 0x172   : > { %v5690_v19 = vpop.eup %5689  ;;  %v881_v15 = vmul.f32 %v5688_v14, %v7432_v42 }
 0x173   : > { %5030 = vmatmul.mubr.msk.bf16.gmra.mxu0 %vm1082_vm3, %v7427_v37  ;;  %v5692_v24 = vpop.eup %5691  ;;  %v880_v25 = vmul.f32 %v5690_v19, %v7439_v46 }
 0x174   : > { %5020 = vmatmul.mubr.msk.bf16.gmra.mxu1 %vm1082_vm3, %v7514_v47  ;;  %1386 = vmatprep.mubr.bf16.mxu0 %v10801_v26  ;;  %v5694_v13 = vpop.eup %5693  ;;  %v791_v29 = vadd.f32 1.0, %v5692_v24 }
 0x175   : > { %1253 = vmatprep.mubr.bf16.mxu1 %v10801_v26  ;;  %v7548_v28 = vpack.c.bf16 %v881_v15, %v880_v25  ;;  %v790_v17 = vadd.f32 1.0, %v5694_v13 }
 0x176   : > { %5711 = vrcp.f32 %v791_v29 }
 0x177   : > { %10955 = vst [vmem:[#allocation18_spill] sm:$0xff] %v7548_v28  ;;  %v5696_v31 = vpop.eup %5695  ;;  %5713 = vrcp.f32 %v790_v17 }
 0x178   : > { %v5698_v42 = vpop.eup %5697  ;;  %v883_v35 = vmul.f32 %v5696_v31, %v7456_v5 }
 0x179   : > { %v5700_v46 = vpop.eup %5699  ;;  %v882_v48 = vmul.f32 %v5698_v42, %v7462_v7 }
 0x17a   : > { %v5702_v38 = vpop.eup %5701  ;;  %v792_v41 = vadd.f32 1.0, %v5700_v46 }
 0x17b   : > { %5031 = vmatmul.mubr.msk.bf16.gmra.mxu0 %vm1082_vm3, %v7451_v3  ;;  %v7558_v45 = vpack.c.bf16 %v883_v35, %v882_v48  ;;  %v793_v1 = vadd.f32 1.0, %v5702_v38  ;;  %v5704_v23 = vpop.eup %5703 }
 0x17c   : > { %5021 = vmatmul.mubr.msk.bf16.gmra.mxu1 %vm1082_vm3, %v7533_v16  ;;  %1396 = vmatprep.mubr.bf16.mxu0 %v10801_v26  ;;  %v5706_v49 = vpop.eup %5705  ;;  %5715 = vrcp.f32 %v792_v41  ;;  %v885_v7 = vmul.f32 %v5704_v23, %v7475_v22 }
 0x17d   : > { %1263 = vmatprep.mubr.bf16.mxu1 %v10801_v26  ;;  %10956 = vst [vmem:[#allocation19_spill] sm:$0xff] %v7558_v45  ;;  %v5708_v5 = vpop.eup %5707  ;;  %5717 = vrcp.f32 %v793_v1  ;;  %v884_v51 = vmul.f32 %v5706_v49, %v7482_v27 }
 0x17e   : > { %v5710_v50 = vpop.eup %5709  ;;  %v794_v53 = vadd.f32 1.0, %v5708_v5 }
 0x17f   : > { %v7568_v55 = vpack.c.bf16 %v885_v7, %v884_v51  ;;  %v795_v57 = vadd.f32 1.0, %v5710_v50 }
 0x180   : > { %5719 = vrcp.f32 %v794_v53 }
 0x181   : > { %10957 = vst [vmem:[#allocation20_spill] sm:$0xff] %v7568_v55  ;;  %5721 = vrcp.f32 %v795_v57 }
 0x183   : > { %5032 = vmatmul.mubr.msk.bf16.gmra.mxu0 %vm1082_vm3, %v7429_v40  ;;  %v5712_v58 = vpop.eup %5711 }
 0x184   : > { %5022 = vmatmul.mubr.msk.bf16.gmra.mxu1 %vm1082_vm3, %v7548_v28  ;;  %1406 = vmatprep.mubr.bf16.mxu0 %v10801_v26  ;;  %v5714_v39 = vpop.eup %5713  ;;  %v887_v22 = vmul.f32 %v5712_v58, %v7495_v44 }
 0x185   : > { %1273 = vmatprep.mubr.bf16.mxu1 %v10801_v26  ;;  %v886_v27 = vmul.f32 %v5714_v39, %v7501_v33 }
 0x187   : > { %v7578_v62 = vpack.c.bf16 %v887_v22, %v886_v27 }
 0x189   : > { %v5716_v54 = vpop.eup %5715  ;;  %10958 = vst [vmem:[#allocation21_spill] sm:$0xff] %v7578_v62 }
 0x18a   : > { %v5718_v2 = vpop.eup %5717  ;;  %v888_v60 = vmul.f32 %v5716_v54, %v7512_v63 }
 0x18b   : > { %5033 = vmatmul.mubr.msk.bf16.gmra.mxu0 %vm1082_vm3, %v7453_v4  ;;  %v889_v44 = vmul.f32 %v5718_v2, %v7517_v32  ;;  %v5586_v32 = vld [vmem:[#allocation7 + $0x70] ss:$40 sps:$4 sm:$0xff]  }
 0x18c   : > { %5023 = vmatmul.mubr.msk.bf16.gmra.mxu1 %vm1082_vm3, %v7558_v45  ;;  %1416 = vmatprep.mubr.bf16.mxu0 %v10801_v26 }
 0x18d   : > { %1283 = vmatprep.mubr.bf16.mxu1 %v10801_v26  ;;  %v5720_v6 = vpop.eup %5719  ;;  %v7588_v33 = vpack.c.bf16 %v889_v44, %v888_v60 }
 0x18e   : > { %v5722_v0 = vpop.eup %5721  ;;  %v890_v56 = vmul.f32 %v5720_v6, %v7531_v12  ;;  %v10800_v12 = vsub.s32 0, %v7661_v36 }
 0x18f   : > { %v891_v63 = vmul.f32 %v5722_v0, %v7536_v34  ;;  %v10799_v34 = vsub.s32 1, %v7661_v36 }
 0x190   : > { %v7676_v14 = vrot.slane %v7670_v59, %v10800_v12 }
 0x191   : > { %v7598_v61 = vpack.c.bf16 %v891_v63, %v890_v56  ;;  %v7681_v18 = vrot.slane %v7670_v59, %v10799_v34 }
 0x193   : > { %5034 = vmatmul.mubr.msk.bf16.gmra.mxu0 %vm1082_vm3, %v7472_v20  ;;  %10959 = vst [vmem:[#allocation22_spill] sm:$0xff] %v7598_v61 }
 0x194   : > { %5024 = vmatmul.mubr.msk.bf16.gmra.mxu1 %vm1082_vm3, %v7568_v55  ;;  %1426 = vmatprep.mubr.bf16.mxu0 %v10801_v26 }
 0x195   : > { %1293 = vmatprep.mubr.bf16.mxu1 %v10801_v26 }
 0x19b   : > { %5035 = vmatmul.mubr.msk.bf16.gmra.mxu0 %vm1082_vm3, %v7492_v43 }
 0x19c   : > { %5025 = vmatmul.mubr.msk.bf16.gmra.mxu1 %vm1082_vm3, %v7578_v62  ;;  %1436 = vmatprep.mubr.bf16.mxu0 %v10801_v26 }
 0x19d   : > { %1303 = vmatprep.mubr.bf16.mxu1 %v10801_v26 }
 0x1a3   : > { %5036 = vmatmul.mubr.msk.bf16.gmra.mxu0 %vm1082_vm3, %v7514_v47 }
 0x1a4   : > { %5026 = vmatmul.mubr.msk.bf16.gmra.mxu1 %vm1082_vm3, %v7588_v33  ;;  %1446 = vmatprep.mubr.bf16.mxu0 %v10801_v26 }
 0x1a5   : > { %1313 = vmatprep.mubr.bf16.mxu1 %v10801_v26 }
 0x1ab   : > { %5037 = vmatmul.mubr.msk.bf16.gmra.mxu0 %vm1082_vm3, %v7533_v16 }
 0x1ac   : > { %5027 = vmatmul.mubr.msk.bf16.gmra.mxu1 %vm1082_vm3, %v7598_v61  ;;  %1456 = vmatprep.mubr.bf16.mxu0 %v10801_v26 }
 0x1ad   : > { %1549 = vmatprep.mubr.bf16.mxu1 %v10801_v26 }
 0x1b3   : > { %5038 = vmatmul.mubr.msk.bf16.gmra.mxu0 %vm1082_vm3, %v7548_v28 }
 0x1b4   : > { %5044 = vmatmul.mubr.msk.bf16.vlgmr.msra.gmra.mxu1 %vm1082_vm3, %v7392_v52  ;;  %1466 = vmatprep.mubr.bf16.mxu0 %v10801_v26 }
 0x1b5   : > { %1916 = vmatpush1.bf16.msra.mxu1 %v5586_v32  ;;  %1559 = vmatprep.mubr.bf16.mxu1 %v10801_v26 }
 0x1b6   : > { %1917 = vmatprep.subr.bf16.mxu1 %v5594_v8 }
 0x1b9   : > { %1918 = vmatpush1.bf16.msra.mxu1 %v5592_v9 }
 0x1bb   : > { %5039 = vmatmul.mubr.msk.bf16.gmra.mxu0 %vm1082_vm3, %v7558_v45 }
 0x1bc   : > { %5045 = vmatmul.mubr.msk.bf16.gmra.mxu1 %vm1082_vm3, %v7409_v11  ;;  %1476 = vmatprep.mubr.bf16.mxu0 %v10801_v26 }
 0x1bd   : > { %1569 = vmatprep.mubr.bf16.mxu1 %v10801_v26 }
 0x1c3   : > { %5040 = vmatmul.mubr.msk.bf16.gmra.mxu0 %vm1082_vm3, %v7568_v55 }
 0x1c4   : > { %5046 = vmatmul.mubr.msk.bf16.gmra.mxu1 %vm1082_vm3, %v7427_v37  ;;  %1486 = vmatprep.mubr.bf16.mxu0 %v10801_v26 }
 0x1c5   : > { %1579 = vmatprep.mubr.bf16.mxu1 %v10801_v26 }
 0x1cb   : > { %5041 = vmatmul.mubr.msk.bf16.gmra.mxu0 %vm1082_vm3, %v7578_v62 }
 0x1cc   : > { %5047 = vmatmul.mubr.msk.bf16.gmra.mxu1 %vm1082_vm3, %v7451_v3  ;;  %1496 = vmatprep.mubr.bf16.mxu0 %v10801_v26 }
 0x1cd   : > { %1589 = vmatprep.mubr.bf16.mxu1 %v10801_v26 }
 0x1d3   : > { %5042 = vmatmul.mubr.msk.bf16.gmra.mxu0 %vm1082_vm3, %v7588_v33 }
 0x1d4   : > { %5048 = vmatmul.mubr.msk.bf16.gmra.mxu1 %vm1082_vm3, %v7429_v40  ;;  %1506 = vmatprep.mubr.bf16.mxu0 %v10801_v26 }
 0x1d5   : > { %1599 = vmatprep.mubr.bf16.mxu1 %v10801_v26 }
 0x1db   : > { %5043 = vmatmul.mubr.msk.bf16.gmra.mxu0 %vm1082_vm3, %v7598_v61 }
 0x1dc   : > { %5049 = vmatmul.mubr.msk.bf16.gmra.mxu1 %vm1082_vm3, %v7453_v4  ;;  %1742 = vmatprep.mubr.bf16.mxu0 %v10801_v26 }
 0x1dd   : > { %1609 = vmatprep.mubr.bf16.mxu1 %v10801_v26 }
 0x1e3   : > { %5060 = vmatmul.mubr.msk.bf16.vlgmr.msra.gmra.mxu0 %vm1082_vm3, %v7392_v52 }
 0x1e4   : > { %5050 = vmatmul.mubr.msk.bf16.gmra.mxu1 %vm1082_vm3, %v7472_v20  ;;  %1752 = vmatprep.mubr.bf16.mxu0 %v10801_v26 }
 0x1e5   : > { %1619 = vmatprep.mubr.bf16.mxu1 %v10801_v26 }
 0x1eb   : > { %5061 = vmatmul.mubr.msk.bf16.gmra.mxu0 %vm1082_vm3, %v7409_v11 }
 0x1ec   : > { %5051 = vmatmul.mubr.msk.bf16.gmra.mxu1 %vm1082_vm3, %v7492_v43  ;;  %1762 = vmatprep.mubr.bf16.mxu0 %v10801_v26 }
 0x1ed   : > { %1629 = vmatprep.mubr.bf16.mxu1 %v10801_v26 }
 0x1f3   : > { %5062 = vmatmul.mubr.msk.bf16.gmra.mxu0 %vm1082_vm3, %v7427_v37 }
 0x1f4   : > { %5052 = vmatmul.mubr.msk.bf16.gmra.mxu1 %vm1082_vm3, %v7514_v47  ;;  %1772 = vmatprep.mubr.bf16.mxu0 %v10801_v26 }
 0x1f5   : > { %1639 = vmatprep.mubr.bf16.mxu1 %v10801_v26 }
 0x1fb   : > { %5063 = vmatmul.mubr.msk.bf16.gmra.mxu0 %vm1082_vm3, %v7451_v3 }
 0x1fc   : > { %5053 = vmatmul.mubr.msk.bf16.gmra.mxu1 %vm1082_vm3, %v7533_v16  ;;  %1782 = vmatprep.mubr.bf16.mxu0 %v10801_v26 }
 0x1fd   : > { %1649 = vmatprep.mubr.bf16.mxu1 %v10801_v26 }
 0x203   : > { %v1165_v19 = vpop.f32.mrf.mxu0  ;;  %5064 = vmatmul.mubr.msk.bf16.gmra.mxu0 %vm1082_vm3, %v7429_v40 }
 0x204   : > { %v7686_v21 = vadd.f32 %v1165_v19, %v7676_v14  ;;  %5054 = vmatmul.mubr.msk.bf16.gmra.mxu1 %vm1082_vm3, %v7548_v28  ;;  %1792 = vmatprep.mubr.bf16.mxu0 %v10801_v26 }
 0x205   : > { %v1167_v15 = vpop.f32.mrf.mxu0  ;;  %1659 = vmatprep.mubr.bf16.mxu1 %v10801_v26 }
 0x206   : > { %v5092_v30 = vmul.f32 -1.442695, %v7686_v21  ;;  %v7694_v24 = vadd.f32 %v1167_v15, %v7681_v18 }
 0x207   : > { %v1169_v25 = vpop.f32.mrf.mxu0 }
 0x208   : > { %5723 = vpow2.f32 %v5092_v30  ;;  %v5093_v13 = vmul.f32 -1.442695, %v7694_v24  ;;  %v7698_v29 = vadd.f32 %v1169_v25, %v7676_v14 }
 0x209   : > { %v1171_v31 = vpop.f32.mrf.mxu0 }
 0x20a   : > { %5725 = vpow2.f32 %v5093_v13  ;;  %v5102_v17 = vmul.f32 -1.442695, %v7698_v29  ;;  %v7702_v42 = vadd.f32 %v1171_v31, %v7681_v18 }
 0x20b   : > { %v1175_v46 = vpop.f32.mrf.mxu0  ;;  %5065 = vmatmul.mubr.msk.bf16.gmra.mxu0 %vm1082_vm3, %v7453_v4 }
 0x20c   : > { %5727 = vpow2.f32 %v5102_v17  ;;  %v5103_v35 = vmul.f32 -1.442695, %v7702_v42  ;;  %v7708_v38 = vadd.f32 %v1175_v46, %v7676_v14  ;;  %5055 = vmatmul.mubr.msk.bf16.gmra.mxu1 %vm1082_vm3, %v7558_v45  ;;  %1802 = vmatprep.mubr.bf16.mxu0 %v10801_v26 }
 0x20d   : > { %v1177_v48 = vpop.f32.mrf.mxu0  ;;  %1669 = vmatprep.mubr.bf16.mxu1 %v10801_v26 }
 0x20e   : > { %5729 = vpow2.f32 %v5103_v35  ;;  %v5112_v41 = vmul.f32 -1.442695, %v7708_v38  ;;  %v7716_v1 = vadd.f32 %v1177_v48, %v7681_v18 }
 0x20f   : > { %v1179_v23 = vpop.f32.mrf.mxu0 }
 0x210   : > { %5731 = vpow2.f32 %v5112_v41  ;;  %v5113_v49 = vmul.f32 -1.442695, %v7716_v1  ;;  %v7720_v5 = vadd.f32 %v1179_v23, %v7676_v14 }
 0x211   : > { %v1181_v7 = vpop.f32.mrf.mxu0 }
 0x212   : > { %5733 = vpow2.f32 %v5113_v49  ;;  %v5122_v50 = vmul.f32 -1.442695, %v7720_v5  ;;  %v7724_v51 = vadd.f32 %v1181_v7, %v7681_v18 }
 0x213   : > { %v1185_v53 = vpop.f32.mrf.mxu0  ;;  %5066 = vmatmul.mubr.msk.bf16.gmra.mxu0 %vm1082_vm3, %v7472_v20 }
 0x214   : > { %5735 = vpow2.f32 %v5122_v50  ;;  %v5123_v57 = vmul.f32 -1.442695, %v7724_v51  ;;  %v7730_v58 = vadd.f32 %v1185_v53, %v7676_v14  ;;  %v1205_v39 = vpop.f32.mrf.mxu1  ;;  %5056 = vmatmul.mubr.msk.bf16.gmra.mxu1 %vm1082_vm3, %v7568_v55  ;;  %1812 = vmatprep.mubr.bf16.mxu0 %v10801_v26 }
 0x215   : > { %v5724_v22 = vpop.eup %5723  ;;  %v7736_v27 = vadd.f32 %v1205_v39, %v7676_v14  ;;  %v1187_v54 = vpop.f32.mrf.mxu0  ;;  %1679 = vmatprep.mubr.bf16.mxu1 %v10801_v26 }
 0x216   : > { %v3056_v2 = vadd.f32 1.0, %v5724_v22  ;;  %5737 = vpow2.f32 %v5123_v57  ;;  %v5132_v60 = vmul.f32 -1.442695, %v7730_v58  ;;  %v7741_v44 = vadd.f32 %v1187_v54, %v7681_v18  ;;  %v1207_v6 = vpop.f32.mrf.mxu1 }
 0x217   : > { %v5726_v0 = vpop.eup %5725  ;;  %v5172_v56 = vmul.f32 -1.442695, %v7736_v27  ;;  %v7745_v63 = vadd.f32 %v1207_v6, %v7681_v18  ;;  %v1189_v32 = vpop.f32.mrf.mxu0 }
 0x218   : > { %5739 = vrcp.f32 %v3056_v2  ;;  %v3057_v8 = vadd.f32 1.0, %v5726_v0  ;;  %v1209_v9 = vpop.f32.mrf.mxu1  ;;  %v5133_v15 = vmul.f32 -1.442695, %v7741_v44  ;;  %v7749_v30 = vadd.f32 %v1189_v32, %v7676_v14 }
 0x219   : > { %v5728_v19 = vpop.eup %5727  ;;  %5741 = vpow2.f32 %v5132_v60  ;;  %v1191_v25 = vpop.f32.mrf.mxu0  ;;  %v5173_v46 = vmul.f32 -1.442695, %v7745_v63  ;;  %v7753_v35 = vadd.f32 %v1209_v9, %v7676_v14 }
 0x21a   : > { %5743 = vrcp.f32 %v3057_v8  ;;  %v3066_v13 = vadd.f32 1.0, %v5728_v19  ;;  %v1211_v31 = vpop.f32.mrf.mxu1  ;;  %v5142_v7 = vmul.f32 -1.442695, %v7749_v30  ;;  %v7762_v50 = vadd.f32 %v1191_v25, %v7681_v18 }
 0x21b   : > { %v5730_v17 = vpop.eup %5729  ;;  %5745 = vpow2.f32 %v5172_v56  ;;  %v1195_v48 = vpop.f32.mrf.mxu0  ;;  %5067 = vmatmul.mubr.msk.bf16.gmra.mxu0 %vm1082_vm3, %v7492_v43  ;;  %v5182_v54 = vmul.f32 -1.442695, %v7753_v35  ;;  %v7767_v2 = vadd.f32 %v1211_v31, %v7681_v18 }
 0x21c   : > { %5747 = vrcp.f32 %v3066_v13  ;;  %v3067_v41 = vadd.f32 1.0, %v5730_v17  ;;  %v1215_v23 = vpop.f32.mrf.mxu1  ;;  %5057 = vmatmul.mubr.msk.bf16.gmra.mxu1 %vm1082_vm3, %v7578_v62  ;;  %1822 = vmatprep.mubr.bf16.mxu0 %v10801_v26  ;;  %v7770_v0 = vadd.f32 %v1195_v48, %v7676_v14  ;;  %v5143_v8 = vmul.f32 -1.442695, %v7762_v50 }
 0x21d   : > { %v5732_v49 = vpop.eup %5731  ;;  %5749 = vpow2.f32 %v5133_v15  ;;  %v1197_v53 = vpop.f32.mrf.mxu0  ;;  %1689 = vmatprep.mubr.bf16.mxu1 %v10801_v26  ;;  %v7774_v15 = vadd.f32 %v1215_v23, %v7676_v14  ;;  %v5183_v31 = vmul.f32 -1.442695, %v7767_v2 }
 0x21e   : > { %5751 = vrcp.f32 %v3067_v41  ;;  %v3076_v57 = vadd.f32 1.0, %v5732_v49  ;;  %v1217_v39 = vpop.f32.mrf.mxu1  ;;  %v5152_v48 = vmul.f32 -1.442695, %v7770_v0  ;;  %v7785_v41 = vadd.f32 %v1197_v53, %v7681_v18 }
 0x21f   : > { %v5734_v22 = vpop.eup %5733  ;;  %5753 = vpow2.f32 %v5173_v46  ;;  %v1199_v60 = vpop.f32.mrf.mxu0  ;;  %v7797_v53 = vadd.f32 %v1217_v39, %v7681_v18 }
 0x220   : > { %5755 = vrcp.f32 %v3076_v57  ;;  %v3077_v6 = vadd.f32 1.0, %v5734_v22  ;;  %v1219_v56 = vpop.f32.mrf.mxu1  ;;  %v5192_v22 = vmul.f32 -1.442695, %v7774_v15  ;;  %v5153_v10 = vmul.f32 -1.442695, %v7785_v41 }
 0x221   : > { %v5736_v32 = vpop.eup %5735  ;;  %5757 = vpow2.f32 %v5142_v7  ;;  %v1201_v9 = vpop.f32.mrf.mxu0  ;;  %v7810_v12 = vadd.f32 %v1219_v56, %v7676_v14 }
 0x222   : > { %5759 = vrcp.f32 %v3077_v6  ;;  %v3086_v19 = vadd.f32 1.0, %v5736_v32  ;;  %v7776_v25 = vpop.f32.mrf.mxu1  ;;  %v7820_v56 = vadd.f32 %v1201_v9, %v7681_v18 }
 0x223   : > { %v5738_v13 = vpop.eup %5737  ;;  %5761 = vpow2.f32 %v5182_v54  ;;  %v7779_v17 = vpop.f32.mrf.mxu0  ;;  %5068 = vmatmul.mubr.msk.bf16.gmra.mxu0 %vm1082_vm3, %v7514_v47  ;;  %v5202_v4 = vmul.f32 -1.442695, %v7810_v12 }
 0x224   : > { %5763 = vrcp.f32 %v3086_v19  ;;  %v3087_v46 = vadd.f32 1.0, %v5738_v13  ;;  %v7787_v23 = vpop.f32.mrf.mxu1  ;;  %5058 = vmatmul.mubr.msk.bf16.gmra.mxu1 %vm1082_vm3, %v7588_v33  ;;  %1832 = vmatprep.mubr.bf16.mxu0 %v10801_v26  ;;  %v7802_v19 = vadd.f32 %v1199_v60, %v7676_v14 }
 0x225   : > { %v5740_v49 = vpop.eup %5739  ;;  %5765 = vpow2.f32 %v5143_v8  ;;  %v7792_v7 = vpop.f32.mrf.mxu0  ;;  %1699 = vmatprep.mubr.bf16.mxu1 %v10801_v26 }
 0x226   : > { %v5742_v57 = vpop.eup %5741  ;;  %5767 = vrcp.f32 %v3087_v46  ;;  %v7799_v54 = vpop.f32.mrf.mxu1  ;;  %v4016_v60 = vmul.f32 %v5740_v49, %v7686_v21 }
 0x227   : > { %v5744_v6 = vpop.eup %5743  ;;  %v3096_v32 = vadd.f32 1.0, %v5742_v57  ;;  %5769 = vpow2.f32 %v5183_v31  ;;  %v7804_v8 = vpop.f32.mrf.mxu0  ;;  %v942_v57 = vsub.s32 2, %v7661_v36 }
 0x228   : > { %v5746_v13 = vpop.eup %5745  ;;  %5771 = vpow2.f32 %v5152_v48  ;;  %v7807_v46 = vpop.f32.mrf.mxu1  ;;  %v5193_v48 = vmul.f32 -1.442695, %v7797_v53 }
 0x229   : > { %v5748_v34 = vpop.eup %5747  ;;  %5773 = vrcp.f32 %v3096_v32  ;;  %v3136_v39 = vadd.f32 1.0, %v5746_v13  ;;  %v5162_v32 = vmul.f32 -1.442695, %v7802_v19  ;;  %v7822_v13 = vpop.f32.mrf.mxu0 }
 0x22a   : > { %v5750_v31 = vpop.eup %5749  ;;  %v4026_v26 = vmul.f32 %v5748_v34, %v7698_v29  ;;  %5775 = vpow2.f32 %v5192_v22  ;;  %v7816_v47 = vpop.f32.mrf.mxu1  ;;  %v4017_v34 = vmul.f32 %v5744_v6, %v7694_v24 }
 0x22b   : > { %v5752_v43 = vpop.eup %5751  ;;  %5777 = vrcp.f32 %v3136_v39  ;;  %v3097_v20 = vadd.f32 1.0, %v5750_v31  ;;  %5069 = vmatmul.mubr.msk.bf16.gmra.mxu0 %vm1082_vm3, %v7533_v16  ;;  %v10961_v39 = vmov 0  }
 0x22c   : > { %v5754_v21 = vpop.eup %5753  ;;  %v4338_v29 = vadd.f32 %v4026_v26, %v4016_v60  ;;  %v4027_v49 = vmul.f32 %v5752_v43, %v7702_v42  ;;  %5779 = vpow2.f32 %v5153_v10  ;;  %v7828_v22 = vpop.f32.mrf.mxu1  ;;  %5059 = vmatmul.mubr.msk.bf16.gmra.mxu1 %vm1082_vm3, %v7598_v61  ;;  %1842 = vmatprep.mubr.bf16.mxu0 %v10961_v39  ;;  %v7838_v43 = vadd.f32 %v7776_v25, %v7681_v18 }
 0x22d   : > { %v5756_v9 = vpop.eup %5755  ;;  %5781 = vrcp.f32 %v3097_v20  ;;  %v3137_v31 = vadd.f32 1.0, %v5754_v21  ;;  %1935 = vmatprep.mubr.bf16.mxu1 %v10961_v39  ;;  %v7843_v20 = vrot.slane %v7670_v59, %v942_v57  ;;  %v946_v60 = vsub.s32 3, %v7661_v36  ;;  %v7846_v21 = vpop.f32.mrf.mxu0 }
 0x22e   : > { %v5758_v16 = vpop.eup %5757  ;;  %v4375_v24 = vadd.f32 %v4027_v49, %v4017_v34  ;;  %v4036_v26 = vmul.f32 %v5756_v9, %v7708_v38  ;;  %5783 = vpow2.f32 %v5193_v48  ;;  %v7840_v10 = vpop.f32.mrf.mxu1  ;;  %v5163_v25 = vmul.f32 -1.442695, %v7820_v56 }
 0x22f   : > { %v5760_v42 = vpop.eup %5759  ;;  %5785 = vrcp.f32 %v3137_v31  ;;  %v3106_v6 = vadd.f32 1.0, %v5758_v16  ;;  %v7854_v16 = vadd.f32 %v7787_v23, %v7676_v14  ;;  %v7867_v23 = vpop.f32.mrf.mxu0 }
 0x230   : > { %v5762_v34 = vpop.eup %5761  ;;  %v4339_v49 = vadd.f32 %v4338_v29, %v4036_v26  ;;  %v4037_v38 = vmul.f32 %v5760_v42, %v7716_v1  ;;  %5787 = vpow2.f32 %v5162_v32  ;;  %v7850_v48 = vpop.f32.mrf.mxu1  ;;  %v5203_v29 = vmul.f32 -1.442695, %v7838_v43 }
 0x231   : > { %v5764_v9 = vpop.eup %5763  ;;  %5789 = vrcp.f32 %v3106_v6  ;;  %v3146_v31 = vadd.f32 1.0, %v5762_v34  ;;  %v7862_v42 = vadd.f32 %v7779_v17, %v7843_v20  ;;  %v7865_v6 = vrot.slane %v7670_v59, %v946_v60 }
 0x232   : > { %v5766_v57 = vpop.eup %5765  ;;  %v4376_v36 = vadd.f32 %v4375_v24, %v4037_v38  ;;  %v4046_v61 = vmul.f32 %v5764_v9, %v7720_v5  ;;  %5791 = vpow2.f32 %v5202_v4  ;;  %v7858_v1 = vpop.f32.mrf.mxu1  ;;  %v5212_v60 = vmul.f32 -1.442695, %v7854_v16 }
 0x233   : > { %v5768_v32 = vpop.eup %5767  ;;  %5793 = vrcp.f32 %v3146_v31  ;;  %v3107_v26 = vadd.f32 1.0, %v5766_v57  ;;  %5070 = vmatmul.mubr.msk.bf16.gmra.mxu0 %vm1082_vm3, %v7548_v28  ;;  %v7880_v38 = vadd.f32 %v7799_v54, %v7681_v18  ;;  %v5094_v31 = vmul.f32 -1.442695, %v7862_v42  ;;  %v7891_v54 = vpop.f32.mrf.mxu0 }
 0x234   : > { %v5770_v4 = vpop.eup %5769  ;;  %v4340_v5 = vadd.f32 %v4339_v49, %v4046_v61  ;;  %v4047_v24 = vmul.f32 %v5768_v32, %v7724_v51  ;;  %5795 = vpow2.f32 %v5163_v25  ;;  %v7872_v34 = vpop.f32.mrf.mxu1  ;;  %5076 = vmatmul.mubr.msk.bf16.vlgmr.msra.gmra.mxu1 %vm1082_vm3, %v7392_v52  ;;  %1852 = vmatprep.mubr.bf16.mxu0 %v10961_v39  ;;  %v7889_v57 = vadd.f32 %v7792_v7, %v7865_v6 }
 0x235   : > { %v5772_v17 = vpop.eup %5771  ;;  %5797 = vrcp.f32 %v3107_v26  ;;  %v3147_v59 = vadd.f32 1.0, %v5770_v4  ;;  %1945 = vmatprep.mubr.bf16.mxu1 %v10961_v39 }
 0x236   : > { %v5774_v61 = vpop.eup %5773  ;;  %v4377_v51 = vadd.f32 %v4376_v36, %v4047_v24  ;;  %v3116_v49 = vadd.f32 1.0, %v5772_v17  ;;  %5799 = vpow2.f32 %v5203_v29  ;;  %v7883_v25 = vpop.f32.mrf.mxu1  ;;  %10962 = vst [vmem:[#allocation24_spill] sm:$0xff] %v7889_v57  ;;  %v7900_v24 = vadd.f32 %v7807_v46, %v7676_v14 }
 0x237   : > { %v5776_v52 = vpop.eup %5775  ;;  %v4056_v9 = vmul.f32 %v5774_v61, %v7730_v58  ;;  %5801 = vrcp.f32 %v3147_v59  ;;  %v5213_v58 = vmul.f32 -1.442695, %v7880_v38 }
 0x238   : > { %v7893_v32 = vpop.eup %5777  ;;  %5803 = vrcp.f32 %v3116_v49  ;;  %v3156_v36 = vadd.f32 1.0, %v5776_v52  ;;  %v7895_v26 = vpop.f32.mrf.mxu1  ;;  %v5095_v52 = vmul.f32 -1.442695, %v7889_v57 }
 0x239   : > { %v5780_v29 = vpop.eup %5779  ;;  %v4341_v4 = vadd.f32 %v4340_v5, %v4056_v9  ;;  %5805 = vpow2.f32 %v5212_v60  ;;  %v7908_v5 = vadd.f32 %v7804_v8, %v7843_v20  ;;  %v7910_v60 = vpop.f32.mrf.mxu0  ;;  %v5222_v8 = vmul.f32 -1.442695, %v7900_v24 }
 0x23a   : > { %v5782_v17 = vpop.eup %5781  ;;  %5807 = vrcp.f32 %v3156_v36  ;;  %v3117_v7 = vadd.f32 1.0, %v5780_v29  ;;  %v7902_v59 = vpop.f32.mrf.mxu1  ;;  %v7924_v29 = vadd.f32 %v7816_v47, %v7681_v18 }
 0x23b   : > { %v5784_v61 = vpop.eup %5783  ;;  %v4057_v49 = vmul.f32 %v5782_v17, %v7741_v44  ;;  %5809 = vpow2.f32 %v5094_v31  ;;  %10963 = vst [vmem:[#allocation25_spill] sm:$0xff] %v7908_v5  ;;  %5071 = vmatmul.mubr.msk.bf16.gmra.mxu0 %vm1082_vm3, %v7558_v45 }
 0x23c   : > { %v7914_v46 = vpop.eup %5785  ;;  %5811 = vrcp.f32 %v3117_v7  ;;  %v3157_v9 = vadd.f32 1.0, %v5784_v61  ;;  %v7916_v36 = vpop.f32.mrf.mxu1  ;;  %5077 = vmatmul.mubr.msk.bf16.gmra.mxu1 %vm1082_vm3, %v7409_v11  ;;  %1862 = vmatprep.mubr.bf16.mxu0 %v10961_v39 }
 0x23d   : > { %v5788_v44 = vpop.eup %5787  ;;  %v4378_v31 = vadd.f32 %v4377_v51, %v4057_v49  ;;  %5813 = vpow2.f32 %v5213_v58  ;;  %1955 = vmatprep.mubr.bf16.mxu1 %v10961_v39  ;;  %v5104_v51 = vmul.f32 -1.442695, %v7908_v5  ;;  %v7933_v58 = vadd.f32 %v7822_v13, %v7865_v6  ;;  %v7935_v49 = vpop.f32.mrf.mxu0 }
 0x23e   : > { %v5790_v17 = vpop.eup %5789  ;;  %5815 = vrcp.f32 %v3157_v9  ;;  %v3126_v7 = vadd.f32 1.0, %v5788_v44  ;;  %v7927_v61 = vpop.f32.mrf.mxu1  ;;  %v7941_v9 = vadd.f32 %v7828_v22, %v7676_v14 }
 0x23f   : > { %10964 = vst [vmem:[#allocation26_spill] sm:$0xff] %v7927_v61  ;;  %v5792_v45 = vpop.eup %5791  ;;  %v4066_v11 = vmul.f32 %v5790_v17, %v7749_v30  ;;  %5817 = vpow2.f32 %v5095_v52  ;;  %v5223_v17 = vmul.f32 -1.442695, %v7924_v29  ;;  %v7948_v61 = vadd.f32 %v7846_v21, %v7843_v20  ;;  %v7954_v5 = vpop.f32.mrf.mxu0 }
 0x240   : > { %v7937_v47 = vpop.eup %5793  ;;  %5819 = vrcp.f32 %v3126_v7  ;;  %v3166_v28 = vadd.f32 1.0, %v5792_v45  ;;  %v7943_v44 = vpop.f32.mrf.mxu1  ;;  %v5232_v21 = vmul.f32 -1.442695, %v7941_v9 }
 0x241   : > { %10965 = vst [vmem:[#allocation27_spill] sm:$0xff] %v7943_v44  ;;  %v5796_v30 = vpop.eup %5795  ;;  %v4342_v52 = vadd.f32 %v4341_v4, %v4066_v11  ;;  %5821 = vpow2.f32 %v5222_v8  ;;  %v5105_v44 = vmul.f32 -1.442695, %v7933_v58  ;;  %v7963_v8 = vadd.f32 %v7840_v10, %v7681_v18 }
 0x242   : > { %v5798_v57 = vpop.eup %5797  ;;  %5823 = vrcp.f32 %v3166_v28  ;;  %v3127_v13 = vadd.f32 1.0, %v5796_v30  ;;  %v7950_v7 = vpop.f32.mrf.mxu1  ;;  %v7975_v10 = vadd.f32 %v7867_v23, %v7865_v6 }
 0x243   : > { %v5800_v45 = vpop.eup %5799  ;;  %v4067_v22 = vmul.f32 %v5798_v57, %v7762_v50  ;;  %5825 = vpow2.f32 %v5104_v51  ;;  %5072 = vmatmul.mubr.msk.bf16.gmra.mxu0 %vm1082_vm3, %v7568_v55 }
 0x244   : > { %v7958_v4 = vpop.eup %5801  ;;  %5827 = vrcp.f32 %v3127_v13  ;;  %v3167_v28 = vadd.f32 1.0, %v5800_v45  ;;  %v7965_v11 = vpop.f32.mrf.mxu1  ;;  %5078 = vmatmul.mubr.msk.bf16.gmra.mxu1 %vm1082_vm3, %v7427_v37  ;;  %1872 = vmatprep.mubr.bf16.mxu0 %v10961_v39  ;;  %v5114_v13 = vmul.f32 -1.442695, %v7948_v61 }
 0x245   : > { %10966 = vst [vmem:[#allocation28_spill] sm:$0xff] %v7965_v11  ;;  %v5804_v50 = vpop.eup %5803  ;;  %v4379_v57 = vadd.f32 %v4378_v31, %v4067_v22  ;;  %5829 = vpow2.f32 %v5223_v17  ;;  %1965 = vmatprep.mubr.bf16.mxu1 %v10961_v39  ;;  %v7981_v31 = vpop.f32.mrf.mxu0 }
 0x246   : > { %v5806_v51 = vpop.eup %5805  ;;  %v4076_v30 = vmul.f32 %v5804_v50, %v7770_v0  ;;  %5831 = vrcp.f32 %v3167_v28  ;;  %v7977_v45 = vpop.f32.mrf.mxu1  ;;  %v5233_v0 = vmul.f32 -1.442695, %v7963_v8  ;;  %v7986_v28 = vadd.f32 %v7850_v48, %v7676_v14 }
 0x247   : > { %10967 = vst [vmem:[#allocation29_spill] sm:$0xff] %v7977_v45  ;;  %v7979_v37 = vpop.eup %5807  ;;  %v3176_v55 = vadd.f32 1.0, %v5806_v51  ;;  %5833 = vpow2.f32 %v5105_v44  ;;  %v5115_v44 = vmul.f32 -1.442695, %v7975_v10 }
 0x248   : > { %v5810_v17 = vpop.eup %5809  ;;  %v4343_v22 = vadd.f32 %v4342_v52, %v4076_v30  ;;  %5835 = vpow2.f32 %v5232_v21  ;;  %10968 = vst [vmem:[#allocation30_spill] sm:$0xff] %v7986_v28  ;;  %v7988_v50 = vpop.f32.mrf.mxu1  ;;  %v7994_v52 = vadd.f32 %v7891_v54, %v7843_v20  ;;  %v5242_v54 = vmul.f32 -1.442695, %v7986_v28 }
 0x249   : > { %10969 = vst [vmem:[#allocation31_spill] sm:$0xff] %v7988_v50  ;;  %v5812_v23 = vpop.eup %5811  ;;  %5837 = vrcp.f32 %v3176_v55  ;;  %v3058_v45 = vadd.f32 1.0, %v5810_v17  ;;  %v8002_v55 = vadd.f32 %v7858_v1, %v7681_v18  ;;  %v8004_v17 = vpop.f32.mrf.mxu0 }
 0x24a   : > { %v5814_v11 = vpop.eup %5813  ;;  %v4077_v51 = vmul.f32 %v5812_v23, %v7785_v41  ;;  %5839 = vpow2.f32 %v5114_v13  ;;  %10970 = vst [vmem:[#allocation32_spill] sm:$0xff] %v7994_v52  ;;  %v7996_v21 = vpop.f32.mrf.mxu1  ;;  %v8011_v23 = vadd.f32 %v7910_v60, %v7865_v6 }
 0x24b   : > { %10971 = vst [vmem:[#allocation33_spill] sm:$0xff] %v7996_v21  ;;  %v7998_v30 = vpop.eup %5815  ;;  %5841 = vrcp.f32 %v3058_v45  ;;  %v3177_v48 = vadd.f32 1.0, %v5814_v11  ;;  %10972 = vst [vmem:[#allocation34_spill] sm:$0xff] %v8002_v55  ;;  %5073 = vmatmul.mubr.msk.bf16.gmra.mxu0 %vm1082_vm3, %v7578_v62 }
 0x24c   : > { %v5818_v41 = vpop.eup %5817  ;;  %v4380_v13 = vadd.f32 %v4379_v57, %v4077_v51  ;;  %5843 = vpow2.f32 %v5233_v0  ;;  %v8013_v45 = vpop.f32.mrf.mxu1  ;;  %5079 = vmatmul.mubr.msk.bf16.gmra.mxu1 %vm1082_vm3, %v7451_v3  ;;  %1882 = vmatprep.mubr.bf16.mxu0 %v10961_v39  ;;  %v8020_v57 = vadd.f32 %v7872_v34, %v7676_v14  ;;  %v8024_v0 = vadd.f32 %v7935_v49, %v7843_v20 }
 0x24d   : > { %10973 = vst [vmem:[#allocation35_spill] sm:$0xff] %v8013_v45  ;;  %v5820_v1 = vpop.eup %5819  ;;  %5845 = vrcp.f32 %v3177_v48  ;;  %v3059_v11 = vadd.f32 1.0, %v5818_v41  ;;  %1975 = vmatprep.mubr.bf16.mxu1 %v10961_v39  ;;  %v5124_v3 = vmul.f32 -1.442695, %v7994_v52  ;;  %v5243_v34 = vmul.f32 -1.442695, %v8002_v55  ;;  %v8032_v45 = vpop.f32.mrf.mxu0 }
 0x24e   : > { %v5822_v60 = vpop.eup %5821  ;;  %v4086_v51 = vmul.f32 %v5820_v1, %v7802_v19  ;;  %5847 = vpow2.f32 %v5115_v44  ;;  %v8029_v62 = vpop.f32.mrf.mxu1  ;;  %v4096_v49 = vmul.f32 %v7893_v32, %v7736_v27  ;;  %v5125_v19 = vmul.f32 -1.442695, %v8011_v23 }
 0x24f   : > { %10974 = vst [vmem:[#allocation36_spill] sm:$0xff] %v8029_v62  ;;  %v5824_v48 = vpop.eup %5823  ;;  %5849 = vrcp.f32 %v3059_v11  ;;  %v3186_v41 = vadd.f32 1.0, %v5822_v60  ;;  %v5252_v11 = vmul.f32 -1.442695, %v8020_v57  ;;  %v5134_v60 = vmul.f32 -1.442695, %v8024_v0 }
 0x250   : > { %v5826_v21 = vpop.eup %5825  ;;  %v4344_v50 = vadd.f32 %v4343_v22, %v4086_v51  ;;  %5851 = vpow2.f32 %v5242_v54  ;;  %v8037_v44 = vpop.f32.mrf.mxu1  ;;  %v4106_v52 = vmul.f32 %v7937_v47, %v7753_v35  ;;  %v4097_v54 = vmul.f32 %v7914_v46, %v7745_v63 }
 0x251   : > { %v5828_v1 = vpop.eup %5827  ;;  %5853 = vrcp.f32 %v3186_v41  ;;  %v3068_v62 = vadd.f32 1.0, %v5826_v21  ;;  %v8050_v51 = vadd.f32 %v7883_v25, %v7681_v18  ;;  %v8052_v41 = vpop.f32.mrf.mxu0  ;;  %v4107_v63 = vmul.f32 %v7958_v4, %v7767_v2 }
 0x252   : > { %v5830_v55 = vpop.eup %5829  ;;  %v4345_v28 = vadd.f32 %v4344_v50, %v4096_v49  ;;  %v4087_v27 = vmul.f32 %v5828_v1, %v7820_v56  ;;  %5855 = vpow2.f32 %v5124_v3  ;;  %v8044_v32 = vpop.f32.mrf.mxu1  ;;  %v4116_v56 = vmul.f32 %v7979_v37, %v7774_v15 }
 0x253   : > { %v5832_v22 = vpop.eup %5831  ;;  %5857 = vrcp.f32 %v3068_v62  ;;  %v3187_v21 = vadd.f32 1.0, %v5830_v55  ;;  %5074 = vmatmul.mubr.msk.bf16.gmra.mxu0 %vm1082_vm3, %v7588_v33  ;;  %v4126_v25 = vmul.f32 %v5824_v48, %v7810_v12  ;;  %v8074_v12 = vadd.f32 %v7954_v5, %v7865_v6  ;;  %v8076_v2 = vpop.f32.mrf.mxu0 }
 0x254   : > { %v5834_v35 = vpop.eup %5833  ;;  %v4346_v47 = vadd.f32 %v4345_v28, %v4106_v52  ;;  %v4381_v50 = vadd.f32 %v4380_v13, %v4087_v27  ;;  %5859 = vpow2.f32 %v5243_v34  ;;  %v8058_v3 = vpop.f32.mrf.mxu1  ;;  %5080 = vmatmul.mubr.msk.bf16.gmra.mxu1 %vm1082_vm3, %v7429_v40  ;;  %1892 = vmatprep.mubr.bf16.mxu0 %v10961_v39  ;;  %v4117_v13 = vmul.f32 %v7998_v30, %v7797_v53 }
 0x255   : > { %v5836_v62 = vpop.eup %5835  ;;  %5861 = vrcp.f32 %v3187_v21  ;;  %v3069_v46 = vadd.f32 1.0, %v5834_v35  ;;  %1985 = vmatprep.mubr.bf16.mxu1 %v10961_v39  ;;  %v5253_v53 = vmul.f32 -1.442695, %v8050_v51 }
 0x256   : > { %v5838_v15 = vpop.eup %5837  ;;  %v4347_v37 = vadd.f32 %v4346_v47, %v4116_v56  ;;  %v4382_v28 = vadd.f32 %v4381_v50, %v4097_v54  ;;  %v3196_v52 = vadd.f32 1.0, %v5836_v62  ;;  %5863 = vpow2.f32 %v5125_v19  ;;  %v8067_v55 = vpop.f32.mrf.mxu1 }
 0x257   : > { %v5840_v40 = vpop.eup %5839  ;;  %v4136_v34 = vmul.f32 %v5838_v15, %v7854_v16  ;;  %5865 = vrcp.f32 %v3069_v46  ;;  %v4127_v54 = vmul.f32 %v5832_v22, %v7838_v43  ;;  %v8084_v16 = vadd.f32 %v7895_v26, %v7676_v14  ;;  %v8097_v26 = vpop.f32.mrf.mxu0  ;;  %v10975_v22 = vld [vmem:[#allocation22_spill] sm:$0xff]  ;;  %v10976_v15 = vld [vmem:[#allocation13_spill] sm:$0xff] }
 0x258   : > { %v5842_v4 = vpop.eup %5841  ;;  %v4348_v48 = vadd.f32 %v4347_v37, %v4126_v25  ;;  %v4383_v49 = vadd.f32 %v4382_v28, %v4107_v63  ;;  %5867 = vrcp.f32 %v3196_v52  ;;  %v3078_v19 = vadd.f32 1.0, %v5840_v40  ;;  %v8078_v1 = vpop.f32.mrf.mxu1 }
 0x259   : > { %v5844_v27 = vpop.eup %5843  ;;  %5869 = vpow2.f32 %v5252_v11  ;;  %v5135_v50 = vmul.f32 -1.442695, %v8074_v12  ;;  %v8091_v43 = vadd.f32 %v7981_v31, %v7843_v20  ;;  %v8095_v11 = vadd.f32 %v7902_v59, %v7681_v18 }
 0x25a   : > { %v5846_v5 = vpop.eup %5845  ;;  %v4384_v30 = vadd.f32 %v4383_v49, %v4117_v13  ;;  %v4349_v21 = vadd.f32 %v4348_v48, %v4136_v34  ;;  %5871 = vrcp.f32 %v3078_v19  ;;  %v3197_v35 = vadd.f32 1.0, %v5844_v27  ;;  %v8086_v56 = vpop.f32.mrf.mxu1 }
 0x25b   : > { %v5848_v47 = vpop.eup %5847  ;;  %5873 = vpow2.f32 %v5134_v60  ;;  %5075 = vmatmul.mubr.msk.bf16.gmra.mxu0 %vm1082_vm3, %v10975_v22  ;;  %v4137_v25 = vmul.f32 %v5846_v5, %v7880_v38  ;;  %v5262_v59 = vmul.f32 -1.442695, %v8084_v16  ;;  %v8110_v38 = vadd.f32 %v8004_v17, %v7865_v6 }
 0x25c   : > { %v5850_v62 = vpop.eup %5849  ;;  %v4385_v63 = vadd.f32 %v4384_v30, %v4127_v54  ;;  %5875 = vrcp.f32 %v3197_v35  ;;  %v3079_v60 = vadd.f32 1.0, %v5848_v47  ;;  %v8102_v46 = vpop.f32.mrf.mxu1  ;;  %5081 = vmatmul.mubr.msk.bf16.gmra.mxu1 %vm1082_vm3, %v10976_v15  ;;  %v5144_v48 = vmul.f32 -1.442695, %v8091_v43  ;;  %v10977_v35 = vld [vmem:[#allocation25_spill] sm:$0xff] }
 0x25d   : > { %v5852_v31 = vpop.eup %5851  ;;  %5877 = vpow2.f32 %v5253_v53  ;;  %1995 = vmatprep.mubr.bf16.mxu1 %v10961_v39  ;;  %v8118_v49 = vadd.f32 %v7916_v36, %v7676_v14  ;;  %v5263_v54 = vmul.f32 -1.442695, %v8095_v11  ;;  %v4018_v5 = vmul.f32 %v5842_v4, %v7862_v42  ;;  %v8125_v47 = vpop.f32.mrf.mxu0 }
 0x25e   : > { %v5854_v37 = vpop.eup %5853  ;;  %v4386_v28 = vadd.f32 %v4385_v63, %v4137_v25  ;;  %5879 = vrcp.f32 %v3079_v60  ;;  %v3206_v52 = vadd.f32 1.0, %v5852_v31  ;;  %v8112_v40 = vpop.f32.mrf.mxu1  ;;  %v5145_v63 = vmul.f32 -1.442695, %v8110_v38 }
 0x25f   : > { %v5856_v13 = vpop.eup %5855  ;;  %v4146_v34 = vmul.f32 %v5854_v37, %v7900_v24  ;;  %5881 = vpow2.f32 %v5135_v50  ;;  %v8130_v25 = vadd.f32 %v8032_v45, %v7843_v20  ;;  %v5272_v4 = vmul.f32 -1.442695, %v8118_v49  ;;  %v10978_v37 = vld [vmem:[#allocation26_spill] sm:$0xff] }
 0x260   : > { %v5858_v19 = vpop.eup %5857  ;;  %5883 = vrcp.f32 %v3206_v52  ;;  %v3088_v27 = vadd.f32 1.0, %v5856_v13  ;;  %v8121_v53 = vpop.f32.mrf.mxu1  ;;  %v8138_v52 = vadd.f32 %v10978_v37, %v7681_v18  ;;  %v8142_v45 = vadd.f32 %v8052_v41, %v7865_v6 }
 0x261   : > { %v5860_v17 = vpop.eup %5859  ;;  %v4350_v30 = vadd.f32 %v4349_v21, %v4146_v34  ;;  %v4028_v24 = vmul.f32 %v5858_v19, %v10977_v35  ;;  %5885 = vpow2.f32 %v5262_v59  ;;  %v10979_v34 = vld [vmem:[#allocation14_spill] sm:$0xff] }
 0x262   : > { %v5862_v50 = vpop.eup %5861  ;;  %5887 = vrcp.f32 %v3088_v27  ;;  %v3207_v36 = vadd.f32 1.0, %v5860_v17  ;;  %v8132_v60 = vpop.f32.mrf.mxu1 }
 0x263   : > { %v5864_v15 = vpop.eup %5863  ;;  %v4412_v31 = vadd.f32 %v4028_v24, %v4018_v5  ;;  %v4147_v42 = vmul.f32 %v5862_v50, %v7924_v29  ;;  %5889 = vpow2.f32 %v5144_v48  ;;  %v10980_v48 = vld [vmem:[#allocation24_spill] sm:$0xff]  ;;  %v8150_v5 = vpop.f32.mrf.mxu0  ;;  %v5154_v24 = vmul.f32 -1.442695, %v8130_v25 }
 0x264   : > { %v5866_v21 = vpop.eup %5865  ;;  %5891 = vrcp.f32 %v3207_v36  ;;  %v3089_v59 = vadd.f32 1.0, %v5864_v15  ;;  %v8144_v13 = vpop.f32.mrf.mxu1  ;;  %5082 = vmatmul.mubr.msk.bf16.gmra.mxu1 %vm1082_vm3, %v10979_v34  ;;  %v4019_v19 = vmul.f32 %v5850_v62, %v10980_v48  ;;  %v10981_v62 = vld [vmem:[#allocation27_spill] sm:$0xff] }
 0x265   : > { %v5868_v29 = vpop.eup %5867  ;;  %v4387_v27 = vadd.f32 %v4386_v28, %v4147_v42  ;;  %v4029_v17 = vmul.f32 %v5866_v21, %v7933_v58  ;;  %5893 = vpow2.f32 %v5263_v54  ;;  %2005 = vmatprep.mubr.bf16.mxu1 %v10961_v39  ;;  %v8159_v58 = vadd.f32 %v10981_v62, %v7676_v14  ;;  %v8166_v48 = vpop.f32.mrf.mxu0 }
 0x266   : > { %v5870_v35 = vpop.eup %5869  ;;  %v4156_v41 = vmul.f32 %v5868_v29, %v7941_v9  ;;  %5895 = vrcp.f32 %v3089_v59  ;;  %v8155_v50 = vpop.f32.mrf.mxu1  ;;  %v5273_v9 = vmul.f32 -1.442695, %v8138_v52  ;;  %v5155_v29 = vmul.f32 -1.442695, %v8142_v45 }
 0x267   : > { %v5872_v36 = vpop.eup %5871  ;;  %v4449_v15 = vadd.f32 %v4029_v17, %v4019_v19  ;;  %v3216_v37 = vadd.f32 1.0, %v5870_v35  ;;  %5897 = vpow2.f32 %v5145_v63 }
 0x268   : > { %v5874_v28 = vpop.eup %5873  ;;  %v4351_v54 = vadd.f32 %v4350_v30, %v4156_v41  ;;  %v4038_v42 = vmul.f32 %v5872_v36, %v7948_v61  ;;  %5899 = vpow2.f32 %v5272_v4  ;;  %v8163_v21 = vpop.f32.mrf.mxu1  ;;  %v8171_v61 = vadd.f32 %v8076_v2, %v7843_v20  ;;  %v10985_v2 = vld [vmem:[#allocation15_spill] sm:$0xff] }
 0x269   : > { %10982 = vst [vmem:[#allocation22_spill] sm:$0xff] %v8163_v21  ;;  %v5876_v59 = vpop.eup %5875  ;;  %5901 = vrcp.f32 %v3216_v37  ;;  %v3098_v34 = vadd.f32 1.0, %v5874_v28  ;;  %v5282_v41 = vmul.f32 -1.442695, %v8159_v58 }
 0x26a   : > { %v5878_v63 = vpop.eup %5877  ;;  %v4413_v19 = vadd.f32 %v4412_v31, %v4038_v42  ;;  %v4157_v17 = vmul.f32 %v5876_v59, %v7963_v8  ;;  %5903 = vpow2.f32 %v5154_v24  ;;  %v8173_v30 = vpop.f32.mrf.mxu1  ;;  %v8179_v8 = vadd.f32 %v7950_v7, %v7681_v18  ;;  %v10986_v7 = vld [vmem:[#allocation30_spill] sm:$0xff] }
 0x26b   : > { %10983 = vst [vmem:[#allocation13_spill] sm:$0xff] %v8173_v30  ;;  %v5880_v4 = vpop.eup %5879  ;;  %5905 = vrcp.f32 %v3098_v34  ;;  %v3217_v35 = vadd.f32 1.0, %v5878_v63  ;;  %v8187_v42 = vadd.f32 %v8097_v26, %v7865_v6  ;;  %v5164_v34 = vmul.f32 -1.442695, %v8171_v61  ;;  %v10988_v26 = vld [vmem:[#allocation32_spill] sm:$0xff] }
 0x26c   : > { %v5882_v36 = vpop.eup %5881  ;;  %v4388_v37 = vadd.f32 %v4387_v27, %v4157_v17  ;;  %v4039_v62 = vmul.f32 %v5880_v4, %v7975_v10  ;;  %5907 = vpow2.f32 %v5273_v9  ;;  %v8181_v31 = vpop.f32.mrf.mxu1  ;;  %5083 = vmatmul.mubr.msk.bf16.gmra.mxu1 %vm1082_vm3, %v10985_v2 }
 0x26d   : > { %10984 = vst [vmem:[#allocation25_spill] sm:$0xff] %v8181_v31  ;;  %v5884_v24 = vpop.eup %5883  ;;  %5909 = vrcp.f32 %v3217_v35  ;;  %v3099_v28 = vadd.f32 1.0, %v5882_v36  ;;  %v8189_v27 = vpop.f32.mrf.mxu0  ;;  %2015 = vmatprep.mubr.bf16.mxu1 %v10961_v39  ;;  %v5283_v31 = vmul.f32 -1.442695, %v8179_v8 }
 0x26e   : > { %v5886_v10 = vpop.eup %5885  ;;  %v4450_v9 = vadd.f32 %v4449_v15, %v4039_v62  ;;  %v4166_v59 = vmul.f32 %v5884_v24, %v10986_v7  ;;  %5911 = vpow2.f32 %v5155_v29  ;;  %v8194_v63 = vpop.f32.mrf.mxu1  ;;  %v10990_v29 = vld [vmem:[#allocation28_spill] sm:$0xff] }
 0x26f   : > { %10987 = vst [vmem:[#allocation26_spill] sm:$0xff] %v8194_v63  ;;  %v5888_v17 = vpop.eup %5887  ;;  %5913 = vrcp.f32 %v3099_v28  ;;  %v3226_v4 = vadd.f32 1.0, %v5886_v10  ;;  %v8202_v24 = vadd.f32 %v10990_v29, %v7676_v14  ;;  %v8204_v7 = vpop.f32.mrf.mxu0  ;;  %v10991_v63 = vld [vmem:[#allocation34_spill] sm:$0xff] }
 0x270   : > { %v5890_v35 = vpop.eup %5889  ;;  %v4352_v36 = vadd.f32 %v4351_v54, %v4166_v59  ;;  %v4048_v2 = vmul.f32 %v5888_v17, %v10988_v26  ;;  %5915 = vpow2.f32 %v5282_v41  ;;  %v8198_v30 = vpop.f32.mrf.mxu1  ;;  %v5165_v41 = vmul.f32 -1.442695, %v8187_v42 }
 0x271   : > { %10989 = vst [vmem:[#allocation14_spill] sm:$0xff] %v8198_v30  ;;  %v5892_v15 = vpop.eup %5891  ;;  %5917 = vrcp.f32 %v3226_v4  ;;  %v3108_v62 = vadd.f32 1.0, %v5890_v35  ;;  %v8212_v4 = vadd.f32 %v8125_v47, %v7843_v20  ;;  %v5292_v47 = vmul.f32 -1.442695, %v8202_v24 }
 0x272   : > { %v5894_v28 = vpop.eup %5893  ;;  %v4414_v10 = vadd.f32 %v4413_v19, %v4048_v2  ;;  %v4167_v54 = vmul.f32 %v5892_v15, %v10991_v63  ;;  %5919 = vpow2.f32 %v5164_v34  ;;  %v8208_v59 = vpop.f32.mrf.mxu1  ;;  %v10993_v19 = vld [vmem:[#allocation29_spill] sm:$0xff]  ;;  %v10995_v2 = vld [vmem:[#allocation16_spill] sm:$0xff] }
 0x273   : > { %10992 = vst [vmem:[#allocation24_spill] sm:$0xff] %v8208_v59  ;;  %v5896_v17 = vpop.eup %5895  ;;  %5921 = vrcp.f32 %v3108_v62  ;;  %v3227_v26 = vadd.f32 1.0, %v5894_v28  ;;  %v8217_v63 = vadd.f32 %v10993_v19, %v7681_v18  ;;  %v8224_v28 = vpop.f32.mrf.mxu0 }
 0x274   : > { %v5898_v35 = vpop.eup %5897  ;;  %v4389_v29 = vadd.f32 %v4388_v37, %v4167_v54  ;;  %v4049_v30 = vmul.f32 %v5896_v17, %v8011_v23  ;;  %5923 = vpow2.f32 %v5283_v31  ;;  %v8219_v34 = vpop.f32.mrf.mxu1  ;;  %5084 = vmatmul.mubr.msk.bf16.gmra.mxu1 %vm1082_vm3, %v10995_v2  ;;  %v5174_v2 = vmul.f32 -1.442695, %v8212_v4 }
 0x275   : > { %10994 = vst [vmem:[#allocation27_spill] sm:$0xff] %v8219_v34  ;;  %v5900_v15 = vpop.eup %5899  ;;  %5925 = vrcp.f32 %v3227_v26  ;;  %v3109_v62 = vadd.f32 1.0, %v5898_v35  ;;  %2025 = vmatprep.mubr.bf16.mxu1 %v10961_v39  ;;  %v8233_v26 = vadd.f32 %v8150_v5, %v7865_v6  ;;  %v5293_v59 = vmul.f32 -1.442695, %v8217_v63 }
 0x276   : > { %v5902_v23 = vpop.eup %5901  ;;  %v4451_v37 = vadd.f32 %v4450_v9, %v4049_v30  ;;  %v3236_v31 = vadd.f32 1.0, %v5900_v15  ;;  %5927 = vpow2.f32 %v5165_v41  ;;  %v8227_v54 = vpop.f32.mrf.mxu1 }
 0x277   : > { %10996 = vst [vmem:[#allocation15_spill] sm:$0xff] %v8227_v54  ;;  %v5904_v17 = vpop.eup %5903  ;;  %v4176_v19 = vmul.f32 %v5902_v23, %v8020_v57  ;;  %5929 = vrcp.f32 %v3109_v62  ;;  %v10998_v57 = vld [vmem:[#allocation31_spill] sm:$0xff]  ;;  %v8243_v23 = vpop.f32.mrf.mxu0 }
 0x278   : > { %v5906_v35 = vpop.eup %5905  ;;  %5931 = vrcp.f32 %v3236_v31  ;;  %v3118_v34 = vadd.f32 1.0, %v5904_v17  ;;  %v8236_v30 = vpop.f32.mrf.mxu1  ;;  %v8241_v62 = vadd.f32 %v10998_v57, %v7676_v14  ;;  %v8247_v31 = vadd.f32 %v8166_v48, %v7843_v20 }
 0x279   : > { %10997 = vst [vmem:[#allocation30_spill] sm:$0xff] %v8236_v30  ;;  %v5908_v9 = vpop.eup %5907  ;;  %v4353_v41 = vadd.f32 %v4352_v36, %v4176_v19  ;;  %v4058_v15 = vmul.f32 %v5906_v35, %v8024_v0  ;;  %5933 = vpow2.f32 %v5292_v47  ;;  %v5175_v0 = vmul.f32 -1.442695, %v8233_v26  ;;  %v10999_v35 = vld [vmem:[#allocation33_spill] sm:$0xff] }
 0x27a   : > { %v5910_v5 = vpop.eup %5909  ;;  %5935 = vrcp.f32 %v3118_v34  ;;  %v3237_v54 = vadd.f32 1.0, %v5908_v9  ;;  %v8253_v57 = vadd.f32 %v10999_v35, %v7681_v18  ;;  %v8255_v34 = vpop.f32.mrf.mxu1  ;;  %v11001_v9 = vld [vmem:[#allocation17_spill] sm:$0xff] }
 0x27b   : > { %v5912_v17 = vpop.eup %5911  ;;  %v4415_v30 = vadd.f32 %v4414_v10, %v4058_v15  ;;  %v4177_v36 = vmul.f32 %v5910_v5, %v8050_v51  ;;  %5937 = vpow2.f32 %v5174_v2  ;;  %11000 = vst [vmem:[#allocation32_spill] sm:$0xff] %v8255_v34  ;;  %v5302_v51 = vmul.f32 -1.442695, %v8241_v62  ;;  %v8261_v2 = vpop.f32.mrf.mxu0 }
 0x27c   : > { %v5914_v47 = vpop.eup %5913  ;;  %5939 = vrcp.f32 %v3237_v54  ;;  %v3119_v19 = vadd.f32 1.0, %v5912_v17  ;;  %5085 = vmatmul.mubr.msk.bf16.gmra.mxu1 %vm1082_vm3, %v11001_v9  ;;  %v5184_v5 = vmul.f32 -1.442695, %v8247_v31 }
 0x27d   : > { %v5916_v48 = vpop.eup %5915  ;;  %v4390_v21 = vadd.f32 %v4389_v29, %v4177_v36  ;;  %v4059_v10 = vmul.f32 %v5914_v47, %v8074_v12  ;;  %5941 = vpow2.f32 %v5293_v59  ;;  %2035 = vmatprep.mubr.bf16.mxu1 %v10961_v39  ;;  %v8268_v12 = vadd.f32 %v8189_v27, %v7865_v6  ;;  %v11002_v36 = vld [vmem:[#allocation35_spill] sm:$0xff] }
 0x27e   : > { %v5918_v54 = vpop.eup %5917  ;;  %5943 = vrcp.f32 %v3119_v19  ;;  %v3246_v15 = vadd.f32 1.0, %v5916_v48  ;;  %v8272_v47 = vadd.f32 %v11002_v36, %v7676_v14  ;;  %v8274_v19 = vpop.f32.mrf.mxu1 }
 0x27f   : > { %v5920_v17 = vpop.eup %5919  ;;  %v4452_v35 = vadd.f32 %v4451_v37, %v4059_v10  ;;  %v4186_v9 = vmul.f32 %v5918_v54, %v8084_v16  ;;  %5945 = vpow2.f32 %v5175_v0  ;;  %v5303_v16 = vmul.f32 -1.442695, %v8253_v57  ;;  %v8278_v0 = vpop.f32.mrf.mxu0 }
 0x280   : > { %v5922_v59 = vpop.eup %5921  ;;  %5947 = vrcp.f32 %v3246_v15  ;;  %v3128_v29 = vadd.f32 1.0, %v5920_v17  ;;  %v8282_v54 = vadd.f32 %v8204_v7, %v7843_v20  ;;  %v11005_v7 = vld [vmem:[#allocation18_spill] sm:$0xff] }
 0x281   : > { %v5924_v48 = vpop.eup %5923  ;;  %v4354_v34 = vadd.f32 %v4353_v41, %v4186_v9  ;;  %v4068_v37 = vmul.f32 %v5922_v59, %v8091_v43  ;;  %5949 = vpow2.f32 %v5302_v51  ;;  %v5185_v41 = vmul.f32 -1.442695, %v8268_v12  ;;  %v11003_v59 = vld [vmem:[#allocation36_spill] sm:$0xff] }
 0x282   : > { %v5926_v27 = vpop.eup %5925  ;;  %5951 = vrcp.f32 %v3128_v29  ;;  %v3247_v10 = vadd.f32 1.0, %v5924_v48  ;;  %v5312_v9 = vmul.f32 -1.442695, %v8272_v47  ;;  %v8289_v29 = vadd.f32 %v11003_v59, %v7681_v18  ;;  %v8291_v48 = vpop.f32.mrf.mxu1 }
 0x283   : > { %v5928_v15 = vpop.eup %5927  ;;  %v4416_v17 = vadd.f32 %v4415_v30, %v4068_v37  ;;  %v4187_v36 = vmul.f32 %v5926_v27, %v8095_v11  ;;  %5953 = vpow2.f32 %v5184_v5  ;;  %11004 = vst [vmem:[#allocation28_spill] sm:$0xff] %v8291_v48  ;;  %v8296_v5 = vpop.f32.mrf.mxu0  ;;  %v8303_v59 = vadd.f32 %v8224_v28, %v7865_v6 }
 0x284   : > { %v5930_v43 = vpop.eup %5929  ;;  %5955 = vrcp.f32 %v3247_v10  ;;  %v3129_v51 = vadd.f32 1.0, %v5928_v15  ;;  %5086 = vmatmul.mubr.msk.bf16.gmra.mxu1 %vm1082_vm3, %v11005_v7  ;;  %v5194_v15 = vmul.f32 -1.442695, %v8282_v54 }
 0x285   : > { %v5932_v30 = vpop.eup %5931  ;;  %v4391_v37 = vadd.f32 %v4390_v21, %v4187_v36  ;;  %v4069_v11 = vmul.f32 %v5930_v43, %v8110_v38  ;;  %5957 = vpow2.f32 %v5303_v16  ;;  %2045 = vmatprep.mubr.bf16.mxu1 %v10961_v39  ;;  %v8307_v38 = vadd.f32 %v8037_v44, %v7676_v14 }
 0x286   : > { %v5934_v27 = vpop.eup %5933  ;;  %v4196_v10 = vmul.f32 %v5932_v30, %v8118_v49  ;;  %5959 = vrcp.f32 %v3129_v51  ;;  %v5313_v49 = vmul.f32 -1.442695, %v8289_v29  ;;  %v8311_v51 = vpop.f32.mrf.mxu1 }
 0x287   : > { %v5936_v7 = vpop.eup %5935  ;;  %v4453_v48 = vadd.f32 %v4452_v35, %v4069_v11  ;;  %v3256_v21 = vadd.f32 1.0, %v5934_v27  ;;  %5961 = vpow2.f32 %v5185_v41  ;;  %v8315_v35 = vadd.f32 %v8243_v23, %v7843_v20  ;;  %v8317_v41 = vpop.f32.mrf.mxu0 }
 0x288   : > { %v5938_v16 = vpop.eup %5937  ;;  %v4355_v36 = vadd.f32 %v4354_v34, %v4196_v10  ;;  %v4078_v43 = vmul.f32 %v5936_v7, %v8130_v25  ;;  %5963 = vpow2.f32 %v5312_v9  ;;  %v5195_v25 = vmul.f32 -1.442695, %v8303_v59 }
 0x289   : > { %v5940_v30 = vpop.eup %5939  ;;  %5965 = vrcp.f32 %v3256_v21  ;;  %v3138_v28 = vadd.f32 1.0, %v5938_v16  ;;  %v5322_v10 = vmul.f32 -1.442695, %v8307_v38  ;;  %v8325_v23 = vadd.f32 %v8044_v32, %v7681_v18 }
 0x28a   : > { %v5942_v44 = vpop.eup %5941  ;;  %v4417_v11 = vadd.f32 %v4416_v17, %v4078_v43  ;;  %v4197_v34 = vmul.f32 %v5940_v30, %v8138_v52  ;;  %5967 = vpow2.f32 %v5194_v15  ;;  %v8327_v17 = vpop.f32.mrf.mxu1  ;;  %v11007_v52 = vld [vmem:[#allocation19_spill] sm:$0xff]  ;;  %v5204_v30 = vmul.f32 -1.442695, %v8315_v35 }
 0x28b   : > { %v5944_v9 = vpop.eup %5943  ;;  %5969 = vrcp.f32 %v3138_v28  ;;  %v3257_v27 = vadd.f32 1.0, %v5942_v44  ;;  %11006 = vst [vmem:[#allocation34_spill] sm:$0xff] %v8327_v17  ;;  %v8332_v28 = vpop.f32.mrf.mxu0  ;;  %v8338_v32 = vadd.f32 %v8261_v2, %v7865_v6 }
 0x28c   : > { %v5946_v7 = vpop.eup %5945  ;;  %v4392_v21 = vadd.f32 %v4391_v37, %v4197_v34  ;;  %v4079_v16 = vmul.f32 %v5944_v9, %v8142_v45  ;;  %5971 = vpow2.f32 %v5313_v49  ;;  %5087 = vmatmul.mubr.msk.bf16.gmra.mxu1 %vm1082_vm3, %v11007_v52  ;;  %v5323_v52 = vmul.f32 -1.442695, %v8325_v23  ;;  %v8342_v17 = vpop.f32.mrf.mxu1 }
 0x28d   : > { %v5948_v15 = vpop.eup %5947  ;;  %5973 = vrcp.f32 %v3257_v27  ;;  %v3139_v43 = vadd.f32 1.0, %v5946_v7  ;;  %2055 = vmatprep.mubr.bf16.mxu1 %v10961_v39  ;;  %v8348_v2 = vpop.f32.mrf.mxu0 }
 0x28e   : > { %v5950_v45 = vpop.eup %5949  ;;  %v4454_v37 = vadd.f32 %v4453_v48, %v4079_v16  ;;  %v4206_v49 = vmul.f32 %v5948_v15, %v8159_v58  ;;  %5975 = vpow2.f32 %v5195_v25  ;;  %v8346_v25 = vadd.f32 %v8058_v3, %v7676_v14 }
 0x28f   : > { %v5952_v44 = vpop.eup %5951  ;;  %5977 = vrcp.f32 %v3139_v43  ;;  %v3266_v34 = vadd.f32 1.0, %v5950_v45  ;;  %v8354_v45 = vadd.f32 %v8278_v0, %v7843_v20  ;;  %v8366_v0 = vpop.f32.mrf.mxu0 }
 0x290   : > { %v5954_v9 = vpop.eup %5953  ;;  %v4356_v27 = vadd.f32 %v4355_v36, %v4206_v49  ;;  %v4088_v7 = vmul.f32 %v5952_v44, %v8171_v61  ;;  %5979 = vpow2.f32 %v5322_v10  ;;  %v5205_v61 = vmul.f32 -1.442695, %v8338_v32 }
 0x291   : > { %v5956_v48 = vpop.eup %5955  ;;  %5981 = vrcp.f32 %v3266_v34  ;;  %v3148_v58 = vadd.f32 1.0, %v5954_v9  ;;  %v8357_v34 = vpop.f32.mrf.mxu1  ;;  %v5332_v9 = vmul.f32 -1.442695, %v8346_v25 }
 0x292   : > { %v5958_v16 = vpop.eup %5957  ;;  %v4418_v15 = vadd.f32 %v4417_v11, %v4088_v7  ;;  %v4207_v36 = vmul.f32 %v5956_v48, %v8179_v8  ;;  %5983 = vpow2.f32 %v5204_v30  ;;  %v11008_v11 = vld [vmem:[#allocation20_spill] sm:$0xff]  ;;  %v8364_v7 = vadd.f32 %v8067_v55, %v7681_v18 }
 0x293   : > { %v5960_v10 = vpop.eup %5959  ;;  %5985 = vrcp.f32 %v3148_v58  ;;  %v3267_v43 = vadd.f32 1.0, %v5958_v16  ;;  %v8371_v48 = vadd.f32 %v8296_v5, %v7865_v6 }
 0x294   : > { %v5962_v49 = vpop.eup %5961  ;;  %v4393_v44 = vadd.f32 %v4392_v21, %v4207_v36  ;;  %v4089_v3 = vmul.f32 %v5960_v10, %v8187_v42  ;;  %5987 = vpow2.f32 %v5323_v52  ;;  %5088 = vmatmul.mubr.msk.bf16.gmra.mxu1 %vm1082_vm3, %v11008_v11  ;;  %v5214_v36 = vmul.f32 -1.442695, %v8354_v45 }
 0x295   : > { %v5964_v8 = vpop.eup %5963  ;;  %5989 = vrcp.f32 %v3267_v43  ;;  %v3149_v30 = vadd.f32 1.0, %v5962_v49  ;;  %2065 = vmatprep.mubr.bf16.mxu1 %v10961_v39  ;;  %v8377_v43 = vadd.f32 %v8078_v1, %v7676_v14 }
 0x296   : > { %v5966_v42 = vpop.eup %5965  ;;  %v4455_v21 = vadd.f32 %v4454_v37, %v4089_v3  ;;  %v3276_v52 = vadd.f32 1.0, %v5964_v8  ;;  %5991 = vpow2.f32 %v5205_v61  ;;  %v8379_v37 = vpop.f32.mrf.mxu1  ;;  %v5333_v3 = vmul.f32 -1.442695, %v8364_v7 }
 0x297   : > { %v5968_v58 = vpop.eup %5967  ;;  %v4216_v16 = vmul.f32 %v5966_v42, %v8202_v24  ;;  %5993 = vrcp.f32 %v3149_v30  ;;  %v8383_v24 = vpop.f32.mrf.mxu0  ;;  %v5215_v30 = vmul.f32 -1.442695, %v8371_v48 }
 0x298   : > { %v5970_v55 = vpop.eup %5969  ;;  %5995 = vrcp.f32 %v3276_v52  ;;  %v3158_v10 = vadd.f32 1.0, %v5968_v58  ;;  %v5342_v58 = vmul.f32 -1.442695, %v8377_v43 }
 0x299   : > { %v5972_v61 = vpop.eup %5971  ;;  %v4357_v49 = vadd.f32 %v4356_v27, %v4216_v16  ;;  %v4098_v5 = vmul.f32 %v5970_v55, %v8212_v4  ;;  %5997 = vpow2.f32 %v5332_v9  ;;  %v8389_v27 = vadd.f32 %v8317_v41, %v7843_v20  ;;  %v8392_v16 = vpop.f32.mrf.mxu1  ;;  %v11009_v55 = vld [vmem:[#allocation21_spill] sm:$0xff] }
 0x29a   : > { %v5974_v11 = vpop.eup %5973  ;;  %5999 = vrcp.f32 %v3158_v10  ;;  %v3277_v8 = vadd.f32 1.0, %v5972_v61  ;;  %v8401_v41 = vpop.f32.mrf.mxu0 }
 0x29b   : > { %v5976_v42 = vpop.eup %5975  ;;  %v4419_v52 = vadd.f32 %v4418_v15, %v4098_v5  ;;  %v4217_v1 = vmul.f32 %v5974_v11, %v8217_v63  ;;  %6001 = vpow2.f32 %v5214_v36  ;;  %v8399_v63 = vadd.f32 %v8086_v56, %v7681_v18 }
 0x29c   : > { %v5978_v4 = vpop.eup %5977  ;;  %6003 = vrcp.f32 %v3277_v8  ;;  %v3159_v9 = vadd.f32 1.0, %v5976_v42  ;;  %5089 = vmatmul.mubr.msk.bf16.gmra.mxu1 %vm1082_vm3, %v11009_v55  ;;  %v8406_v11 = vadd.f32 %v8332_v28, %v7865_v6 }
 0x29d   : > { %v5980_v10 = vpop.eup %5979  ;;  %v4394_v61 = vadd.f32 %v4393_v44, %v4217_v1  ;;  %v4099_v15 = vmul.f32 %v5978_v4, %v8233_v26  ;;  %6005 = vpow2.f32 %v5333_v3  ;;  %2075 = vmatprep.mubr.bf16.mxu1 %v10961_v39  ;;  %v5224_v3 = vmul.f32 -1.442695, %v8389_v27  ;;  %v8414_v4 = vpop.f32.mrf.mxu1 }
 0x29e   : > { %v5982_v36 = vpop.eup %5981  ;;  %6007 = vrcp.f32 %v3159_v9  ;;  %v3286_v5 = vadd.f32 1.0, %v5980_v10  ;;  %v8412_v1 = vadd.f32 %v8102_v46, %v7676_v14 }
 0x29f   : > { %v5984_v8 = vpop.eup %5983  ;;  %v4456_v44 = vadd.f32 %v4455_v21, %v4099_v15  ;;  %v4226_v26 = vmul.f32 %v5982_v36, %v8241_v62  ;;  %6009 = vpow2.f32 %v5215_v30  ;;  %v5343_v21 = vmul.f32 -1.442695, %v8399_v63  ;;  %v8418_v62 = vpop.f32.mrf.mxu0 }
 0x2a0   : > { %v5986_v56 = vpop.eup %5985  ;;  %6011 = vrcp.f32 %v3286_v5  ;;  %v3168_v42 = vadd.f32 1.0, %v5984_v8  ;;  %v8422_v15 = vadd.f32 %v8348_v2, %v7843_v20  ;;  %v5352_v8 = vmul.f32 -1.442695, %v8412_v1 }
 0x2a1   : > { %v5988_v9 = vpop.eup %5987  ;;  %v4358_v55 = vadd.f32 %v4357_v49, %v4226_v26  ;;  %v4108_v28 = vmul.f32 %v5986_v56, %v8247_v31  ;;  %6013 = vpow2.f32 %v5342_v58  ;;  %v5225_v49 = vmul.f32 -1.442695, %v8406_v11  ;;  %v8431_v56 = vpop.f32.mrf.mxu1 }
 0x2a2   : > { %v5990_v30 = vpop.eup %5989  ;;  %6015 = vrcp.f32 %v3168_v42  ;;  %v3287_v10 = vadd.f32 1.0, %v5988_v9  ;;  %v8429_v26 = vadd.f32 %v8112_v40, %v7681_v18  ;;  %v5234_v40 = vmul.f32 -1.442695, %v8422_v15 }
 0x2a3   : > { %v5992_v46 = vpop.eup %5991  ;;  %v4420_v36 = vadd.f32 %v4419_v52, %v4108_v28  ;;  %v4227_v5 = vmul.f32 %v5990_v30, %v8253_v57  ;;  %6017 = vpow2.f32 %v5224_v3  ;;  %v8436_v3 = vpop.f32.mrf.mxu0  ;;  %v8443_v28 = vadd.f32 %v8366_v0, %v7865_v6 }
 0x2a4   : > { %v5994_v31 = vpop.eup %5993  ;;  %6019 = vrcp.f32 %v3287_v10  ;;  %v3169_v58 = vadd.f32 1.0, %v5992_v46  ;;  %5090 = vmatmul.mubr.msk.bf16.gmra.mxu1 %vm1082_vm3, %v7588_v33  ;;  %v8451_v46 = vpop.f32.mrf.mxu1 }
 0x2a5   : > { %v5996_v2 = vpop.eup %5995  ;;  %v4395_v52 = vadd.f32 %v4394_v61, %v4227_v5  ;;  %v4109_v57 = vmul.f32 %v5994_v31, %v8268_v12  ;;  %6021 = vpow2.f32 %v5343_v21  ;;  %2085 = vmatprep.mubr.bf16.mxu1 %v10961_v39  ;;  %v8447_v12 = vadd.f32 %v8121_v53, %v7676_v14 }
 0x2a6   : > { %v5998_v42 = vpop.eup %5997  ;;  %v4236_v9 = vmul.f32 %v5996_v2, %v8272_v47  ;;  %6023 = vrcp.f32 %v3169_v58  ;;  %v5353_v47 = vmul.f32 -1.442695, %v8429_v26 }
 0x2a7   : > { %v6000_v33 = vpop.eup %5999  ;;  %v4457_v30 = vadd.f32 %v4456_v44, %v4109_v57  ;;  %v3296_v61 = vadd.f32 1.0, %v5998_v42  ;;  %6025 = vpow2.f32 %v5225_v49  ;;  %v8455_v44 = vadd.f32 %v8383_v24, %v7843_v20  ;;  %v8457_v49 = vpop.f32.mrf.mxu0 }
 0x2a8   : > { %v6002_v21 = vpop.eup %6001  ;;  %v4359_v39 = vadd.f32 %v4358_v55, %v4236_v9  ;;  %v4118_v10 = vmul.f32 %v6000_v33, %v8282_v54  ;;  %6027 = vpow2.f32 %v5352_v8  ;;  %v5235_v54 = vmul.f32 -1.442695, %v8443_v28 }
 0x2a9   : > { %v6004_v5 = vpop.eup %6003  ;;  %6029 = vrcp.f32 %v3296_v61  ;;  %v3178_v0 = vadd.f32 1.0, %v6002_v21  ;;  %v5362_v2 = vmul.f32 -1.442695, %v8447_v12  ;;  %v8465_v24 = vadd.f32 %v8132_v60, %v7681_v18  ;;  %v8472_v61 = vpop.f32.mrf.mxu0 }
 0x2aa   : > { %v6006_v53 = vpop.eup %6005  ;;  %v4421_v31 = vadd.f32 %v4420_v36, %v4118_v10  ;;  %v4237_v55 = vmul.f32 %v6004_v5, %v8289_v29  ;;  %6031 = vpow2.f32 %v5234_v40  ;;  %v8467_v36 = vpop.f32.mrf.mxu1  ;;  %v5244_v33 = vmul.f32 -1.442695, %v8455_v44 }
 0x2ab   : > { %v6008_v58 = vpop.eup %6007  ;;  %6033 = vrcp.f32 %v3178_v0  ;;  %v3297_v8 = vadd.f32 1.0, %v6006_v53  ;;  %v8477_v60 = vadd.f32 %v8401_v41, %v7865_v6  ;;  %v5363_v53 = vmul.f32 -1.442695, %v8465_v24 }
 0x2ac   : > { %v6010_v57 = vpop.eup %6009  ;;  %v4396_v42 = vadd.f32 %v4395_v52, %v4237_v55  ;;  %v4119_v9 = vmul.f32 %v6008_v58, %v8303_v59  ;;  %6035 = vpow2.f32 %v5353_v47  ;;  %5091 = vmatmul.mubr.msk.bf16.gmra.mxu1 %vm1082_vm3, %v10975_v22 }
 0x2ad   : > { %v6012_v29 = vpop.eup %6011  ;;  %6037 = vrcp.f32 %v3297_v8  ;;  %v3179_v40 = vadd.f32 1.0, %v6010_v57  ;;  %v8491_v57 = vadd.f32 %v8418_v62, %v7843_v20 }
 0x2ae   : > { %v6014_v52 = vpop.eup %6013  ;;  %v4458_v21 = vadd.f32 %v4457_v30, %v4119_v9  ;;  %v4246_v59 = vmul.f32 %v6012_v29, %v8307_v38  ;;  %6039 = vpow2.f32 %v5235_v54  ;;  %v8483_v38 = vadd.f32 %v8144_v13, %v7676_v14  ;;  %v8485_v54 = vpop.f32.mrf.mxu0 }
 0x2af   : > { %v6016_v10 = vpop.eup %6015  ;;  %6041 = vrcp.f32 %v3179_v40  ;;  %v3306_v47 = vadd.f32 1.0, %v6014_v52 }
 0x2b0   : > { %v6018_v22 = vpop.eup %6017  ;;  %v4360_v5 = vadd.f32 %v4359_v39, %v4246_v59  ;;  %v4128_v0 = vmul.f32 %v6016_v10, %v8315_v35  ;;  %6043 = vpow2.f32 %v5362_v2  ;;  %v5245_v39 = vmul.f32 -1.442695, %v8477_v60  ;;  %v8499_v52 = vpop.f32.mrf.mxu0 }
 0x2b1   : > { %v6020_v55 = vpop.eup %6019  ;;  %6045 = vrcp.f32 %v3306_v47  ;;  %v3188_v30 = vadd.f32 1.0, %v6018_v22 }
 0x2b2   : > { %v6022_v41 = vpop.eup %6021  ;;  %v4422_v58 = vadd.f32 %v4421_v31, %v4128_v0  ;;  %v4247_v8 = vmul.f32 %v6020_v55, %v8325_v23  ;;  %6047 = vpow2.f32 %v5244_v33  ;;  %v8496_v31 = vadd.f32 %v8155_v50, %v7681_v18 }
 0x2b3   : > { %v6024_v35 = vpop.eup %6023  ;;  %6049 = vrcp.f32 %v3188_v30  ;;  %v3307_v2 = vadd.f32 1.0, %v6022_v41  ;;  %v5372_v33 = vmul.f32 -1.442695, %v8483_v38  ;;  %v8505_v50 = vadd.f32 %v8436_v3, %v7865_v6  ;;  %v11010_v41 = vld [vmem:[#allocation22_spill] sm:$0xff] }
 0x2b4   : > { %v6026_v9 = vpop.eup %6025  ;;  %v4397_v29 = vadd.f32 %v4396_v42, %v4247_v8  ;;  %v4129_v13 = vmul.f32 %v6024_v35, %v8338_v32  ;;  %6051 = vpow2.f32 %v5363_v53  ;;  %v5254_v32 = vmul.f32 -1.442695, %v8491_v57  ;;  %v8513_v8 = vpop.f32.mrf.mxu0 }
 0x2b5   : > { %v6028_v23 = vpop.eup %6027  ;;  %6053 = vrcp.f32 %v3307_v2  ;;  %v3189_v40 = vadd.f32 1.0, %v6026_v9  ;;  %v5373_v53 = vmul.f32 -1.442695, %v8496_v31  ;;  %v8517_v35 = vadd.f32 %v8457_v49, %v7843_v20 }
 0x2b6   : > { %v6030_v59 = vpop.eup %6029  ;;  %v4459_v10 = vadd.f32 %v4458_v21, %v4129_v13  ;;  %v3316_v62 = vadd.f32 1.0, %v6028_v23  ;;  %6055 = vpow2.f32 %v5245_v39 }
 0x2b7   : > { %v6032_v47 = vpop.eup %6031  ;;  %v4256_v42 = vmul.f32 %v6030_v59, %v8346_v25  ;;  %6057 = vrcp.f32 %v3189_v40  ;;  %v8511_v25 = vadd.f32 %v11010_v41, %v7676_v14  ;;  %v11011_v40 = vld [vmem:[#allocation13_spill] sm:$0xff] }
 0x2b8   : > { %v6034_v22 = vpop.eup %6033  ;;  %6059 = vrcp.f32 %v3316_v62  ;;  %v3198_v0 = vadd.f32 1.0, %v6032_v47  ;;  %v11012_v41 = vld [vmem:[#allocation25_spill] sm:$0xff] }
 0x2b9   : > { %v6036_v55 = vpop.eup %6035  ;;  %v4361_v30 = vadd.f32 %v4360_v5, %v4256_v42  ;;  %v4138_v21 = vmul.f32 %v6034_v22, %v8354_v45  ;;  %6061 = vpow2.f32 %v5372_v33  ;;  %v5255_v45 = vmul.f32 -1.442695, %v8505_v50  ;;  %v8530_v22 = vpop.f32.mrf.mxu1 }
 0x2ba   : > { %v6038_v39 = vpop.eup %6037  ;;  %6063 = vrcp.f32 %v3198_v0  ;;  %v3317_v3 = vadd.f32 1.0, %v6036_v55  ;;  %v8523_v33 = vadd.f32 %v11011_v40, %v7681_v18  ;;  %v5382_v49 = vmul.f32 -1.442695, %v8511_v25 }
 0x2bb   : > { %v6040_v2 = vpop.eup %6039  ;;  %v4423_v9 = vadd.f32 %v4422_v58, %v4138_v21  ;;  %v4257_v5 = vmul.f32 %v6038_v39, %v8364_v7  ;;  %6065 = vpow2.f32 %v5254_v32  ;;  %v8527_v58 = vpop.f32.mrf.mxu0  ;;  %v5264_v32 = vmul.f32 -1.442695, %v8517_v35 }
 0x2bc   : > { %v6042_v13 = vpop.eup %6041  ;;  %6067 = vrcp.f32 %v3317_v3  ;;  %v3199_v23 = vadd.f32 1.0, %v6040_v2  ;;  %v8539_v39 = vadd.f32 %v11012_v41, %v7676_v14  ;;  %v8565_v41 = vadd.f32 %v8499_v52, %v7865_v6 }
 0x2bd   : > { %v6044_v59 = vpop.eup %6043  ;;  %v4398_v62 = vadd.f32 %v4397_v29, %v4257_v5  ;;  %v4139_v47 = vmul.f32 %v6042_v13, %v8371_v48  ;;  %6069 = vpow2.f32 %v5373_v53  ;;  %v8535_v48 = vadd.f32 %v8472_v61, %v7865_v6 }
 0x2be   : > { %v6046_v7 = vpop.eup %6045  ;;  %6071 = vrcp.f32 %v3199_v23  ;;  %v3326_v42 = vadd.f32 1.0, %v6044_v59  ;;  %v8547_v13 = vadd.f32 %v8485_v54, %v7843_v20  ;;  %v8549_v23 = vpop.f32.mrf.mxu1 }
 0x2bf   : > { %v6048_v0 = vpop.eup %6047  ;;  %v4460_v55 = vadd.f32 %v4459_v10, %v4139_v47  ;;  %v4266_v21 = vmul.f32 %v6046_v7, %v8377_v43  ;;  %6073 = vpow2.f32 %v5255_v45  ;;  %v5383_v10 = vmul.f32 -1.442695, %v8523_v33  ;;  %v8543_v43 = vpop.f32.mrf.mxu0 }
 0x2c0   : > { %v6050_v29 = vpop.eup %6049  ;;  %6075 = vrcp.f32 %v3326_v42  ;;  %v3208_v53 = vadd.f32 1.0, %v6048_v0  ;;  %v5392_v7 = vmul.f32 -1.442695, %v8539_v39  ;;  %v11013_v42 = vld [vmem:[#allocation26_spill] sm:$0xff] }
 0x2c1   : > { %v6052_v3 = vpop.eup %6051  ;;  %v4362_v2 = vadd.f32 %v4361_v30, %v4266_v21  ;;  %v4148_v5 = vmul.f32 %v6050_v29, %v8389_v27  ;;  %6077 = vpow2.f32 %v5382_v49  ;;  %v5265_v27 = vmul.f32 -1.442695, %v8535_v48 }
 0x2c2   : > { %v6054_v45 = vpop.eup %6053  ;;  %6079 = vrcp.f32 %v3208_v53  ;;  %v3327_v61 = vadd.f32 1.0, %v6052_v3  ;;  %v8556_v0 = vadd.f32 %v11013_v42, %v7681_v18  ;;  %v5274_v53 = vmul.f32 -1.442695, %v8547_v13  ;;  %v8567_v3 = vpop.f32.mrf.mxu1 }
 0x2c3   : > { %v6056_v40 = vpop.eup %6055  ;;  %v4424_v59 = vadd.f32 %v4423_v9, %v4148_v5  ;;  %v4267_v30 = vmul.f32 %v6054_v45, %v8399_v63  ;;  %6081 = vpow2.f32 %v5264_v32  ;;  %v8559_v9 = vpop.f32.mrf.mxu0 }
 0x2c4   : > { %v6058_v47 = vpop.eup %6057  ;;  %6083 = vrcp.f32 %v3327_v61  ;;  %v3209_v49 = vadd.f32 1.0, %v6056_v40 }
 0x2c5   : > { %v6060_v54 = vpop.eup %6059  ;;  %v4399_v21 = vadd.f32 %v4398_v62, %v4267_v30  ;;  %v4149_v29 = vmul.f32 %v6058_v47, %v8406_v11  ;;  %6085 = vpow2.f32 %v5383_v10  ;;  %v11014_v11 = vld [vmem:[#allocation14_spill] sm:$0xff]  ;;  %v5393_v30 = vmul.f32 -1.442695, %v8556_v0 }
 0x2c6   : > { %v6062_v63 = vpop.eup %6061  ;;  %v4276_v32 = vmul.f32 %v6060_v54, %v8412_v1  ;;  %6087 = vrcp.f32 %v3209_v49  ;;  %v8571_v10 = vadd.f32 %v11014_v11, %v7676_v14  ;;  %v8577_v49 = vadd.f32 %v8513_v8, %v7843_v20 }
 0x2c7   : > { %v6064_v5 = vpop.eup %6063  ;;  %v4461_v45 = vadd.f32 %v4460_v55, %v4149_v29  ;;  %v3336_v62 = vadd.f32 1.0, %v6062_v63  ;;  %6089 = vpow2.f32 %v5265_v27  ;;  %v8579_v55 = vpop.f32.mrf.mxu0  ;;  %v11015_v63 = vld [vmem:[#allocation23_spill] sm:$0xff] }
 0x2c8   : > { %v6066_v61 = vpop.eup %6065  ;;  %v4363_v40 = vadd.f32 %v4362_v2, %v4276_v32  ;;  %v4158_v1 = vmul.f32 %v6064_v5, %v8422_v15  ;;  %6091 = vpow2.f32 %v5392_v7  ;;  %v5275_v2 = vmul.f32 -1.442695, %v8565_v41  ;;  %v8583_v15 = vpop.f32.mrf.mxu1 }
 0x2c9   : > { %v6068_v47 = vpop.eup %6067  ;;  %6093 = vrcp.f32 %v3336_v62  ;;  %v3218_v52 = vadd.f32 1.0, %v6066_v61  ;;  %v5402_v29 = vmul.f32 -1.442695, %v8571_v10  ;;  %v950_v32 = vsub.s32 4, %v11015_v63 }
 0x2ca   : > { %v6070_v27 = vpop.eup %6069  ;;  %v4425_v42 = vadd.f32 %v4424_v59, %v4158_v1  ;;  %v4277_v14 = vmul.f32 %v6068_v47, %v8429_v26  ;;  %6095 = vpow2.f32 %v5274_v53  ;;  %v11016_v59 = vld [vmem:[#allocation24_spill] sm:$0xff]  ;;  %v5284_v61 = vmul.f32 -1.442695, %v8577_v49  ;;  %v8597_v47 = vpop.f32.mrf.mxu0 }
 0x2cb   : > { %v6072_v7 = vpop.eup %6071  ;;  %6097 = vrcp.f32 %v3218_v52  ;;  %v3337_v54 = vadd.f32 1.0, %v6070_v27  ;;  %v8590_v26 = vadd.f32 %v11016_v59, %v7681_v18  ;;  %v8595_v1 = vadd.f32 %v8527_v58, %v7865_v6  ;;  %v8601_v18 = vpop.f32.mrf.mxu1 }
 0x2cc   : > { %v6074_v8 = vpop.eup %6073  ;;  %v4400_v5 = vadd.f32 %v4399_v21, %v4277_v14  ;;  %v4159_v62 = vmul.f32 %v6072_v7, %v8443_v28  ;;  %6099 = vpow2.f32 %v5393_v30  ;;  %v954_v30 = vsub.s32 5, %v11015_v63  ;;  %11017 = vst [vmem:[#allocation29_spill] sm:$0xff] %v8601_v18  ;;  %v8603_v7 = vld [vmem:[#allocation8] sm:$0xff] }
 0x2cd   : > { %v6076_v53 = vpop.eup %6075  ;;  %6101 = vrcp.f32 %v3337_v54  ;;  %v3219_v11 = vadd.f32 1.0, %v6074_v8  ;;  %11018 = vst [vmem:[#allocation16_spill] sm:$0xff] %v8603_v7  ;;  %v8606_v54 = vrot.slane %v8603_v7, %v950_v32 }
 0x2ce   : > { %v6078_v52 = vpop.eup %6077  ;;  %v4462_v21 = vadd.f32 %v4461_v45, %v4159_v62  ;;  %v4286_v28 = vmul.f32 %v6076_v53, %v8447_v12  ;;  %6103 = vpow2.f32 %v5275_v2  ;;  %v5403_v12 = vmul.f32 -1.442695, %v8590_v26 }
 0x2cf   : > { %v6080_v27 = vpop.eup %6079  ;;  %6105 = vrcp.f32 %v3219_v11  ;;  %v3346_v14 = vadd.f32 1.0, %v6078_v52  ;;  %v5285_v62 = vmul.f32 -1.442695, %v8595_v1  ;;  %v8613_v53 = vadd.f32 %v8543_v43, %v7843_v20  ;;  %v8615_v11 = vpop.f32.mrf.mxu0 }
 0x2d0   : > { %v6082_v58 = vpop.eup %6081  ;;  %v4364_v8 = vadd.f32 %v4363_v40, %v4286_v28  ;;  %v4168_v59 = vmul.f32 %v6080_v27, %v8455_v44  ;;  %6107 = vpow2.f32 %v5402_v29  ;;  %v8619_v44 = vrot.slane %v8603_v7, %v954_v30  ;;  %v8621_v29 = vpop.f32.mrf.mxu1 }
 0x2d1   : > { %v6084_v45 = vpop.eup %6083  ;;  %6109 = vrcp.f32 %v3346_v14  ;;  %v3228_v2 = vadd.f32 1.0, %v6082_v58  ;;  %v11019_v14 = vld [vmem:[#allocation27_spill] sm:$0xff]  ;;  %v8631_v30 = vadd.f32 %v8559_v9, %v7865_v6 }
 0x2d2   : > { %v6086_v32 = vpop.eup %6085  ;;  %v4426_v52 = vadd.f32 %v4425_v42, %v4168_v59  ;;  %v4287_v40 = vmul.f32 %v6084_v45, %v8465_v24  ;;  %6111 = vpow2.f32 %v5284_v61  ;;  %v8625_v58 = vadd.f32 %v11019_v14, %v8606_v54  ;;  %v8633_v59 = vpop.f32.mrf.mxu0 }
 0x2d3   : > { %v6088_v28 = vpop.eup %6087  ;;  %6113 = vrcp.f32 %v3228_v2  ;;  %v3347_v27 = vadd.f32 1.0, %v6086_v32  ;;  %v5294_v61 = vmul.f32 -1.442695, %v8613_v53 }
 0x2d4   : > { %v6090_v43 = vpop.eup %6089  ;;  %v4401_v63 = vadd.f32 %v4400_v5, %v4287_v40  ;;  %v4169_v18 = vmul.f32 %v6088_v28, %v8477_v60  ;;  %6115 = vpow2.f32 %v5403_v12  ;;  %v11020_v5 = vld [vmem:[#allocation15_spill] sm:$0xff]  ;;  %v8639_v60 = vpop.f32.mrf.mxu1 }
 0x2d5   : > { %v6092_v42 = vpop.eup %6091  ;;  %6117 = vrcp.f32 %v3347_v27  ;;  %v3229_v24 = vadd.f32 1.0, %v6090_v43  ;;  %v8637_v40 = vadd.f32 %v11020_v5, %v8619_v44  ;;  %11021 = vst [vmem:[#allocation31_spill] sm:$0xff] %v8639_v60  ;;  %v5096_v27 = vmul.f32 -1.442695, %v8625_v58  ;;  %v8649_v5 = vpop.f32.mrf.mxu0 }
 0x2d6   : > { %v6094_v45 = vpop.eup %6093  ;;  %v4463_v2 = vadd.f32 %v4462_v21, %v4169_v18  ;;  %v3356_v32 = vadd.f32 1.0, %v6092_v42  ;;  %6119 = vpow2.f32 %v5285_v62  ;;  %v8645_v21 = vadd.f32 %v8579_v55, %v7843_v20 }
 0x2d7   : > { %v6096_v12 = vpop.eup %6095  ;;  %v4296_v28 = vmul.f32 %v6094_v45, %v8483_v38  ;;  %6121 = vrcp.f32 %v3229_v24  ;;  %v5295_v42 = vmul.f32 -1.442695, %v8631_v30  ;;  %v5097_v45 = vmul.f32 -1.442695, %v8637_v40 }
 0x2d8   : > { %v6098_v9 = vpop.eup %6097  ;;  %6123 = vrcp.f32 %v3356_v32  ;;  %v3238_v14 = vadd.f32 1.0, %v6096_v12  ;;  %v8652_v32 = vpop.f32.mrf.mxu1 }
 0x2d9   : > { %v6100_v18 = vpop.eup %6099  ;;  %v4365_v62 = vadd.f32 %v4364_v8, %v4296_v28  ;;  %v4178_v43 = vmul.f32 %v6098_v9, %v8491_v57  ;;  %6125 = vpow2.f32 %v5294_v61  ;;  %11022 = vst [vmem:[#allocation33_spill] sm:$0xff] %v8652_v32  ;;  %v11023_v8 = vld [vmem:[#allocation30_spill] sm:$0xff]  ;;  %v5304_v9 = vmul.f32 -1.442695, %v8645_v21 }
 0x2da   : > { %v6102_v38 = vpop.eup %6101  ;;  %6127 = vrcp.f32 %v3238_v14  ;;  %v3357_v24 = vadd.f32 1.0, %v6100_v18  ;;  %v8657_v57 = vadd.f32 %v11023_v8, %v8606_v54 }
 0x2db   : > { %v6104_v12 = vpop.eup %6103  ;;  %v4427_v7 = vadd.f32 %v4426_v52, %v4178_v43  ;;  %v4297_v55 = vmul.f32 %v6102_v38, %v8496_v31  ;;  %6129 = vpow2.f32 %v5096_v27  ;;  %v8663_v52 = vadd.f32 %v8597_v47, %v7865_v6  ;;  %v8665_v31 = vpop.f32.mrf.mxu0  ;;  %v11024_v38 = vld [vmem:[#allocation32_spill] sm:$0xff] }
 0x2dc   : > { %v6106_v61 = vpop.eup %6105  ;;  %6131 = vrcp.f32 %v3357_v24  ;;  %v3239_v28 = vadd.f32 1.0, %v6104_v12  ;;  %v8669_v24 = vadd.f32 %v11024_v38, %v8619_v44  ;;  %v8671_v12 = vpop.f32.mrf.mxu1 }
 0x2dd   : > { %v6108_v14 = vpop.eup %6107  ;;  %v4402_v18 = vadd.f32 %v4401_v63, %v4297_v55  ;;  %v4179_v60 = vmul.f32 %v6106_v61, %v8505_v50  ;;  %6133 = vpow2.f32 %v5295_v42  ;;  %11025 = vst [vmem:[#allocation17_spill] sm:$0xff] %v8671_v12  ;;  %v5106_v42 = vmul.f32 -1.442695, %v8657_v57 }
 0x2de   : > { %v6110_v27 = vpop.eup %6109  ;;  %6135 = vrcp.f32 %v3239_v28  ;;  %v3366_v43 = vadd.f32 1.0, %v6108_v14  ;;  %v8677_v61 = vadd.f32 %v8615_v11, %v7843_v20  ;;  %v5305_v12 = vmul.f32 -1.442695, %v8663_v52 }
 0x2df   : > { %v6112_v8 = vpop.eup %6111  ;;  %v4464_v63 = vadd.f32 %v4463_v2, %v4179_v60  ;;  %v4306_v50 = vmul.f32 %v6110_v27, %v8511_v25  ;;  %6137 = vpow2.f32 %v5097_v45  ;;  %v8681_v2 = vpop.f32.mrf.mxu0  ;;  %v8685_v45 = vadd.f32 %v8274_v19, %v8606_v54 }
 0x2e0   : > { %v6114_v47 = vpop.eup %6113  ;;  %6139 = vrcp.f32 %v3366_v43  ;;  %v3248_v55 = vadd.f32 1.0, %v6112_v8  ;;  %v8687_v27 = vpop.f32.mrf.mxu1 }
 0x2e1   : > { %v6116_v28 = vpop.eup %6115  ;;  %v4366_v14 = vadd.f32 %v4365_v62, %v4306_v50  ;;  %v4188_v38 = vmul.f32 %v6114_v47, %v8517_v35  ;;  %6141 = vpow2.f32 %v5304_v9  ;;  %11026 = vst [vmem:[#allocation35_spill] sm:$0xff] %v8687_v27  ;;  %v5107_v35 = vmul.f32 -1.442695, %v8669_v24 }
 0x2e2   : > { %v6118_v25 = vpop.eup %6117  ;;  %6143 = vrcp.f32 %v3248_v55  ;;  %v3367_v60 = vadd.f32 1.0, %v6116_v28  ;;  %v5314_v50 = vmul.f32 -1.442695, %v8677_v61  ;;  %v8694_v47 = vadd.f32 %v8633_v59, %v7865_v6 }
 0x2e3   : > { %v6120_v11 = vpop.eup %6119  ;;  %v4428_v43 = vadd.f32 %v4427_v7, %v4188_v38  ;;  %v4307_v62 = vmul.f32 %v6118_v25, %v8523_v33  ;;  %6145 = vpow2.f32 %v5106_v42  ;;  %v8697_v7 = vpop.f32.mrf.mxu0  ;;  %v5116_v38 = vmul.f32 -1.442695, %v8685_v45  ;;  %v11027_v25 = vld [vmem:[#allocation28_spill] sm:$0xff] }
 0x2e4   : > { %v6122_v9 = vpop.eup %6121  ;;  %6147 = vrcp.f32 %v3367_v60  ;;  %v3249_v8 = vadd.f32 1.0, %v6120_v11  ;;  %v8703_v60 = vadd.f32 %v11027_v25, %v8619_v44  ;;  %v8705_v11 = vpop.f32.mrf.mxu1  ;;  %v8715_v25 = vadd.f32 %v8311_v51, %v8606_v54 }
 0x2e5   : > { %v6124_v19 = vpop.eup %6123  ;;  %v4403_v55 = vadd.f32 %v4402_v18, %v4307_v62  ;;  %v4189_v28 = vmul.f32 %v6122_v9, %v8535_v48  ;;  %6149 = vpow2.f32 %v5305_v12  ;;  %11028 = vst [vmem:[#allocation36_spill] sm:$0xff] %v8705_v11  ;;  %v8709_v48 = vadd.f32 %v8649_v5, %v7843_v20 }
 0x2e6   : > { %v6126_v33 = vpop.eup %6125  ;;  %v4316_v42 = vmul.f32 %v6124_v19, %v8539_v39  ;;  %6151 = vrcp.f32 %v3249_v8  ;;  %v5315_v9 = vmul.f32 -1.442695, %v8694_v47 }
 0x2e7   : > { %v6128_v59 = vpop.eup %6127  ;;  %v4465_v27 = vadd.f32 %v4464_v63, %v4189_v28  ;;  %v3258_v18 = vadd.f32 1.0, %v6126_v33  ;;  %6153 = vpow2.f32 %v5107_v35  ;;  %v8717_v63 = vpop.f32.mrf.mxu0 }
 0x2e8   : > { %v6130_v12 = vpop.eup %6129  ;;  %v4367_v62 = vadd.f32 %v4366_v14, %v4316_v42  ;;  %v4198_v39 = vmul.f32 %v6128_v59, %v8547_v13  ;;  %6155 = vpow2.f32 %v5314_v50  ;;  %v5117_v14 = vmul.f32 -1.442695, %v8703_v60  ;;  %v8721_v13 = vpop.f32.mrf.mxu1 }
 0x2e9   : > { %v6132_v8 = vpop.eup %6131  ;;  %6157 = vrcp.f32 %v3258_v18  ;;  %v3060_v19 = vadd.f32 1.0, %v6130_v12  ;;  %11029 = vst [vmem:[#allocation18_spill] sm:$0xff] %v8721_v13  ;;  %v5324_v42 = vmul.f32 -1.442695, %v8709_v48  ;;  %v8729_v12 = vpop.f32.mrf.mxu0 }
 0x2ea   : > { %v6134_v35 = vpop.eup %6133  ;;  %v4429_v28 = vadd.f32 %v4428_v43, %v4198_v39  ;;  %v4317_v5 = vmul.f32 %v6132_v8, %v8556_v0  ;;  %6159 = vpow2.f32 %v5116_v38  ;;  %v8727_v43 = vadd.f32 %v8665_v31, %v7865_v6  ;;  %v11031_v31 = vld [vmem:[#allocation34_spill] sm:$0xff] }
 0x2eb   : > { %v6136_v50 = vpop.eup %6135  ;;  %6161 = vrcp.f32 %v3060_v19  ;;  %v3259_v33 = vadd.f32 1.0, %v6134_v35  ;;  %v5126_v35 = vmul.f32 -1.442695, %v8715_v25 }
 0x2ec   : > { %v6138_v59 = vpop.eup %6137  ;;  %v4404_v18 = vadd.f32 %v4403_v55, %v4317_v5  ;;  %v4199_v51 = vmul.f32 %v6136_v50, %v8565_v41  ;;  %6163 = vpow2.f32 %v5315_v9  ;;  %v8733_v55 = vpop.f32.mrf.mxu1  ;;  %v8737_v5 = vadd.f32 %v11031_v31, %v8619_v44 }
 0x2ed   : > { %v6140_v0 = vpop.eup %6139  ;;  %6165 = vrcp.f32 %v3259_v33  ;;  %v3061_v38 = vadd.f32 1.0, %v6138_v59  ;;  %11030 = vst [vmem:[#allocation19_spill] sm:$0xff] %v8733_v55 }
 0x2ee   : > { %v6142_v39 = vpop.eup %6141  ;;  %v4466_v8 = vadd.f32 %v4465_v27, %v4199_v51  ;;  %v4326_v19 = vmul.f32 %v6140_v0, %v8571_v10  ;;  %6167 = vpow2.f32 %v5117_v14  ;;  %v5325_v27 = vmul.f32 -1.442695, %v8727_v43  ;;  %v8745_v0 = vpop.f32.mrf.mxu0 }
 0x2ef   : > { %v6144_v41 = vpop.eup %6143  ;;  %6169 = vrcp.f32 %v3061_v38  ;;  %v3268_v9 = vadd.f32 1.0, %v6142_v39  ;;  %v8743_v51 = vadd.f32 %v8681_v2, %v7843_v20 }
 0x2f0   : > { %v6146_v50 = vpop.eup %6145  ;;  %v4368_v33 = vadd.f32 %v4367_v62, %v4326_v19  ;;  %v4208_v59 = vmul.f32 %v6144_v41, %v8577_v49  ;;  %6171 = vpow2.f32 %v5324_v42  ;;  %v8748_v62 = vpop.f32.mrf.mxu1  ;;  %v5127_v19 = vmul.f32 -1.442695, %v8737_v5 }
 0x2f1   : > { %v6148_v10 = vpop.eup %6147  ;;  %6173 = vrcp.f32 %v3268_v9  ;;  %v3070_v14 = vadd.f32 1.0, %v6146_v50  ;;  %11032 = vst [vmem:[#allocation20_spill] sm:$0xff] %v8748_v62  ;;  %v8753_v41 = vadd.f32 %v8342_v17, %v8606_v54 }
 0x2f2   : > { %v6150_v38 = vpop.eup %6149  ;;  %v4369_v39 = vrot.slane %v4368_v33, 4  ;;  %v4430_v31 = vadd.f32 %v4429_v28, %v4208_v59  ;;  %v4327_v55 = vmul.f32 %v6148_v10, %v8590_v26  ;;  %6175 = vpow2.f32 %v5126_v35  ;;  %v8761_v10 = vpop.f32.mrf.mxu0 }
 0x2f3   : > { %v6152_v49 = vpop.eup %6151  ;;  %6177 = vrcp.f32 %v3070_v14  ;;  %v3269_v42 = vadd.f32 1.0, %v6150_v38  ;;  %v5334_v35 = vmul.f32 -1.442695, %v8743_v51  ;;  %v8759_v59 = vadd.f32 %v8697_v7, %v7865_v6 }
 0x2f4   : > { %v6154_v2 = vpop.eup %6153  ;;  %v4370_v9 = vadd.f32 %v4369_v39, %v4368_v33  ;;  %v4405_v50 = vadd.f32 %v4404_v18, %v4327_v55  ;;  %v4209_v13 = vmul.f32 %v6152_v49, %v8595_v1  ;;  %6179 = vpow2.f32 %v5325_v27  ;;  %v8763_v18 = vpop.f32.mrf.mxu1 }
 0x2f5   : > { %v6156_v28 = vpop.eup %6155  ;;  %6181 = vrcp.f32 %v3269_v42  ;;  %v3071_v26 = vadd.f32 1.0, %v6154_v2  ;;  %11033 = vst [vmem:[#allocation21_spill] sm:$0xff] %v8763_v18  ;;  %v5136_v27 = vmul.f32 -1.442695, %v8753_v41  ;;  %v8769_v39 = vadd.f32 %v8357_v34, %v8619_v44 }
 0x2f6   : > { %v6158_v14 = vpop.eup %6157  ;;  %v4371_v17 = vrot.slane %v4370_v9, 2  ;;  %v4406_v38 = vrot.slane %v4405_v50, 4  ;;  %v4467_v62 = vadd.f32 %v4466_v8, %v4209_v13  ;;  %v3278_v33 = vadd.f32 1.0, %v6156_v28  ;;  %v8779_v28 = vpop.f32.mrf.mxu0 }
 0x2f7   : > { %v6160_v1 = vpop.eup %6159  ;;  %v4218_v55 = vmul.f32 %v6158_v14, %v8613_v53  ;;  %6183 = vrcp.f32 %v3071_v26  ;;  %v8773_v8 = vadd.f32 %v8717_v63, %v7843_v20  ;;  %v8777_v53 = vadd.f32 %v8379_v37, %v8606_v54 }
 0x2f8   : > { %v6162_v7 = vpop.eup %6161  ;;  %v4372_v49 = vadd.f32 %v4371_v17, %v4370_v9  ;;  %v4407_v42 = vadd.f32 %v4406_v38, %v4405_v50  ;;  %6185 = vrcp.f32 %v3278_v33  ;;  %v3080_v2 = vadd.f32 1.0, %v6160_v1 }
 0x2f9   : > { %v6164_v11 = vpop.eup %6163  ;;  %v4431_v13 = vadd.f32 %v4430_v31, %v4218_v55  ;;  %6187 = vpow2.f32 %v5127_v19  ;;  %v8783_v50 = vadd.f32 %v8729_v12, %v7865_v6  ;;  %v8785_v31 = vpop.f32.mrf.mxu1  ;;  %v5335_v14 = vmul.f32 -1.442695, %v8759_v59 }
 0x2fa   : > { %v6166_v34 = vpop.eup %6165  ;;  %v4408_v26 = vrot.slane %v4407_v42, 2  ;;  %6189 = vrcp.f32 %v3080_v2  ;;  %v3279_v9 = vadd.f32 1.0, %v6164_v11  ;;  %11034 = vst [vmem:[#allocation22_spill] sm:$0xff] %v8785_v31  ;;  %v5137_v37 = vmul.f32 -1.442695, %v8769_v39  ;;  %v8792_v31 = vpop.f32.mrf.mxu0 }
 0x2fb   : > { %v6168_v19 = vpop.eup %6167  ;;  %v4219_v63 = vmul.f32 %v6166_v34, %v8631_v30  ;;  %6191 = vpow2.f32 %v5334_v35  ;;  %v4373_v38 = vrot.slane %v4372_v49, 1  ;;  %v5344_v12 = vmul.f32 -1.442695, %v8773_v8  ;;  %v8795_v32 = vpop.f32.mrf.mxu1 }
 0x2fc   : > { %v6170_v17 = vpop.eup %6169  ;;  %v4409_v33 = vadd.f32 %v4408_v26, %v4407_v42  ;;  %6193 = vrcp.f32 %v3279_v9  ;;  %v3081_v1 = vadd.f32 1.0, %v6168_v19  ;;  %v5146_v2 = vmul.f32 -1.442695, %v8777_v53  ;;  %11035 = vst [vmem:[#allocation13_spill] sm:$0xff] %v8795_v32 }
 0x2fd   : > { %v6172_v11 = vpop.eup %6171  ;;  %v4468_v55 = vadd.f32 %v4467_v62, %v4219_v63  ;;  %6195 = vpow2.f32 %v5136_v27  ;;  %v5345_v18 = vmul.f32 -1.442695, %v8783_v50  ;;  %v8800_v62 = vadd.f32 %v8392_v16, %v8619_v44  ;;  %v8812_v16 = vpop.f32.mrf.mxu0 }
 0x2fe   : > { %v6174_v30 = vpop.eup %6173  ;;  %v4410_v35 = vrot.slane %v4409_v33, 1  ;;  %6197 = vrcp.f32 %v3081_v1  ;;  %v3288_v34 = vadd.f32 1.0, %v6172_v11  ;;  %v8804_v27 = vadd.f32 %v8745_v0, %v7843_v20 }
 0x2ff   : > { %v6176_v42 = vpop.eup %6175  ;;  %v4228_v26 = vmul.f32 %v6174_v30, %v8645_v21  ;;  %6199 = vpow2.f32 %v5335_v14  ;;  %v8806_v19 = vadd.f32 %v4373_v38, %v4372_v49  ;;  %v4020_v32 = vmul.f32 %v6162_v7, %v8625_v58 }
 0x300   : > { %v6178_v9 = vpop.eup %6177  ;;  %v8808_v63 = vadd.f32 %v4410_v35, %v4409_v33  ;;  %6201 = vrcp.f32 %v3288_v34  ;;  %v3090_v1 = vadd.f32 1.0, %v6176_v42  ;;  %v8818_v38 = vadd.f32 %v8414_v4, %v8606_v54  ;;  %v8820_v33 = vpop.f32.mrf.mxu1 }
 0x301   : > { %v6180_v11 = vpop.eup %6179  ;;  %v4432_v21 = vadd.f32 %v4431_v13, %v4228_v26  ;;  %v4030_v14 = vmul.f32 %v6178_v9, %v8657_v57  ;;  %6203 = vpow2.f32 %v5137_v37  ;;  %v5147_v57 = vmul.f32 -1.442695, %v8800_v62 }
 0x302   : > { %v6182_v30 = vpop.eup %6181  ;;  %6205 = vrcp.f32 %v3090_v1  ;;  %v3289_v49 = vadd.f32 1.0, %v6180_v11  ;;  %v5354_v13 = vmul.f32 -1.442695, %v8804_v27  ;;  %v8827_v37 = vadd.f32 %v8761_v10, %v7865_v6  ;;  %v8839_v1 = vpop.f32.mrf.mxu1 }
 0x303   : > { %v4486_v35 = vadd.f32 %v4030_v14, %v4020_v32  ;;  %v4229_v58 = vmul.f32 %v6182_v30, %v8663_v52  ;;  %6207 = vpow2.f32 %v5344_v12  ;;  %v8831_v4 = vadd.f32 %v8431_v56, %v8619_v44  ;;  %v8835_v12 = vpop.f32.mrf.mxu0 }
 0x304   : > { %v6184_v7 = vpop.eup %6183  ;;  %6209 = vrcp.f32 %v3289_v49  ;;  %v4021_v32 = vmul.f32 %v6170_v17, %v8637_v40  ;;  %v5156_v10 = vmul.f32 -1.442695, %v8818_v38  ;;  %v8843_v40 = vadd.f32 %v8779_v28, %v7843_v20 }
 0x305   : > { %v6186_v34 = vpop.eup %6185  ;;  %v4469_v42 = vadd.f32 %v4468_v55, %v4229_v58  ;;  %v4031_v52 = vmul.f32 %v6184_v7, %v8669_v24  ;;  %6211 = vpow2.f32 %v5146_v2  ;;  %v5157_v30 = vmul.f32 -1.442695, %v8831_v4  ;;  %v8848_v49 = vpop.f32.mrf.mxu0 }
 0x306   : > { %v6188_v26 = vpop.eup %6187  ;;  %v4238_v9 = vmul.f32 %v6186_v34, %v8677_v61  ;;  %6213 = vpow2.f32 %v5345_v18  ;;  %v5355_v61 = vmul.f32 -1.442695, %v8827_v37  ;;  %v8853_v28 = vadd.f32 %v8451_v46, %v8606_v54 }
 0x307   : > { %v6190_v11 = vpop.eup %6189  ;;  %v4523_v56 = vadd.f32 %v4031_v52, %v4021_v32  ;;  %v3091_v14 = vadd.f32 1.0, %v6188_v26  ;;  %6215 = vpow2.f32 %v5147_v57  ;;  %v5364_v34 = vmul.f32 -1.442695, %v8843_v40 }
 0x308   : > { %v6192_v24 = vpop.eup %6191  ;;  %v4433_v17 = vadd.f32 %v4432_v21, %v4238_v9  ;;  %v4040_v55 = vmul.f32 %v6190_v11, %v8685_v45  ;;  %6217 = vpow2.f32 %v5354_v13  ;;  %v8855_v45 = vpop.f32.mrf.mxu1 }
 0x309   : > { %v6194_v18 = vpop.eup %6193  ;;  %6219 = vrcp.f32 %v3091_v14  ;;  %v3298_v2 = vadd.f32 1.0, %v6192_v24  ;;  %v8863_v9 = vpop.f32.mrf.mxu0  ;;  %v5166_v24 = vmul.f32 -1.442695, %v8853_v28 }
 0x30a   : > { %v6196_v58 = vpop.eup %6195  ;;  %v4487_v57 = vadd.f32 %v4486_v35, %v4040_v55  ;;  %v4239_v7 = vmul.f32 %v6194_v18, %v8694_v47  ;;  %6221 = vpow2.f32 %v5156_v10  ;;  %v8861_v47 = vadd.f32 %v8792_v31, %v7865_v6 }
 0x30b   : > { %v6198_v21 = vpop.eup %6197  ;;  %6223 = vrcp.f32 %v3298_v2  ;;  %v3100_v13 = vadd.f32 1.0, %v6196_v58 }
 0x30c   : > { %v6200_v32 = vpop.eup %6199  ;;  %v4470_v52 = vadd.f32 %v4469_v42, %v4239_v7  ;;  %v4041_v26 = vmul.f32 %v6198_v21, %v8703_v60  ;;  %6225 = vpow2.f32 %v5355_v61  ;;  %v8867_v42 = vpop.f32.mrf.mxu1  ;;  %v5365_v2 = vmul.f32 -1.442695, %v8861_v47 }
 0x30d   : > { %v6202_v35 = vpop.eup %6201  ;;  %6227 = vrcp.f32 %v3100_v13  ;;  %v3299_v46 = vadd.f32 1.0, %v6200_v32  ;;  %v8882_v32 = vadd.f32 %v8812_v16, %v7843_v20 }
 0x30e   : > { %v6204_v10 = vpop.eup %6203  ;;  %v4524_v11 = vadd.f32 %v4523_v56, %v4041_v26  ;;  %v4248_v14 = vmul.f32 %v6202_v35, %v8709_v48  ;;  %6229 = vpow2.f32 %v5157_v30  ;;  %v8873_v48 = vadd.f32 %v8467_v36, %v8619_v44  ;;  %v8875_v30 = vpop.f32.mrf.mxu0 }
 0x30f   : > { %v6206_v60 = vpop.eup %6205  ;;  %6231 = vrcp.f32 %v3299_v46  ;;  %v3101_v55 = vadd.f32 1.0, %v6204_v10  ;;  %v8886_v46 = vadd.f32 %v8530_v22, %v8606_v54  ;;  %v8897_v22 = vadd.f32 %v8835_v12, %v7865_v6 }
 0x310   : > { %v6208_v61 = vpop.eup %6207  ;;  %v4434_v31 = vadd.f32 %v4433_v17, %v4248_v14  ;;  %v4050_v18 = vmul.f32 %v6206_v60, %v8715_v25  ;;  %6233 = vpow2.f32 %v5364_v34  ;;  %v8878_v17 = vpop.f32.mrf.mxu1  ;;  %v5167_v10 = vmul.f32 -1.442695, %v8873_v48 }
 0x311   : > { %v6210_v58 = vpop.eup %6209  ;;  %6235 = vrcp.f32 %v3101_v55  ;;  %v3308_v56 = vadd.f32 1.0, %v6208_v61  ;;  %v8889_v14 = vpop.f32.mrf.mxu0  ;;  %v5374_v61 = vmul.f32 -1.442695, %v8882_v32 }
 0x312   : > { %v6212_v7 = vpop.eup %6211  ;;  %v4488_v21 = vadd.f32 %v4487_v57, %v4050_v18  ;;  %v4249_v13 = vmul.f32 %v6210_v58, %v8727_v43  ;;  %6237 = vpow2.f32 %v5166_v24  ;;  %v8891_v16 = vpop.f32.mrf.mxu1  ;;  %v5176_v58 = vmul.f32 -1.442695, %v8886_v46 }
 0x313   : > { %v6214_v25 = vpop.eup %6213  ;;  %6239 = vrcp.f32 %v3308_v56  ;;  %v3110_v34 = vadd.f32 1.0, %v6212_v7 }
 0x314   : > { %v6216_v26 = vpop.eup %6215  ;;  %v4471_v35 = vadd.f32 %v4470_v52, %v4249_v13  ;;  %v3309_v36 = vadd.f32 1.0, %v6214_v25  ;;  %6241 = vpow2.f32 %v5365_v2  ;;  %v8905_v25 = vpop.f32.mrf.mxu0 }
 0x315   : > { %v6218_v57 = vpop.eup %6217  ;;  %6243 = vrcp.f32 %v3110_v34  ;;  %v3111_v43 = vadd.f32 1.0, %v6216_v26  ;;  %v8909_v26 = vadd.f32 %v8848_v49, %v7843_v20 }
 0x316   : > { %v6220_v24 = vpop.eup %6219  ;;  %6245 = vrcp.f32 %v3309_v36  ;;  %v3318_v60 = vadd.f32 1.0, %v6218_v57  ;;  %v8911_v36 = vpop.f32.mrf.mxu1 }
 0x317   : > { %v6222_v55 = vpop.eup %6221  ;;  %v4051_v52 = vmul.f32 %v6220_v24, %v8737_v5  ;;  %6247 = vrcp.f32 %v3111_v43  ;;  %v8903_v5 = vadd.f32 %v8549_v23, %v8619_v44  ;;  %v5375_v43 = vmul.f32 -1.442695, %v8897_v22 }
 0x318   : > { %v6224_v18 = vpop.eup %6223  ;;  %6249 = vrcp.f32 %v3318_v60  ;;  %v3120_v2 = vadd.f32 1.0, %v6222_v55  ;;  %v8917_v24 = vadd.f32 %v8567_v3, %v8606_v54  ;;  %v8928_v3 = vpop.f32.mrf.mxu1 }
 0x319   : > { %v6226_v56 = vpop.eup %6225  ;;  %v4525_v7 = vadd.f32 %v4524_v11, %v4051_v52  ;;  %v4258_v13 = vmul.f32 %v6224_v18, %v8743_v51  ;;  %6251 = vpow2.f32 %v5167_v10  ;;  %v5177_v52 = vmul.f32 -1.442695, %v8903_v5 }
 0x31a   : > { %v6228_v34 = vpop.eup %6227  ;;  %6253 = vrcp.f32 %v3120_v2  ;;  %v3319_v12 = vadd.f32 1.0, %v6226_v56  ;;  %v5384_v18 = vmul.f32 -1.442695, %v8909_v26  ;;  %v8926_v2 = vadd.f32 %v8863_v9, %v7865_v6 }
 0x31b   : > { %v6230_v57 = vpop.eup %6229  ;;  %v4435_v11 = vadd.f32 %v4434_v31, %v4258_v13  ;;  %v4060_v51 = vmul.f32 %v6228_v34, %v8753_v41  ;;  %6255 = vpow2.f32 %v5374_v61  ;;  %v8921_v31 = vpop.f32.mrf.mxu0 }
 0x31c   : > { %v6232_v23 = vpop.eup %6231  ;;  %6257 = vrcp.f32 %v3319_v12  ;;  %v3121_v10 = vadd.f32 1.0, %v6230_v57  ;;  %v8937_v12 = vadd.f32 %v8875_v30, %v7843_v20  ;;  %v8948_v30 = vpop.f32.mrf.mxu1 }
 0x31d   : > { %v6234_v60 = vpop.eup %6233  ;;  %v4489_v55 = vadd.f32 %v4488_v21, %v4060_v51  ;;  %v4259_v49 = vmul.f32 %v6232_v23, %v8759_v59  ;;  %6259 = vpow2.f32 %v5176_v58  ;;  %v8933_v58 = vadd.f32 %v8583_v15, %v8619_v44 }
 0x31e   : > { %v6236_v41 = vpop.eup %6235  ;;  %6261 = vrcp.f32 %v3121_v10  ;;  %v3328_v61 = vadd.f32 1.0, %v6234_v60  ;;  %v5385_v23 = vmul.f32 -1.442695, %v8926_v2  ;;  %v11036_v10 = vld [vmem:[#allocation29_spill] sm:$0xff] }
 0x31f   : > { %v6238_v56 = vpop.eup %6237  ;;  %v4472_v21 = vadd.f32 %v4471_v35, %v4259_v49  ;;  %v4061_v59 = vmul.f32 %v6236_v41, %v8769_v39  ;;  %6263 = vpow2.f32 %v5375_v43  ;;  %v5186_v35 = vmul.f32 -1.442695, %v8917_v24  ;;  %v8941_v39 = vpop.f32.mrf.mxu0 }
 0x320   : > { %v6240_v13 = vpop.eup %6239  ;;  %6265 = vrcp.f32 %v3328_v61  ;;  %v3130_v34 = vadd.f32 1.0, %v6238_v56  ;;  %v8946_v60 = vadd.f32 %v11036_v10, %v8606_v54  ;;  %v5394_v56 = vmul.f32 -1.442695, %v8937_v12 }
 0x321   : > { %v6242_v9 = vpop.eup %6241  ;;  %v4526_v57 = vadd.f32 %v4525_v7, %v4061_v59  ;;  %v4268_v51 = vmul.f32 %v6240_v13, %v8773_v8  ;;  %6267 = vpow2.f32 %v5177_v52  ;;  %v5187_v52 = vmul.f32 -1.442695, %v8933_v58 }
 0x322   : > { %v6244_v43 = vpop.eup %6243  ;;  %6269 = vrcp.f32 %v3130_v34  ;;  %v3329_v15 = vadd.f32 1.0, %v6242_v9  ;;  %v8956_v59 = vadd.f32 %v8889_v14, %v7865_v6  ;;  %v8967_v14 = vpop.f32.mrf.mxu1 }
 0x323   : > { %v6246_v49 = vpop.eup %6245  ;;  %v4436_v7 = vadd.f32 %v4435_v11, %v4268_v51  ;;  %v4070_v8 = vmul.f32 %v6244_v43, %v8777_v53  ;;  %6271 = vpow2.f32 %v5384_v18  ;;  %v8961_v53 = vadd.f32 %v8621_v29, %v8619_v44  ;;  %v8963_v11 = vpop.f32.mrf.mxu0 }
 0x324   : > { %v6248_v41 = vpop.eup %6247  ;;  %v4269_v61 = vmul.f32 %v6246_v49, %v8783_v50  ;;  %6273 = vrcp.f32 %v3329_v15  ;;  %v5196_v43 = vmul.f32 -1.442695, %v8946_v60 }
 0x325   : > { %v6250_v13 = vpop.eup %6249  ;;  %v4490_v34 = vadd.f32 %v4489_v55, %v4070_v8  ;;  %v4071_v9 = vmul.f32 %v6248_v41, %v8800_v62  ;;  %6275 = vpow2.f32 %v5186_v35  ;;  %v8971_v62 = vadd.f32 %v8905_v25, %v7843_v20  ;;  %v8976_v41 = vpop.f32.mrf.mxu0  ;;  %v11037_v20 = vld [vmem:[#allocation31_spill] sm:$0xff] }
 0x326   : > { %v6252_v18 = vpop.eup %6251  ;;  %v4473_v50 = vadd.f32 %v4472_v21, %v4269_v61  ;;  %v4278_v51 = vmul.f32 %v6250_v13, %v8804_v27  ;;  %6277 = vpow2.f32 %v5385_v23  ;;  %v5395_v27 = vmul.f32 -1.442695, %v8956_v59 }
 0x327   : > { %v6254_v15 = vpop.eup %6253  ;;  %v4527_v55 = vadd.f32 %v4526_v57, %v4071_v9  ;;  %v3131_v10 = vadd.f32 1.0, %v6252_v18  ;;  %6279 = vpow2.f32 %v5187_v52  ;;  %v5197_v8 = vmul.f32 -1.442695, %v8961_v53 }
 0x328   : > { %v6256_v29 = vpop.eup %6255  ;;  %v4437_v35 = vadd.f32 %v4436_v7, %v4278_v51  ;;  %v4080_v49 = vmul.f32 %v6254_v15, %v8818_v38  ;;  %6281 = vpow2.f32 %v5394_v56  ;;  %v8981_v25 = vadd.f32 %v11037_v20, %v8606_v54  ;;  %v8983_v38 = vpop.f32.mrf.mxu1  ;;  %v11038_v51 = vld [vmem:[#allocation23_spill] sm:$0xff] }
 0x329   : > { %v6258_v21 = vpop.eup %6257  ;;  %6283 = vrcp.f32 %v3131_v10  ;;  %v3338_v23 = vadd.f32 1.0, %v6256_v29  ;;  %v5404_v13 = vmul.f32 -1.442695, %v8971_v62  ;;  %v8988_v9 = vadd.f32 %v8921_v31, %v7865_v6  ;;  %v8992_v29 = vpop.f32.mrf.mxu0 }
 0x32a   : > { %v6260_v57 = vpop.eup %6259  ;;  %v4491_v52 = vadd.f32 %v4490_v34, %v4080_v49  ;;  %v4279_v61 = vmul.f32 %v6258_v21, %v8827_v37  ;;  %6285 = vpow2.f32 %v5196_v43  ;;  %v958_v43 = vsub.s32 6, %v11038_v51  ;;  %v8996_v31 = vpop.f32.mrf.mxu1 }
 0x32b   : > { %v6262_v7 = vpop.eup %6261  ;;  %6287 = vrcp.f32 %v3338_v23  ;;  %v3140_v56 = vadd.f32 1.0, %v6260_v57  ;;  %v5206_v6 = vmul.f32 -1.442695, %v8981_v25 }
 0x32c   : > { %v6264_v18 = vpop.eup %6263  ;;  %v4474_v34 = vadd.f32 %v4473_v50, %v4279_v61  ;;  %v4081_v37 = vmul.f32 %v6262_v7, %v8831_v4  ;;  %6289 = vpow2.f32 %v5395_v27  ;;  %v5405_v27 = vmul.f32 -1.442695, %v8988_v9  ;;  %v11039_v7 = vld [vmem:[#allocation16_spill] sm:$0xff] }
 0x32d   : > { %v6266_v15 = vpop.eup %6265  ;;  %6291 = vrcp.f32 %v3140_v56  ;;  %v3339_v10 = vadd.f32 1.0, %v6264_v18  ;;  %v9001_v56 = vrot.slane %v11039_v7, %v958_v43 }
 0x32e   : > { %v6268_v49 = vpop.eup %6267  ;;  %v4528_v21 = vadd.f32 %v4527_v55, %v4081_v37  ;;  %v4288_v23 = vmul.f32 %v6266_v15, %v8843_v40  ;;  %6293 = vpow2.f32 %v5197_v8  ;;  %v11040_v8 = vld [vmem:[#allocation33_spill] sm:$0xff]  ;;  %v962_v37 = vsub.s32 7, %v11038_v51  ;;  %v9008_v15 = vpop.f32.mrf.mxu0 }
 0x32f   : > { %v6270_v50 = vpop.eup %6269  ;;  %6295 = vrcp.f32 %v3339_v10  ;;  %v3141_v4 = vadd.f32 1.0, %v6268_v49  ;;  %v9005_v18 = vadd.f32 %v11040_v8, %v8619_v44  ;;  %v9019_v8 = vadd.f32 %v8941_v39, %v9001_v56 }
 0x330   : > { %v6272_v57 = vpop.eup %6271  ;;  %v4438_v61 = vadd.f32 %v4437_v35, %v4288_v23  ;;  %v4090_v20 = vmul.f32 %v6270_v50, %v8853_v28  ;;  %6297 = vpow2.f32 %v5404_v13  ;;  %v9011_v28 = vpop.f32.mrf.mxu1  ;;  %v11041_v23 = vld [vmem:[#allocation17_spill] sm:$0xff] }
 0x331   : > { %v6274_v55 = vpop.eup %6273  ;;  %6299 = vrcp.f32 %v3141_v4  ;;  %v3348_v40 = vadd.f32 1.0, %v6272_v57  ;;  %v9015_v50 = vadd.f32 %v11041_v23, %v8606_v54  ;;  %11042 = vst [vmem:[#allocation25_spill] sm:$0xff] %v9019_v8 }
 0x332   : > { %v6276_v10 = vpop.eup %6275  ;;  %v4492_v49 = vadd.f32 %v4491_v52, %v4090_v20  ;;  %v4289_v35 = vmul.f32 %v6274_v55, %v8861_v47  ;;  %6301 = vpow2.f32 %v5206_v6  ;;  %v5207_v6 = vmul.f32 -1.442695, %v9005_v18  ;;  %v7004_v20 = vld [vmem:[#allocation8] sm:$0xff] }
 0x333   : > { %v6278_v13 = vpop.eup %6277  ;;  %6303 = vrcp.f32 %v3348_v40  ;;  %v3150_v43 = vadd.f32 1.0, %v6276_v10  ;;  %v9022_v55 = vrot.slane %v7004_v20, %v962_v37  ;;  %v9024_v40 = vpop.f32.mrf.mxu0  ;;  %v5098_v20 = vmul.f32 -1.442695, %v9019_v8 }
 0x334   : > { %v6280_v4 = vpop.eup %6279  ;;  %v4475_v57 = vadd.f32 %v4474_v34, %v4289_v35  ;;  %v3349_v7 = vadd.f32 1.0, %v6278_v13  ;;  %6305 = vpow2.f32 %v5405_v27  ;;  %v11043_v34 = vld [vmem:[#allocation35_spill] sm:$0xff]  ;;  %v9030_v35 = vpop.f32.mrf.mxu1 }
 0x335   : > { %v6282_v52 = vpop.eup %6281  ;;  %6307 = vrcp.f32 %v3150_v43  ;;  %v3151_v47 = vadd.f32 1.0, %v6280_v4  ;;  %v9028_v27 = vadd.f32 %v11043_v34, %v8619_v44  ;;  %11044 = vst [vmem:[#allocation26_spill] sm:$0xff] %v9030_v35  ;;  %v5216_v43 = vmul.f32 -1.442695, %v9015_v50  ;;  %v9040_v35 = vpop.f32.mrf.mxu0 }
 0x336   : > { %v6284_v10 = vpop.eup %6283  ;;  %6309 = vrcp.f32 %v3349_v7  ;;  %v3358_v23 = vadd.f32 1.0, %v6282_v52  ;;  %v9038_v34 = vadd.f32 %v8963_v11, %v9022_v55 }
 0x337   : > { %v6286_v39 = vpop.eup %6285  ;;  %v4091_v13 = vmul.f32 %v6284_v10, %v8873_v48  ;;  %6311 = vrcp.f32 %v3151_v47  ;;  %v5217_v10 = vmul.f32 -1.442695, %v9028_v27 }
 0x338   : > { %v6288_v4 = vpop.eup %6287  ;;  %6313 = vrcp.f32 %v3358_v23  ;;  %v3160_v37 = vadd.f32 1.0, %v6286_v39  ;;  %11045 = vst [vmem:[#allocation14_spill] sm:$0xff] %v9038_v34  ;;  %v9043_v23 = vpop.f32.mrf.mxu1 }
 0x339   : > { %v6290_v0 = vpop.eup %6289  ;;  %v4529_v7 = vadd.f32 %v4528_v21, %v4091_v13  ;;  %v4298_v52 = vmul.f32 %v6288_v4, %v8882_v32  ;;  %6315 = vpow2.f32 %v5207_v6  ;;  %11046 = vst [vmem:[#allocation24_spill] sm:$0xff] %v9043_v23  ;;  %v11047_v32 = vld [vmem:[#allocation36_spill] sm:$0xff]  ;;  %v9052_v4 = vadd.f32 %v8976_v41, %v9001_v56 }
 0x33a   : > { %v6292_v48 = vpop.eup %6291  ;;  %6317 = vrcp.f32 %v3160_v37  ;;  %v3359_v47 = vadd.f32 1.0, %v6290_v0  ;;  %v9048_v6 = vadd.f32 %v11047_v32, %v8606_v54 }
 0x33b   : > { %v6294_v39 = vpop.eup %6293  ;;  %v4439_v8 = vadd.f32 %v4438_v61, %v4298_v52  ;;  %v4100_v21 = vmul.f32 %v6292_v48, %v8886_v46  ;;  %6319 = vpow2.f32 %v5216_v43  ;;  %11048 = vst [vmem:[#allocation27_spill] sm:$0xff] %v9052_v4  ;;  %v5099_v61 = vmul.f32 -1.442695, %v9038_v34  ;;  %v9056_v46 = vpop.f32.mrf.mxu0  ;;  %v11049_v48 = vld [vmem:[#allocation18_spill] sm:$0xff] }
 0x33c   : > { %v6296_v11 = vpop.eup %6295  ;;  %6321 = vrcp.f32 %v3359_v47  ;;  %v3161_v13 = vadd.f32 1.0, %v6294_v39  ;;  %v9060_v47 = vadd.f32 %v11049_v48, %v8619_v44  ;;  %v9062_v39 = vpop.f32.mrf.mxu1 }
 0x33d   : > { %v6298_v0 = vpop.eup %6297  ;;  %v4493_v37 = vadd.f32 %v4492_v49, %v4100_v21  ;;  %v4299_v23 = vmul.f32 %v6296_v11, %v8897_v22  ;;  %6323 = vpow2.f32 %v5098_v20  ;;  %11050 = vst [vmem:[#allocation15_spill] sm:$0xff] %v9062_v39  ;;  %v5226_v22 = vmul.f32 -1.442695, %v9048_v6  ;;  %v11051_v11 = vld [vmem:[#allocation19_spill] sm:$0xff] }
 0x33e   : > { %v6300_v43 = vpop.eup %6299  ;;  %6325 = vrcp.f32 %v3161_v13  ;;  %v3368_v52 = vadd.f32 1.0, %v6298_v0  ;;  %v9068_v13 = vadd.f32 %v11051_v11, %v8606_v54  ;;  %v5108_v39 = vmul.f32 -1.442695, %v9052_v4 }
 0x33f   : > { %v6302_v41 = vpop.eup %6301  ;;  %v4476_v32 = vadd.f32 %v4475_v57, %v4299_v23  ;;  %v4101_v49 = vmul.f32 %v6300_v43, %v8903_v5  ;;  %6327 = vpow2.f32 %v5217_v10  ;;  %v9072_v57 = vpop.f32.mrf.mxu0  ;;  %v5227_v23 = vmul.f32 -1.442695, %v9060_v47 }
 0x340   : > { %v6304_v20 = vpop.eup %6303  ;;  %6329 = vrcp.f32 %v3368_v52  ;;  %v3170_v21 = vadd.f32 1.0, %v6302_v41  ;;  %v9075_v43 = vpop.f32.mrf.mxu1 }
 0x341   : > { %v6306_v0 = vpop.eup %6305  ;;  %v4530_v34 = vadd.f32 %v4529_v7, %v4101_v49  ;;  %v4308_v48 = vmul.f32 %v6304_v20, %v8909_v26  ;;  %6331 = vpow2.f32 %v5099_v61  ;;  %v11052_v7 = vld [vmem:[#allocation20_spill] sm:$0xff]  ;;  %v5236_v20 = vmul.f32 -1.442695, %v9068_v13 }
 0x342   : > { %v6308_v5 = vpop.eup %6307  ;;  %6333 = vrcp.f32 %v3170_v21  ;;  %v3369_v10 = vadd.f32 1.0, %v6306_v0  ;;  %v9080_v26 = vadd.f32 %v11052_v7, %v8619_v44 }
 0x343   : > { %v6310_v52 = vpop.eup %6309  ;;  %v4440_v41 = vadd.f32 %v4439_v8, %v4308_v48  ;;  %v4110_v11 = vmul.f32 %v6308_v5, %v8917_v24  ;;  %6335 = vpow2.f32 %v5226_v22  ;;  %v9087_v8 = vadd.f32 %v8992_v29, %v9022_v55  ;;  %v9089_v24 = vpop.f32.mrf.mxu0  ;;  %v11055_v29 = vld [vmem:[#allocation21_spill] sm:$0xff] }
 0x344   : > { %v6312_v61 = vpop.eup %6311  ;;  %v4309_v49 = vmul.f32 %v6310_v52, %v8926_v2  ;;  %6337 = vrcp.f32 %v3369_v10  ;;  %v9092_v2 = vpop.f32.mrf.mxu1 }
 0x345   : > { %v6314_v21 = vpop.eup %6313  ;;  %v4494_v0 = vadd.f32 %v4493_v37, %v4110_v11  ;;  %v4111_v4 = vmul.f32 %v6312_v61, %v8933_v58  ;;  %6339 = vpow2.f32 %v5108_v39  ;;  %11053 = vst [vmem:[#allocation30_spill] sm:$0xff] %v9087_v8  ;;  %11054 = vst [vmem:[#allocation32_spill] sm:$0xff] %v9092_v2  ;;  %v5237_v37 = vmul.f32 -1.442695, %v9080_v26 }
 0x346   : > { %v6316_v22 = vpop.eup %6315  ;;  %v4477_v48 = vadd.f32 %v4476_v32, %v4309_v49  ;;  %v4318_v5 = vmul.f32 %v6314_v21, %v8937_v12  ;;  %6341 = vpow2.f32 %v5227_v23  ;;  %v9098_v61 = vadd.f32 %v11055_v29, %v8606_v54  ;;  %v9112_v21 = vpop.f32.mrf.mxu1 }
 0x347   : > { %v6318_v10 = vpop.eup %6317  ;;  %v4531_v52 = vadd.f32 %v4530_v34, %v4111_v4  ;;  %v3171_v7 = vadd.f32 1.0, %v6316_v22  ;;  %6343 = vpow2.f32 %v5236_v20  ;;  %v5109_v23 = vmul.f32 -1.442695, %v9087_v8  ;;  %v9105_v4 = vpop.f32.mrf.mxu0  ;;  %11058 = vst [vmem:[#allocation29_spill] sm:$0xff] %v9112_v21 }
 0x348   : > { %v6320_v58 = vpop.eup %6319  ;;  %v4441_v39 = vadd.f32 %v4440_v41, %v4318_v5  ;;  %v4120_v11 = vmul.f32 %v6318_v10, %v8946_v60  ;;  %v9103_v34 = vadd.f32 %v9008_v15, %v9001_v56  ;;  %v9110_v20 = vadd.f32 %v9024_v40, %v9022_v55  ;;  %v11059_v15 = vld [vmem:[#allocation22_spill] sm:$0xff] }
 0x349   : > { %v6322_v32 = vpop.eup %6321  ;;  %6345 = vrcp.f32 %v3171_v7  ;;  %v3180_v12 = vadd.f32 1.0, %v6320_v58  ;;  %v7155_v5 = vmov 1966171168   ;;  %v9118_v7 = vadd.f32 %v11059_v15, %v8619_v44 }
 0x34a   : > { %11056 = vst [vmem:[#allocation28_spill] sm:$0xff] %v9103_v34  ;;  %v6324_v49 = vpop.eup %6323  ;;  %v4495_v41 = vadd.f32 %v4494_v0, %v4120_v11  ;;  %v4319_v60 = vmul.f32 %v6322_v32, %v8956_v59  ;;  %11057 = vst [vmem:[#allocation34_spill] sm:$0xff] %v9110_v20  ;;  %v9114_v10 = vunpack.c.l.s4 %v7155_v5  ;;  %v5246_v59 = vmul.f32 -1.442695, %v9098_v61 }
 0x34b   : > { %v6326_v22 = vpop.eup %6325  ;;  %6347 = vrcp.f32 %v3180_v12  ;;  %v5118_v32 = vmul.f32 -1.442695, %v9103_v34  ;;  %v9125_v5 = vadd.f32 %v9040_v35, %v9001_v56  ;;  %v9127_v12 = vpop.f32.mrf.mxu0  ;;  %v5247_v35 = vmul.f32 -1.442695, %v9118_v7 }
 0x34c   : > { %v6328_v58 = vpop.eup %6327  ;;  %v4478_v29 = vadd.f32 %v4477_v48, %v4319_v60  ;;  %v4121_v0 = vmul.f32 %v6326_v22, %v8961_v53  ;;  %6349 = vpow2.f32 %v5237_v37  ;;  %v5119_v53 = vmul.f32 -1.442695, %v9110_v20  ;;  %v9131_v37 = vpop.f32.mrf.mxu1 }
 0x34d   : > { %v6330_v40 = vpop.eup %6329  ;;  %v3181_v11 = vadd.f32 1.0, %v6328_v58  ;;  %6351 = vpow2.f32 %v5109_v23  ;;  %11060 = vst [vmem:[#allocation31_spill] sm:$0xff] %v9125_v5  ;;  %11061 = vst [vmem:[#allocation23_spill] sm:$0xff] %v9131_v37 }
 0x34e   : > { %v6332_v15 = vpop.eup %6331  ;;  %v4532_v8 = vadd.f32 %v4531_v52, %v4121_v0  ;;  %v4328_v48 = vmul.f32 %v6330_v40, %v8971_v62  ;;  %v5128_v62 = vmul.f32 -1.442695, %v9125_v5  ;;  %v11062_v52 = vld [vmem:[#allocation13_spill] sm:$0xff]  ;;  %v9141_v40 = vpop.f32.mrf.mxu0 }
 0x34f   : > { %v6334_v60 = vpop.eup %6333  ;;  %6353 = vrcp.f32 %v3181_v11  ;;  %v9139_v0 = vadd.f32 %v11062_v52, %v8606_v54 }
 0x350   : > { %v6336_v23 = vpop.eup %6335  ;;  %v4442_v58 = vadd.f32 %v4441_v39, %v4328_v48  ;;  %v4130_v34 = vmul.f32 %v6334_v60, %v8981_v25  ;;  %6355 = vpow2.f32 %v5246_v59  ;;  %v9144_v25 = vpop.f32.mrf.mxu1  ;;  %v3062_v48 = vadd.f32 1.0, %v6324_v49 }
 0x351   : > { %v6338_v21 = vpop.eup %6337  ;;  %v3190_v2 = vadd.f32 1.0, %v6336_v23  ;;  %6357 = vpow2.f32 %v5118_v32  ;;  %11063 = vst [vmem:[#allocation16_spill] sm:$0xff] %v9144_v25  ;;  %v9148_v32 = vadd.f32 %v9056_v46, %v9022_v55  ;;  %v9152_v60 = vadd.f32 %v9072_v57, %v9001_v56  ;;  %v9155_v49 = vpop.f32.mrf.mxu0 }
 0x352   : > { %v6340_v22 = vpop.eup %6339  ;;  %v4443_v11 = vrot.slane %v4442_v58, 4  ;;  %v4496_v20 = vadd.f32 %v4495_v41, %v4130_v34  ;;  %v4329_v39 = vmul.f32 %v6338_v21, %v8988_v9  ;;  %6359 = vpow2.f32 %v5119_v53  ;;  %v9157_v37 = vpop.f32.mrf.mxu1 }
 0x353   : > { %v6342_v59 = vpop.eup %6341  ;;  %6361 = vrcp.f32 %v3190_v2  ;;  %11064 = vst [vmem:[#allocation33_spill] sm:$0xff] %v9148_v32  ;;  %11065 = vst [vmem:[#allocation17_spill] sm:$0xff] %v9152_v60  ;;  %v3063_v9 = vadd.f32 1.0, %v6332_v15  ;;  %v3072_v41 = vadd.f32 1.0, %v6340_v22  ;;  %v5256_v21 = vmul.f32 -1.442695, %v9139_v0 }
 0x354   : > { %v4444_v23 = vadd.f32 %v4443_v11, %v4442_v58  ;;  %v4479_v52 = vadd.f32 %v4478_v29, %v4329_v39  ;;  %v3191_v5 = vadd.f32 1.0, %v6342_v59  ;;  %6363 = vpow2.f32 %v5247_v35  ;;  %v6344_v34 = vpop.eup %6343  ;;  %v9171_v59 = vpop.f32.mrf.mxu0 }
 0x355   : > { %6365 = vpow2.f32 %v5128_v62  ;;  %v3200_v25 = vadd.f32 1.0, %v6344_v34  ;;  %v9162_v29 = vadd.f32 %v8820_v33, %v8619_v44  ;;  %v9166_v15 = vadd.f32 %v9089_v24, %v9022_v55 }
 0x356   : > { %v6346_v2 = vpop.eup %6345  ;;  %v4445_v53 = vrot.slane %v4444_v23, 2  ;;  %v4480_v46 = vrot.slane %v4479_v52, 4  ;;  %6367 = vrcp.f32 %v3191_v5  ;;  %v5129_v5 = vmul.f32 -1.442695, %v9148_v32 }
 0x357   : > { %v4131_v57 = vmul.f32 %v6346_v2, %v9005_v18  ;;  %6369 = vrcp.f32 %v3062_v48  ;;  %11066 = vst [vmem:[#allocation35_spill] sm:$0xff] %v9166_v15  ;;  %v5138_v18 = vmul.f32 -1.442695, %v9152_v60 }
 0x358   : > { %v6348_v22 = vpop.eup %6347  ;;  %v4446_v58 = vadd.f32 %v4445_v53, %v4444_v23  ;;  %v4481_v35 = vadd.f32 %v4480_v46, %v4479_v52  ;;  %6371 = vrcp.f32 %v3200_v25  ;;  %v9175_v23 = vadd.f32 %v8839_v1, %v8606_v54  ;;  %v9177_v25 = vpop.f32.mrf.mxu1 }
 0x359   : > { %v6350_v62 = vpop.eup %6349  ;;  %v4533_v11 = vadd.f32 %v4532_v8, %v4131_v57  ;;  %v4140_v39 = vmul.f32 %v6348_v22, %v9015_v50  ;;  %6373 = vrcp.f32 %v3063_v9  ;;  %v5257_v8 = vmul.f32 -1.442695, %v9162_v29 }
 0x35a   : > { %v6352_v33 = vpop.eup %6351  ;;  %v4482_v48 = vrot.slane %v4481_v35, 2  ;;  %6375 = vrcp.f32 %v3072_v41  ;;  %v3201_v24 = vadd.f32 1.0, %v6350_v62  ;;  %v5139_v50 = vmul.f32 -1.442695, %v9166_v15 }
 0x35b   : > { %v4497_v52 = vadd.f32 %v4496_v20, %v4140_v39  ;;  %6377 = vpow2.f32 %v5256_v21  ;;  %v4447_v9 = vrot.slane %v4446_v58, 1  ;;  %v9183_v41 = vadd.f32 %v9105_v4, %v9001_v56  ;;  %v9190_v21 = vpop.f32.mrf.mxu0  ;;  %v9196_v4 = vpop.f32.mrf.mxu1 }
 0x35c   : > { %v6354_v34 = vpop.eup %6353  ;;  %v4483_v2 = vadd.f32 %v4482_v48, %v4481_v35  ;;  %6379 = vrcp.f32 %v3201_v24  ;;  %v3073_v46 = vadd.f32 1.0, %v6352_v33  ;;  %v9188_v20 = vadd.f32 %v8855_v45, %v8619_v44 }
 0x35d   : > { %11067 = vst [vmem:[#allocation36_spill] sm:$0xff] %v9183_v41  ;;  %v6356_v53 = vpop.eup %6355  ;;  %v4141_v1 = vmul.f32 %v6354_v34, %v9028_v27  ;;  %6381 = vpow2.f32 %v5129_v5  ;;  %v9194_v35 = vadd.f32 %v8867_v42, %v8606_v54  ;;  %v11068_v27 = vunpack.c.0.s8 %v9114_v10 }
 0x35e   : > { %v6358_v57 = vpop.eup %6357  ;;  %v4484_v22 = vrot.slane %v4483_v2, 1  ;;  %v3210_v62 = vadd.f32 1.0, %v6356_v53  ;;  %6383 = vpow2.f32 %v5138_v18  ;;  %v5266_v33 = vmul.f32 -1.442695, %v9175_v23 }
 0x35f   : > { %v6360_v39 = vpop.eup %6359  ;;  %v9201_v5 = vsub.s32 %v11068_v27, %v11038_v51  ;;  %v4534_v45 = vadd.f32 %v4533_v11, %v4141_v1  ;;  %6385 = vpow2.f32 %v5257_v8  ;;  %v4448_v24 = vadd.f32 %v4447_v9, %v4446_v58  ;;  %v9211_v11 = vpop.f32.mrf.mxu0 }
 0x360   : > { %v6362_v48 = vpop.eup %6361  ;;  %v4485_v34 = vadd.f32 %v4484_v22, %v4483_v2  ;;  %6387 = vrcp.f32 %v3210_v62  ;;  %v9206_v42 = vadd.f32 %v9127_v12, %v9022_v55  ;;  %v5148_v10 = vmul.f32 -1.442695, %v9183_v41  ;;  %v9214_v9 = vpop.f32.mrf.mxu1 }
 0x361   : > { %11069 = vst [vmem:[#allocation18_spill] sm:$0xff] %v9201_v5  ;;  %v6364_v18 = vpop.eup %6363  ;;  %v4150_v53 = vmul.f32 %v6362_v48, %v9048_v6  ;;  %6389 = vrcp.f32 %v3073_v46  ;;  %v5267_v27 = vmul.f32 -1.442695, %v9188_v20  ;;  %v5276_v58 = vmul.f32 -1.442695, %v9194_v35 }
 0x362   : > { %11070 = vst [vmem:[#allocation19_spill] sm:$0xff] %v9206_v42  ;;  %v6366_v8 = vpop.eup %6365  ;;  %v4719_v1 = vcombine.low %v4448_v24, %v4485_v34  ;;  %v3211_v15 = vadd.f32 1.0, %v6364_v18  ;;  %6391 = vpow2.f32 %v5139_v50  ;;  %v3082_v22 = vadd.f32 1.0, %v6358_v57  ;;  %v9236_v34 = vpop.f32.mrf.mxu0 }
 0x363   : > { %v6368_v12 = vpop.eup %6367  ;;  %v4498_v2 = vadd.f32 %v4497_v52, %v4150_v53  ;;  %6393 = vpow2.f32 %v5266_v33  ;;  %v9218_v6 = vadd.f32 %v8878_v17, %v8619_v44  ;;  %v11071_v62 = vcombine.low %v8806_v19, %v8808_v63 }
 0x364   : > { %v9220_v46 = vpop.eup %6369  ;;  %v9229_v50 = vrot.slane %v4719_v1, %v9201_v5  ;;  %v4151_v24 = vmul.f32 %v6368_v12, %v9060_v47  ;;  %6395 = vrcp.f32 %v3211_v15  ;;  %v3083_v57 = vadd.f32 1.0, %v6360_v39  ;;  %v9243_v47 = vpop.f32.mrf.mxu1 }
 0x365   : > { %v9226_v48 = vrot.slane %v11071_v62, %v9201_v5  ;;  %v6372_v52 = vpop.eup %6371  ;;  %v3092_v33 = vadd.f32 1.0, %v6366_v8  ;;  %6397 = vpow2.f32 %v5148_v10  ;;  %v9234_v17 = vadd.f32 %v9141_v40, %v9001_v56 }
 0x366   : > { %11073 = vst [vmem:[#allocation21_spill] sm:$0xff] %v9229_v50  ;;  %v9238_v18 = vpop.eup %6373  ;;  %v4535_v63 = vadd.f32 %v4534_v45, %v4151_v24  ;;  %v4160_v53 = vmul.f32 %v6372_v52, %v9068_v13  ;;  %6399 = vpow2.f32 %v5267_v27  ;;  %v5277_v40 = vmul.f32 -1.442695, %v9218_v6  ;;  %v9253_v27 = vpop.f32.mrf.mxu0 }
 0x367   : > { %11072 = vst [vmem:[#allocation20_spill] sm:$0xff] %v9226_v48  ;;  %11074 = vst [vmem:[#allocation22_spill] sm:$0xff] %v9234_v17  ;;  %v9245_v15 = vpop.eup %6375  ;;  %6401 = vrcp.f32 %v3082_v22  ;;  %v9250_v8 = vadd.f32 %v8891_v16, %v8606_v54  ;;  %v5149_v13 = vmul.f32 -1.442695, %v9206_v42  ;;  %v9279_v48 = vadd.f32 %v9171_v59, %v9001_v56 }
 0x368   : > { %v6378_v39 = vpop.eup %6377  ;;  %v4499_v10 = vadd.f32 %v4498_v2, %v4160_v53  ;;  %6403 = vpow2.f32 %v5276_v58  ;;  %v5158_v2 = vmul.f32 -1.442695, %v9234_v17  ;;  %v9257_v58 = vpop.f32.mrf.mxu1 }
 0x369   : > { %v6380_v1 = vpop.eup %6379  ;;  %6405 = vrcp.f32 %v3083_v57  ;;  %v3220_v45 = vadd.f32 1.0, %v6378_v39  ;;  %v5286_v52 = vmul.f32 -1.442695, %v9250_v8  ;;  %v9262_v57 = vadd.f32 %v8911_v36, %v8619_v44  ;;  %11077 = vst [vmem:[#allocation38_spill] sm:$0xff] %v9279_v48 }
 0x36a   : > { %v6382_v12 = vpop.eup %6381  ;;  %v4161_v62 = vmul.f32 %v6380_v1, %v9080_v26  ;;  %6407 = vrcp.f32 %v3092_v33  ;;  %v9266_v26 = vadd.f32 %v9155_v49, %v9022_v55  ;;  %v9268_v33 = vpop.f32.mrf.mxu0  ;;  %v5168_v5 = vmul.f32 -1.442695, %v9279_v48 }
 0x36b   : > { %v6384_v22 = vpop.eup %6383  ;;  %6409 = vrcp.f32 %v3220_v45  ;;  %v3093_v39 = vadd.f32 1.0, %v6382_v12  ;;  %v9273_v45 = vpop.f32.mrf.mxu1 }
 0x36c   : > { %v6386_v24 = vpop.eup %6385  ;;  %v4536_v16 = vadd.f32 %v4535_v63, %v4161_v62  ;;  %6411 = vpow2.f32 %v5277_v40  ;;  %11075 = vst [vmem:[#allocation13_spill] sm:$0xff] %v9266_v26  ;;  %v3102_v40 = vadd.f32 1.0, %v6384_v22  ;;  %v5159_v50 = vmul.f32 -1.442695, %v9266_v26 }
 0x36d   : > { %v6388_v53 = vpop.eup %6387  ;;  %v3221_v19 = vadd.f32 1.0, %v6386_v24  ;;  %6413 = vpow2.f32 %v5149_v13  ;;  %v5287_v13 = vmul.f32 -1.442695, %v9262_v57 }
 0x36e   : > { %v9270_v1 = vpop.eup %6389  ;;  %v4170_v63 = vmul.f32 %v6388_v53, %v9098_v61  ;;  %6415 = vpow2.f32 %v5158_v2  ;;  %v9281_v61 = vpop.f32.mrf.mxu0  ;;  %v9288_v53 = vadd.f32 %v8928_v3, %v8606_v54 }
 0x36f   : > { %11076 = vst [vmem:[#allocation37_spill] sm:$0xff] %v9270_v1  ;;  %v6392_v36 = vpop.eup %6391  ;;  %6417 = vrcp.f32 %v3221_v19  ;;  %v9284_v19 = vpop.f32.mrf.mxu1 }
 0x370   : > { %v6394_v62 = vpop.eup %6393  ;;  %v4500_v12 = vadd.f32 %v4499_v10, %v4170_v63  ;;  %6419 = vpow2.f32 %v5286_v52  ;;  %v3103_v52 = vadd.f32 1.0, %v6392_v36 }
 0x371   : > { %v6396_v24 = vpop.eup %6395  ;;  %6421 = vrcp.f32 %v3093_v39  ;;  %v3230_v49 = vadd.f32 1.0, %v6394_v62 }
 0x372   : > { %v6398_v2 = vpop.eup %6397  ;;  %v4171_v22 = vmul.f32 %v6396_v24, %v9118_v7  ;;  %6423 = vrcp.f32 %v3102_v40  ;;  %v9295_v7 = vadd.f32 %v9190_v21, %v9022_v55  ;;  %v9297_v40 = vpop.f32.mrf.mxu0  ;;  %v9312_v21 = vadd.f32 %v8948_v30, %v8619_v44 }
 0x373   : > { %v6400_v10 = vpop.eup %6399  ;;  %6425 = vrcp.f32 %v3230_v49  ;;  %v3112_v24 = vadd.f32 1.0, %v6398_v2  ;;  %v5296_v49 = vmul.f32 -1.442695, %v9288_v53 }
 0x374   : > { %v9290_v39 = vpop.eup %6401  ;;  %v4537_v63 = vadd.f32 %v4536_v16, %v4171_v22  ;;  %v3231_v59 = vadd.f32 1.0, %v6400_v10  ;;  %6427 = vpow2.f32 %v5287_v13  ;;  %11079 = vst [vmem:[#allocation40_spill] sm:$0xff] %v9295_v7  ;;  %v9303_v16 = vadd.f32 %v9211_v11, %v9001_v56  ;;  %v9305_v13 = vpop.f32.mrf.mxu1 }
 0x375   : > { %11078 = vst [vmem:[#allocation39_spill] sm:$0xff] %v9290_v39  ;;  %v6404_v62 = vpop.eup %6403  ;;  %6429 = vpow2.f32 %v5159_v50  ;;  %v5169_v11 = vmul.f32 -1.442695, %v9295_v7 }
 0x376   : > { %v9299_v36 = vpop.eup %6405  ;;  %6431 = vrcp.f32 %v3231_v59  ;;  %v3240_v3 = vadd.f32 1.0, %v6404_v62  ;;  %11081 = vst [vmem:[#allocation42_spill] sm:$0xff] %v9303_v16  ;;  %v9316_v59 = vpop.f32.mrf.mxu0 }
 0x377   : > { %11080 = vst [vmem:[#allocation41_spill] sm:$0xff] %v9299_v36  ;;  %v9307_v50 = vpop.eup %6407  ;;  %6433 = vrcp.f32 %v3103_v52  ;;  %v5178_v52 = vmul.f32 -1.442695, %v9303_v16  ;;  %v9319_v26 = vpop.f32.mrf.mxu1 }
 0x378   : > { %11082 = vst [vmem:[#allocation43_spill] sm:$0xff] %v9307_v50  ;;  %v6410_v22 = vpop.eup %6409  ;;  %6435 = vrcp.f32 %v3240_v3  ;;  %v5297_v3 = vmul.f32 -1.442695, %v9312_v21  ;;  %v9331_v16 = vpop.f32.mrf.mxu0 }
 0x379   : > { %v6412_v2 = vpop.eup %6411  ;;  %v4180_v10 = vmul.f32 %v6410_v22, %v9139_v0  ;;  %6437 = vpow2.f32 %v5168_v5  ;;  %v9324_v0 = vadd.f32 %v8967_v14, %v8606_v54  ;;  %v9337_v14 = vadd.f32 %v8983_v38, %v8619_v44 }
 0x37a   : > { %v6414_v62 = vpop.eup %6413  ;;  %6439 = vrcp.f32 %v3112_v24  ;;  %v3241_v48 = vadd.f32 1.0, %v6412_v2  ;;  %v9329_v2 = vadd.f32 %v9236_v34, %v9022_v55 }
 0x37b   : > { %v6416_v17 = vpop.eup %6415  ;;  %v4501_v30 = vadd.f32 %v4500_v12, %v4180_v10  ;;  %6441 = vpow2.f32 %v5296_v49  ;;  %v3113_v24 = vadd.f32 1.0, %v6414_v62  ;;  %v5306_v34 = vmul.f32 -1.442695, %v9324_v0 }
 0x37c   : > { %v6418_v5 = vpop.eup %6417  ;;  %6443 = vrcp.f32 %v3241_v48  ;;  %11083 = vst [vmem:[#allocation44_spill] sm:$0xff] %v9329_v2  ;;  %v3122_v49 = vadd.f32 1.0, %v6416_v17  ;;  %v9339_v48 = vpop.f32.mrf.mxu1  ;;  %v9346_v62 = vadd.f32 %v9253_v27, %v9001_v56  ;;  %v9350_v17 = vadd.f32 %v8996_v31, %v8606_v54 }
 0x37d   : > { %v6420_v22 = vpop.eup %6419  ;;  %v4181_v7 = vmul.f32 %v6418_v5, %v9162_v29  ;;  %6445 = vpow2.f32 %v5169_v11  ;;  %v9363_v31 = vadd.f32 %v9281_v61, %v9001_v56  ;;  %v9375_v61 = vadd.f32 %v9011_v28, %v8619_v44 }
 0x37e   : > { %v9333_v12 = vpop.eup %6421  ;;  %v3250_v10 = vadd.f32 1.0, %v6420_v22  ;;  %6447 = vpow2.f32 %v5178_v52  ;;  %11086 = vst [vmem:[#allocation47_spill] sm:$0xff] %v9346_v62  ;;  %v5179_v22 = vmul.f32 -1.442695, %v9329_v2  ;;  %v9365_v42 = vpop.f32.mrf.mxu1  ;;  %v9387_v28 = vadd.f32 %v9297_v40, %v9022_v55 }
 0x37f   : > { %11084 = vst [vmem:[#allocation45_spill] sm:$0xff] %v9333_v12  ;;  %v9341_v29 = vpop.eup %6423  ;;  %v4538_v11 = vadd.f32 %v4537_v63, %v4181_v7  ;;  %6449 = vpow2.f32 %v5297_v3  ;;  %v9356_v63 = vadd.f32 %v9268_v33, %v9022_v55  ;;  %v9358_v7 = vpop.f32.mrf.mxu0  ;;  %11088 = vst [vmem:[#allocation49_spill] sm:$0xff] %v9363_v31 }
 0x380   : > { %11085 = vst [vmem:[#allocation46_spill] sm:$0xff] %v9341_v29  ;;  %v6426_v5 = vpop.eup %6425  ;;  %6451 = vrcp.f32 %v3250_v10  ;;  %v5307_v10 = vmul.f32 -1.442695, %v9337_v14  ;;  %11091 = vst [vmem:[#allocation52_spill] sm:$0xff] %v9387_v28  ;;  %v9438_v12 = vadd.f32 %v9358_v7, %v9001_v56 }
 0x381   : > { %v6428_v38 = vpop.eup %6427  ;;  %v4190_v52 = vmul.f32 %v6426_v5, %v9175_v23  ;;  %6453 = vrcp.f32 %v3113_v24  ;;  %11087 = vst [vmem:[#allocation48_spill] sm:$0xff] %v9356_v63  ;;  %v5188_v5 = vmul.f32 -1.442695, %v9346_v62  ;;  %v5189_v41 = vmul.f32 -1.442695, %v9356_v63  ;;  %v9377_v29 = vpop.f32.mrf.mxu0 }
 0x382   : > { %v6430_v27 = vpop.eup %6429  ;;  %6455 = vrcp.f32 %v3122_v49  ;;  %v3251_v3 = vadd.f32 1.0, %v6428_v38  ;;  %v5316_v49 = vmul.f32 -1.442695, %v9350_v17 }
 0x383   : > { %v6432_v23 = vpop.eup %6431  ;;  %v4502_v24 = vadd.f32 %v4501_v30, %v4190_v52  ;;  %6457 = vpow2.f32 %v5306_v34  ;;  %v3123_v62 = vadd.f32 1.0, %v6430_v27 }
 0x384   : > { %v9368_v33 = vpop.eup %6433  ;;  %v4191_v2 = vmul.f32 %v6432_v23, %v9188_v20  ;;  %6459 = vrcp.f32 %v3251_v3  ;;  %v5198_v20 = vmul.f32 -1.442695, %v9363_v31  ;;  %v9381_v3 = vpop.f32.mrf.mxu1 }
 0x385   : > { %11089 = vst [vmem:[#allocation50_spill] sm:$0xff] %v9368_v33  ;;  %v6436_v38 = vpop.eup %6435  ;;  %6461 = vpow2.f32 %v5179_v22 }
 0x386   : > { %v6438_v30 = vpop.eup %6437  ;;  %v4539_v34 = vadd.f32 %v4538_v11, %v4191_v2  ;;  %v4200_v52 = vmul.f32 %v6436_v38, %v9194_v35  ;;  %6463 = vpow2.f32 %v5307_v10  ;;  %v5317_v35 = vmul.f32 -1.442695, %v9375_v61  ;;  %v9390_v11 = vpop.f32.mrf.mxu0 }
 0x387   : > { %v9383_v23 = vpop.eup %6439  ;;  %6465 = vpow2.f32 %v5188_v5  ;;  %v3132_v31 = vadd.f32 1.0, %v6438_v30  ;;  %v9397_v5 = vpop.f32.mrf.mxu1  ;;  %v9469_v50 = vadd.f32 %v9390_v11, %v9001_v56 }
 0x388   : > { %11090 = vst [vmem:[#allocation51_spill] sm:$0xff] %v9383_v23  ;;  %v6442_v22 = vpop.eup %6441  ;;  %v4503_v63 = vadd.f32 %v4502_v24, %v4200_v52  ;;  %6467 = vpow2.f32 %v5316_v49  ;;  %v11092_v24 = vld [vmem:[#allocation26_spill] sm:$0xff] }
 0x389   : > { %v6444_v33 = vpop.eup %6443  ;;  %v3260_v2 = vadd.f32 1.0, %v6442_v22  ;;  %6469 = vpow2.f32 %v5189_v41  ;;  %v9395_v27 = vadd.f32 %v11092_v24, %v8606_v54  ;;  %v5199_v41 = vmul.f32 -1.442695, %v9387_v28 }
 0x38a   : > { %v6446_v10 = vpop.eup %6445  ;;  %v4201_v38 = vmul.f32 %v6444_v33, %v9218_v6  ;;  %6471 = vpow2.f32 %v5198_v20  ;;  %v9402_v6 = vadd.f32 %v9316_v59, %v9001_v56  ;;  %v9404_v33 = vpop.f32.mrf.mxu0 }
 0x38b   : > { %v6448_v40 = vpop.eup %6447  ;;  %6473 = vrcp.f32 %v3260_v2  ;;  %v3133_v23 = vadd.f32 1.0, %v6446_v10 }
 0x38c   : > { %v6450_v49 = vpop.eup %6449  ;;  %v4540_v52 = vadd.f32 %v4539_v34, %v4201_v38  ;;  %6475 = vrcp.f32 %v3123_v62  ;;  %11093 = vst [vmem:[#allocation26_spill] sm:$0xff] %v9402_v6  ;;  %v5326_v34 = vmul.f32 -1.442695, %v9395_v27  ;;  %v9410_v62 = vpop.f32.mrf.mxu1  ;;  %v3142_v24 = vadd.f32 1.0, %v6448_v40 }
 0x38d   : > { %v6452_v22 = vpop.eup %6451  ;;  %v3261_v60 = vadd.f32 1.0, %v6450_v49  ;;  %6477 = vpow2.f32 %v5317_v35  ;;  %v11096_v35 = vld [vmem:[#allocation24_spill] sm:$0xff] }
 0x38e   : > { %v9406_v30 = vpop.eup %6453  ;;  %v4210_v20 = vmul.f32 %v6452_v22, %v9250_v8  ;;  %6479 = vrcp.f32 %v3132_v31  ;;  %v9416_v10 = vadd.f32 %v11096_v35, %v8619_v44  ;;  %v5208_v8 = vmul.f32 -1.442695, %v9402_v6  ;;  %v9423_v22 = vpop.f32.mrf.mxu0 }
 0x38f   : > { %11094 = vst [vmem:[#allocation53_spill] sm:$0xff] %v9406_v30  ;;  %v9412_v2 = vpop.eup %6455  ;;  %6481 = vrcp.f32 %v3261_v60  ;;  %v9421_v31 = vadd.f32 %v9331_v16, %v9022_v55  ;;  %v9426_v35 = vpop.f32.mrf.mxu1 }
 0x390   : > { %11095 = vst [vmem:[#allocation54_spill] sm:$0xff] %v9412_v2  ;;  %v6458_v59 = vpop.eup %6457  ;;  %v4504_v38 = vadd.f32 %v4503_v63, %v4210_v20  ;;  %6483 = vpow2.f32 %v5199_v41  ;;  %v5327_v40 = vmul.f32 -1.442695, %v9416_v10 }
 0x391   : > { %v6460_v49 = vpop.eup %6459  ;;  %6485 = vrcp.f32 %v3133_v23  ;;  %v3270_v28 = vadd.f32 1.0, %v6458_v59  ;;  %11097 = vst [vmem:[#allocation24_spill] sm:$0xff] %v9421_v31  ;;  %v11098_v23 = vld [vmem:[#allocation15_spill] sm:$0xff]  ;;  %v5209_v30 = vmul.f32 -1.442695, %v9421_v31 }
 0x392   : > { %v6462_v60 = vpop.eup %6461  ;;  %v4211_v2 = vmul.f32 %v6460_v49, %v9262_v57  ;;  %6487 = vpow2.f32 %v5326_v34  ;;  %v9431_v41 = vadd.f32 %v11098_v23, %v8606_v54  ;;  %v9434_v57 = vpop.f32.mrf.mxu0  ;;  %11099 = vst [vmem:[#allocation15_spill] sm:$0xff] %v9438_v12 }
 0x393   : > { %v6464_v63 = vpop.eup %6463  ;;  %6489 = vrcp.f32 %v3270_v28  ;;  %v3143_v49 = vadd.f32 1.0, %v6462_v60  ;;  %v9440_v23 = vpop.f32.mrf.mxu1 }
 0x394   : > { %v6466_v20 = vpop.eup %6465  ;;  %v4541_v59 = vadd.f32 %v4540_v52, %v4211_v2  ;;  %6491 = vrcp.f32 %v3142_v24  ;;  %v3271_v16 = vadd.f32 1.0, %v6464_v63  ;;  %v5336_v52 = vmul.f32 -1.442695, %v9431_v41  ;;  %v9450_v7 = vpop.f32.mrf.mxu0 }
 0x395   : > { %v6468_v6 = vpop.eup %6467  ;;  %6493 = vpow2.f32 %v5208_v8  ;;  %v3152_v24 = vadd.f32 1.0, %v6466_v20  ;;  %v9445_v8 = vadd.f32 %v9075_v43, %v8619_v44  ;;  %v9455_v20 = vadd.f32 %v9377_v29, %v9022_v55 }
 0x396   : > { %v6470_v34 = vpop.eup %6469  ;;  %6495 = vrcp.f32 %v3271_v16  ;;  %v3280_v28 = vadd.f32 1.0, %v6468_v6 }
 0x397   : > { %v6472_v32 = vpop.eup %6471  ;;  %6497 = vpow2.f32 %v5327_v40  ;;  %v3153_v63 = vadd.f32 1.0, %v6470_v34  ;;  %v5218_v40 = vmul.f32 -1.442695, %v9438_v12  ;;  %11101 = vst [vmem:[#allocation56_spill] sm:$0xff] %v9455_v20 }
 0x398   : > { %v6474_v2 = vpop.eup %6473  ;;  %6499 = vrcp.f32 %v3280_v28  ;;  %v9457_v28 = vpop.f32.mrf.mxu1 }
 0x399   : > { %v9447_v60 = vpop.eup %6475  ;;  %v4220_v6 = vmul.f32 %v6474_v2, %v9288_v53  ;;  %6501 = vpow2.f32 %v5209_v30  ;;  %11102 = vst [vmem:[#allocation57_spill] sm:$0xff] %v9457_v28  ;;  %v11104_v53 = vld [vmem:[#allocation32_spill] sm:$0xff] }
 0x39a   : > { %11100 = vst [vmem:[#allocation55_spill] sm:$0xff] %v9447_v60  ;;  %v6478_v16 = vpop.eup %6477  ;;  %6503 = vrcp.f32 %v3143_v49  ;;  %v3162_v60 = vadd.f32 1.0, %v6472_v32  ;;  %v9463_v30 = vadd.f32 %v11104_v53, %v8606_v54  ;;  %v5337_v49 = vmul.f32 -1.442695, %v9445_v8  ;;  %11105 = vst [vmem:[#allocation32_spill] sm:$0xff] %v9469_v50  ;;  %v9480_v53 = vpop.f32.mrf.mxu1 }
 0x39b   : > { %v9459_v43 = vpop.eup %6479  ;;  %v4505_v31 = vadd.f32 %v4504_v38, %v4220_v6  ;;  %6505 = vpow2.f32 %v5336_v52  ;;  %v3281_v29 = vadd.f32 1.0, %v6478_v16  ;;  %v9471_v38 = vpop.f32.mrf.mxu0  ;;  %v5219_v52 = vmul.f32 -1.442695, %v9455_v20 }
 0x39c   : > { %11103 = vst [vmem:[#allocation58_spill] sm:$0xff] %v9459_v43  ;;  %v6482_v34 = vpop.eup %6481  ;;  %6507 = vrcp.f32 %v3152_v24  ;;  %v11107_v24 = vld [vmem:[#allocation29_spill] sm:$0xff]  ;;  %v5346_v16 = vmul.f32 -1.442695, %v9463_v30  ;;  %v11111_v43 = vld [vmem:[#allocation23_spill] sm:$0xff] }
 0x39d   : > { %v6484_v2 = vpop.eup %6483  ;;  %v4221_v12 = vmul.f32 %v6482_v34, %v9312_v21  ;;  %6509 = vrcp.f32 %v3153_v63  ;;  %v9478_v6 = vadd.f32 %v11107_v24, %v8619_v44  ;;  %11108 = vst [vmem:[#allocation29_spill] sm:$0xff] %v9480_v53  ;;  %v5228_v24 = vmul.f32 -1.442695, %v9469_v50 }
 0x39e   : > { %v9473_v32 = vpop.eup %6485  ;;  %6511 = vpow2.f32 %v5218_v40  ;;  %v3163_v34 = vadd.f32 1.0, %v6484_v2  ;;  %v9498_v2 = vpop.f32.mrf.mxu1 }
 0x39f   : > { %11106 = vst [vmem:[#allocation59_spill] sm:$0xff] %v9473_v32  ;;  %v6488_v21 = vpop.eup %6487  ;;  %v4542_v63 = vadd.f32 %v4541_v59, %v4221_v12  ;;  %6513 = vrcp.f32 %v3162_v60  ;;  %v9485_v32 = vadd.f32 %v9404_v33, %v9022_v55  ;;  %v9493_v12 = vadd.f32 %v11111_v43, %v8606_v54  ;;  %v9495_v59 = vpop.f32.mrf.mxu0  ;;  %11112 = vst [vmem:[#allocation23_spill] sm:$0xff] %v9498_v2 }
 0x3a0   : > { %v6490_v11 = vpop.eup %6489  ;;  %6515 = vpow2.f32 %v5337_v49  ;;  %v5347_v49 = vmul.f32 -1.442695, %v9478_v6  ;;  %v9504_v43 = vadd.f32 %v9423_v22, %v9001_v56 }
 0x3a1   : > { %11109 = vst [vmem:[#allocation60_spill] sm:$0xff] %v9485_v32  ;;  %v9487_v40 = vpop.eup %6491  ;;  %v4230_v20 = vmul.f32 %v6490_v11, %v9324_v0  ;;  %6517 = vrcp.f32 %v3281_v29  ;;  %v5229_v11 = vmul.f32 -1.442695, %v9485_v32  ;;  %v5356_v53 = vmul.f32 -1.442695, %v9493_v12  ;;  %v9507_v2 = vpop.f32.mrf.mxu0 }
 0x3a2   : > { %11110 = vst [vmem:[#allocation61_spill] sm:$0xff] %v9487_v40  ;;  %v6494_v60 = vpop.eup %6493  ;;  %6519 = vpow2.f32 %v5219_v52  ;;  %v3290_v40 = vadd.f32 1.0, %v6488_v21  ;;  %11113 = vst [vmem:[#allocation62_spill] sm:$0xff] %v9504_v43 }
 0x3a3   : > { %v6496_v33 = vpop.eup %6495  ;;  %v4506_v36 = vadd.f32 %v4505_v31, %v4230_v20  ;;  %6521 = vpow2.f32 %v5346_v16  ;;  %v3172_v52 = vadd.f32 1.0, %v6494_v60 }
 0x3a4   : > { %v6498_v0 = vpop.eup %6497  ;;  %v4231_v29 = vmul.f32 %v6496_v33, %v9337_v14  ;;  %6523 = vrcp.f32 %v3163_v34  ;;  %v11114_v14 = vld [vmem:[#allocation16_spill] sm:$0xff]  ;;  %v9516_v34 = vpop.f32.mrf.mxu1 }
 0x3a5   : > { %v6500_v50 = vpop.eup %6499  ;;  %6525 = vpow2.f32 %v5228_v24  ;;  %v9514_v16 = vadd.f32 %v11114_v14, %v8619_v44  ;;  %11115 = vst [vmem:[#allocation16_spill] sm:$0xff] %v9516_v34  ;;  %v3291_v24 = vadd.f32 1.0, %v6498_v0 }
 0x3a6   : > { %v6502_v31 = vpop.eup %6501  ;;  %v9509_v20 = vadd.f32 %v4542_v63, %v4231_v29  ;;  %v4240_v21 = vmul.f32 %v6500_v50, %v9350_v17  ;;  %6527 = vpow2.f32 %v5347_v49  ;;  %v5238_v63 = vmul.f32 -1.442695, %v9504_v43 }
 0x3a7   : > { %v9518_v22 = vpop.eup %6503  ;;  %6529 = vrcp.f32 %v3290_v40  ;;  %v9525_v50 = vadd.f32 %v9434_v57, %v9022_v55  ;;  %v3173_v49 = vadd.f32 1.0, %v6502_v31  ;;  %v9531_v29 = vadd.f32 %v9157_v37, %v8606_v54  ;;  %v9533_v40 = vpop.f32.mrf.mxu0 }
 0x3a8   : > { %11116 = vst [vmem:[#allocation63_spill] sm:$0xff] %v9518_v22  ;;  %v6506_v60 = vpop.eup %6505  ;;  %v9520_v33 = vadd.f32 %v4506_v36, %v4240_v21  ;;  %6531 = vpow2.f32 %v5229_v11  ;;  %v5357_v36 = vmul.f32 -1.442695, %v9514_v16  ;;  %v9538_v11 = vpop.f32.mrf.mxu1  ;;  %v9550_v43 = vadd.f32 %v9177_v25, %v8619_v44 }
 0x3a9   : > { %11117 = vst [vmem:[#allocation64_spill] sm:$0xff] %v9525_v50  ;;  %v9527_v17 = vpop.eup %6507  ;;  %6533 = vrcp.f32 %v3172_v52  ;;  %11120 = vst [vmem:[#allocation67_spill] sm:$0xff] %v9538_v11  ;;  %v3300_v57 = vadd.f32 1.0, %v6506_v60  ;;  %v9542_v52 = vadd.f32 %v9450_v7, %v9001_v56  ;;  %v5239_v37 = vmul.f32 -1.442695, %v9525_v50  ;;  %v9552_v32 = vpop.f32.mrf.mxu0 }
 0x3aa   : > { %11118 = vst [vmem:[#allocation65_spill] sm:$0xff] %v9527_v17  ;;  %v9535_v0 = vpop.eup %6509  ;;  %6535 = vpow2.f32 %v5356_v53  ;;  %v5366_v53 = vmul.f32 -1.442695, %v9531_v29  ;;  %v9556_v7 = vpop.f32.mrf.mxu1  ;;  %v5367_v25 = vmul.f32 -1.442695, %v9550_v43  ;;  %v9564_v17 = vadd.f32 %v9471_v38, %v9022_v55 }
 0x3ab   : > { %11119 = vst [vmem:[#allocation66_spill] sm:$0xff] %v9535_v0  ;;  %v6512_v21 = vpop.eup %6511  ;;  %6537 = vrcp.f32 %v3291_v24  ;;  %11121 = vst [vmem:[#allocation68_spill] sm:$0xff] %v9542_v52 }
 0x3ac   : > { %v9544_v31 = vpop.eup %6513  ;;  %6539 = vpow2.f32 %v5238_v63  ;;  %v3182_v60 = vadd.f32 1.0, %v6512_v21  ;;  %11123 = vst [vmem:[#allocation70_spill] sm:$0xff] %v9556_v7  ;;  %v5248_v63 = vmul.f32 -1.442695, %v9542_v52  ;;  %11125 = vst [vmem:[#allocation72_spill] sm:$0xff] %v9564_v17  ;;  %v9566_v21 = vpop.f32.mrf.mxu0 }
 0x3ad   : > { %11122 = vst [vmem:[#allocation69_spill] sm:$0xff] %v9544_v31  ;;  %v6516_v14 = vpop.eup %6515  ;;  %6541 = vrcp.f32 %v3173_v49 }
 0x3ae   : > { %v9554_v24 = vpop.eup %6517  ;;  %6543 = vpow2.f32 %v5357_v36  ;;  %v3301_v49 = vadd.f32 1.0, %v6516_v14 }
 0x3af   : > { %v6520_v31 = vpop.eup %6519  ;;  %6545 = vrcp.f32 %v3300_v57  ;;  %v9568_v57 = vpop.f32.mrf.mxu1 }
 0x3b0   : > { %v6522_v50 = vpop.eup %6521  ;;  %6547 = vpow2.f32 %v5239_v37  ;;  %v3183_v22 = vadd.f32 1.0, %v6520_v31  ;;  %11126 = vst [vmem:[#allocation73_spill] sm:$0xff] %v9568_v57  ;;  %v9572_v37 = vadd.f32 %v9196_v4, %v8606_v54  ;;  %v9579_v31 = vadd.f32 %v9495_v59, %v9001_v56 }
 0x3b1   : > { %v9559_v0 = vpop.eup %6523  ;;  %6549 = vpow2.f32 %v5366_v53  ;;  %v3310_v7 = vadd.f32 1.0, %v6522_v50  ;;  %v9585_v4 = vpop.f32.mrf.mxu1 }
 0x3b2   : > { %11124 = vst [vmem:[#allocation71_spill] sm:$0xff] %v9559_v0  ;;  %v6526_v36 = vpop.eup %6525  ;;  %6551 = vrcp.f32 %v3182_v60  ;;  %v5249_v0 = vmul.f32 -1.442695, %v9564_v17  ;;  %11127 = vst [vmem:[#allocation74_spill] sm:$0xff] %v9579_v31  ;;  %v9581_v60 = vpop.f32.mrf.mxu0 }
 0x3b3   : > { %v6528_v52 = vpop.eup %6527  ;;  %6553 = vpow2.f32 %v5248_v63  ;;  %v3192_v53 = vadd.f32 1.0, %v6526_v36  ;;  %11129 = vst [vmem:[#allocation76_spill] sm:$0xff] %v9585_v4 }
 0x3b4   : > { %v9574_v14 = vpop.eup %6529  ;;  %6555 = vrcp.f32 %v3301_v49  ;;  %v3311_v63 = vadd.f32 1.0, %v6528_v52  ;;  %v5376_v49 = vmul.f32 -1.442695, %v9572_v37  ;;  %v9599_v52 = vpop.f32.mrf.mxu0 }
 0x3b5   : > { %v6532_v38 = vpop.eup %6531  ;;  %6557 = vpow2.f32 %v5367_v25  ;;  %v9590_v25 = vadd.f32 %v9214_v9, %v8619_v44  ;;  %v9603_v9 = vpop.f32.mrf.mxu1 }
 0x3b6   : > { %v9583_v50 = vpop.eup %6533  ;;  %6559 = vrcp.f32 %v3183_v22  ;;  %v3193_v59 = vadd.f32 1.0, %v6532_v38  ;;  %v9597_v22 = vadd.f32 %v9507_v2, %v9022_v55  ;;  %11132 = vst [vmem:[#allocation79_spill] sm:$0xff] %v9603_v9 }
 0x3b7   : > { %11128 = vst [vmem:[#allocation75_spill] sm:$0xff] %v9583_v50  ;;  %v6536_v57 = vpop.eup %6535  ;;  %6561 = vrcp.f32 %v3310_v7  ;;  %v5258_v50 = vmul.f32 -1.442695, %v9579_v31  ;;  %v9619_v34 = vpop.f32.mrf.mxu1 }
 0x3b8   : > { %v9592_v36 = vpop.eup %6537  ;;  %6563 = vrcp.f32 %v3192_v53  ;;  %11130 = vst [vmem:[#allocation77_spill] sm:$0xff] %v9597_v22  ;;  %v3320_v4 = vadd.f32 1.0, %v6536_v57  ;;  %v5377_v53 = vmul.f32 -1.442695, %v9590_v25  ;;  %11133 = vst [vmem:[#allocation80_spill] sm:$0xff] %v9619_v34 }
 0x3b9   : > { %v6540_v17 = vpop.eup %6539  ;;  %6565 = vpow2.f32 %v5249_v0  ;;  %v9608_v0 = vadd.f32 %v9243_v47, %v8606_v54 }
 0x3ba   : > { %v9601_v7 = vpop.eup %6541  ;;  %6567 = vrcp.f32 %v3311_v63  ;;  %v3202_v2 = vadd.f32 1.0, %v6540_v17  ;;  %v9613_v63 = vpop.f32.mrf.mxu0 }
 0x3bb   : > { %11131 = vst [vmem:[#allocation78_spill] sm:$0xff] %v9601_v7  ;;  %v6544_v11 = vpop.eup %6543  ;;  %6569 = vpow2.f32 %v5376_v49  ;;  %v5259_v7 = vmul.f32 -1.442695, %v9597_v22  ;;  %v9617_v49 = vadd.f32 %v9257_v58, %v8619_v44  ;;  %v5386_v17 = vmul.f32 -1.442695, %v9608_v0 }
 0x3bc   : > { %v9610_v38 = vpop.eup %6545  ;;  %6571 = vrcp.f32 %v3193_v59  ;;  %v3321_v9 = vadd.f32 1.0, %v6544_v11  ;;  %v9626_v22 = vadd.f32 %v9273_v45, %v8606_v54  ;;  %v9630_v58 = vpop.f32.mrf.mxu0 }
 0x3bd   : > { %v6548_v31 = vpop.eup %6547  ;;  %6573 = vpow2.f32 %v5258_v50 }
 0x3be   : > { %v6550_v57 = vpop.eup %6549  ;;  %6575 = vrcp.f32 %v3320_v4  ;;  %v3203_v50 = vadd.f32 1.0, %v6548_v31 }
 0x3bf   : > { %v9621_v47 = vpop.eup %6551  ;;  %6577 = vpow2.f32 %v5377_v53  ;;  %v3330_v11 = vadd.f32 1.0, %v6550_v57  ;;  %v9634_v53 = vadd.f32 %v9533_v40, %v9001_v56  ;;  %v9643_v57 = vadd.f32 %v9552_v32, %v9022_v55 }
 0x3c0   : > { %11134 = vst [vmem:[#allocation81_spill] sm:$0xff] %v9621_v47  ;;  %v6554_v59 = vpop.eup %6553  ;;  %6579 = vrcp.f32 %v3202_v2  ;;  %v5387_v47 = vmul.f32 -1.442695, %v9617_v49  ;;  %v9637_v2 = vpop.f32.mrf.mxu1  ;;  %v9650_v40 = vadd.f32 %v9284_v19, %v8619_v44  ;;  %v9659_v32 = vadd.f32 %v9566_v21, %v9001_v56 }
 0x3c1   : > { %v9628_v4 = vpop.eup %6555  ;;  %6581 = vpow2.f32 %v5259_v7  ;;  %11135 = vst [vmem:[#allocation82_spill] sm:$0xff] %v9634_v53  ;;  %11136 = vst [vmem:[#allocation83_spill] sm:$0xff] %v9637_v2  ;;  %v3212_v45 = vadd.f32 1.0, %v6554_v59  ;;  %v5268_v59 = vmul.f32 -1.442695, %v9634_v53 }
 0x3c2   : > { %v6558_v39 = vpop.eup %6557  ;;  %6583 = vrcp.f32 %v3321_v9  ;;  %11138 = vst [vmem:[#allocation85_spill] sm:$0xff] %v9643_v57  ;;  %v5396_v9 = vmul.f32 -1.442695, %v9626_v22  ;;  %11139 = vst [vmem:[#allocation86_spill] sm:$0xff] %v9650_v40  ;;  %v5269_v19 = vmul.f32 -1.442695, %v9643_v57  ;;  %v9678_v57 = vadd.f32 %v9581_v60, %v9022_v55 }
 0x3c3   : > { %v9639_v31 = vpop.eup %6559  ;;  %6585 = vpow2.f32 %v5386_v17  ;;  %v3331_v2 = vadd.f32 1.0, %v6558_v39  ;;  %11141 = vst [vmem:[#allocation88_spill] sm:$0xff] %v9659_v32  ;;  %v5397_v39 = vmul.f32 -1.442695, %v9650_v40  ;;  %v929_v60 = vld [vmem:[#allocation8 + $0x8] sm:$0x3] }
 0x3c4   : > { %11137 = vst [vmem:[#allocation84_spill] sm:$0xff] %v9639_v31  ;;  %v9645_v7 = vpop.eup %6561  ;;  %6587 = vrcp.f32 %v3203_v50  ;;  %v9654_v31 = vpop.f32.mrf.mxu0  ;;  %11145 = vst [vmem:[#allocation92_spill] sm:$0xff] %v9678_v57 }
 0x3c5   : > { %v9652_v34 = vpop.eup %6563  ;;  %6589 = vrcp.f32 %v3330_v11  ;;  %v9661_v50 = vpop.f32.mrf.mxu1  ;;  %v9669_v11 = vadd.f32 %v9305_v13, %v8606_v54 }
 0x3c6   : > { %11140 = vst [vmem:[#allocation87_spill] sm:$0xff] %v9652_v34  ;;  %v6566_v17 = vpop.eup %6565  ;;  %6591 = vpow2.f32 %v5387_v47  ;;  %11142 = vst [vmem:[#allocation89_spill] sm:$0xff] %v9661_v50  ;;  %v9673_v53 = vpop.f32.mrf.mxu0 }
 0x3c7   : > { %v9663_v1 = vpop.eup %6567  ;;  %6593 = vrcp.f32 %v3212_v45  ;;  %11143 = vst [vmem:[#allocation90_spill] sm:$0xff] %v9669_v11  ;;  %v3213_v21 = vadd.f32 1.0, %v6566_v17  ;;  %v5278_v45 = vmul.f32 -1.442695, %v9659_v32  ;;  %v9687_v17 = vadd.f32 %v9319_v26, %v8619_v44 }
 0x3c8   : > { %v6570_v34 = vpop.eup %6569  ;;  %6595 = vpow2.f32 %v5396_v9  ;;  %v9680_v9 = vpop.f32.mrf.mxu1 }
 0x3c9   : > { %v9671_v47 = vpop.eup %6571  ;;  %6597 = vrcp.f32 %v3331_v2  ;;  %11146 = vst [vmem:[#allocation93_spill] sm:$0xff] %v9680_v9  ;;  %v3340_v54 = vadd.f32 1.0, %v6570_v34  ;;  %v5406_v2 = vmul.f32 -1.442695, %v9669_v11  ;;  %11147 = vst [vmem:[#allocation94_spill] sm:$0xff] %v9687_v17 }
 0x3ca   : > { %11144 = vst [vmem:[#allocation91_spill] sm:$0xff] %v9671_v47  ;;  %v6574_v50 = vpop.eup %6573  ;;  %6599 = vpow2.f32 %v5268_v59  ;;  %v9691_v47 = vpop.f32.mrf.mxu0  ;;  %v5279_v34 = vmul.f32 -1.442695, %v9678_v57 }
 0x3cb   : > { %v9682_v28 = vpop.eup %6575  ;;  %6601 = vpow2.f32 %v5269_v19  ;;  %v3222_v32 = vadd.f32 1.0, %v6574_v50  ;;  %v9696_v19 = vadd.f32 %v9599_v52, %v9001_v56  ;;  %v5407_v50 = vmul.f32 -1.442695, %v9687_v17 }
 0x3cc   : > { %v6578_v13 = vpop.eup %6577  ;;  %6603 = vpow2.f32 %v5397_v39  ;;  %v9698_v39 = vpop.f32.mrf.mxu1 }
 0x3cd   : > { %v9689_v59 = vpop.eup %6579  ;;  %6605 = vrcp.f32 %v3213_v21  ;;  %11149 = vst [vmem:[#allocation96_spill] sm:$0xff] %v9696_v19  ;;  %11150 = vst [vmem:[#allocation97_spill] sm:$0xff] %v9698_v39  ;;  %v3341_v44 = vadd.f32 1.0, %v6578_v13  ;;  %v11151_v21 = vsub.s32 0, %v11038_v51  ;;  %v1854_v52 = vpop.f32.mrf.mxu0  ;;  %v5288_v39 = vmul.f32 -1.442695, %v9696_v19 }
 0x3ce   : > { %11148 = vst [vmem:[#allocation95_spill] sm:$0xff] %v9689_v59  ;;  %v6582_v9 = vpop.eup %6581  ;;  %6607 = vpow2.f32 %v5278_v45  ;;  %v11154_v13 = vsub.s32 1, %v11038_v51 }
 0x3cf   : > { %v9700_v11 = vpop.eup %6583  ;;  %6609 = vrcp.f32 %v3340_v54  ;;  %v9705_v59 = vrot.slane %v929_v60, %v11151_v21  ;;  %v3223_v57 = vadd.f32 1.0, %v6582_v9  ;;  %v9714_v54 = vadd.f32 %v9613_v63, %v9022_v55  ;;  %v9720_v21 = vpop.f32.mrf.mxu1 }
 0x3d0   : > { %v6586_v26 = vpop.eup %6585  ;;  %6611 = vpow2.f32 %v5406_v2  ;;  %v9718_v2 = vrot.slane %v929_v60, %v11154_v13  ;;  %11155 = vst [vmem:[#allocation100_spill] sm:$0xff] %v9720_v21  ;;  %v9724_v9 = vadd.f32 %v9630_v58, %v9001_v56  ;;  %v9734_v60 = vadd.f32 %v9654_v31, %v9022_v55 }
 0x3d1   : > { %v9707_v45 = vpop.eup %6587  ;;  %6613 = vrcp.f32 %v3222_v32  ;;  %11153 = vst [vmem:[#allocation99_spill] sm:$0xff] %v9714_v54  ;;  %v3350_v32 = vadd.f32 1.0, %v6586_v26  ;;  %v9730_v63 = vadd.f32 %v9339_v48, %v9705_v59  ;;  %v5289_v13 = vmul.f32 -1.442695, %v9714_v54  ;;  %v9745_v48 = vpop.f32.mrf.mxu1  ;;  %v11164_v54 = vld [vmem:[#allocation14_spill] sm:$0xff] }
 0x3d2   : > { %11152 = vst [vmem:[#allocation98_spill] sm:$0xff] %v9707_v45  ;;  %v9709_v40 = vpop.eup %6589  ;;  %6615 = vpow2.f32 %v5279_v34  ;;  %11156 = vst [vmem:[#allocation101_spill] sm:$0xff] %v9724_v9 }
 0x3d3   : > { %v6592_v17 = vpop.eup %6591  ;;  %6617 = vrcp.f32 %v3341_v44  ;;  %11158 = vst [vmem:[#allocation103_spill] sm:$0xff] %v9730_v63  ;;  %11159 = vst [vmem:[#allocation104_spill] sm:$0xff] %v9734_v60  ;;  %v9736_v44 = vpop.f32.mrf.mxu0 }
 0x3d4   : > { %v9726_v34 = vpop.eup %6593  ;;  %v3351_v19 = vadd.f32 1.0, %v6592_v17  ;;  %6619 = vpow2.f32 %v5407_v50  ;;  %v9743_v17 = vadd.f32 %v9365_v42, %v9718_v2  ;;  %11161 = vst [vmem:[#allocation106_spill] sm:$0xff] %v9745_v48  ;;  %v9759_v48 = vmul.f32 %v9238_v18, %v11164_v54  ;;  %v9771_v21 = vpop.f32.mrf.mxu1  ;;  %v11166_v54 = vld [vmem:[#allocation27_spill] sm:$0xff] }
 0x3d5   : > { %11157 = vst [vmem:[#allocation102_spill] sm:$0xff] %v9726_v34  ;;  %v6596_v51 = vpop.eup %6595  ;;  %6621 = vrcp.f32 %v3223_v57  ;;  %v5298_v57 = vmul.f32 -1.442695, %v9724_v9  ;;  %v11162_v34 = vld [vmem:[#allocation25_spill] sm:$0xff]  ;;  %v9764_v9 = vadd.f32 %v9381_v3, %v9705_v59  ;;  %v9779_v3 = vadd.f32 %v9691_v47, %v9022_v55 }
 0x3d6   : > { %v9738_v26 = vpop.eup %6597  ;;  %v3360_v58 = vadd.f32 1.0, %v6596_v51  ;;  %6623 = vpow2.f32 %v5288_v39  ;;  %11160 = vst [vmem:[#allocation105_spill] sm:$0xff] %v9743_v17  ;;  %v9750_v45 = vmul.f32 %v9220_v46, %v11162_v34  ;;  %v5100_v39 = vmul.f32 -1.442695, %v9730_v63  ;;  %v9766_v46 = vpop.f32.mrf.mxu0 }
 0x3d7   : > { %v6600_v50 = vpop.eup %6599  ;;  %6625 = vrcp.f32 %v3350_v32  ;;  %v9755_v51 = vadd.f32 %v9673_v53, %v9001_v56  ;;  %v5299_v32 = vmul.f32 -1.442695, %v9734_v60  ;;  %11165 = vst [vmem:[#allocation14_spill] sm:$0xff] %v9764_v9  ;;  %v5101_v53 = vmul.f32 -1.442695, %v9743_v17 }
 0x3d8   : > { %v6602_v31 = vpop.eup %6601  ;;  %6627 = vrcp.f32 %v3351_v19  ;;  %v3232_v34 = vadd.f32 1.0, %v6600_v50  ;;  %v9783_v60 = vadd.f32 %v9397_v5, %v9718_v2  ;;  %v9789_v17 = vadd.f32 %v1854_v52, %v9001_v56 }
 0x3d9   : > { %11163 = vst [vmem:[#allocation25_spill] sm:$0xff] %v9755_v51  ;;  %v6604_v42 = vpop.eup %6603  ;;  %6629 = vrcp.f32 %v3360_v58  ;;  %v9775_v58 = vmul.f32 %v9245_v15, %v11166_v54  ;;  %v5110_v47 = vmul.f32 -1.442695, %v9764_v9  ;;  %v9796_v5 = vadd.f32 %v9410_v62, %v9705_v59  ;;  %v9798_v54 = vpop.f32.mrf.mxu0 }
 0x3da   : > { %v9768_v19 = vpop.eup %6605  ;;  %v3361_v63 = vadd.f32 1.0, %v6604_v42  ;;  %6631 = vpow2.f32 %v5289_v13  ;;  %11167 = vst [vmem:[#allocation27_spill] sm:$0xff] %v9783_v60  ;;  %v4250_v13 = vmul.f32 %v9574_v14, %v9395_v27  ;;  %v5308_v42 = vmul.f32 -1.442695, %v9755_v51  ;;  %v9804_v51 = vpop.f32.mrf.mxu1 }
 0x3db   : > { %v6608_v18 = vpop.eup %6607  ;;  %6633 = vpow2.f32 %v5298_v57  ;;  %v4241_v57 = vmul.f32 %v9554_v24, %v9375_v61  ;;  %11168 = vst [vmem:[#allocation107_spill] sm:$0xff] %v9796_v5  ;;  %v4260_v14 = vmul.f32 %v9610_v38, %v9431_v41  ;;  %v3233_v52 = vadd.f32 1.0, %v6602_v31 }
 0x3dc   : > { %v6610_v50 = vpop.eup %6609  ;;  %6635 = vrcp.f32 %v3361_v63  ;;  %v4251_v24 = vmul.f32 %v9592_v36, %v9416_v10  ;;  %v5309_v62 = vmul.f32 -1.442695, %v9779_v3  ;;  %v4270_v41 = vmul.f32 %v9645_v7, %v9463_v30 }
 0x3dd   : > { %v6612_v15 = vpop.eup %6611  ;;  %6637 = vpow2.f32 %v5100_v39  ;;  %v5111_v39 = vmul.f32 -1.442695, %v9783_v60  ;;  %v5318_v38 = vmul.f32 -1.442695, %v9789_v17  ;;  %v4261_v10 = vmul.f32 %v9628_v4, %v9445_v8 }
 0x3de   : > { %v9800_v27 = vpop.eup %6613  ;;  %6639 = vrcp.f32 %v3232_v34  ;;  %v3370_v63 = vadd.f32 1.0, %v6612_v15  ;;  %v4544_v34 = vadd.f32 %v9509_v20, %v4241_v57  ;;  %v5120_v36 = vmul.f32 -1.442695, %v9796_v5 }
 0x3df   : > { %11169 = vst [vmem:[#allocation108_spill] sm:$0xff] %v9800_v27  ;;  %v6616_v61 = vpop.eup %6615  ;;  %6641 = vpow2.f32 %v5299_v32  ;;  %v4508_v27 = vadd.f32 %v9520_v33, %v4250_v13  ;;  %v9818_v32 = vpop.f32.mrf.mxu0  ;;  %v4280_v30 = vmul.f32 %v9682_v28, %v9493_v12  ;;  %v4271_v8 = vmul.f32 %v9663_v1, %v9478_v6 }
 0x3e0   : > { %v6618_v9 = vpop.eup %6617  ;;  %6643 = vrcp.f32 %v3370_v63  ;;  %v9824_v13 = vpop.f32.mrf.mxu1  ;;  %v4545_v20 = vadd.f32 %v4544_v34, %v4251_v24  ;;  %v3242_v4 = vadd.f32 1.0, %v6608_v18  ;;  %v4290_v5 = vmul.f32 %v9709_v40, %v9531_v29 }
 0x3e1   : > { %v6620_v31 = vpop.eup %6619  ;;  %6645 = vpow2.f32 %v5101_v53  ;;  %v4509_v33 = vadd.f32 %v4508_v27, %v4260_v14  ;;  %v9832_v28 = vadd.f32 %v9736_v44, %v9022_v55  ;;  %v4281_v14 = vmul.f32 %v9700_v11, %v9514_v16  ;;  %v9840_v6 = vpop.f32.mrf.mxu0 }
 0x3e2   : > { %v9820_v15 = vpop.eup %6621  ;;  %6647 = vrcp.f32 %v3233_v52  ;;  %v3371_v7 = vadd.f32 1.0, %v6620_v31  ;;  %v4546_v27 = vadd.f32 %v4545_v20, %v4261_v10  ;;  %v9838_v1 = vadd.f32 %v9426_v35, %v9718_v2  ;;  %v9843_v44 = vpop.f32.mrf.mxu1  ;;  %v11173_v20 = vld [vmem:[#allocation86_spill] sm:$0xff] }
 0x3e3   : > { %v6624_v63 = vpop.eup %6623  ;;  %6649 = vpow2.f32 %v5308_v42  ;;  %v4510_v57 = vadd.f32 %v4509_v33, %v4270_v41  ;;  %11170 = vst [vmem:[#allocation109_spill] sm:$0xff] %v9832_v28  ;;  %v4300_v29 = vmul.f32 %v6610_v50, %v9572_v37  ;;  %v3243_v40 = vadd.f32 1.0, %v6616_v61  ;;  %v9854_v34 = vpop.f32.mrf.mxu0 }
 0x3e4   : > { %v6626_v53 = vpop.eup %6625  ;;  %6651 = vrcp.f32 %v3371_v7  ;;  %11171 = vst [vmem:[#allocation110_spill] sm:$0xff] %v9838_v1  ;;  %v4547_v24 = vadd.f32 %v4546_v27, %v4271_v8  ;;  %v4291_v16 = vmul.f32 %v9738_v26, %v9550_v43  ;;  %v9849_v35 = vadd.f32 %v9766_v46, %v9001_v56 }
 0x3e5   : > { %v6628_v12 = vpop.eup %6627  ;;  %6653 = vpow2.f32 %v5110_v47  ;;  %v4511_v42 = vadd.f32 %v4510_v57, %v4280_v30  ;;  %v4310_v41 = vmul.f32 %v6626_v53, %v9608_v0  ;;  %v3252_v31 = vadd.f32 1.0, %v6624_v63  ;;  %v9868_v53 = vpop.f32.mrf.mxu0 }
 0x3e6   : > { %v6630_v18 = vpop.eup %6629  ;;  %6655 = vpow2.f32 %v5309_v62  ;;  %v4548_v50 = vadd.f32 %v4547_v24, %v4281_v14  ;;  %v4301_v61 = vmul.f32 %v6618_v9, %v9590_v25  ;;  %v5319_v62 = vmul.f32 -1.442695, %v9832_v28 }
 0x3e7   : > { %v6632_v52 = vpop.eup %6631  ;;  %6657 = vrcp.f32 %v3242_v4  ;;  %v4512_v47 = vadd.f32 %v4511_v42, %v4290_v5  ;;  %v4320_v46 = vmul.f32 %v6630_v18, %v9626_v22  ;;  %v9857_v5 = vpop.f32.mrf.mxu1  ;;  %v4311_v33 = vmul.f32 %v6628_v12, %v9617_v49 }
 0x3e8   : > { %v6634_v11 = vpop.eup %6633  ;;  %6659 = vpow2.f32 %v5111_v39  ;;  %v3253_v10 = vadd.f32 1.0, %v6632_v52  ;;  %v4549_v39 = vadd.f32 %v4548_v50, %v4291_v16  ;;  %v9865_v7 = vadd.f32 %v9440_v23, %v9705_v59  ;;  %v9887_v50 = vpop.f32.mrf.mxu0 }
 0x3e9   : > { %v6636_v37 = vpop.eup %6635  ;;  %6661 = vpow2.f32 %v5318_v38  ;;  %v4513_v26 = vadd.f32 %v4512_v47, %v4300_v29  ;;  %v3262_v30 = vadd.f32 1.0, %v6634_v11  ;;  %v5121_v38 = vmul.f32 -1.442695, %v9838_v1  ;;  %v9871_v14 = vpop.f32.mrf.mxu1 }
 0x3ea   : > { %v6638_v43 = vpop.eup %6637  ;;  %6663 = vrcp.f32 %v3243_v40  ;;  %11172 = vst [vmem:[#allocation111_spill] sm:$0xff] %v9865_v7  ;;  %v4550_v63 = vadd.f32 %v4549_v39, %v4301_v61  ;;  %v4321_v8 = vmul.f32 %v6636_v37, %v11173_v20  ;;  %v5328_v42 = vmul.f32 -1.442695, %v9849_v35  ;;  %v11182_v20 = vld [vmem:[#allocation28_spill] sm:$0xff] }
 0x3eb   : > { %v9859_v0 = vpop.eup %6639  ;;  %6665 = vpow2.f32 %v5120_v36  ;;  %v4514_v9 = vadd.f32 %v4513_v26, %v4310_v41  ;;  %v3064_v4 = vadd.f32 1.0, %v6638_v43  ;;  %v11174_v36 = vld [vmem:[#allocation90_spill] sm:$0xff]  ;;  %v9878_v29 = vadd.f32 %v9798_v54, %v9022_v55 }
 0x3ec   : > { %v6642_v25 = vpop.eup %6641  ;;  %6667 = vrcp.f32 %v3252_v31  ;;  %v4551_v23 = vadd.f32 %v4550_v63, %v4311_v33  ;;  %v4560_v52 = vadd.f32 %v9775_v58, %v9750_v45  ;;  %v5130_v41 = vmul.f32 -1.442695, %v9865_v7  ;;  %v11176_v31 = vld [vmem:[#allocation57_spill] sm:$0xff]  ;;  %v9890_v58 = vpop.f32.mrf.mxu1 }
 0x3ed   : > { %v6644_v22 = vpop.eup %6643  ;;  %6669 = vpow2.f32 %v5319_v62  ;;  %v4515_v57 = vadd.f32 %v4514_v9, %v4320_v46  ;;  %v3263_v27 = vadd.f32 1.0, %v6642_v25  ;;  %11175 = vst [vmem:[#allocation86_spill] sm:$0xff] %v9878_v29  ;;  %v9885_v37 = vadd.f32 %v11176_v31, %v9718_v2  ;;  %v11178_v62 = vld [vmem:[#allocation94_spill] sm:$0xff]  ;;  %v11204_v7 = vld [vmem:[#allocation45_spill] sm:$0xff] }
 0x3ee   : > { %v6646_v49 = vpop.eup %6645  ;;  %v4330_v12 = vmul.f32 %v6644_v22, %v11174_v36  ;;  %6671 = vrcp.f32 %v3253_v10  ;;  %v4552_v47 = vadd.f32 %v4551_v23, %v4321_v8  ;;  %v11179_v46 = vld [vmem:[#allocation30_spill] sm:$0xff]  ;;  %v11180_v10 = vld [vmem:[#allocation37_spill] sm:$0xff]  ;;  %v5329_v33 = vmul.f32 -1.442695, %v9878_v29  ;;  %v11183_v8 = vld [vmem:[#allocation39_spill] sm:$0xff] }
 0x3ef   : > { %v9873_v18 = vpop.eup %6647  ;;  %6673 = vrcp.f32 %v3262_v30  ;;  %v3065_v16 = vadd.f32 1.0, %v6646_v49  ;;  %11177 = vst [vmem:[#allocation90_spill] sm:$0xff] %v9885_v37  ;;  %v4033_v39 = vmul.f32 %v11180_v10, %v11179_v46  ;;  %v9897_v30 = vadd.f32 %v9818_v32, %v9001_v56 }
 0x3f0   : > { %v6650_v40 = vpop.eup %6649  ;;  %v4516_v24 = vadd.f32 %v4515_v57, %v4330_v12  ;;  %6675 = vpow2.f32 %v5121_v38  ;;  %v5131_v49 = vmul.f32 -1.442695, %v9885_v37  ;;  %v11184_v57 = vld [vmem:[#allocation29_spill] sm:$0xff]  ;;  %v9908_v12 = vpop.f32.mrf.mxu0 }
 0x3f1   : > { %v6652_v11 = vpop.eup %6651  ;;  %6677 = vrcp.f32 %v3064_v4  ;;  %v3272_v45 = vadd.f32 1.0, %v6650_v40  ;;  %11181 = vst [vmem:[#allocation57_spill] sm:$0xff] %v9897_v30  ;;  %v4042_v4 = vmul.f32 %v11183_v8, %v11182_v20  ;;  %v9906_v36 = vadd.f32 %v11184_v57, %v9705_v59  ;;  %v9910_v40 = vpop.f32.mrf.mxu1  ;;  %v11192_v20 = vld [vmem:[#allocation43_spill] sm:$0xff]  ;;  %v11203_v37 = vld [vmem:[#allocation33_spill] sm:$0xff] }
 0x3f2   : > { %v6654_v54 = vpop.eup %6653  ;;  %v4517_v61 = vrot.slane %v4516_v24, 4  ;;  %v4331_v43 = vmul.f32 %v6652_v11, %v11178_v62  ;;  %6679 = vrcp.f32 %v3263_v27  ;;  %v5338_v11 = vmul.f32 -1.442695, %v9897_v30 }
 0x3f3   : > { %v6656_v26 = vpop.eup %6655  ;;  %6681 = vpow2.f32 %v5328_v42  ;;  %v3074_v22 = vadd.f32 1.0, %v6654_v54  ;;  %11185 = vst [vmem:[#allocation94_spill] sm:$0xff] %v9906_v36  ;;  %v4053_v1 = vmul.f32 %v11204_v7, %v11203_v37 }
 0x3f4   : > { %v9899_v25 = vpop.eup %6657  ;;  %v4518_v9 = vadd.f32 %v4517_v61, %v4516_v24  ;;  %v4553_v38 = vadd.f32 %v4552_v47, %v4331_v43  ;;  %6683 = vrcp.f32 %v3065_v16  ;;  %v3273_v42 = vadd.f32 1.0, %v6656_v26  ;;  %v11188_v26 = vld [vmem:[#allocation41_spill] sm:$0xff] }
 0x3f5   : > { %v6660_v63 = vpop.eup %6659  ;;  %6685 = vpow2.f32 %v5130_v41  ;;  %v4597_v16 = vadd.f32 %v4033_v39, %v9759_v48  ;;  %v9918_v47 = vadd.f32 %v9840_v6, %v9022_v55  ;;  %v4561_v43 = vadd.f32 %v4560_v52, %v4042_v4  ;;  %v9924_v48 = vpop.f32.mrf.mxu0  ;;  %v11191_v52 = vld [vmem:[#allocation31_spill] sm:$0xff] }
 0x3f6   : > { %v6662_v32 = vpop.eup %6661  ;;  %v4519_v27 = vrot.slane %v4518_v9, 2  ;;  %v4554_v23 = vrot.slane %v4553_v38, 4  ;;  %6687 = vrcp.f32 %v3272_v45  ;;  %v3075_v61 = vadd.f32 1.0, %v6660_v63  ;;  %v11187_v45 = vld [vmem:[#allocation34_spill] sm:$0xff] }
 0x3f7   : > { %v9912_v24 = vpop.eup %6663  ;;  %6689 = vpow2.f32 %v5329_v33  ;;  %11186 = vst [vmem:[#allocation30_spill] sm:$0xff] %v9918_v47  ;;  %v4043_v46 = vmul.f32 %v11188_v26, %v11187_v45  ;;  %v3282_v10 = vadd.f32 1.0, %v6662_v32  ;;  %v5140_v6 = vmul.f32 -1.442695, %v9906_v36 }
 0x3f8   : > { %v6666_v41 = vpop.eup %6665  ;;  %v4520_v31 = vadd.f32 %v4519_v27, %v4518_v9  ;;  %v4555_v54 = vadd.f32 %v4554_v23, %v4553_v38  ;;  %6691 = vrcp.f32 %v3074_v22  ;;  %v11189_v9 = vld [vmem:[#allocation23_spill] sm:$0xff]  ;;  %v9931_v22 = vpop.f32.mrf.mxu1  ;;  %v4052_v8 = vmul.f32 %v11192_v20, %v11191_v52 }
 0x3f9   : > { %v9920_v62 = vpop.eup %6667  ;;  %6693 = vpow2.f32 %v5131_v49  ;;  %v9929_v38 = vadd.f32 %v11189_v9, %v9718_v2  ;;  %v3084_v4 = vadd.f32 1.0, %v6666_v41  ;;  %v9939_v49 = vadd.f32 %v9854_v34, %v9001_v56  ;;  %v11194_v9 = vld [vmem:[#allocation16_spill] sm:$0xff] }
 0x3fa   : > { %v6670_v39 = vpop.eup %6669  ;;  %v4556_v33 = vrot.slane %v4555_v54, 2  ;;  %6695 = vrcp.f32 %v3273_v42  ;;  %v4521_v32 = vrot.slane %v4520_v31, 1  ;;  %v5339_v23 = vmul.f32 -1.442695, %v9918_v47 }
 0x3fb   : > { %11190 = vst [vmem:[#allocation37_spill] sm:$0xff] %v9929_v38  ;;  %v9933_v63 = vpop.eup %6671  ;;  %6697 = vpow2.f32 %v5338_v11  ;;  %11193 = vst [vmem:[#allocation28_spill] sm:$0xff] %v9939_v49  ;;  %v4598_v45 = vadd.f32 %v4597_v16, %v4043_v46  ;;  %v3283_v26 = vadd.f32 1.0, %v6670_v39  ;;  %v9946_v52 = vadd.f32 %v11194_v9, %v9705_v59  ;;  %v9948_v11 = vpop.f32.mrf.mxu0  ;;  %v11198_v39 = vld [vmem:[#allocation67_spill] sm:$0xff] }
 0x3fc   : > { %v9941_v57 = vpop.eup %6673  ;;  %v4557_v27 = vadd.f32 %v4556_v33, %v4555_v54  ;;  %6699 = vrcp.f32 %v3075_v61  ;;  %v5141_v20 = vmul.f32 -1.442695, %v9929_v38  ;;  %v9955_v54 = vadd.f32 %v9868_v53, %v9022_v55  ;;  %v9957_v61 = vpop.f32.mrf.mxu1 }
 0x3fd   : > { %v6676_v42 = vpop.eup %6675  ;;  %6701 = vrcp.f32 %v3282_v10  ;;  %11195 = vst [vmem:[#allocation39_spill] sm:$0xff] %v9946_v52  ;;  %v4562_v46 = vadd.f32 %v4561_v43, %v4052_v8  ;;  %v5348_v10 = vmul.f32 -1.442695, %v9939_v49  ;;  %v9964_v33 = vadd.f32 %v11198_v39, %v9718_v2  ;;  %v11205_v43 = vld [vmem:[#allocation17_spill] sm:$0xff]  ;;  %v11206_v8 = vld [vmem:[#allocation46_spill] sm:$0xff]  ;;  %v9977_v39 = vpop.f32.mrf.mxu0 }
 0x3fe   : > { %v9950_v41 = vpop.eup %6677  ;;  %v4558_v34 = vrot.slane %v4557_v27, 1  ;;  %6703 = vpow2.f32 %v5140_v6  ;;  %11197 = vst [vmem:[#allocation34_spill] sm:$0xff] %v9955_v54  ;;  %v9966_v6 = vadd.f32 %v4521_v32, %v4520_v31  ;;  %v3085_v36 = vadd.f32 1.0, %v6676_v42  ;;  %v9986_v7 = vpop.f32.mrf.mxu1  ;;  %v11209_v42 = vld [vmem:[#allocation50_spill] sm:$0xff] }
 0x3ff   : > { %11196 = vst [vmem:[#allocation29_spill] sm:$0xff] %v9950_v41  ;;  %v9959_v16 = vpop.eup %6679  ;;  %6705 = vrcp.f32 %v3084_v4  ;;  %11199 = vst [vmem:[#allocation41_spill] sm:$0xff] %v9964_v33  ;;  %v4062_v4 = vmul.f32 %v11206_v8, %v11205_v43  ;;  %v5150_v60 = vmul.f32 -1.442695, %v9946_v52  ;;  %v5349_v32 = vmul.f32 -1.442695, %v9955_v54 }
 0x400   : > { %v6682_v9 = vpop.eup %6681  ;;  %11200 = vst [vmem:[#allocation23_spill] sm:$0xff] %v9966_v6  ;;  %v9968_v38 = vadd.f32 %v4558_v34, %v4557_v27  ;;  %6707 = vpow2.f32 %v5339_v23  ;;  %v9984_v27 = vadd.f32 %v9887_v50, %v9001_v56  ;;  %v11208_v23 = vld [vmem:[#allocation35_spill] sm:$0xff]  ;;  %v11210_v34 = vld [vmem:[#allocation36_spill] sm:$0xff]  ;;  %v4599_v6 = vadd.f32 %v4598_v45, %v4053_v1 }
 0x401   : > { %v9970_v53 = vpop.eup %6683  ;;  %6709 = vrcp.f32 %v3283_v26  ;;  %v4063_v26 = vmul.f32 %v11209_v42, %v11208_v23  ;;  %v11211_v43 = vld [vmem:[#allocation51_spill] sm:$0xff]  ;;  %v3292_v52 = vadd.f32 1.0, %v6682_v9  ;;  %v4563_v54 = vadd.f32 %v4562_v46, %v4062_v4  ;;  %v10001_v23 = vpop.f32.mrf.mxu0 }
 0x402   : > { %11201 = vst [vmem:[#allocation31_spill] sm:$0xff] %v9968_v38  ;;  %11202 = vst [vmem:[#allocation43_spill] sm:$0xff] %v9970_v53  ;;  %v6686_v41 = vpop.eup %6685  ;;  %6711 = vpow2.f32 %v5141_v20  ;;  %v4072_v8 = vmul.f32 %v11211_v43, %v11210_v34  ;;  %v5151_v20 = vmul.f32 -1.442695, %v9964_v33  ;;  %v11212_v53 = vld [vmem:[#allocation70_spill] sm:$0xff]  ;;  %v10008_v9 = vpop.f32.mrf.mxu1 }
 0x403   : > { %11207 = vst [vmem:[#allocation16_spill] sm:$0xff] %v9984_v27  ;;  %v9988_v37 = vpop.eup %6687  ;;  %6713 = vpow2.f32 %v5348_v10  ;;  %v9997_v50 = vadd.f32 %v11212_v53, %v9705_v59  ;;  %v3094_v47 = vadd.f32 1.0, %v6686_v41  ;;  %v5358_v10 = vmul.f32 -1.442695, %v9984_v27  ;;  %11216 = vst [vmem:[#allocation17_spill] sm:$0xff] %v10008_v9  ;;  %v11218_v41 = vld [vmem:[#allocation53_spill] sm:$0xff] }
 0x404   : > { %v6690_v31 = vpop.eup %6689  ;;  %6715 = vrcp.f32 %v3085_v36  ;;  %v10006_v36 = vadd.f32 %v9908_v12, %v9022_v55  ;;  %v4600_v34 = vadd.f32 %v4599_v6, %v4063_v26  ;;  %v4564_v43 = vadd.f32 %v4563_v54, %v4072_v8  ;;  %v11223_v27 = vld [vmem:[#allocation54_spill] sm:$0xff]  ;;  %v1888_v6 = vpop.f32.mrf.mxu0  ;;  %v11225_v26 = vld [vmem:[#allocation13_spill] sm:$0xff]  ;;  %v11226_v8 = vld [vmem:[#allocation55_spill] sm:$0xff] }
 0x405   : > { %11213 = vst [vmem:[#allocation67_spill] sm:$0xff] %v9997_v50  ;;  %v9999_v38 = vpop.eup %6691  ;;  %6717 = vpow2.f32 %v5150_v60  ;;  %v3293_v1 = vadd.f32 1.0, %v6690_v31  ;;  %v11217_v60 = vld [vmem:[#allocation19_spill] sm:$0xff]  ;;  %v5160_v4 = vmul.f32 -1.442695, %v9997_v50 }
 0x406   : > { %11214 = vst [vmem:[#allocation33_spill] sm:$0xff] %v9999_v38  ;;  %v6694_v42 = vpop.eup %6693  ;;  %6719 = vpow2.f32 %v5349_v32  ;;  %11215 = vst [vmem:[#allocation45_spill] sm:$0xff] %v10006_v36  ;;  %v4073_v46 = vmul.f32 %v11218_v41, %v11217_v60  ;;  %v11219_v32 = vld [vmem:[#allocation73_spill] sm:$0xff]  ;;  %v11222_v38 = vld [vmem:[#allocation22_spill] sm:$0xff]  ;;  %v5359_v60 = vmul.f32 -1.442695, %v10006_v36 }
 0x407   : > { %v10010_v53 = vpop.eup %6695  ;;  %6721 = vrcp.f32 %v3292_v52  ;;  %v10017_v33 = vadd.f32 %v11219_v32, %v9718_v2  ;;  %v4082_v49 = vmul.f32 %v11223_v27, %v11222_v38  ;;  %v3095_v54 = vadd.f32 1.0, %v6694_v42  ;;  %v11227_v41 = vld [vmem:[#allocation76_spill] sm:$0xff]  ;;  %v10036_v38 = vpop.f32.mrf.mxu1  ;;  %v11230_v27 = vld [vmem:[#allocation38_spill] sm:$0xff]  ;;  %v11236_v36 = vld [vmem:[#allocation21_spill] sm:$0xff] }
 0x408   : > { %v6698_v45 = vpop.eup %6697  ;;  %6723 = vpow2.f32 %v5151_v20  ;;  %v10025_v52 = vadd.f32 %v9924_v48, %v9001_v56  ;;  %v4083_v20 = vmul.f32 %v11226_v8, %v11225_v26  ;;  %v10034_v32 = vadd.f32 %v11227_v41, %v9705_v59  ;;  %11229 = vst [vmem:[#allocation51_spill] sm:$0xff] %v10036_v38  ;;  %v11231_v42 = vld [vmem:[#allocation58_spill] sm:$0xff]  ;;  %v11235_v8 = vld [vmem:[#allocation20_spill] sm:$0xff] }
 0x409   : > { %11220 = vst [vmem:[#allocation46_spill] sm:$0xff] %v10017_v33  ;;  %v10019_v12 = vpop.eup %6699  ;;  %6725 = vrcp.f32 %v3094_v47  ;;  %v4092_v48 = vmul.f32 %v11231_v42, %v11230_v27  ;;  %v3302_v50 = vadd.f32 1.0, %v6698_v45  ;;  %v11237_v29 = vcombine.low %v11235_v8, %v11236_v36  ;;  %v1890_v42 = vpop.f32.mrf.mxu0  ;;  %v11242_v36 = vld [vmem:[#allocation40_spill] sm:$0xff] }
 0x40a   : > { %11221 = vst [vmem:[#allocation35_spill] sm:$0xff] %v10019_v12  ;;  %11224 = vst [vmem:[#allocation50_spill] sm:$0xff] %v10025_v52  ;;  %v10027_v31 = vpop.eup %6701  ;;  %6727 = vpow2.f32 %v5358_v10  ;;  %v10042_v12 = vadd.f32 %v9948_v11, %v9022_v55  ;;  %v11234_v10 = vld [vmem:[#allocation18_spill] sm:$0xff]  ;;  %v4601_v30 = vadd.f32 %v4600_v34, %v4073_v46  ;;  %v5161_v38 = vmul.f32 -1.442695, %v10017_v33  ;;  %v11239_v11 = vld [vmem:[#allocation79_spill] sm:$0xff]  ;;  %v10062_v46 = vpop.f32.mrf.mxu1 }
 0x40b   : > { %11228 = vst [vmem:[#allocation36_spill] sm:$0xff] %v10034_v32  ;;  %v6704_v47 = vpop.eup %6703  ;;  %6729 = vrcp.f32 %v3293_v1  ;;  %v10050_v41 = vrot.slane %v11237_v29, %v11234_v10  ;;  %v4565_v27 = vadd.f32 %v4564_v43, %v4082_v49  ;;  %v5368_v1 = vmul.f32 -1.442695, %v10025_v52  ;;  %v11243_v29 = vld [vmem:[#allocation59_spill] sm:$0xff]  ;;  %11244 = vst [vmem:[#allocation54_spill] sm:$0xff] %v10062_v46  ;;  %v11263_v46 = vld [vmem:[#allocation65_spill] sm:$0xff] }
 0x40c   : > { %11232 = vst [vmem:[#allocation70_spill] sm:$0xff] %v10042_v12  ;;  %v10044_v26 = vpop.eup %6705  ;;  %6731 = vpow2.f32 %v5160_v4  ;;  %v10056_v45 = vadd.f32 %v11239_v11, %v9718_v2  ;;  %v4602_v9 = vadd.f32 %v4601_v30, %v4083_v20  ;;  %v4093_v8 = vmul.f32 %v11243_v29, %v11242_v36  ;;  %v11246_v20 = vld [vmem:[#allocation80_spill] sm:$0xff]  ;;  %v11249_v36 = vld [vmem:[#allocation42_spill] sm:$0xff] }
 0x40d   : > { %11233 = vst [vmem:[#allocation19_spill] sm:$0xff] %v10044_v26  ;;  %11238 = vst [vmem:[#allocation53_spill] sm:$0xff] %v10050_v41  ;;  %v6708_v28 = vpop.eup %6707  ;;  %6733 = vrcp.f32 %v3095_v54  ;;  %v3104_v34 = vadd.f32 1.0, %v6704_v47  ;;  %v4566_v49 = vadd.f32 %v4565_v27, %v4092_v48  ;;  %v5170_v43 = vmul.f32 -1.442695, %v10034_v32  ;;  %v11250_v48 = vld [vmem:[#allocation61_spill] sm:$0xff] }
 0x40e   : > { %11240 = vst [vmem:[#allocation73_spill] sm:$0xff] %v10056_v45  ;;  %v10058_v26 = vpop.eup %6709  ;;  %6735 = vpow2.f32 %v5359_v60  ;;  %v5369_v54 = vmul.f32 -1.442695, %v10042_v12  ;;  %v3303_v33 = vadd.f32 1.0, %v6708_v28  ;;  %v10068_v30 = vadd.f32 %v9977_v39, %v9001_v56  ;;  %v11268_v52 = vld [vmem:[#allocation66_spill] sm:$0xff] }
 0x40f   : > { %11241 = vst [vmem:[#allocation22_spill] sm:$0xff] %v10058_v26  ;;  %v6712_v4 = vpop.eup %6711  ;;  %6737 = vrcp.f32 %v3302_v50  ;;  %v10072_v47 = vadd.f32 %v11246_v20, %v9705_v59  ;;  %v4102_v50 = vmul.f32 %v11250_v48, %v11249_v36  ;;  %v5171_v27 = vmul.f32 -1.442695, %v10056_v45  ;;  %v11252_v20 = vld [vmem:[#allocation83_spill] sm:$0xff]  ;;  %v11255_v36 = vld [vmem:[#allocation44_spill] sm:$0xff] }
 0x410   : > { %v6714_v11 = vpop.eup %6713  ;;  %6739 = vpow2.f32 %v5161_v38  ;;  %11245 = vst [vmem:[#allocation13_spill] sm:$0xff] %v10068_v30  ;;  %v10081_v28 = vadd.f32 %v10001_v23, %v9022_v55  ;;  %v1894_v38 = vpop.f32.mrf.mxu0  ;;  %v4603_v39 = vadd.f32 %v4602_v9, %v4093_v8  ;;  %v3105_v32 = vadd.f32 1.0, %v6712_v4 }
 0x411   : > { %11247 = vst [vmem:[#allocation55_spill] sm:$0xff] %v10072_v47  ;;  %v10074_v60 = vpop.eup %6715  ;;  %6741 = vpow2.f32 %v5368_v1  ;;  %v10085_v41 = vadd.f32 %v11252_v20, %v9718_v2  ;;  %v11256_v1 = vld [vmem:[#allocation63_spill] sm:$0xff]  ;;  %v3312_v45 = vadd.f32 1.0, %v6714_v11  ;;  %v10092_v23 = vadd.f32 %v1888_v6, %v9001_v56 }
 0x412   : > { %11248 = vst [vmem:[#allocation76_spill] sm:$0xff] %v10074_v60  ;;  %11251 = vst [vmem:[#allocation38_spill] sm:$0xff] %v10081_v28  ;;  %v6718_v29 = vpop.eup %6717  ;;  %6743 = vrcp.f32 %v3104_v34  ;;  %v10087_v60 = vpop.f32.mrf.mxu1  ;;  %v4103_v48 = vmul.f32 %v11256_v1, %v11255_v36  ;;  %v5378_v8 = vmul.f32 -1.442695, %v10068_v30  ;;  %v5180_v34 = vmul.f32 -1.442695, %v10072_v47 }
 0x413   : > { %11253 = vst [vmem:[#allocation58_spill] sm:$0xff] %v10085_v41  ;;  %11254 = vst [vmem:[#allocation20_spill] sm:$0xff] %v10087_v60  ;;  %v6720_v10 = vpop.eup %6719  ;;  %6745 = vpow2.f32 %v5170_v43  ;;  %v3114_v9 = vadd.f32 1.0, %v6718_v29  ;;  %v4567_v20 = vadd.f32 %v4566_v49, %v4102_v50  ;;  %v5379_v60 = vmul.f32 -1.442695, %v10081_v28  ;;  %v11259_v36 = vld [vmem:[#allocation89_spill] sm:$0xff]  ;;  %v1896_v43 = vpop.f32.mrf.mxu0 }
 0x414   : > { %11257 = vst [vmem:[#allocation21_spill] sm:$0xff] %v10092_v23  ;;  %v10094_v12 = vpop.eup %6721  ;;  %6747 = vrcp.f32 %v3303_v33  ;;  %v10101_v11 = vadd.f32 %v11259_v36, %v9705_v59  ;;  %v11262_v1 = vld [vmem:[#allocation47_spill] sm:$0xff]  ;;  %v3313_v29 = vadd.f32 1.0, %v6720_v10  ;;  %v10108_v30 = vadd.f32 %v1890_v42, %v9022_v55  ;;  %v10110_v47 = vpop.f32.mrf.mxu1  ;;  %v11269_v10 = vld [vmem:[#allocation93_spill] sm:$0xff] }
 0x415   : > { %11258 = vst [vmem:[#allocation79_spill] sm:$0xff] %v10094_v12  ;;  %v6724_v4 = vpop.eup %6723  ;;  %6749 = vpow2.f32 %v5369_v54  ;;  %v4112_v33 = vmul.f32 %v11263_v46, %v11262_v1  ;;  %11265 = vst [vmem:[#allocation42_spill] sm:$0xff] %v10110_v47  ;;  %v4604_v54 = vadd.f32 %v4603_v39, %v4103_v48  ;;  %v5181_v50 = vmul.f32 -1.442695, %v10085_v41  ;;  %v11271_v1 = vld [vmem:[#allocation49_spill] sm:$0xff]  ;;  %v1898_v41 = vpop.f32.mrf.mxu0 }
 0x416   : > { %11260 = vst [vmem:[#allocation40_spill] sm:$0xff] %v10101_v11  ;;  %v10103_v6 = vpop.eup %6725  ;;  %6751 = vrcp.f32 %v3105_v32  ;;  %11264 = vst [vmem:[#allocation80_spill] sm:$0xff] %v10108_v30  ;;  %v5388_v36 = vmul.f32 -1.442695, %v10092_v23  ;;  %v3115_v32 = vadd.f32 1.0, %v6724_v4  ;;  %v10120_v42 = vadd.f32 %v11269_v10, %v9718_v2  ;;  %v11272_v47 = vld [vmem:[#allocation69_spill] sm:$0xff] }
 0x417   : > { %11261 = vst [vmem:[#allocation59_spill] sm:$0xff] %v10103_v6  ;;  %v6728_v49 = vpop.eup %6727  ;;  %6753 = vrcp.f32 %v3312_v45  ;;  %v11267_v6 = vld [vmem:[#allocation48_spill] sm:$0xff]  ;;  %v4122_v39 = vmul.f32 %v11272_v47, %v11271_v1  ;;  %v10125_v45 = vmul.f32 -1.442695, %v10101_v11  ;;  %v10128_v48 = vadd.f32 %v1894_v38, %v9001_v56  ;;  %v11275_v47 = vld [vmem:[#allocation97_spill] sm:$0xff] }
 0x418   : > { %v10114_v28 = vpop.eup %6729  ;;  %v4113_v26 = vmul.f32 %v11268_v52, %v11267_v6  ;;  %6755 = vrcp.f32 %v3114_v9  ;;  %11270 = vst [vmem:[#allocation83_spill] sm:$0xff] %v10120_v42  ;;  %v4568_v52 = vadd.f32 %v4567_v20, %v4112_v33  ;;  %v3322_v9 = vadd.f32 1.0, %v6728_v49  ;;  %v10135_v6 = vpop.f32.mrf.mxu1  ;;  %v11278_v1 = vld [vmem:[#allocation100_spill] sm:$0xff] }
 0x419   : > { %11266 = vst [vmem:[#allocation61_spill] sm:$0xff] %v10114_v28  ;;  %v6732_v46 = vpop.eup %6731  ;;  %6757 = vpow2.f32 %v5171_v27  ;;  %v10133_v4 = vmul.f32 -1.442695, %v10108_v30  ;;  %11274 = vst [vmem:[#allocation63_spill] sm:$0xff] %v10135_v6  ;;  %v10139_v27 = vadd.f32 %v11275_v47, %v9705_v59  ;;  %v10142_v38 = vadd.f32 %v1896_v43, %v9022_v55  ;;  %v11281_v6 = vld [vmem:[#allocation52_spill] sm:$0xff]  ;;  %v11282_v47 = vld [vmem:[#allocation71_spill] sm:$0xff]  ;;  %v1900_v28 = vpop.f32.mrf.mxu0 }
 0x41a   : > { %v10130_v23 = vpop.eup %6733  ;;  %6759 = vrcp.f32 %v3313_v29  ;;  %v10146_v11 = vadd.f32 %v11278_v1, %v9718_v2  ;;  %v4605_v33 = vadd.f32 %v4604_v54, %v4113_v26  ;;  %v3124_v29 = vadd.f32 1.0, %v6732_v46  ;;  %v11283_v26 = vld [vmem:[#allocation106_spill] sm:$0xff] }
 0x41b   : > { %11273 = vst [vmem:[#allocation44_spill] sm:$0xff] %v10130_v23  ;;  %v6736_v10 = vpop.eup %6735  ;;  %6761 = vpow2.f32 %v5378_v8  ;;  %11276 = vst [vmem:[#allocation89_spill] sm:$0xff] %v10139_v27  ;;  %v10151_v49 = vmul.f32 -1.442695, %v10120_v42  ;;  %v4569_v23 = vadd.f32 %v4568_v52, %v4122_v39  ;;  %v4123_v30 = vmul.f32 %v11282_v47, %v11281_v6 }
 0x41c   : > { %11277 = vst [vmem:[#allocation47_spill] sm:$0xff] %v10142_v38  ;;  %11279 = vst [vmem:[#allocation65_spill] sm:$0xff] %v10146_v11  ;;  %v10148_v20 = vpop.eup %6737  ;;  %6763 = vrcp.f32 %v3115_v32  ;;  %v5398_v43 = vmul.f32 -1.442695, %v10128_v48  ;;  %v3323_v1 = vadd.f32 1.0, %v6736_v10  ;;  %v10161_v54 = vadd.f32 %v11283_v26, %v9705_v59  ;;  %v10163_v32 = vpop.f32.mrf.mxu1 }
 0x41d   : > { %11280 = vst [vmem:[#allocation48_spill] sm:$0xff] %v10148_v20  ;;  %v6740_v8 = vpop.eup %6739  ;;  %6765 = vpow2.f32 %v5180_v34  ;;  %v10157_v20 = vadd.f32 %v1898_v41, %v9001_v56  ;;  %11285 = vst [vmem:[#allocation93_spill] sm:$0xff] %v10163_v32  ;;  %v10168_v34 = vmul.f32 -1.442695, %v10139_v27  ;;  %v10171_v39 = vmul.f32 -1.442695, %v10142_v38 }
 0x41e   : > { %v6742_v12 = vpop.eup %6741  ;;  %6767 = vrcp.f32 %v3322_v9  ;;  %11284 = vst [vmem:[#allocation66_spill] sm:$0xff] %v10161_v54  ;;  %v10174_v52 = vmul.f32 -1.442695, %v10146_v11  ;;  %v11287_v41 = vld [vmem:[#allocation26_spill] sm:$0xff]  ;;  %v11288_v9 = vld [vmem:[#allocation75_spill] sm:$0xff]  ;;  %v3125_v10 = vadd.f32 1.0, %v6740_v8  ;;  %v10179_v47 = vadd.f32 %v1900_v28, %v9022_v55  ;;  %v10195_v28 = vpop.f32.mrf.mxu1 }
 0x41f   : > { %v10165_v46 = vpop.eup %6743  ;;  %6769 = vpow2.f32 %v5379_v60  ;;  %v4132_v6 = vmul.f32 %v11288_v9, %v11287_v41  ;;  %v4606_v60 = vadd.f32 %v4605_v33, %v4123_v30  ;;  %v3332_v27 = vadd.f32 1.0, %v6742_v12  ;;  %v11292_v32 = vld [vmem:[#allocation78_spill] sm:$0xff]  ;;  %11293 = vst [vmem:[#allocation100_spill] sm:$0xff] %v10195_v28 }
 0x420   : > { %11286 = vst [vmem:[#allocation49_spill] sm:$0xff] %v10165_v46  ;;  %v6746_v56 = vpop.eup %6745  ;;  %6771 = vrcp.f32 %v3124_v29  ;;  %11289 = vst [vmem:[#allocation69_spill] sm:$0xff] %v10179_v47  ;;  %v10185_v42 = vadd.f32 %v9771_v21, %v9718_v2  ;;  %v11291_v46 = vld [vmem:[#allocation24_spill] sm:$0xff]  ;;  %v10190_v29 = vmul.f32 -1.442695, %v10157_v20  ;;  %v10201_v21 = vadd.f32 %v9804_v51, %v9705_v59  ;;  %v11313_v28 = vld [vmem:[#allocation98_spill] sm:$0xff] }
 0x421   : > { %v10181_v26 = vpop.eup %6747  ;;  %6773 = vpow2.f32 %v5181_v50  ;;  %v4133_v38 = vmul.f32 %v11292_v32, %v11291_v46  ;;  %v10193_v55 = vmul.f32 -1.442695, %v10161_v54  ;;  %v3134_v12 = vadd.f32 1.0, %v6746_v56  ;;  %v11298_v32 = vld [vmem:[#allocation81_spill] sm:$0xff]  ;;  %v11302_v54 = vld [vmem:[#allocation84_spill] sm:$0xff] }
 0x422   : > { %11290 = vst [vmem:[#allocation97_spill] sm:$0xff] %v10185_v42  ;;  %v6750_v11 = vpop.eup %6749  ;;  %6775 = vrcp.f32 %v3323_v1  ;;  %11295 = vst [vmem:[#allocation71_spill] sm:$0xff] %v10201_v21  ;;  %v10205_v50 = vadd.f32 %v9824_v13, %v9718_v2  ;;  %v4570_v8 = vadd.f32 %v4569_v23, %v4132_v6  ;;  %v11297_v1 = vld [vmem:[#allocation15_spill] sm:$0xff]  ;;  %v10212_v41 = vmul.f32 -1.442695, %v10179_v47  ;;  %v11301_v6 = vld [vmem:[#allocation56_spill] sm:$0xff] }
 0x423   : > { %v10197_v30 = vpop.eup %6751  ;;  %6777 = vpow2.f32 %v5388_v36  ;;  %v4142_v46 = vmul.f32 %v11298_v32, %v11297_v1  ;;  %v3333_v36 = vadd.f32 1.0, %v6750_v11  ;;  %v10217_v51 = vmul.f32 -1.442695, %v10185_v42  ;;  %v11305_v32 = vld [vmem:[#allocation32_spill] sm:$0xff]  ;;  %v11306_v42 = vld [vmem:[#allocation87_spill] sm:$0xff] }
 0x424   : > { %11294 = vst [vmem:[#allocation52_spill] sm:$0xff] %v10197_v30  ;;  %11296 = vst [vmem:[#allocation106_spill] sm:$0xff] %v10205_v50  ;;  %v10207_v33 = vpop.eup %6753  ;;  %6779 = vrcp.f32 %v3125_v10  ;;  %v10221_v13 = vadd.f32 %v9843_v44, %v9705_v59  ;;  %v4607_v23 = vadd.f32 %v4606_v60, %v4133_v38  ;;  %v4143_v1 = vmul.f32 %v11302_v54, %v11301_v6  ;;  %v11307_v60 = vld [vmem:[#allocation60_spill] sm:$0xff]  ;;  %v11308_v6 = vld [vmem:[#allocation91_spill] sm:$0xff] }
 0x425   : > { %v10214_v56 = vpop.eup %6755  ;;  %6781 = vrcp.f32 %v3332_v27  ;;  %v10228_v10 = vadd.f32 %v9857_v5, %v9718_v2  ;;  %v10230_v27 = vpop.f32.mrf.mxu1  ;;  %v10237_v44 = vmul.f32 -1.442695, %v10201_v21  ;;  %v10240_v38 = vmul.f32 -1.442695, %v10205_v50 }
 0x426   : > { %11299 = vst [vmem:[#allocation26_spill] sm:$0xff] %v10214_v56  ;;  %11300 = vst [vmem:[#allocation75_spill] sm:$0xff] %v10221_v13  ;;  %v6758_v9 = vpop.eup %6757  ;;  %6783 = vpow2.f32 %v10133_v4  ;;  %v4152_v56 = vmul.f32 %v11306_v42, %v11305_v32  ;;  %v4571_v4 = vadd.f32 %v4570_v8, %v4142_v46  ;;  %v4153_v5 = vmul.f32 %v11308_v6, %v11307_v60  ;;  %v11310_v42 = vld [vmem:[#allocation62_spill] sm:$0xff]  ;;  %v11312_v46 = vld [vmem:[#allocation64_spill] sm:$0xff] }
 0x427   : > { %11303 = vst [vmem:[#allocation24_spill] sm:$0xff] %v10228_v10  ;;  %11304 = vst [vmem:[#allocation78_spill] sm:$0xff] %v10230_v27  ;;  %v10232_v11 = vpop.eup %6759  ;;  %6785 = vrcp.f32 %v3134_v12  ;;  %v10246_v30 = vadd.f32 %v9871_v14, %v9705_v59  ;;  %v11311_v12 = vld [vmem:[#allocation95_spill] sm:$0xff]  ;;  %v3135_v21 = vadd.f32 1.0, %v6758_v9  ;;  %v10253_v50 = vmul.f32 -1.442695, %v10221_v13 }
 0x428   : > { %v6762_v54 = vpop.eup %6761  ;;  %6787 = vpow2.f32 %v5398_v43  ;;  %v4162_v32 = vmul.f32 %v11311_v12, %v11310_v42  ;;  %v4608_v8 = vadd.f32 %v4607_v23, %v4143_v1  ;;  %v4163_v60 = vmul.f32 %v11313_v28, %v11312_v46  ;;  %v10261_v43 = vpop.f32.mrf.mxu1  ;;  %v11316_v9 = vld [vmem:[#allocation102_spill] sm:$0xff] }
 0x429   : > { %v10248_v27 = vpop.eup %6763  ;;  %6789 = vrcp.f32 %v3333_v36  ;;  %v10259_v14 = vmul.f32 -1.442695, %v10228_v10  ;;  %11314 = vst [vmem:[#allocation81_spill] sm:$0xff] %v10261_v43  ;;  %v4572_v42 = vadd.f32 %v4571_v4, %v4152_v56  ;;  %v11315_v36 = vld [vmem:[#allocation68_spill] sm:$0xff]  ;;  %v3342_v13 = vadd.f32 1.0, %v6762_v54  ;;  %v11318_v56 = vld [vmem:[#allocation74_spill] sm:$0xff] }
 0x42a   : > { %11309 = vst [vmem:[#allocation15_spill] sm:$0xff] %v10248_v27  ;;  %v6766_v47 = vpop.eup %6765  ;;  %6791 = vpow2.f32 %v10125_v45  ;;  %v4172_v12 = vmul.f32 %v11316_v9, %v11315_v36  ;;  %v4609_v1 = vadd.f32 %v4608_v8, %v4153_v5  ;;  %v11317_v27 = vld [vmem:[#allocation72_spill] sm:$0xff]  ;;  %v10272_v45 = vmul.f32 -1.442695, %v10246_v30  ;;  %v11320_v8 = vld [vmem:[#allocation82_spill] sm:$0xff] }
 0x42b   : > { %v10263_v6 = vpop.eup %6767  ;;  %6793 = vpow2.f32 %v10151_v49  ;;  %v4173_v28 = vmul.f32 %v9768_v19, %v11317_v27  ;;  %v4573_v10 = vadd.f32 %v4572_v42, %v4162_v32  ;;  %v11319_v4 = vld [vmem:[#allocation108_spill] sm:$0xff]  ;;  %v3144_v54 = vadd.f32 1.0, %v6766_v47  ;;  %v10287_v27 = vpop.f32.mrf.mxu1  ;;  %v11321_v42 = vld [vmem:[#allocation77_spill] sm:$0xff] }
 0x42c   : > { %v6770_v23 = vpop.eup %6769  ;;  %6795 = vpow2.f32 %v10171_v39  ;;  %v4182_v43 = vmul.f32 %v11319_v4, %v11318_v56  ;;  %v4610_v49 = vadd.f32 %v4609_v1, %v4163_v60  ;;  %v10281_v19 = vadd.f32 %v9890_v58, %v9718_v2  ;;  %v11328_v4 = vld [vmem:[#allocation96_spill] sm:$0xff] }
 0x42d   : > { %v10274_v46 = vpop.eup %6771  ;;  %6797 = vrcp.f32 %v3135_v21  ;;  %v10285_v39 = vadd.f32 %v9910_v40, %v9705_v59  ;;  %v4574_v32 = vadd.f32 %v4573_v10, %v4172_v12  ;;  %v4192_v47 = vmul.f32 %v9859_v0, %v11320_v8  ;;  %v11322_v10 = vld [vmem:[#allocation88_spill] sm:$0xff] }
 0x42e   : > { %v6774_v36 = vpop.eup %6773  ;;  %6799 = vpow2.f32 %v10168_v34  ;;  %v3343_v21 = vadd.f32 1.0, %v6770_v23  ;;  %v4611_v34 = vadd.f32 %v4610_v49, %v4173_v28  ;;  %v4183_v58 = vmul.f32 %v9820_v15, %v11321_v42  ;;  %v11323_v23 = vld [vmem:[#allocation85_spill] sm:$0xff]  ;;  %v10309_v15 = vpop.f32.mrf.mxu1  ;;  %v11329_v49 = vld [vmem:[#allocation92_spill] sm:$0xff] }
 0x42f   : > { %v10289_v5 = vpop.eup %6775  ;;  %6801 = vrcp.f32 %v3342_v13  ;;  %v10298_v40 = vadd.f32 %v9931_v22, %v9718_v2  ;;  %v4575_v1 = vadd.f32 %v4574_v32, %v4182_v43  ;;  %v4202_v12 = vmul.f32 %v9899_v25, %v11322_v10 }
 0x430   : > { %v6778_v60 = vpop.eup %6777  ;;  %6803 = vpow2.f32 %v10190_v29  ;;  %v3145_v0 = vadd.f32 1.0, %v6774_v36  ;;  %v4193_v28 = vmul.f32 %v9873_v18, %v11323_v23  ;;  %v11324_v29 = vlaneseq }
 0x431   : > { %v10300_v9 = vpop.eup %6779  ;;  %6805 = vrcp.f32 %v3144_v54  ;;  %v11325_v22 = vmov 0  ;;  %v4576_v56 = vadd.f32 %v4575_v1, %v4192_v47  ;;  %v4212_v25 = vmul.f32 %v9920_v62, %v11328_v4  ;;  %v11330_v1 = vld [vmem:[#allocation101_spill] sm:$0xff] }
 0x432   : > { %v10304_v13 = vpop.eup %6781  ;;  %6807 = vpow2.f32 %v10174_v52  ;;  %vm10312_vm4 = vcmp.lt.s32.totalorder %v11324_v29, 256  ;;  %v3352_v54 = vadd.f32 1.0, %v6778_v60  ;;  %v7156_v36 = vmov 0.0  }
 0x433   : > { %v11326_v22 = vsel %vm10312_vm4, 4294967295, %v11325_v22  ;;  %v6784_v43 = vpop.eup %6783  ;;  %6809 = vrcp.f32 %v3343_v21  ;;  %316 = vst.msk [vmem:[#allocation2 + $0x8] sm:$0x3] %vm10312_vm4, %v7156_v36  ;;  %v4612_v52 = vadd.f32 %v4611_v34, %v4183_v58  ;;  %v4203_v32 = vmul.f32 %v9912_v24, %v11329_v49  ;;  %v10336_v34 = vpop.f32.mrf.mxu1 }
 0x434   : > { %11327 = vst [vmem:[#allocation56_spill] sm:$0xff] %v11326_v22  ;;  %v10320_v18 = vpop.eup %6785  ;;  %v3353_v8 = vadd.f32 1.0, %v6784_v43  ;;  %6811 = vpow2.f32 %v10212_v41  ;;  %v4577_v47 = vadd.f32 %v4576_v56, %v4202_v12  ;;  %v4222_v62 = vmul.f32 %v9941_v57, %v11330_v1  ;;  %v11331_v12 = vld [vmem:[#allocation99_spill] sm:$0xff] }
 0x435   : > { %v6788_v42 = vpop.eup %6787  ;;  %6813 = vrcp.f32 %v3145_v0  ;;  %v10328_v21 = vmul.f32 -1.442695, %v10281_v19  ;;  %v4613_v10 = vadd.f32 %v4612_v52, %v4193_v28  ;;  %v10334_v24 = vmul.f32 -1.442695, %v10285_v39  ;;  %v11332_v0 = vld [vmem:[#allocation25_spill] sm:$0xff] }
 0x436   : > { %v10330_v60 = vpop.eup %6789  ;;  %v3362_v23 = vadd.f32 1.0, %v6788_v42  ;;  %6815 = vpow2.f32 %v10193_v55  ;;  %v4578_v58 = vadd.f32 %v4577_v47, %v4212_v25  ;;  %v4213_v57 = vmul.f32 %v9933_v63, %v11331_v12  ;;  %v11333_v25 = vld [vmem:[#allocation104_spill] sm:$0xff]  ;;  %v11339_v12 = vld [vmem:[#allocation22_spill] sm:$0xff] }
 0x437   : > { %v6792_v41 = vpop.eup %6791  ;;  %v4232_v29 = vmul.f32 %v9988_v37, %v11332_v0  ;;  %6817 = vrcp.f32 %v3352_v54  ;;  %v4614_v56 = vadd.f32 %v4613_v10, %v4203_v32  ;;  %v10343_v28 = vmul.f32 -1.442695, %v10298_v40 }
 0x438   : > { %v6794_v43 = vpop.eup %6793  ;;  %6819 = vrcp.f32 %v3353_v8  ;;  %v10347_v55 = vadd.f32 %v9957_v61, %v9705_v59  ;;  %v4579_v36 = vadd.f32 %v4578_v58, %v4222_v62  ;;  %v4223_v52 = vmul.f32 %v9959_v16, %v11333_v25  ;;  %v10360_v61 = vpop.f32.mrf.mxu1  ;;  %v11338_v58 = vld [vmem:[#allocation109_spill] sm:$0xff]  ;;  %v11342_v25 = vld [vmem:[#allocation86_spill] sm:$0xff] }
 0x439   : > { %v6796_v4 = vpop.eup %6795  ;;  %v4242_v63 = vmul.f32 %v10027_v31, %v9789_v17  ;;  %6821 = vpow2.f32 %v10217_v51  ;;  %v3154_v54 = vadd.f32 1.0, %v6792_v41  ;;  %v10358_v32 = vadd.f32 %v9986_v7, %v9718_v2  ;;  %v11335_v31 = vld [vmem:[#allocation79_spill] sm:$0xff]  ;;  %v11336_v7 = vld [vmem:[#allocation17_spill] sm:$0xff] }
 0x43a   : > { %v10354_v37 = vpop.eup %6797  ;;  %6823 = vrcp.f32 %v3362_v23  ;;  %v3363_v49 = vadd.f32 1.0, %v6796_v4  ;;  %v4615_v42 = vadd.f32 %v4614_v56, %v4213_v57  ;;  %v4580_v47 = vadd.f32 %v4579_v36, %v4232_v29  ;;  %v10381_v56 = vpop.f32.mrf.mxu1 }
 0x43b   : > { %11334 = vst [vmem:[#allocation84_spill] sm:$0xff] %v10358_v32  ;;  %v6800_v8 = vpop.eup %6799  ;;  %v4233_v16 = vmul.f32 %v10010_v53, %v9779_v3  ;;  %6825 = vpow2.f32 %v10237_v44  ;;  %v4252_v51 = vmul.f32 %v11335_v31, %v9849_v35  ;;  %v10368_v1 = vmul.f32 -1.442695, %v10347_v55  ;;  %v11340_v44 = vld [vmem:[#allocation57_spill] sm:$0xff]  ;;  %v11341_v35 = vld [vmem:[#allocation48_spill] sm:$0xff] }
 0x43c   : > { %v6802_v17 = vpop.eup %6801  ;;  %6827 = vrcp.f32 %v3363_v49  ;;  %v10372_v62 = vadd.f32 %v11336_v7, %v9705_v59  ;;  %v4616_v23 = vadd.f32 %v4615_v42, %v4223_v52  ;;  %v4581_v41 = vadd.f32 %v4580_v47, %v4242_v63  ;;  %v11343_v52 = vld [vmem:[#allocation61_spill] sm:$0xff]  ;;  %v11344_v47 = vld [vmem:[#allocation28_spill] sm:$0xff] }
 0x43d   : > { %v6804_v10 = vpop.eup %6803  ;;  %v4243_v3 = vmul.f32 %v11339_v12, %v11338_v58  ;;  %6829 = vpow2.f32 %v10240_v38  ;;  %v4262_v57 = vmul.f32 %v11341_v35, %v11340_v44  ;;  %v3155_v0 = vadd.f32 1.0, %v6794_v43  ;;  %v10405_v44 = vpop.f32.mrf.mxu1 }
 0x43e   : > { %11337 = vst [vmem:[#allocation32_spill] sm:$0xff] %v10372_v62  ;;  %v10377_v53 = vpop.eup %6805  ;;  %6831 = vrcp.f32 %v3154_v54  ;;  %v3372_v29 = vadd.f32 1.0, %v6804_v10  ;;  %v4617_v36 = vadd.f32 %v4616_v23, %v4233_v16  ;;  %v4253_v63 = vmul.f32 %v11343_v52, %v11342_v25  ;;  %v11345_v16 = vld [vmem:[#allocation30_spill] sm:$0xff] }
 0x43f   : > { %v6808_v4 = vpop.eup %6807  ;;  %6833 = vpow2.f32 %v10253_v50  ;;  %v10387_v49 = vmul.f32 -1.442695, %v10358_v32  ;;  %v4582_v42 = vadd.f32 %v4581_v41, %v4252_v51  ;;  %v4272_v31 = vmul.f32 %v10207_v33, %v11344_v47  ;;  %v11346_v50 = vld [vmem:[#allocation51_spill] sm:$0xff]  ;;  %v11348_v41 = vld [vmem:[#allocation16_spill] sm:$0xff]  ;;  %v11350_v52 = vld [vmem:[#allocation50_spill] sm:$0xff] }
 0x440   : > { %v6810_v38 = vpop.eup %6809  ;;  %6835 = vrcp.f32 %v3372_v29  ;;  %v10392_v43 = vmul.f32 -1.442695, %v10372_v62  ;;  %v4618_v7 = vadd.f32 %v4617_v36, %v4243_v3  ;;  %v4263_v10 = vmul.f32 %v10181_v26, %v11345_v16  ;;  %v11349_v29 = vld [vmem:[#allocation34_spill] sm:$0xff]  ;;  %v10422_v16 = vpop.f32.mrf.mxu1  ;;  %v11406_v32 = vld [vmem:[#allocation53_spill] sm:$0xff] }
 0x441   : > { %v6812_v54 = vpop.eup %6811  ;;  %6837 = vpow2.f32 %v10259_v14  ;;  %v10399_v23 = vadd.f32 %v11346_v50, %v9718_v2  ;;  %v4583_v51 = vadd.f32 %v4582_v42, %v4262_v57  ;;  %v4282_v33 = vmul.f32 %v10263_v6, %v11348_v41  ;;  %v11351_v6 = vld [vmem:[#allocation54_spill] sm:$0xff] }
 0x442   : > { %v10401_v58 = vpop.eup %6813  ;;  %6839 = vrcp.f32 %v3155_v0  ;;  %v3373_v12 = vadd.f32 1.0, %v6812_v54  ;;  %v4619_v35 = vadd.f32 %v4618_v7, %v4253_v63  ;;  %v4273_v26 = vmul.f32 %v10232_v11, %v11349_v29  ;;  %v11353_v54 = vld [vmem:[#allocation45_spill] sm:$0xff]  ;;  %v11355_v41 = vld [vmem:[#allocation70_spill] sm:$0xff] }
 0x443   : > { %11347 = vst [vmem:[#allocation87_spill] sm:$0xff] %v10399_v23  ;;  %v6816_v3 = vpop.eup %6815  ;;  %v3164_v14 = vadd.f32 1.0, %v6800_v8  ;;  %6841 = vpow2.f32 %v10272_v45  ;;  %v4584_v25 = vadd.f32 %v4583_v51, %v4272_v31  ;;  %v4292_v57 = vmul.f32 %v10304_v13, %v11350_v52  ;;  %v11354_v8 = vld [vmem:[#allocation13_spill] sm:$0xff]  ;;  %v11357_v29 = vld [vmem:[#allocation38_spill] sm:$0xff] }
 0x444   : > { %v6818_v36 = vpop.eup %6817  ;;  %6843 = vrcp.f32 %v3373_v12  ;;  %v10414_v0 = vadd.f32 %v11351_v6, %v9705_v59  ;;  %v4620_v47 = vadd.f32 %v4619_v35, %v4263_v10  ;;  %v4283_v63 = vmul.f32 %v10289_v5, %v11353_v54 }
 0x445   : > { %v6820_v42 = vpop.eup %6819  ;;  %v3165_v7 = vadd.f32 1.0, %v6808_v4  ;;  %6845 = vpow2.f32 %v10328_v21  ;;  %v4585_v45 = vadd.f32 %v4584_v25, %v4282_v33  ;;  %v4302_v31 = vmul.f32 %v6802_v17, %v11354_v8  ;;  %v11356_v21 = vld [vmem:[#allocation21_spill] sm:$0xff] }
 0x446   : > { %11352 = vst [vmem:[#allocation60_spill] sm:$0xff] %v10414_v0  ;;  %v6822_v11 = vpop.eup %6821  ;;  %6847 = vpow2.f32 %v10334_v24  ;;  %v5271_v13 = vmul.f32 -1.442695, %v10399_v23  ;;  %v4621_v51 = vadd.f32 %v4620_v47, %v4273_v26  ;;  %v4293_v10 = vmul.f32 %v10330_v60, %v11355_v41  ;;  %v11360_v47 = vld [vmem:[#allocation80_spill] sm:$0xff]  ;;  %v11402_v23 = vld [vmem:[#allocation110_spill] sm:$0xff] }
 0x447   : > { %v6824_v50 = vpop.eup %6823  ;;  %6849 = vrcp.f32 %v3164_v14  ;;  %v3174_v5 = vadd.f32 1.0, %v6816_v3  ;;  %v4586_v12 = vadd.f32 %v4585_v45, %v4292_v57  ;;  %v4312_v35 = vmul.f32 %v6818_v36, %v11356_v21  ;;  %v11358_v3 = vld [vmem:[#allocation20_spill] sm:$0xff]  ;;  %v10436_v36 = vpop.f32.mrf.mxu1 }
 0x448   : > { %v6826_v4 = vpop.eup %6825  ;;  %6851 = vpow2.f32 %v10343_v28  ;;  %v5280_v17 = vmul.f32 -1.442695, %v10414_v0  ;;  %v4622_v33 = vadd.f32 %v4621_v51, %v4283_v63  ;;  %v4303_v25 = vmul.f32 %v6810_v38, %v11357_v29  ;;  %v11400_v0 = vld [vmem:[#allocation105_spill] sm:$0xff] }
 0x449   : > { %v6828_v24 = vpop.eup %6827  ;;  %6853 = vrcp.f32 %v3165_v7  ;;  %v3175_v52 = vadd.f32 1.0, %v6822_v11  ;;  %v4587_v6 = vadd.f32 %v4586_v12, %v4302_v31  ;;  %v4322_v60 = vmul.f32 %v6824_v50, %v10128_v48  ;;  %v11361_v48 = vld [vmem:[#allocation42_spill] sm:$0xff]  ;;  %v11363_v11 = vld [vmem:[#allocation63_spill] sm:$0xff] }
 0x44a   : > { %v6830_v26 = vpop.eup %6829  ;;  %6855 = vpow2.f32 %v10368_v1  ;;  %v10434_v14 = vadd.f32 %v11358_v3, %v9718_v2  ;;  %v4623_v57 = vadd.f32 %v4622_v33, %v4293_v10  ;;  %v4313_v54 = vmul.f32 %v6820_v42, %v11360_v47  ;;  %v11365_v50 = vld [vmem:[#allocation47_spill] sm:$0xff] }
 0x44b   : > { %v10438_v28 = vpop.eup %6831  ;;  %6857 = vrcp.f32 %v3174_v5  ;;  %v3184_v38 = vadd.f32 1.0, %v6826_v4  ;;  %v4588_v7 = vadd.f32 %v4587_v6, %v4312_v35  ;;  %v10444_v1 = vadd.f32 %v11361_v48, %v9705_v59  ;;  %v11366_v35 = vld [vmem:[#allocation93_spill] sm:$0xff] }
 0x44c   : > { %11359 = vst [vmem:[#allocation91_spill] sm:$0xff] %v10434_v14  ;;  %v6834_v63 = vpop.eup %6833  ;;  %6859 = vpow2.f32 %v10387_v49  ;;  %v10448_v45 = vadd.f32 %v11363_v11, %v9718_v2  ;;  %v4624_v31 = vadd.f32 %v4623_v57, %v4303_v25  ;;  %v4323_v51 = vmul.f32 %v6828_v24, %v11365_v50  ;;  %v10453_v49 = vpop.f32.mrf.mxu1  ;;  %v11368_v24 = vld [vmem:[#allocation100_spill] sm:$0xff] }
 0x44d   : > { %11362 = vst [vmem:[#allocation62_spill] sm:$0xff] %v10444_v1  ;;  %v6836_v8 = vpop.eup %6835  ;;  %6861 = vrcp.f32 %v3175_v52  ;;  %v3185_v42 = vadd.f32 1.0, %v6830_v26  ;;  %v4589_v10 = vadd.f32 %v4588_v7, %v4322_v60  ;;  %v3194_v4 = vadd.f32 1.0, %v6834_v63 }
 0x44e   : > { %11364 = vst [vmem:[#allocation95_spill] sm:$0xff] %v10448_v45  ;;  %v6838_v41 = vpop.eup %6837  ;;  %v4332_v5 = vmul.f32 %v6836_v8, %v10157_v20  ;;  %6863 = vpow2.f32 %v10392_v43  ;;  %v4625_v21 = vadd.f32 %v4624_v31, %v4313_v54  ;;  %v10459_v33 = vadd.f32 %v11366_v35, %v9705_v59  ;;  %v11370_v54 = vld [vmem:[#allocation69_spill] sm:$0xff]  ;;  %v10469_v7 = vpop.f32.mrf.mxu1  ;;  %v11371_v8 = vld [vmem:[#allocation78_spill] sm:$0xff] }
 0x44f   : > { %v10455_v12 = vpop.eup %6839  ;;  %6865 = vrcp.f32 %v3184_v38  ;;  %v10463_v29 = vadd.f32 %v11368_v24, %v9718_v2  ;;  %v3195_v20 = vadd.f32 1.0, %v6838_v41  ;;  %v5281_v43 = vmul.f32 -1.442695, %v10434_v14  ;;  %v11399_v14 = vld [vmem:[#allocation19_spill] sm:$0xff] }
 0x450   : > { %11367 = vst [vmem:[#allocation64_spill] sm:$0xff] %v10459_v33  ;;  %v6842_v25 = vpop.eup %6841  ;;  %v4590_v52 = vadd.f32 %v4589_v10, %v4332_v5  ;;  %6867 = vpow2.f32 %v5271_v13  ;;  %v4626_v6 = vadd.f32 %v4625_v21, %v4323_v51  ;;  %v5290_v60 = vmul.f32 -1.442695, %v10444_v1  ;;  %v11373_v5 = vld [vmem:[#allocation81_spill] sm:$0xff]  ;;  %v11398_v1 = vld [vmem:[#allocation107_spill] sm:$0xff] }
 0x451   : > { %11369 = vst [vmem:[#allocation98_spill] sm:$0xff] %v10463_v29  ;;  %v6844_v26 = vpop.eup %6843  ;;  %6869 = vrcp.f32 %v3185_v42  ;;  %v5291_v3 = vmul.f32 -1.442695, %v10448_v45  ;;  %v3204_v63 = vadd.f32 1.0, %v6842_v25  ;;  %v5300_v13 = vmul.f32 -1.442695, %v10459_v33 }
 0x452   : > { %v6846_v57 = vpop.eup %6845  ;;  %v4591_v47 = vrot.slane %v4590_v52, 4  ;;  %v4333_v38 = vmul.f32 %v6844_v26, %v11370_v54  ;;  %6871 = vrcp.f32 %v3194_v4  ;;  %v5301_v11 = vmul.f32 -1.442695, %v10463_v29  ;;  %v11394_v33 = vld [vmem:[#allocation103_spill] sm:$0xff] }
 0x453   : > { %v6848_v48 = vpop.eup %6847  ;;  %6873 = vpow2.f32 %v5280_v17  ;;  %v10475_v31 = vadd.f32 %v11371_v8, %v9705_v59  ;;  %v3205_v41 = vadd.f32 1.0, %v6846_v57  ;;  %v10481_v4 = vadd.f32 %v11373_v5, %v9718_v2 }
 0x454   : > { %v10477_v50 = vpop.eup %6849  ;;  %v4592_v51 = vadd.f32 %v4591_v47, %v4590_v52  ;;  %v4627_v42 = vadd.f32 %v4626_v6, %v4333_v38  ;;  %6875 = vrcp.f32 %v3195_v20  ;;  %v10485_v17 = vadd.f32 %v10287_v27, %v9705_v59  ;;  %v2071_v20 = vpop.f32.mrf.mxu1 }
 0x455   : > { %11372 = vst [vmem:[#allocation68_spill] sm:$0xff] %v10475_v31  ;;  %v6852_v10 = vpop.eup %6851  ;;  %6877 = vpow2.f32 %v5281_v43  ;;  %11374 = vst [vmem:[#allocation102_spill] sm:$0xff] %v10481_v4  ;;  %v10489_v21 = vadd.f32 %v10309_v15, %v9718_v2  ;;  %v3214_v52 = vadd.f32 1.0, %v6848_v48  ;;  %v10495_v26 = vadd.f32 %v10336_v34, %v9705_v59 }
 0x456   : > { %11375 = vst [vmem:[#allocation72_spill] sm:$0xff] %v10485_v17  ;;  %v10491_v35 = vpop.eup %6853  ;;  %v4593_v24 = vrot.slane %v4592_v51, 2  ;;  %v4628_v25 = vrot.slane %v4627_v42, 4  ;;  %6879 = vrcp.f32 %v3204_v63  ;;  %v10499_v27 = vadd.f32 %v10360_v61, %v9718_v2  ;;  %v2073_v5 = vpop.f32.mrf.mxu1 }
 0x457   : > { %11376 = vst [vmem:[#allocation74_spill] sm:$0xff] %v10489_v21  ;;  %v6856_v43 = vpop.eup %6855  ;;  %6881 = vpow2.f32 %v5290_v60  ;;  %11377 = vst [vmem:[#allocation108_spill] sm:$0xff] %v10495_v26  ;;  %v10503_v15 = vadd.f32 %v10381_v56, %v9705_v59  ;;  %v3215_v54 = vadd.f32 1.0, %v6852_v10  ;;  %v5310_v60 = vmul.f32 -1.442695, %v10475_v31 }
 0x458   : > { %11378 = vst [vmem:[#allocation82_spill] sm:$0xff] %v10499_v27  ;;  %v10505_v6 = vpop.eup %6857  ;;  %v4594_v57 = vadd.f32 %v4593_v24, %v4592_v51  ;;  %v4629_v47 = vadd.f32 %v4628_v25, %v4627_v42  ;;  %6883 = vrcp.f32 %v3205_v41  ;;  %v5311_v34 = vmul.f32 -1.442695, %v10481_v4 }
 0x459   : > { %11379 = vst [vmem:[#allocation77_spill] sm:$0xff] %v10503_v15  ;;  %v6860_v38 = vpop.eup %6859  ;;  %6885 = vpow2.f32 %v5291_v3  ;;  %v5320_v63 = vmul.f32 -1.442695, %v10485_v17  ;;  %v3224_v56 = vadd.f32 1.0, %v6856_v43  ;;  %v5321_v8 = vmul.f32 -1.442695, %v10489_v21 }
 0x45a   : > { %v10510_v61 = vpop.eup %6861  ;;  %v4630_v48 = vrot.slane %v4629_v47, 2  ;;  %6887 = vrcp.f32 %v3214_v52  ;;  %v5330_v42 = vmul.f32 -1.442695, %v10495_v26  ;;  %v10515_v3 = vmul.f32 -1.442695, %v10499_v27 }
 0x45b   : > { %v6864_v51 = vpop.eup %6863  ;;  %6889 = vpow2.f32 %v5300_v13  ;;  %v10518_v41 = vmul.f32 -1.442695, %v10503_v15  ;;  %v4595_v24 = vrot.slane %v4594_v57, 1  ;;  %v3225_v52 = vadd.f32 1.0, %v6860_v38 }
 0x45c   : > { %v10520_v10 = vpop.eup %6865  ;;  %v4631_v25 = vadd.f32 %v4630_v48, %v4629_v47  ;;  %6891 = vrcp.f32 %v3215_v54  ;;  %v10524_v22 = vadd.f32 %v10405_v44, %v9718_v2  ;;  %v10528_v13 = vadd.f32 %v10422_v16, %v9705_v59  ;;  %v2077_v54 = vpop.f32.mrf.mxu1 }
 0x45d   : > { %v6868_v43 = vpop.eup %6867  ;;  %6893 = vpow2.f32 %v5301_v11  ;;  %v10532_v15 = vadd.f32 %v10436_v36, %v9718_v2  ;;  %v3234_v47 = vadd.f32 1.0, %v6864_v51  ;;  %v10538_v11 = vadd.f32 %v10453_v49, %v9705_v59 }
 0x45e   : > { %11380 = vst [vmem:[#allocation88_spill] sm:$0xff] %v10524_v22  ;;  %11381 = vst [vmem:[#allocation85_spill] sm:$0xff] %v10528_v13  ;;  %v10534_v27 = vpop.eup %6869  ;;  %v4632_v26 = vrot.slane %v4631_v25, 1  ;;  %6895 = vrcp.f32 %v3224_v56  ;;  %v10544_v16 = vadd.f32 %v10469_v7, %v9718_v2  ;;  %v10547_v36 = vadd.f32 %v2071_v20, %v9705_v59 }
 0x45f   : > { %11382 = vst [vmem:[#allocation96_spill] sm:$0xff] %v10532_v15  ;;  %11383 = vst [vmem:[#allocation92_spill] sm:$0xff] %v10538_v11  ;;  %v10540_v44 = vpop.eup %6871  ;;  %6897 = vpow2.f32 %v5310_v60  ;;  %v10550_v38 = vadd.f32 %v2073_v5, %v9718_v2  ;;  %v4596_v56 = vadd.f32 %v4595_v24, %v4594_v57  ;;  %v3235_v49 = vadd.f32 1.0, %v6868_v43 }
 0x460   : > { %11384 = vst [vmem:[#allocation101_spill] sm:$0xff] %v10544_v16  ;;  %11385 = vst [vmem:[#allocation99_spill] sm:$0xff] %v10547_v36  ;;  %v6874_v48 = vpop.eup %6873  ;;  %v4633_v51 = vadd.f32 %v4632_v26, %v4631_v25  ;;  %6899 = vrcp.f32 %v3225_v52  ;;  %v5341_v60 = vmul.f32 -1.442695, %v10524_v22  ;;  %v10556_v17 = vmul.f32 -1.442695, %v10528_v13  ;;  %v2079_v52 = vpop.f32.mrf.mxu1 }
 0x461   : > { %11386 = vst [vmem:[#allocation25_spill] sm:$0xff] %v10550_v38  ;;  %v10552_v21 = vpop.eup %6875  ;;  %6901 = vpow2.f32 %v5311_v34  ;;  %v10559_v7 = vadd.f32 %v2077_v54, %v9705_v59  ;;  %v10562_v5 = vmul.f32 -1.442695, %v10532_v15  ;;  %v10565_v26 = vmul.f32 -1.442695, %v10538_v11  ;;  %v11388_v54 = vld [vmem:[#allocation18_spill] sm:$0xff] }
 0x462   : > { %v6878_v20 = vpop.eup %6877  ;;  %v4721_v4 = vcombine.low %v4596_v56, %v4633_v51  ;;  %6903 = vrcp.f32 %v3234_v47  ;;  %v3244_v34 = vadd.f32 1.0, %v6874_v48  ;;  %v10570_v24 = vmul.f32 -1.442695, %v10544_v16  ;;  %v11389_v47 = vld [vmem:[#allocation23_spill] sm:$0xff]  ;;  %v11392_v48 = vld [vmem:[#allocation14_spill] sm:$0xff]  ;;  %v11393_v16 = vld [vmem:[#allocation33_spill] sm:$0xff] }
 0x463   : > { %11387 = vst [vmem:[#allocation104_spill] sm:$0xff] %v10559_v7  ;;  %v10567_v57 = vpop.eup %6879  ;;  %6905 = vpow2.f32 %v5320_v63  ;;  %v10573_v25 = vmul.f32 -1.442695, %v10547_v36  ;;  %v11390_v56 = vld [vmem:[#allocation31_spill] sm:$0xff]  ;;  %v10581_v13 = vmul.f32 -1.442695, %v10550_v38  ;;  %v4034_v22 = vmul.f32 %v11393_v16, %v11392_v48  ;;  %v2081_v48 = vpop.f32.mrf.mxu1 }
 0x464   : > { %v6882_v43 = vpop.eup %6881  ;;  %v11391_v51 = vcombine.low %v11389_v47, %v11390_v56  ;;  %v4749_v11 = vrot.slane %v4721_v4, %v11388_v54  ;;  %6907 = vrcp.f32 %v3235_v49  ;;  %v3245_v36 = vadd.f32 1.0, %v6878_v20  ;;  %v11395_v47 = vld [vmem:[#allocation29_spill] sm:$0xff]  ;;  %v11397_v4 = vld [vmem:[#allocation35_spill] sm:$0xff] }
 0x465   : > { %v10583_v63 = vpop.eup %6883  ;;  %6909 = vpow2.f32 %v5321_v8  ;;  %v10588_v31 = vmul.f32 -1.442695, %v10559_v7  ;;  %v4024_v56 = vmul.f32 %v11395_v47, %v11394_v33  ;;  %v4044_v16 = vmul.f32 %v11399_v14, %v11398_v1  ;;  %v11401_v33 = vld [vmem:[#allocation43_spill] sm:$0xff] }
 0x466   : > { %v4742_v15 = vrot.slane %v11391_v51, %v11388_v54  ;;  %v6886_v29 = vpop.eup %6885  ;;  %v11396_v51 = vld [vmem:[#allocation27_spill] sm:$0xff]  ;;  %6911 = vpow2.f32 %v5330_v42  ;;  %v3254_v8 = vadd.f32 1.0, %v6882_v43  ;;  %v10599_v20 = vadd.f32 %v2079_v52, %v9718_v2 }
 0x467   : > { %v4035_v49 = vmul.f32 %v11397_v4, %v11396_v51  ;;  %v10594_v38 = vpop.eup %6887  ;;  %6913 = vrcp.f32 %v3244_v34  ;;  %v4025_v47 = vmul.f32 %v11401_v33, %v11400_v0  ;;  %v11403_v51 = vld [vmem:[#allocation76_spill] sm:$0xff]  ;;  %v4634_v14 = vadd.f32 %v4034_v22, %v4024_v56  ;;  %v11404_v1 = vld [vmem:[#allocation111_spill] sm:$0xff]  ;;  %v11407_v33 = vld [vmem:[#allocation90_spill] sm:$0xff] }
 0x468   : > { %v4751_v45 = vcombine.low %v4742_v15, %v4749_v11  ;;  %v6890_v7 = vpop.eup %6889  ;;  %v4045_v15 = vmul.f32 %v11403_v51, %v11402_v23  ;;  %6915 = vpow2.f32 %v10515_v3  ;;  %v11405_v34 = vld [vmem:[#allocation59_spill] sm:$0xff]  ;;  %v3255_v52 = vadd.f32 1.0, %v6886_v29  ;;  %v11408_v22 = vld [vmem:[#allocation44_spill] sm:$0xff] }
 0x469   : > { %v10607_v11 = vpop.eup %6891  ;;  %v4054_v43 = vmul.f32 %v11405_v34, %v11404_v1  ;;  %6917 = vrcp.f32 %v3245_v36  ;;  %v4671_v62 = vadd.f32 %v4035_v49, %v4025_v47  ;;  %v10615_v23 = vadd.f32 %v2081_v48, %v9705_v59  ;;  %v11409_v1 = vld [vmem:[#allocation94_spill] sm:$0xff]  ;;  %v11410_v34 = vld [vmem:[#allocation49_spill] sm:$0xff] }
 0x46a   : > { %v4765_v42 = vrot.slane %v4751_v45, %v11388_v54  ;;  %v6894_v4 = vpop.eup %6893  ;;  %6919 = vpow2.f32 %v10518_v41  ;;  %v4635_v3 = vadd.f32 %v4634_v14, %v4044_v16  ;;  %v4055_v56 = vmul.f32 %v11408_v22, %v11407_v33  ;;  %v11411_v48 = vld [vmem:[#allocation37_spill] sm:$0xff] }
 0x46b   : > { %v10617_v45 = vpop.eup %6895  ;;  %6921 = vrcp.f32 %v3254_v8  ;;  %v3264_v51 = vadd.f32 1.0, %v6890_v7  ;;  %v4672_v29 = vadd.f32 %v4671_v62, %v4045_v15  ;;  %v4064_v49 = vmul.f32 %v11410_v34, %v11409_v1  ;;  %v11413_v62 = vld [vmem:[#allocation39_spill] sm:$0xff]  ;;  %v11414_v8 = vld [vmem:[#allocation26_spill] sm:$0xff]  ;;  %v11415_v33 = vld [vmem:[#allocation41_spill] sm:$0xff] }
 0x46c   : > { %v4766_v0 = vcombine.low %v11406_v32, %v4765_v42  ;;  %v6898_v36 = vpop.eup %6897  ;;  %6923 = vpow2.f32 %v5341_v60  ;;  %v2083_v32 = vpop.f32.mrf.mxu1  ;;  %v4636_v41 = vadd.f32 %v4635_v3, %v4054_v43  ;;  %v11412_v42 = vld [vmem:[#allocation52_spill] sm:$0xff]  ;;  %v3265_v16 = vadd.f32 1.0, %v6894_v4 }
 0x46d   : > { %v10623_v47 = vpop.eup %6899  ;;  %v4065_v54 = vmul.f32 %v11412_v42, %v11411_v48  ;;  %6925 = vrcp.f32 %v3255_v52  ;;  %v4074_v15 = vmul.f32 %v11414_v8, %v11413_v62  ;;  %v3274_v60 = vadd.f32 1.0, %v6898_v36  ;;  %v11416_v52 = vld [vmem:[#allocation15_spill] sm:$0xff]  ;;  %v11418_v36 = vld [vmem:[#allocation46_spill] sm:$0xff] }
 0x46e   : > { %v6902_v7 = vpop.eup %6901  ;;  %6927 = vpow2.f32 %v10556_v17  ;;  %v4797_v14 = vmul.f32 0.00390625, %v4766_v0  ;;  %v4673_v3 = vadd.f32 %v4672_v29, %v4055_v56  ;;  %v4075_v4 = vmul.f32 %v11416_v52, %v11415_v33  ;;  %v11417_v48 = vld [vmem:[#allocation67_spill] sm:$0xff]  ;;  %v2087_v17 = vpop.f32.mrf.mxu1  ;;  %v11420_v33 = vld [vmem:[#allocation73_spill] sm:$0xff] }
 0x46f   : > { %v10635_v43 = vpop.eup %6903  ;;  %6929 = vrcp.f32 %v3264_v51  ;;  %v10640_v22 = vmul.f32 -1.442695, %v10599_v20  ;;  %v4637_v34 = vadd.f32 %v4636_v41, %v4064_v49  ;;  %v4084_v42 = vmul.f32 %v10274_v46, %v11417_v48  ;;  %v11419_v41 = vld [vmem:[#allocation36_spill] sm:$0xff]  ;;  %v11422_v48 = vld [vmem:[#allocation58_spill] sm:$0xff] }
 0x470   : > { %v6906_v1 = vpop.eup %6905  ;;  %v3275_v62 = vadd.f32 1.0, %v6902_v7  ;;  %6931 = vpow2.f32 %v10562_v5  ;;  %4799 = vst [vmem:[%s10630_s12] sm:$0xff] %v4797_v14  ;;  %v4674_v56 = vadd.f32 %v4673_v3, %v4065_v54  ;;  %v4085_v29 = vmul.f32 %v10300_v9, %v11418_v36 }
 0x471   : > { %v10646_v0 = vpop.eup %6907  ;;  %6933 = vrcp.f32 %v3265_v16  ;;  %v10651_v51 = vadd.f32 %v2083_v32, %v9718_v2  ;;  %v4638_v49 = vadd.f32 %v4637_v34, %v4074_v15  ;;  %v4094_v46 = vmul.f32 %v10320_v18, %v11419_v41  ;;  %v11421_v16 = vld [vmem:[#allocation55_spill] sm:$0xff]  ;;  %v11425_v41 = vld [vmem:[#allocation89_spill] sm:$0xff] }
 0x472   : > { %v6910_v8 = vpop.eup %6909  ;;  %6935 = vrcp.f32 %v3274_v60  ;;  %v10656_v5 = vmul.f32 -1.442695, %v10615_v23  ;;  %v4675_v14 = vadd.f32 %v4674_v56, %v4075_v4  ;;  %v4095_v54 = vmul.f32 %v10354_v37, %v11420_v33  ;;  %v2089_v60 = vpop.f32.mrf.mxu1  ;;  %v11423_v56 = vld [vmem:[#allocation40_spill] sm:$0xff]  ;;  %v11426_v33 = vld [vmem:[#allocation65_spill] sm:$0xff] }
 0x473   : > { %v6912_v7 = vpop.eup %6911  ;;  %v3284_v3 = vadd.f32 1.0, %v6906_v1  ;;  %6937 = vpow2.f32 %v10565_v26  ;;  %v4639_v32 = vadd.f32 %v4638_v49, %v4084_v42  ;;  %v4104_v15 = vmul.f32 %v10377_v53, %v11421_v16 }
 0x474   : > { %v10661_v9 = vpop.eup %6913  ;;  %6939 = vrcp.f32 %v3275_v62  ;;  %v3285_v18 = vadd.f32 1.0, %v6910_v8  ;;  %v4676_v34 = vadd.f32 %v4675_v14, %v4085_v29  ;;  %v4105_v4 = vmul.f32 %v10401_v58, %v11422_v48  ;;  %v11424_v8 = vld [vmem:[#allocation83_spill] sm:$0xff] }
 0x475   : > { %v6916_v52 = vpop.eup %6915  ;;  %6941 = vpow2.f32 %v10570_v24  ;;  %v5391_v37 = vmul.f32 -1.442695, %v10651_v51  ;;  %v4640_v26 = vadd.f32 %v4639_v32, %v4094_v46  ;;  %v4114_v42 = vmul.f32 %v10438_v28, %v11423_v56  ;;  %v11427_v32 = vld [vmem:[#allocation66_spill] sm:$0xff]  ;;  %v11429_v48 = vld [vmem:[#allocation71_spill] sm:$0xff] }
 0x476   : > { %v10669_v1 = vpop.eup %6917  ;;  %v3294_v36 = vadd.f32 1.0, %v6912_v7  ;;  %6943 = vpow2.f32 %v10573_v25  ;;  %v4677_v62 = vadd.f32 %v4676_v34, %v4095_v54  ;;  %v4115_v29 = vmul.f32 %v10455_v12, %v11424_v8  ;;  %v2091_v7 = vpop.f32.mrf.mxu1  ;;  %v11431_v8 = vld [vmem:[#allocation75_spill] sm:$0xff] }
 0x477   : > { %v6920_v53 = vpop.eup %6919  ;;  %6945 = vrcp.f32 %v3284_v3  ;;  %v10677_v58 = vadd.f32 %v2087_v17, %v9705_v59  ;;  %v4641_v49 = vadd.f32 %v4640_v26, %v4104_v15  ;;  %v4124_v46 = vmul.f32 %v10477_v50, %v11425_v41 }
 0x478   : > { %v10679_v24 = vpop.eup %6921  ;;  %6947 = vrcp.f32 %v3285_v18  ;;  %v3295_v28 = vadd.f32 1.0, %v6916_v52  ;;  %v4678_v25 = vadd.f32 %v4677_v62, %v4105_v4  ;;  %v4125_v54 = vmul.f32 %v10491_v35, %v11426_v33  ;;  %v11428_v52 = vld [vmem:[#allocation97_spill] sm:$0xff] }
 0x479   : > { %v6924_v14 = vpop.eup %6923  ;;  %6949 = vpow2.f32 %v10581_v13  ;;  %v10687_v12 = vadd.f32 %v2089_v60, %v9718_v2  ;;  %v4642_v3 = vadd.f32 %v4641_v49, %v4114_v42  ;;  %v4134_v16 = vmul.f32 %v10505_v6, %v11427_v32  ;;  %v2093_v6 = vpop.f32.mrf.mxu1 }
 0x47a   : > { %v10689_v17 = vpop.eup %6925  ;;  %6951 = vrcp.f32 %v3294_v36  ;;  %v3304_v50 = vadd.f32 1.0, %v6920_v53  ;;  %v4679_v18 = vadd.f32 %v4678_v25, %v4115_v29  ;;  %v4135_v34 = vmul.f32 %v10510_v61, %v11428_v52  ;;  %v11430_v36 = vld [vmem:[#allocation106_spill] sm:$0xff] }
 0x47b   : > { %v6928_v15 = vpop.eup %6927  ;;  %6953 = vpow2.f32 %v10588_v31  ;;  %v5400_v35 = vmul.f32 -1.442695, %v10677_v58  ;;  %v4643_v60 = vadd.f32 %v4642_v3, %v4124_v46  ;;  %v4144_v4 = vmul.f32 %v10520_v10, %v11429_v48  ;;  %v11432_v46 = vld [vmem:[#allocation24_spill] sm:$0xff] }
 0x47c   : > { %v10697_v13 = vpop.eup %6929  ;;  %6955 = vrcp.f32 %v3295_v28  ;;  %v3305_v26 = vadd.f32 1.0, %v6924_v14  ;;  %v4680_v42 = vadd.f32 %v4679_v18, %v4125_v54  ;;  %v4145_v53 = vmul.f32 %v10534_v27, %v11430_v36 }
 0x47d   : > { %v6932_v56 = vpop.eup %6931  ;;  %6957 = vpow2.f32 %v10640_v22  ;;  %v10705_v31 = vadd.f32 %v2091_v7, %v9705_v59  ;;  %v4644_v62 = vadd.f32 %v4643_v60, %v4134_v16  ;;  %v4154_v29 = vmul.f32 %v10540_v44, %v11431_v8 }
 0x47e   : > { %v10707_v61 = vpop.eup %6933  ;;  %6959 = vrcp.f32 %v3304_v50  ;;  %v3314_v10 = vadd.f32 1.0, %v6928_v15  ;;  %v4681_v41 = vadd.f32 %v4680_v42, %v4135_v34  ;;  %v4155_v28 = vmul.f32 %v10552_v21, %v11432_v46  ;;  %v11436_v42 = vld [vmem:[#allocation60_spill] sm:$0xff] }
 0x47f   : > { %v10711_v49 = vpop.eup %6935  ;;  %6961 = vpow2.f32 %v10656_v5  ;;  %v10717_v27 = vadd.f32 %v2093_v6, %v9718_v2  ;;  %v4645_v22 = vadd.f32 %v4644_v62, %v4144_v4  ;;  %v4164_v7 = vmul.f32 %v10567_v57, %v10246_v30  ;;  %v11437_v62 = vld [vmem:[#allocation91_spill] sm:$0xff] }
 0x480   : > { %v6938_v59 = vpop.eup %6937  ;;  %6963 = vrcp.f32 %v3305_v26  ;;  %v3315_v44 = vadd.f32 1.0, %v6932_v56  ;;  %v4682_v25 = vadd.f32 %v4681_v41, %v4145_v53  ;;  %v4165_v33 = vmul.f32 %v10583_v63, %v10281_v19  ;;  %v11435_v26 = vld [vmem:[#allocation87_spill] sm:$0xff]  ;;  %v11438_v41 = vld [vmem:[#allocation62_spill] sm:$0xff] }
 0x481   : > { %v10721_v14 = vpop.eup %6939  ;;  %6965 = vpow2.f32 %v5391_v37  ;;  %v5401_v21 = vmul.f32 -1.442695, %v10687_v12  ;;  %v4646_v54 = vadd.f32 %v4645_v22, %v4154_v29  ;;  %v4174_v2 = vmul.f32 %v10594_v38, %v10285_v39  ;;  %v11433_v38 = vld [vmem:[#allocation84_spill] sm:$0xff] }
 0x482   : > { %v6942_v5 = vpop.eup %6941  ;;  %6967 = vrcp.f32 %v3314_v10  ;;  %v5410_v3 = vmul.f32 -1.442695, %v10705_v31  ;;  %v4683_v57 = vadd.f32 %v4682_v25, %v4155_v28  ;;  %v4175_v32 = vmul.f32 %v10607_v11, %v10298_v40  ;;  %v11434_v40 = vld [vmem:[#allocation32_spill] sm:$0xff] }
 0x483   : > { %v6944_v30 = vpop.eup %6943  ;;  %6969 = vpow2.f32 %v5400_v35  ;;  %v5411_v16 = vmul.f32 -1.442695, %v10717_v27  ;;  %v4647_v63 = vadd.f32 %v4646_v54, %v4164_v7  ;;  %v4184_v37 = vmul.f32 %v10617_v45, %v10347_v55  ;;  %v11440_v25 = vld [vmem:[#allocation64_spill] sm:$0xff] }
 0x484   : > { %v6946_v19 = vpop.eup %6945  ;;  %6971 = vrcp.f32 %v3315_v44  ;;  %v3324_v50 = vadd.f32 1.0, %v6938_v59  ;;  %v4684_v39 = vadd.f32 %v4683_v57, %v4165_v33  ;;  %v4185_v18 = vmul.f32 %v10623_v47, %v11433_v38  ;;  %v11439_v59 = vld [vmem:[#allocation95_spill] sm:$0xff] }
 0x485   : > { %v6948_v15 = vpop.eup %6947  ;;  %v3325_v52 = vadd.f32 1.0, %v6942_v5  ;;  %6973 = vpow2.f32 %v5401_v21  ;;  %v4648_v60 = vadd.f32 %v4647_v63, %v4174_v2  ;;  %v4194_v11 = vmul.f32 %v10635_v43, %v11434_v40  ;;  %v11441_v5 = vld [vmem:[#allocation98_spill] sm:$0xff] }
 0x486   : > { %v6950_v34 = vpop.eup %6949  ;;  %v3334_v35 = vadd.f32 1.0, %v6944_v30  ;;  %6975 = vpow2.f32 %v5410_v3  ;;  %v4685_v4 = vadd.f32 %v4684_v39, %v4175_v32  ;;  %v4195_v55 = vmul.f32 %v10646_v0, %v11435_v26  ;;  %v11442_v30 = vld [vmem:[#allocation68_spill] sm:$0xff] }
 0x487   : > { %v6952_v48 = vpop.eup %6951  ;;  %v3335_v45 = vadd.f32 1.0, %v6950_v34  ;;  %6977 = vpow2.f32 %v5411_v16  ;;  %v4649_v56 = vadd.f32 %v4648_v60, %v4184_v37  ;;  %v4204_v47 = vmul.f32 %v10661_v9, %v11436_v42  ;;  %v11443_v16 = vld [vmem:[#allocation102_spill] sm:$0xff]  ;;  %v11444_v39 = vld [vmem:[#allocation72_spill] sm:$0xff]  ;;  %v11448_v42 = vld [vmem:[#allocation77_spill] sm:$0xff] }
 0x488   : > { %v6954_v6 = vpop.eup %6953  ;;  %6979 = vrcp.f32 %v3324_v50  ;;  %v4686_v53 = vadd.f32 %v4685_v4, %v4185_v18  ;;  %v4205_v43 = vmul.f32 %v10669_v1, %v11437_v62  ;;  %v4214_v0 = vmul.f32 %v10679_v24, %v11438_v41 }
 0x489   : > { %v6956_v36 = vpop.eup %6955  ;;  %6981 = vrcp.f32 %v3325_v52  ;;  %v3344_v8 = vadd.f32 1.0, %v6954_v6  ;;  %v4650_v10 = vadd.f32 %v4649_v56, %v4194_v11  ;;  %v4215_v22 = vmul.f32 %v10689_v17, %v11439_v59  ;;  %v11445_v52 = vld [vmem:[#allocation74_spill] sm:$0xff] }
 0x48a   : > { %v6958_v29 = vpop.eup %6957  ;;  %6983 = vrcp.f32 %v3334_v35  ;;  %v4687_v28 = vadd.f32 %v4686_v53, %v4195_v55  ;;  %v4224_v1 = vmul.f32 %v10697_v13, %v11440_v25  ;;  %v4225_v54 = vmul.f32 %v10707_v61, %v11441_v5  ;;  %v11447_v55 = vld [vmem:[#allocation82_spill] sm:$0xff] }
 0x48b   : > { %v6960_v46 = vpop.eup %6959  ;;  %6985 = vrcp.f32 %v3335_v45  ;;  %v3345_v9 = vadd.f32 1.0, %v6958_v29  ;;  %v4651_v44 = vadd.f32 %v4650_v10, %v4204_v47  ;;  %v4234_v17 = vmul.f32 %v10711_v49, %v11442_v30  ;;  %v11446_v49 = vld [vmem:[#allocation108_spill] sm:$0xff] }
 0x48c   : > { %v6962_v7 = vpop.eup %6961  ;;  %6987 = vrcp.f32 %v3344_v8  ;;  %v4688_v21 = vadd.f32 %v4687_v28, %v4205_v43  ;;  %v4235_v63 = vmul.f32 %v10721_v14, %v11443_v16  ;;  %v4244_v38 = vmul.f32 %v6946_v19, %v11444_v39  ;;  %v11451_v28 = vld [vmem:[#allocation96_spill] sm:$0xff] }
 0x48d   : > { %v6964_v33 = vpop.eup %6963  ;;  %6989 = vrcp.f32 %v3345_v9  ;;  %v3354_v24 = vadd.f32 1.0, %v6962_v7  ;;  %v4652_v3 = vadd.f32 %v4651_v44, %v4214_v0  ;;  %v4245_v34 = vmul.f32 %v6948_v15, %v11445_v52  ;;  %v11449_v15 = vld [vmem:[#allocation88_spill] sm:$0xff] }
 0x48e   : > { %v6966_v2 = vpop.eup %6965  ;;  %v4689_v32 = vadd.f32 %v4688_v21, %v4215_v22  ;;  %v4254_v35 = vmul.f32 %v6952_v48, %v11446_v49  ;;  %v4255_v14 = vmul.f32 %v6956_v36, %v11447_v55  ;;  %v4264_v19 = vmul.f32 %v6960_v46, %v11448_v42  ;;  %v11450_v48 = vld [vmem:[#allocation85_spill] sm:$0xff]  ;;  %v11452_v46 = vld [vmem:[#allocation92_spill] sm:$0xff] }
 0x48f   : > { %v6968_v57 = vpop.eup %6967  ;;  %6991 = vrcp.f32 %v3354_v24  ;;  %v3355_v13 = vadd.f32 1.0, %v6966_v2  ;;  %v4653_v50 = vadd.f32 %v4652_v3, %v4224_v1  ;;  %v4265_v43 = vmul.f32 %v6964_v33, %v11449_v15  ;;  %v11453_v1 = vld [vmem:[#allocation101_spill] sm:$0xff] }
 0x490   : > { %v6970_v37 = vpop.eup %6969  ;;  %v4690_v61 = vadd.f32 %v4689_v32, %v4225_v54  ;;  %v4274_v41 = vmul.f32 %v6968_v57, %v11450_v48  ;;  %v11454_v54 = vld [vmem:[#allocation99_spill] sm:$0xff]  ;;  %v11455_v3 = vld [vmem:[#allocation25_spill] sm:$0xff]  ;;  %v11456_v32 = vld [vmem:[#allocation104_spill] sm:$0xff] }
 0x491   : > { %v6972_v18 = vpop.eup %6971  ;;  %6993 = vrcp.f32 %v3355_v13  ;;  %v3364_v60 = vadd.f32 1.0, %v6970_v37  ;;  %v4654_v11 = vadd.f32 %v4653_v50, %v4234_v17  ;;  %v4337_v48 = vld [vmem:[#allocation2 + $0x8] sm:$0x3] }
 0x492   : > { %v6974_v40 = vpop.eup %6973  ;;  %v4691_v26 = vadd.f32 %v4690_v61, %v4235_v63  ;;  %v4275_v59 = vmul.f32 %v6972_v18, %v11451_v28 }
 0x493   : > { %v6976_v4 = vpop.eup %6975  ;;  %6995 = vrcp.f32 %v3364_v60  ;;  %v3365_v45 = vadd.f32 1.0, %v6974_v40  ;;  %v4655_v56 = vadd.f32 %v4654_v11, %v4244_v38 }
 0x494   : > { %v6978_v6 = vpop.eup %6977  ;;  %v3374_v47 = vadd.f32 1.0, %v6976_v4  ;;  %v4692_v62 = vadd.f32 %v4691_v26, %v4245_v34 }
 0x495   : > { %v6980_v53 = vpop.eup %6979  ;;  %6997 = vrcp.f32 %v3365_v45  ;;  %v3375_v8 = vadd.f32 1.0, %v6978_v6  ;;  %v4656_v10 = vadd.f32 %v4655_v56, %v4254_v35 }
 0x496   : > { %v6982_v29 = vpop.eup %6981  ;;  %6999 = vrcp.f32 %v3374_v47  ;;  %v4693_v36 = vadd.f32 %v4692_v62, %v4255_v14  ;;  %v4284_v7 = vmul.f32 %v6980_v53, %v11452_v46 }
 0x497   : > { %v6984_v0 = vpop.eup %6983  ;;  %7001 = vrcp.f32 %v3375_v8  ;;  %v4657_v9 = vadd.f32 %v4656_v10, %v4264_v19  ;;  %v4285_v33 = vmul.f32 %v6982_v29, %v11453_v1 }
 0x498   : > { %v6986_v22 = vpop.eup %6985  ;;  %v4694_v25 = vadd.f32 %v4693_v36, %v4265_v43  ;;  %v4294_v24 = vmul.f32 %v6984_v0, %v11454_v54 }
 0x499   : > { %v6988_v44 = vpop.eup %6987  ;;  %v4658_v5 = vadd.f32 %v4657_v9, %v4274_v41  ;;  %v4295_v30 = vmul.f32 %v6986_v22, %v11455_v3 }
 0x49a   : > { %v6990_v21 = vpop.eup %6989  ;;  %v4695_v2 = vadd.f32 %v4694_v25, %v4275_v59  ;;  %v4304_v16 = vmul.f32 %v6988_v44, %v11456_v32 }
 0x49b   : > { %v4659_v57 = vadd.f32 %v4658_v5, %v4284_v7  ;;  %v4305_v13 = vmul.f32 %v6990_v21, %v10599_v20 }
 0x49c   : > { %v6992_v17 = vpop.eup %6991  ;;  %v4696_v63 = vadd.f32 %v4695_v2, %v4285_v33 }
 0x49d   : > { %v4660_v50 = vadd.f32 %v4659_v57, %v4294_v24  ;;  %v4314_v39 = vmul.f32 %v6992_v17, %v10615_v23 }
 0x49e   : > { %v6994_v37 = vpop.eup %6993  ;;  %v4697_v38 = vadd.f32 %v4696_v63, %v4295_v30 }
 0x49f   : > { %v4315_v18 = vmul.f32 %v6994_v37, %v10651_v51  ;;  %v4661_v52 = vadd.f32 %v4660_v50, %v4304_v16 }
 0x4a0   : > { %v6996_v61 = vpop.eup %6995  ;;  %v4698_v34 = vadd.f32 %v4697_v38, %v4305_v13 }
 0x4a1   : > { %v4324_v60 = vmul.f32 %v6996_v61, %v10677_v58  ;;  %v4662_v11 = vadd.f32 %v4661_v52, %v4314_v39 }
 0x4a2   : > { %v6998_v40 = vpop.eup %6997  ;;  %v4699_v35 = vadd.f32 %v4698_v34, %v4315_v18 }
 0x4a3   : > { %v7000_v49 = vpop.eup %6999  ;;  %v4325_v4 = vmul.f32 %v6998_v40, %v10687_v12  ;;  %v4663_v20 = vadd.f32 %v4662_v11, %v4324_v60 }
 0x4a4   : > { %v7002_v26 = vpop.eup %7001  ;;  %v4334_v55 = vmul.f32 %v7000_v49, %v10705_v31  ;;  %v11457_v31 = vld [vmem:[#allocation18_spill] sm:$0xff] }
 0x4a5   : > { %v4700_v14 = vadd.f32 %v4699_v35, %v4325_v4  ;;  %v4335_v23 = vmul.f32 %v7002_v26, %v10717_v27 }
 0x4a6   : > { %v4664_v45 = vadd.f32 %v4663_v20, %v4334_v55 }
 0x4a7   : > { %v4701_v51 = vadd.f32 %v4700_v14, %v4335_v23 }
 0x4a8   : > { %v4665_v6 = vrot.slane %v4664_v45, 4 }
 0x4a9   : > { %v4702_v56 = vrot.slane %v4701_v51, 4 }
 0x4aa   : > { %v4666_v42 = vadd.f32 %v4665_v6, %v4664_v45 }
 0x4ab   : > { %v4703_v19 = vadd.f32 %v4702_v56, %v4701_v51 }
 0x4ac   : > { %v4667_v58 = vrot.slane %v4666_v42, 2 }
 0x4ad   : > { %v4704_v47 = vrot.slane %v4703_v19, 2 }
 0x4ae   : > { %v4668_v53 = vadd.f32 %v4667_v58, %v4666_v42 }
 0x4af   : > { %v4705_v62 = vadd.f32 %v4704_v47, %v4703_v19 }
 0x4b0   : > { %v4669_v15 = vrot.slane %v4668_v53, 1 }
 0x4b1   : > { %v4706_v12 = vrot.slane %v4705_v62, 1 }
 0x4b2   : > { %v4670_v43 = vadd.f32 %v4669_v15, %v4668_v53 }
 0x4b3   : > { %v4707_v8 = vadd.f32 %v4706_v12, %v4705_v62 }
 0x4b5   : > { %v4767_v29 = vcombine.low %v4670_v43, %v4707_v8 }
 0x4b7   : > { %v4774_v10 = vrot.slane %v4767_v29, %v11457_v31 }
 0x4b9   : > { %v4781_v27 = vrot.slane %v4774_v10, %v11457_v31 }
 0x4bb   : > { %v4785_v41 = vadd.f32 %v4781_v27, %v4337_v48 }
 0x4bd   : > { %4791 = vst.msk [vmem:[#allocation2 + $0x8] sm:$0x3] %vm10312_vm4, %v4785_v41 }
 0x4c4   : > { %v4796_v36 = vld [vmem:[#allocation2 + $0x8] sm:$0x3] }
 0x4c5   : > { %v4798_v28 = vmul.f32 0.00390625, %v4796_v36 }
 0x4c7   : > { %4800 = vst.msk [vmem:[%s10630_s12 + $0x8] sm:$0x3] %vm10312_vm4, %v4798_v28 }
 0x4c8 PF: > { %s18_s20 = sadd.s32 1, %s7143_s20   ;;  %s11459_s18 = smov %s7139_s19 }
 0x4c9   : > { %p15_p2 = scmp.ge.s32.totalorder %s18_s20, 4   ;;  %s11460_s19 = smov %s11462_s26 }
 0x4cb   :  { %17 = sbr.rel (!%p15_p2) target bundleno = 4 (0x4), region = 95 }
 0x4d0   :  { %4820 = vsyncpa [#allocation4], 1 }
 0x4d1   :  { %4822 = vsyncpa [#allocation4 + $0x1], 1 }
 0x4d2   :  { %4823 = vsyncpa [#allocation6], 1 }
 0x4d3   :  { %4824 = vsyncpa [#allocation9], 1 }

// kernel: supcon_efficientnet_forward.3
= control target key start
LH: loop header
LB: loop body
LE: loop exit
PB: predicated region body
PF: predicated region fallthrough
CT: control target
= control target key end

     0   :  { %10 = vsyncpa [#allocation3], 0  ;;  %s9467_s0 = inlined_call_operand.vmem [shape: f32[8,1280], index: 0, kind: input, shape index: {}]   ;;  %s9468_s1 = inlined_call_operand.hbm [shape: bf16[1280,1280], index: 1, kind: input, shape index: {}]   ;;  %s9469_s2 = inlined_call_operand.hbm [shape: f32[1,1280], index: 2, kind: input, shape index: {}]   ;;  %s9470_s3 = inlined_call_operand.hbm [shape: bf16[1280,128], index: 3, kind: input, shape index: {}]   ;;  %s9471_s4 = inlined_call_operand.hbm [shape: f32[1,128], index: 4, kind: input, shape index: {}]   ;;  %s9472_s5 = inlined_call_operand.vmem [shape: f32[8,128], index: 5, kind: output, shape index: {}]  }
   0x1   :  { %11 = vsyncpa [#allocation5], 0 }
   0x2   :  { %12 = vsyncpa [#allocation8], 0  ;;  %s9222_s18 = smov [#allocation4]   ;;  %s9223_s20 = smov [#allocation2]  }
   0x3   :  { %s33_s19 = sshll.u32 %s9222_s18, 4  ;;  %s20_s21 = sshll.u32 %s9223_s20, 4  ;;  %s34_s19 = int_to_ptr.vmem [resolvable:$true] %s33_s19  ;;  %s21_s21 = int_to_ptr.vmem [resolvable:$true] %s20_s21 }
   0x4   :  { %s9144_s22 = scalar_lea.vmem %s34_s19, 160  ;;  %p9149_p1 = scmp.lt.s32.totalorder %s34_s19, %s34_s19 }
   0x5   :  { %p9145_p0 = scmp.ne.s32.totalorder %s34_s19, %s9144_s22  ;;  %p9150_p2 = scmp.lt.s32.totalorder %s9144_s22, %s9144_s22 }
   0x7   :  { %p9151_p3 = por %p9150_p2, %p9149_p1 }
   0x9   :  { %p9152_p4 = pnand %p9151_p3, %p9145_p0 }
   0xb   :  { %9155 = shalt.err (!%p9152_p4)
}
   0xc   :  { %36 = dma.hbm_to_vmem [thread:$0]  %s9469_s2, 160, %s34_s19, [#allocation5]  }
   0xd   :  { %s9164_s25 = scalar_lea.vmem %s21_s21, 102400  ;;  %p9169_p6 = scmp.lt.s32.totalorder %s21_s21, %s21_s21 }
   0xe   :  { %p9165_p5 = scmp.ne.s32.totalorder %s21_s21, %s9164_s25  ;;  %p9170_p7 = scmp.lt.s32.totalorder %s9164_s25, %s9164_s25 }
  0x10   :  { %p9171_p8 = por %p9170_p7, %p9169_p6 }
  0x12   :  { %p9172_p9 = pnand %p9171_p8, %p9165_p5 }
  0x14   :  { %9175 = shalt.err (!%p9172_p9)
}
  0x15   :  { %s9224_s26 = smov 640   ;;  %s9225_s27 = smov 40  }
  0x16   :  { %26 = dma.hbm_to_vmem [thread:$0]  %s9468_s1, 102400, %s21_s21, [#allocation3], %s9224_s26, %s9224_s26, %s9225_s27  }
  0x17   :  { %s9226_s30 = smov [#allocation6]  }
  0x18   :  { %s42_s6 = sshll.u32 %s9226_s30, 4  ;;  %s43_s6 = int_to_ptr.vmem [resolvable:$true] %s42_s6 }
  0x19   :  { %s9184_s7 = scalar_lea.vmem %s43_s6, 10240  ;;  %p9189_p11 = scmp.lt.s32.totalorder %s43_s6, %s43_s6 }
  0x1a   :  { %p9185_p10 = scmp.ne.s32.totalorder %s43_s6, %s9184_s7  ;;  %p9190_p12 = scmp.lt.s32.totalorder %s9184_s7, %s9184_s7 }
  0x1c   :  { %p9191_p13 = por %p9190_p12, %p9189_p11 }
  0x1e   :  { %p9192_p0 = pnand %p9191_p13, %p9185_p10 }
  0x20   :  { %9195 = shalt.err (!%p9192_p0)
}
  0x21   :  { %s9227_s2 = smov 64   ;;  %s9228_s8 = smov 4  }
  0x22   :  { %48 = dma.hbm_to_vmem [thread:$0]  %s9470_s3, 10240, %s43_s6, [#allocation5], %s9227_s2, %s9227_s2, %s9228_s8  }
  0x23   :  { %s9229_s11 = smov [#allocation7]  }
  0x24   :  { %s55_s12 = sshll.u32 %s9229_s11, 4  ;;  %s56_s12 = int_to_ptr.vmem [resolvable:$true] %s55_s12 }
  0x25   :  { %s9204_s1 = scalar_lea.vmem %s56_s12, 16  ;;  %s9208_s13 = scalar_lea.vmem %s56_s12, 32 }
  0x26   :  { %p9205_p1 = scmp.ne.s32.totalorder %s56_s12, %s9204_s1  ;;  %p9209_p2 = scmp.lt.s32.totalorder %s56_s12, %s56_s12 }
  0x27   :  { %p9210_p3 = scmp.lt.s32.totalorder %s9208_s13, %s9204_s1 }
  0x29   :  { %p9211_p4 = por %p9210_p3, %p9209_p2 }
  0x2b   :  { %p9212_p5 = pnand %p9211_p4, %p9205_p1 }
  0x2d   :  { %9215 = shalt.err (!%p9212_p5)
}
  0x2e   :  { %58 = dma.hbm_to_vmem [thread:$0]  %s9471_s4, 16, %s56_s12, [#allocation8]  }
  0x2f   :  { %9216 = dma.done.wait [#allocation3], 102400  }
  0x30   :  { %9217 = vsyncadd [#allocation3], 4294864896 }
  0x31   :  { %9218 = dma.done.wait [#allocation5], 10400  }
  0x32   :  { %9219 = vsyncadd [#allocation5], 4294956896 }
  0x33   :  { %9220 = dma.done.wait [#allocation8], 16  }
  0x34   :  { %9221 = vsyncadd [#allocation8], 4294967280  ;;  %v7851_v0 = vld [vmem:[#allocation2 + $0x234] ss:$40 sps:$4 sm:$0xff]   ;;  %v7855_v2 = vld [vmem:[#allocation2 + $0x230] ss:$40 sps:$4 sm:$0xff]  }
  0x35   :  { %v7853_v1 = vld [vmem:[#allocation2 + $0x734] ss:$40 sps:$4 sm:$0xff]   ;;  %4946 = vmatprep.subr.bf16.mxu0 %v7851_v0  ;;  %v7856_v3 = vld [vmem:[#allocation2 + $0x730] ss:$40 sps:$4 sm:$0xff]   ;;  %v7857_v4 = vld [vmem:[#allocation2 + $0x1e4] ss:$40 sps:$4 sm:$0xff]  }
  0x36   :  { %4987 = vmatprep.subr.bf16.mxu1 %v7853_v1  ;;  %4947 = vmatpush1.bf16.msra.mxu0 %v7855_v2  ;;  %v7859_v5 = vld [vmem:[#allocation2 + $0x6e4] ss:$40 sps:$4 sm:$0xff]   ;;  %v7861_v6 = vld [vmem:[#allocation2 + $0x1e0] ss:$40 sps:$4 sm:$0xff]   ;;  %v7863_v8 = vld [vmem:[#allocation2 + $0x194] ss:$40 sps:$4 sm:$0xff]  }
  0x37   :  { %4988 = vmatpush1.bf16.msra.mxu1 %v7856_v3  ;;  %4948 = vmatprep.subr.bf16.mxu0 %v7857_v4  ;;  %v7862_v7 = vld [vmem:[#allocation2 + $0x6e0] ss:$40 sps:$4 sm:$0xff]   ;;  %v7865_v9 = vld [vmem:[#allocation2 + $0x694] ss:$40 sps:$4 sm:$0xff]   ;;  %v7867_v10 = vld [vmem:[#allocation2 + $0x190] ss:$40 sps:$4 sm:$0xff]  }
  0x38   :  { %4989 = vmatprep.subr.bf16.mxu1 %v7859_v5  ;;  %v7868_v11 = vld [vmem:[#allocation2 + $0x690] ss:$40 sps:$4 sm:$0xff]   ;;  %v7869_v12 = vld [vmem:[#allocation2 + $0x144] ss:$40 sps:$4 sm:$0xff]   ;;  %v7873_v14 = vld [vmem:[#allocation2 + $0x140] ss:$40 sps:$4 sm:$0xff]  }
  0x39   :  { %v7871_v13 = vld [vmem:[#allocation2 + $0x644] ss:$40 sps:$4 sm:$0xff]   ;;  %v7874_v15 = vld [vmem:[#allocation2 + $0x640] ss:$40 sps:$4 sm:$0xff]   ;;  %v7875_v16 = vld [vmem:[#allocation2 + $0xf4] ss:$40 sps:$4 sm:$0xff]  }
  0x3a   :  { %4949 = vmatpush1.bf16.msra.mxu0 %v7861_v6  ;;  %v7877_v17 = vld [vmem:[#allocation2 + $0x5f4] ss:$40 sps:$4 sm:$0xff]   ;;  %v7879_v18 = vld [vmem:[#allocation2 + $0xf0] ss:$40 sps:$4 sm:$0xff]   ;;  %v7881_v20 = vld [vmem:[#allocation2 + $0xa4] ss:$40 sps:$4 sm:$0xff]  }
  0x3b   :  { %4990 = vmatpush1.bf16.msra.mxu1 %v7862_v7  ;;  %4950 = vmatprep.subr.bf16.mxu0 %v7863_v8  ;;  %v7880_v19 = vld [vmem:[#allocation2 + $0x5f0] ss:$40 sps:$4 sm:$0xff]   ;;  %v7883_v21 = vld [vmem:[#allocation2 + $0x5a4] ss:$40 sps:$4 sm:$0xff]   ;;  %v7885_v22 = vld [vmem:[#allocation2 + $0xa0] ss:$40 sps:$4 sm:$0xff]  }
  0x3c   :  { %4991 = vmatprep.subr.bf16.mxu1 %v7865_v9  ;;  %v7886_v23 = vld [vmem:[#allocation2 + $0x5a0] ss:$40 sps:$4 sm:$0xff]   ;;  %v7887_v24 = vld [vmem:[#allocation2 + $0x54] ss:$40 sps:$4 sm:$0xff]   ;;  %v7891_v26 = vld [vmem:[#allocation2 + $0x50] ss:$40 sps:$4 sm:$0xff]  }
  0x3d   :  { %v7889_v25 = vld [vmem:[#allocation2 + $0x554] ss:$40 sps:$4 sm:$0xff]   ;;  %v7892_v27 = vld [vmem:[#allocation2 + $0x550] ss:$40 sps:$4 sm:$0xff]   ;;  %v7893_v28 = vld [vmem:[#allocation2 + $0x4] ss:$40 sps:$4 sm:$0xff]  }
  0x3e   :  { %4951 = vmatpush1.bf16.msra.mxu0 %v7867_v10  ;;  %v7895_v29 = vld [vmem:[#allocation2 + $0x504] ss:$40 sps:$4 sm:$0xff]   ;;  %v7897_v30 = vld [vmem:[#allocation2] ss:$40 sps:$4 sm:$0xff]   ;;  %v7899_v32 = vld [vmem:[#allocation2 + $0x4b4] ss:$40 sps:$4 sm:$0xff]  }
  0x3f   :  { %4992 = vmatpush1.bf16.msra.mxu1 %v7868_v11  ;;  %4952 = vmatprep.subr.bf16.mxu0 %v7869_v12  ;;  %v7898_v31 = vld [vmem:[#allocation2 + $0x500] ss:$40 sps:$4 sm:$0xff]   ;;  %v7901_v33 = vld [vmem:[#allocation2 + $0x9b4] ss:$40 sps:$4 sm:$0xff]   ;;  %v7903_v34 = vld [vmem:[#allocation2 + $0x4b0] ss:$40 sps:$4 sm:$0xff]  }
  0x40   :  { %4993 = vmatprep.subr.bf16.mxu1 %v7871_v13  ;;  %v7904_v35 = vld [vmem:[#allocation2 + $0x9b0] ss:$40 sps:$4 sm:$0xff]   ;;  %v7905_v36 = vld [vmem:[#allocation2 + $0x464] ss:$40 sps:$4 sm:$0xff]   ;;  %v7909_v38 = vld [vmem:[#allocation2 + $0x460] ss:$40 sps:$4 sm:$0xff]  }
  0x41   :  { %v7907_v37 = vld [vmem:[#allocation2 + $0x964] ss:$40 sps:$4 sm:$0xff]   ;;  %v7910_v39 = vld [vmem:[#allocation2 + $0x960] ss:$40 sps:$4 sm:$0xff]   ;;  %v7911_v40 = vld [vmem:[#allocation2 + $0x414] ss:$40 sps:$4 sm:$0xff]  }
  0x42   :  { %4953 = vmatpush1.bf16.msra.mxu0 %v7873_v14  ;;  %v7913_v41 = vld [vmem:[#allocation2 + $0x914] ss:$40 sps:$4 sm:$0xff]   ;;  %v7915_v42 = vld [vmem:[#allocation2 + $0x410] ss:$40 sps:$4 sm:$0xff]   ;;  %v7917_v44 = vld [vmem:[#allocation2 + $0x3c4] ss:$40 sps:$4 sm:$0xff]  }
  0x43   :  { %4994 = vmatpush1.bf16.msra.mxu1 %v7874_v15  ;;  %4954 = vmatprep.subr.bf16.mxu0 %v7875_v16  ;;  %v7916_v43 = vld [vmem:[#allocation2 + $0x910] ss:$40 sps:$4 sm:$0xff]   ;;  %v7919_v45 = vld [vmem:[#allocation2 + $0x8c4] ss:$40 sps:$4 sm:$0xff]   ;;  %v7921_v47 = vld [vmem:[#allocation2 + $0x3c0] ss:$40 sps:$4 sm:$0xff]  }
  0x44   :  { %4995 = vmatprep.subr.bf16.mxu1 %v7877_v17  ;;  %v73_v46 = vld [vmem:[%s9467_s0 + $0x8] sm:$0xff]  ;;  %v75_v49 = vld [vmem:[%s9467_s0 + $0x18] sm:$0xff]  ;;  %v72_v4 = vld [vmem:[%s9467_s0] sm:$0xff] }
  0x45   :  { %v9275_v48 = vpack.c.bf16 %v73_v46, %v73_v46  ;;  %v7922_v50 = vld [vmem:[#allocation2 + $0x8c0] ss:$40 sps:$4 sm:$0xff]   ;;  %v7923_v51 = vld [vmem:[#allocation2 + $0x374] ss:$40 sps:$4 sm:$0xff]   ;;  %v9280_v52 = vpack.c.bf16 %v75_v49, %v75_v49  ;;  %v7927_v54 = vld [vmem:[#allocation2 + $0x370] ss:$40 sps:$4 sm:$0xff]   ;;  %v9290_v8 = vpack.c.bf16 %v72_v4, %v72_v4 }
  0x46   :  { %4955 = vmatpush1.bf16.msra.mxu0 %v7879_v18  ;;  %v7925_v53 = vld [vmem:[#allocation2 + $0x874] ss:$40 sps:$4 sm:$0xff]   ;;  %v7928_v55 = vld [vmem:[#allocation2 + $0x870] ss:$40 sps:$4 sm:$0xff]   ;;  %v7929_v56 = vld [vmem:[#allocation2 + $0x324] ss:$40 sps:$4 sm:$0xff]  }
  0x47   :  { %4996 = vmatpush1.bf16.msra.mxu1 %v7880_v19  ;;  %4956 = vmatprep.subr.bf16.mxu0 %v7881_v20  ;;  %v7931_v57 = vld [vmem:[#allocation2 + $0x824] ss:$40 sps:$4 sm:$0xff]   ;;  %v7933_v58 = vld [vmem:[#allocation2 + $0x320] ss:$40 sps:$4 sm:$0xff]   ;;  %v7935_v60 = vld [vmem:[#allocation2 + $0x2d4] ss:$40 sps:$4 sm:$0xff]  }
  0x48   :  { %4997 = vmatprep.subr.bf16.mxu1 %v7883_v21  ;;  %4978 = vmatprep.mubr.bf16.mxu0 %v9275_v48  ;;  %v7934_v59 = vld [vmem:[#allocation2 + $0x820] ss:$40 sps:$4 sm:$0xff]   ;;  %v7937_v61 = vld [vmem:[#allocation2 + $0x7d4] ss:$40 sps:$4 sm:$0xff]   ;;  %v7939_v62 = vld [vmem:[#allocation2 + $0x2d0] ss:$40 sps:$4 sm:$0xff]  }
  0x49   :  { %5019 = vmatprep.mubr.bf16.mxu1 %v9280_v52  ;;  %v7940_v63 = vld [vmem:[#allocation2 + $0x7d0] ss:$40 sps:$4 sm:$0xff]   ;;  %v7941_v0 = vld [vmem:[#allocation2 + $0x284] ss:$40 sps:$4 sm:$0xff]   ;;  %v7945_v2 = vld [vmem:[#allocation2 + $0x280] ss:$40 sps:$4 sm:$0xff]  }
  0x4a   :  { %4957 = vmatpush1.bf16.msra.mxu0 %v7885_v22  ;;  %v7943_v1 = vld [vmem:[#allocation2 + $0x784] ss:$40 sps:$4 sm:$0xff]   ;;  %v7946_v3 = vld [vmem:[#allocation2 + $0x780] ss:$40 sps:$4 sm:$0xff]   ;;  %v7949_v5 = vld [vmem:[#allocation2 + $0xc34] ss:$40 sps:$4 sm:$0xff]  }
  0x4b   :  { %4998 = vmatpush1.bf16.msra.mxu1 %v7886_v23  ;;  %4958 = vmatprep.subr.bf16.mxu0 %v7887_v24  ;;  %v74_v6 = vld [vmem:[%s9467_s0 + $0x10] sm:$0xff]  ;;  %v7955_v12 = vld [vmem:[#allocation2 + $0xbe4] ss:$40 sps:$4 sm:$0xff]   ;;  %v7953_v14 = vld [vmem:[#allocation2 + $0xbe0] ss:$40 sps:$4 sm:$0xff]  }
  0x4c   :  { %4999 = vmatprep.subr.bf16.mxu1 %v7889_v25  ;;  %v7952_v7 = vld [vmem:[#allocation2 + $0x1134] ss:$40 sps:$4 sm:$0xff]   ;;  %v7947_v9 = vld [vmem:[#allocation2 + $0xc30] ss:$40 sps:$4 sm:$0xff]   ;;  %v9292_v11 = vpack.c.bf16 %v74_v6, %v74_v6  ;;  %v7958_v13 = vld [vmem:[#allocation2 + $0x10e4] ss:$40 sps:$4 sm:$0xff]  }
  0x4d   :  { %v7950_v10 = vld [vmem:[#allocation2 + $0x1130] ss:$40 sps:$4 sm:$0xff]   ;;  %v7956_v15 = vld [vmem:[#allocation2 + $0x10e0] ss:$40 sps:$4 sm:$0xff]   ;;  %v7961_v16 = vld [vmem:[#allocation2 + $0xb94] ss:$40 sps:$4 sm:$0xff]  }
  0x4e   :  { %4959 = vmatpush1.bf16.msra.mxu0 %v7891_v26  ;;  %v7964_v17 = vld [vmem:[#allocation2 + $0x1094] ss:$40 sps:$4 sm:$0xff]   ;;  %v7959_v18 = vld [vmem:[#allocation2 + $0xb90] ss:$40 sps:$4 sm:$0xff]   ;;  %v7967_v20 = vld [vmem:[#allocation2 + $0xb44] ss:$40 sps:$4 sm:$0xff]  }
  0x4f   :  { %5000 = vmatpush1.bf16.msra.mxu1 %v7892_v27  ;;  %4960 = vmatprep.subr.bf16.mxu0 %v7893_v28  ;;  %v7962_v19 = vld [vmem:[#allocation2 + $0x1090] ss:$40 sps:$4 sm:$0xff]   ;;  %v7970_v21 = vld [vmem:[#allocation2 + $0x1044] ss:$40 sps:$4 sm:$0xff]   ;;  %v7965_v22 = vld [vmem:[#allocation2 + $0xb40] ss:$40 sps:$4 sm:$0xff]  }
  0x50   :  { %5001 = vmatprep.subr.bf16.mxu1 %v7895_v29  ;;  %v7968_v23 = vld [vmem:[#allocation2 + $0x1040] ss:$40 sps:$4 sm:$0xff]   ;;  %v7973_v24 = vld [vmem:[#allocation2 + $0xaf4] ss:$40 sps:$4 sm:$0xff]   ;;  %v7971_v26 = vld [vmem:[#allocation2 + $0xaf0] ss:$40 sps:$4 sm:$0xff]  }
  0x51   :  { %v7976_v25 = vld [vmem:[#allocation2 + $0xff4] ss:$40 sps:$4 sm:$0xff]   ;;  %v7974_v27 = vld [vmem:[#allocation2 + $0xff0] ss:$40 sps:$4 sm:$0xff]   ;;  %v7979_v28 = vld [vmem:[#allocation2 + $0xaa4] ss:$40 sps:$4 sm:$0xff]  }
  0x52   :  { %4961 = vmatpush1.bf16.msra.mxu0 %v7897_v30  ;;  %v7982_v29 = vld [vmem:[#allocation2 + $0xfa4] ss:$40 sps:$4 sm:$0xff]   ;;  %v7977_v30 = vld [vmem:[#allocation2 + $0xaa0] ss:$40 sps:$4 sm:$0xff]   ;;  %v7995_v46 = vld [vmem:[#allocation2 + $0xeb0] ss:$40 sps:$4 sm:$0xff]  }
  0x53   :  { %5002 = vmatpush1.bf16.msra.mxu1 %v7898_v31  ;;  %4962 = vmatprep.subr.bf16.mxu0 %v7899_v32  ;;  %v7980_v31 = vld [vmem:[#allocation2 + $0xfa0] ss:$40 sps:$4 sm:$0xff]   ;;  %v7985_v32 = vld [vmem:[#allocation2 + $0xa54] ss:$40 sps:$4 sm:$0xff]   ;;  %v8003_v49 = vld [vmem:[#allocation2 + $0xe64] ss:$40 sps:$4 sm:$0xff]  }
  0x54   :  { %5003 = vmatprep.subr.bf16.mxu1 %v7901_v33  ;;  %v7988_v33 = vld [vmem:[#allocation2 + $0xf54] ss:$40 sps:$4 sm:$0xff]   ;;  %v8025_v4 = vld [vmem:[#allocation2 + $0xd20] ss:$40 sps:$4 sm:$0xff]  }
  0x55   :  { %v8033_v6 = vld [vmem:[#allocation2 + $0xcd4] ss:$40 sps:$4 sm:$0xff]  }
  0x56   :  { %4963 = vmatpush2.bf16.msra.mxu0 %v7903_v34  ;;  %v77_v34 = vld [vmem:[%s9467_s0 + $0x28] sm:$0xff] }
  0x57   :  { %5004 = vmatpush2.bf16.msra.mxu1 %v7904_v35  ;;  %4964 = vmatprep.subr.bf16.mxu0 %v7905_v36  ;;  %v7983_v35 = vld [vmem:[#allocation2 + $0xa50] ss:$40 sps:$4 sm:$0xff]   ;;  %v9299_v36 = vpack.c.bf16 %v77_v34, %v77_v34  ;;  %v8063_v34 = vld [vmem:[#allocation2 + $0x1544] ss:$40 sps:$4 sm:$0xff]  }
  0x58   :  { %5005 = vmatprep.subr.bf16.mxu1 %v7907_v37  ;;  %v79_v37 = vld [vmem:[%s9467_s0 + $0x38] sm:$0xff] }
  0x5a   :  { %4965 = vmatpush2.bf16.msra.mxu0 %v7909_v38  ;;  %v7986_v38 = vld [vmem:[#allocation2 + $0xf50] ss:$40 sps:$4 sm:$0xff]  }
  0x5b   :  { %5006 = vmatpush2.bf16.msra.mxu1 %v7910_v39  ;;  %4966 = vmatprep.subr.bf16.mxu0 %v7911_v40  ;;  %v7991_v39 = vld [vmem:[#allocation2 + $0xa04] ss:$40 sps:$4 sm:$0xff]   ;;  %v9304_v40 = vpack.c.bf16 %v79_v37, %v79_v37  ;;  %v8061_v37 = vld [vmem:[#allocation2 + $0x1540] ss:$40 sps:$4 sm:$0xff]  }
  0x5c   :  { %5007 = vmatprep.subr.bf16.mxu1 %v7913_v41  ;;  %v7994_v41 = vld [vmem:[#allocation2 + $0xf04] ss:$40 sps:$4 sm:$0xff]  }
  0x5e   :  { %4967 = vmatpush2.bf16.msra.mxu0 %v7915_v42  ;;  %v7989_v42 = vld [vmem:[#allocation2 + $0xa00] ss:$40 sps:$4 sm:$0xff]  }
  0x5f   :  { %5008 = vmatpush2.bf16.msra.mxu1 %v7916_v43  ;;  %4968 = vmatprep.subr.bf16.mxu0 %v7917_v44  ;;  %v7992_v43 = vld [vmem:[#allocation2 + $0xf00] ss:$40 sps:$4 sm:$0xff]   ;;  %v7997_v44 = vld [vmem:[#allocation2 + $0xeb4] ss:$40 sps:$4 sm:$0xff]  }
  0x60   :  { %5009 = vmatprep.subr.bf16.mxu1 %v7919_v45  ;;  %v8000_v45 = vld [vmem:[#allocation2 + $0x13b4] ss:$40 sps:$4 sm:$0xff]  }
  0x62   :  { %4969 = vmatpush2.bf16.msra.mxu0 %v7921_v47  ;;  %v7998_v47 = vld [vmem:[#allocation2 + $0x13b0] ss:$40 sps:$4 sm:$0xff]  }
  0x63   :  { %5010 = vmatpush2.bf16.msra.mxu1 %v7922_v50  ;;  %4970 = vmatprep.subr.bf16.mxu0 %v7923_v51  ;;  %v8006_v50 = vld [vmem:[#allocation2 + $0x1364] ss:$40 sps:$4 sm:$0xff]   ;;  %v8001_v51 = vld [vmem:[#allocation2 + $0xe60] ss:$40 sps:$4 sm:$0xff]  }
  0x64   :  { %5011 = vmatprep.subr.bf16.mxu1 %v7925_v53  ;;  %v8004_v53 = vld [vmem:[#allocation2 + $0x1360] ss:$40 sps:$4 sm:$0xff]  }
  0x66   :  { %4971 = vmatpush2.bf16.msra.mxu0 %v7927_v54  ;;  %v8009_v54 = vld [vmem:[#allocation2 + $0xe14] ss:$40 sps:$4 sm:$0xff]  }
  0x67   :  { %5012 = vmatpush2.bf16.msra.mxu1 %v7928_v55  ;;  %4972 = vmatprep.subr.bf16.mxu0 %v7929_v56  ;;  %v8012_v55 = vld [vmem:[#allocation2 + $0x1314] ss:$40 sps:$4 sm:$0xff]   ;;  %v8007_v56 = vld [vmem:[#allocation2 + $0xe10] ss:$40 sps:$4 sm:$0xff]  }
  0x68   :  { %5013 = vmatprep.subr.bf16.mxu1 %v7931_v57  ;;  %v8010_v57 = vld [vmem:[#allocation2 + $0x1310] ss:$40 sps:$4 sm:$0xff]  }
  0x6a   :  { %4973 = vmatpush2.bf16.msra.mxu0 %v7933_v58  ;;  %v8015_v58 = vld [vmem:[#allocation2 + $0xdc4] ss:$40 sps:$4 sm:$0xff]  }
  0x6b   :  { %5014 = vmatpush2.bf16.msra.mxu1 %v7934_v59  ;;  %4974 = vmatprep.subr.bf16.mxu0 %v7935_v60  ;;  %v8018_v59 = vld [vmem:[#allocation2 + $0x12c4] ss:$40 sps:$4 sm:$0xff]   ;;  %v8013_v60 = vld [vmem:[#allocation2 + $0xdc0] ss:$40 sps:$4 sm:$0xff]  }
  0x6c   :  { %5015 = vmatprep.subr.bf16.mxu1 %v7937_v61  ;;  %v8016_v61 = vld [vmem:[#allocation2 + $0x12c0] ss:$40 sps:$4 sm:$0xff]  }
  0x6e   :  { %4975 = vmatpush2.bf16.msra.mxu0 %v7939_v62  ;;  %v8021_v62 = vld [vmem:[#allocation2 + $0xd74] ss:$40 sps:$4 sm:$0xff]  }
  0x6f   :  { %5016 = vmatpush2.bf16.msra.mxu1 %v7940_v63  ;;  %4976 = vmatprep.subr.bf16.mxu0 %v7941_v0  ;;  %v8024_v63 = vld [vmem:[#allocation2 + $0x1274] ss:$40 sps:$4 sm:$0xff]   ;;  %v8019_v0 = vld [vmem:[#allocation2 + $0xd70] ss:$40 sps:$4 sm:$0xff]  }
  0x70   :  { %5017 = vmatprep.subr.bf16.mxu1 %v7943_v1  ;;  %v8022_v1 = vld [vmem:[#allocation2 + $0x1270] ss:$40 sps:$4 sm:$0xff]  }
  0x72   :  { %4977 = vmatpush2.bf16.msra.mxu0 %v7945_v2  ;;  %v8027_v2 = vld [vmem:[#allocation2 + $0xd24] ss:$40 sps:$4 sm:$0xff]  }
  0x73   :  { %5018 = vmatpush2.bf16.msra.mxu1 %v7946_v3  ;;  %5028 = vmatprep.subr.bf16.mxu0 %v7949_v5  ;;  %v8030_v3 = vld [vmem:[#allocation2 + $0x1224] ss:$40 sps:$4 sm:$0xff]   ;;  %v8028_v5 = vld [vmem:[#allocation2 + $0x1220] ss:$40 sps:$4 sm:$0xff]  }
  0x74   :  { %5069 = vmatprep.subr.bf16.mxu1 %v7952_v7  ;;  %v8036_v7 = vld [vmem:[#allocation2 + $0x11d4] ss:$40 sps:$4 sm:$0xff]  }
  0x75   :  { %4979 = vmatmul.mubr.bf16.vlgmr.msra.gmra.mxu0 %v9290_v8 }
  0x76   :  { %5020 = vmatmul.mubr.bf16.vlgmr.msra.gmra.mxu1 %v9292_v11  ;;  %5029 = vmatpush1.bf16.msra.mxu0 %v7947_v9  ;;  %v8031_v9 = vld [vmem:[#allocation2 + $0xcd0] ss:$40 sps:$4 sm:$0xff]  }
  0x77   :  { %5070 = vmatpush1.bf16.msra.mxu1 %v7950_v10  ;;  %5030 = vmatprep.subr.bf16.mxu0 %v7955_v12  ;;  %v8034_v10 = vld [vmem:[#allocation2 + $0x11d0] ss:$40 sps:$4 sm:$0xff]   ;;  %v8039_v12 = vld [vmem:[#allocation2 + $0xc84] ss:$40 sps:$4 sm:$0xff]  }
  0x78   :  { %5071 = vmatprep.subr.bf16.mxu1 %v7958_v13  ;;  %5060 = vmatprep.mubr.bf16.mxu0 %v9299_v36  ;;  %v8042_v13 = vld [vmem:[#allocation2 + $0x1184] ss:$40 sps:$4 sm:$0xff]  }
  0x79   :  { %5101 = vmatprep.mubr.bf16.mxu1 %v9304_v40 }
  0x7a   :  { %5031 = vmatpush1.bf16.msra.mxu0 %v7953_v14  ;;  %v8037_v14 = vld [vmem:[#allocation2 + $0xc80] ss:$40 sps:$4 sm:$0xff]  }
  0x7b   :  { %5072 = vmatpush1.bf16.msra.mxu1 %v7956_v15  ;;  %5032 = vmatprep.subr.bf16.mxu0 %v7961_v16  ;;  %v8040_v15 = vld [vmem:[#allocation2 + $0x1180] ss:$40 sps:$4 sm:$0xff]  }
  0x7c   :  { %5073 = vmatprep.subr.bf16.mxu1 %v7964_v17  ;;  %v76_v16 = vld [vmem:[%s9467_s0 + $0x20] sm:$0xff]  ;;  %v8045_v17 = vld [vmem:[#allocation2 + $0x1634] ss:$40 sps:$4 sm:$0xff]  }
  0x7e   :  { %5033 = vmatpush1.bf16.msra.mxu0 %v7959_v18  ;;  %v78_v18 = vld [vmem:[%s9467_s0 + $0x30] sm:$0xff] }
  0x7f   :  { %5074 = vmatpush1.bf16.msra.mxu1 %v7962_v19  ;;  %5034 = vmatprep.subr.bf16.mxu0 %v7967_v20  ;;  %v8048_v19 = vld [vmem:[#allocation2 + $0x23c] ss:$40 sps:$4 sm:$0xff]   ;;  %v9314_v20 = vpack.c.bf16 %v76_v16, %v76_v16 }
  0x80   :  { %5075 = vmatprep.subr.bf16.mxu1 %v7970_v21  ;;  %v8043_v21 = vld [vmem:[#allocation2 + $0x1630] ss:$40 sps:$4 sm:$0xff]   ;;  %v8123_v16 = vld [vmem:[#allocation2 + $0x1724] ss:$40 sps:$4 sm:$0xff]  }
  0x82   :  { %5035 = vmatpush1.bf16.msra.mxu0 %v7965_v22  ;;  %v8046_v22 = vld [vmem:[#allocation2 + $0x238] ss:$40 sps:$4 sm:$0xff]  }
  0x83   :  { %5076 = vmatpush1.bf16.msra.mxu1 %v7968_v23  ;;  %5036 = vmatprep.subr.bf16.mxu0 %v7973_v24  ;;  %v9316_v23 = vpack.c.bf16 %v78_v18, %v78_v18  ;;  %v8051_v24 = vld [vmem:[#allocation2 + $0x15e4] ss:$40 sps:$4 sm:$0xff]   ;;  %v8121_v18 = vld [vmem:[#allocation2 + $0x1720] ss:$40 sps:$4 sm:$0xff]  }
  0x84   :  { %5077 = vmatprep.subr.bf16.mxu1 %v7976_v25  ;;  %v8054_v25 = vld [vmem:[#allocation2 + $0x1ec] ss:$40 sps:$4 sm:$0xff]  }
  0x86   :  { %5037 = vmatpush1.bf16.msra.mxu0 %v7971_v26  ;;  %v81_v26 = vld [vmem:[%s9467_s0 + $0x48] sm:$0xff] }
  0x87   :  { %5078 = vmatpush1.bf16.msra.mxu1 %v7974_v27  ;;  %5038 = vmatprep.subr.bf16.mxu0 %v7979_v28  ;;  %v9323_v27 = vpack.c.bf16 %v81_v26, %v81_v26  ;;  %v8049_v28 = vld [vmem:[#allocation2 + $0x15e0] ss:$40 sps:$4 sm:$0xff]   ;;  %v8135_v26 = vld [vmem:[#allocation2 + $0x1684] ss:$40 sps:$4 sm:$0xff]  }
  0x88   :  { %5079 = vmatprep.subr.bf16.mxu1 %v7982_v29  ;;  %v8052_v29 = vld [vmem:[#allocation2 + $0x1e8] ss:$40 sps:$4 sm:$0xff]  }
  0x8a   :  { %5039 = vmatpush1.bf16.msra.mxu0 %v7977_v30  ;;  %v8057_v30 = vld [vmem:[#allocation2 + $0x1594] ss:$40 sps:$4 sm:$0xff]  }
  0x8b   :  { %5080 = vmatpush1.bf16.msra.mxu1 %v7980_v31  ;;  %5040 = vmatprep.subr.bf16.mxu0 %v7985_v32  ;;  %v8060_v31 = vld [vmem:[#allocation2 + $0x19c] ss:$40 sps:$4 sm:$0xff]   ;;  %v8055_v32 = vld [vmem:[#allocation2 + $0x1590] ss:$40 sps:$4 sm:$0xff]  }
  0x8c   :  { %5081 = vmatprep.subr.bf16.mxu1 %v7988_v33  ;;  %v8058_v33 = vld [vmem:[#allocation2 + $0x198] ss:$40 sps:$4 sm:$0xff]  }
  0x8e   :  { %5041 = vmatpush1.bf16.msra.mxu0 %v7983_v35  ;;  %v8066_v35 = vld [vmem:[#allocation2 + $0x14c] ss:$40 sps:$4 sm:$0xff]  }
  0x8f   :  { %5082 = vmatpush1.bf16.msra.mxu1 %v7986_v38  ;;  %5042 = vmatprep.subr.bf16.mxu0 %v7991_v39  ;;  %v8064_v38 = vld [vmem:[#allocation2 + $0x148] ss:$40 sps:$4 sm:$0xff]   ;;  %v8069_v39 = vld [vmem:[#allocation2 + $0x14f4] ss:$40 sps:$4 sm:$0xff]  }
  0x90   :  { %5083 = vmatprep.subr.bf16.mxu1 %v7994_v41  ;;  %v8072_v41 = vld [vmem:[#allocation2 + $0xfc] ss:$40 sps:$4 sm:$0xff]  }
  0x92   :  { %5043 = vmatpush1.bf16.msra.mxu0 %v7989_v42  ;;  %v8067_v42 = vld [vmem:[#allocation2 + $0x14f0] ss:$40 sps:$4 sm:$0xff]  }
  0x93   :  { %5084 = vmatpush1.bf16.msra.mxu1 %v7992_v43  ;;  %5044 = vmatprep.subr.bf16.mxu0 %v7997_v44  ;;  %v8070_v43 = vld [vmem:[#allocation2 + $0xf8] ss:$40 sps:$4 sm:$0xff]   ;;  %v8075_v44 = vld [vmem:[#allocation2 + $0x14a4] ss:$40 sps:$4 sm:$0xff]  }
  0x94   :  { %5085 = vmatprep.subr.bf16.mxu1 %v8000_v45  ;;  %v8078_v45 = vld [vmem:[#allocation2 + $0xac] ss:$40 sps:$4 sm:$0xff]  }
  0x96   :  { %5045 = vmatpush2.bf16.msra.mxu0 %v7995_v46  ;;  %v8073_v46 = vld [vmem:[#allocation2 + $0x14a0] ss:$40 sps:$4 sm:$0xff]  }
  0x97   :  { %5086 = vmatpush2.bf16.msra.mxu1 %v7998_v47  ;;  %5046 = vmatprep.subr.bf16.mxu0 %v8003_v49  ;;  %v8076_v47 = vld [vmem:[#allocation2 + $0xa8] ss:$40 sps:$4 sm:$0xff]   ;;  %v8081_v49 = vld [vmem:[#allocation2 + $0x1454] ss:$40 sps:$4 sm:$0xff]  }
  0x98   :  { %5087 = vmatprep.subr.bf16.mxu1 %v8006_v50  ;;  %v8084_v50 = vld [vmem:[#allocation2 + $0x5c] ss:$40 sps:$4 sm:$0xff]  }
  0x9a   :  { %5047 = vmatpush2.bf16.msra.mxu0 %v8001_v51  ;;  %v8079_v51 = vld [vmem:[#allocation2 + $0x1450] ss:$40 sps:$4 sm:$0xff]  }
  0x9b   :  { %5088 = vmatpush2.bf16.msra.mxu1 %v8004_v53  ;;  %5048 = vmatprep.subr.bf16.mxu0 %v8009_v54  ;;  %v8082_v53 = vld [vmem:[#allocation2 + $0x58] ss:$40 sps:$4 sm:$0xff]   ;;  %v8087_v54 = vld [vmem:[#allocation2 + $0x1404] ss:$40 sps:$4 sm:$0xff]  }
  0x9c   :  { %5089 = vmatprep.subr.bf16.mxu1 %v8012_v55  ;;  %v8090_v55 = vld [vmem:[#allocation2 + $0xc] ss:$40 sps:$4 sm:$0xff]  }
  0x9e   :  { %5049 = vmatpush2.bf16.msra.mxu0 %v8007_v56  ;;  %v8085_v56 = vld [vmem:[#allocation2 + $0x1400] ss:$40 sps:$4 sm:$0xff]  }
  0x9f   :  { %5090 = vmatpush2.bf16.msra.mxu1 %v8010_v57  ;;  %5050 = vmatprep.subr.bf16.mxu0 %v8015_v58  ;;  %v8088_v57 = vld [vmem:[#allocation2 + $0x8] ss:$40 sps:$4 sm:$0xff]   ;;  %v8093_v58 = vld [vmem:[#allocation2 + $0x18b4] ss:$40 sps:$4 sm:$0xff]  }
  0xa0   :  { %5091 = vmatprep.subr.bf16.mxu1 %v8018_v59  ;;  %v8096_v59 = vld [vmem:[#allocation2 + $0x4bc] ss:$40 sps:$4 sm:$0xff]  }
  0xa2   :  { %5051 = vmatpush2.bf16.msra.mxu0 %v8013_v60  ;;  %v8091_v60 = vld [vmem:[#allocation2 + $0x18b0] ss:$40 sps:$4 sm:$0xff]  }
  0xa3   :  { %5092 = vmatpush2.bf16.msra.mxu1 %v8016_v61  ;;  %5052 = vmatprep.subr.bf16.mxu0 %v8021_v62  ;;  %v8094_v61 = vld [vmem:[#allocation2 + $0x4b8] ss:$40 sps:$4 sm:$0xff]   ;;  %v8099_v62 = vld [vmem:[#allocation2 + $0x1864] ss:$40 sps:$4 sm:$0xff]  }
  0xa4   :  { %5093 = vmatprep.subr.bf16.mxu1 %v8024_v63  ;;  %v8102_v63 = vld [vmem:[#allocation2 + $0x46c] ss:$40 sps:$4 sm:$0xff]  }
  0xa6   :  { %5053 = vmatpush2.bf16.msra.mxu0 %v8019_v0  ;;  %v8097_v0 = vld [vmem:[#allocation2 + $0x1860] ss:$40 sps:$4 sm:$0xff]  }
  0xa7   :  { %5094 = vmatpush2.bf16.msra.mxu1 %v8022_v1  ;;  %5054 = vmatprep.subr.bf16.mxu0 %v8027_v2  ;;  %v8100_v1 = vld [vmem:[#allocation2 + $0x468] ss:$40 sps:$4 sm:$0xff]   ;;  %v8105_v2 = vld [vmem:[#allocation2 + $0x1814] ss:$40 sps:$4 sm:$0xff]  }
  0xa8   :  { %5095 = vmatprep.subr.bf16.mxu1 %v8030_v3  ;;  %v8108_v3 = vld [vmem:[#allocation2 + $0x41c] ss:$40 sps:$4 sm:$0xff]  }
  0xaa   :  { %5055 = vmatpush2.bf16.msra.mxu0 %v8025_v4  ;;  %v8103_v4 = vld [vmem:[#allocation2 + $0x1810] ss:$40 sps:$4 sm:$0xff]  }
  0xab   :  { %5096 = vmatpush2.bf16.msra.mxu1 %v8028_v5  ;;  %5056 = vmatprep.subr.bf16.mxu0 %v8033_v6  ;;  %v8106_v5 = vld [vmem:[#allocation2 + $0x418] ss:$40 sps:$4 sm:$0xff]   ;;  %v8111_v6 = vld [vmem:[#allocation2 + $0x17c4] ss:$40 sps:$4 sm:$0xff]  }
  0xac   :  { %5097 = vmatprep.subr.bf16.mxu1 %v8036_v7  ;;  %v8114_v7 = vld [vmem:[#allocation2 + $0x3cc] ss:$40 sps:$4 sm:$0xff]  }
  0xae   :  { %5057 = vmatpush2.bf16.msra.mxu0 %v8031_v9  ;;  %v8109_v9 = vld [vmem:[#allocation2 + $0x17c0] ss:$40 sps:$4 sm:$0xff]  }
  0xaf   :  { %5098 = vmatpush2.bf16.msra.mxu1 %v8034_v10  ;;  %5058 = vmatprep.subr.bf16.mxu0 %v8039_v12  ;;  %v8112_v10 = vld [vmem:[#allocation2 + $0x3c8] ss:$40 sps:$4 sm:$0xff]   ;;  %v8117_v12 = vld [vmem:[#allocation2 + $0x1774] ss:$40 sps:$4 sm:$0xff]  }
  0xb0   :  { %5099 = vmatprep.subr.bf16.mxu1 %v8042_v13  ;;  %v8120_v13 = vld [vmem:[#allocation2 + $0x37c] ss:$40 sps:$4 sm:$0xff]  }
  0xb2   :  { %5059 = vmatpush2.bf16.msra.mxu0 %v8037_v14  ;;  %v8115_v14 = vld [vmem:[#allocation2 + $0x1770] ss:$40 sps:$4 sm:$0xff]  }
  0xb3   :  { %5100 = vmatpush2.bf16.msra.mxu1 %v8040_v15  ;;  %5110 = vmatprep.subr.bf16.mxu0 %v8045_v17  ;;  %v8118_v15 = vld [vmem:[#allocation2 + $0x378] ss:$40 sps:$4 sm:$0xff]   ;;  %v8126_v17 = vld [vmem:[#allocation2 + $0x32c] ss:$40 sps:$4 sm:$0xff]  }
  0xb4   :  { %5151 = vmatprep.subr.bf16.mxu1 %v8048_v19  ;;  %v8124_v19 = vld [vmem:[#allocation2 + $0x328] ss:$40 sps:$4 sm:$0xff]  }
  0xb5   :  { %5061 = vmatmul.mubr.bf16.vlgmr.msra.gmra.mxu0 %v9314_v20 }
  0xb6   :  { %5102 = vmatmul.mubr.bf16.vlgmr.msra.gmra.mxu1 %v9316_v23  ;;  %5111 = vmatpush1.bf16.msra.mxu0 %v8043_v21  ;;  %v8129_v21 = vld [vmem:[#allocation2 + $0x16d4] ss:$40 sps:$4 sm:$0xff]  }
  0xb7   :  { %5152 = vmatpush1.bf16.msra.mxu1 %v8046_v22  ;;  %5112 = vmatprep.subr.bf16.mxu0 %v8051_v24  ;;  %v8132_v22 = vld [vmem:[#allocation2 + $0x2dc] ss:$40 sps:$4 sm:$0xff]   ;;  %v8127_v24 = vld [vmem:[#allocation2 + $0x16d0] ss:$40 sps:$4 sm:$0xff]  }
  0xb8   :  { %5153 = vmatprep.subr.bf16.mxu1 %v8054_v25  ;;  %5142 = vmatprep.mubr.bf16.mxu0 %v9323_v27  ;;  %v8130_v25 = vld [vmem:[#allocation2 + $0x2d8] ss:$40 sps:$4 sm:$0xff]  }
  0xb9   :  { %5183 = vmatprep.mubr.bf16.mxu1 %v9275_v48 }
  0xba   :  { %5113 = vmatpush1.bf16.msra.mxu0 %v8049_v28  ;;  %v8138_v28 = vld [vmem:[#allocation2 + $0x28c] ss:$40 sps:$4 sm:$0xff]  }
  0xbb   :  { %5154 = vmatpush1.bf16.msra.mxu1 %v8052_v29  ;;  %5114 = vmatprep.subr.bf16.mxu0 %v8057_v30  ;;  %v8133_v29 = vld [vmem:[#allocation2 + $0x1680] ss:$40 sps:$4 sm:$0xff]  }
  0xbc   :  { %5155 = vmatprep.subr.bf16.mxu1 %v8060_v31  ;;  %v8136_v30 = vld [vmem:[#allocation2 + $0x288] ss:$40 sps:$4 sm:$0xff]   ;;  %v80_v31 = vld [vmem:[%s9467_s0 + $0x40] sm:$0xff] }
  0xbe   :  { %5115 = vmatpush1.bf16.msra.mxu0 %v8055_v32  ;;  %v8141_v32 = vld [vmem:[#allocation2 + $0x73c] ss:$40 sps:$4 sm:$0xff]  }
  0xbf   :  { %5156 = vmatpush1.bf16.msra.mxu1 %v8058_v33  ;;  %5116 = vmatprep.subr.bf16.mxu0 %v8063_v34  ;;  %v8144_v33 = vld [vmem:[#allocation2 + $0xc3c] ss:$40 sps:$4 sm:$0xff]   ;;  %v9330_v34 = vpack.c.bf16 %v80_v31, %v80_v31  ;;  %v8222_v31 = vld [vmem:[#allocation2 + $0xd2c] ss:$40 sps:$4 sm:$0xff]  }
  0xc0   :  { %5157 = vmatprep.subr.bf16.mxu1 %v8066_v35  ;;  %v8139_v35 = vld [vmem:[#allocation2 + $0x738] ss:$40 sps:$4 sm:$0xff]  }
  0xc2   :  { %5117 = vmatpush1.bf16.msra.mxu0 %v8061_v37  ;;  %v8142_v37 = vld [vmem:[#allocation2 + $0xc38] ss:$40 sps:$4 sm:$0xff]  }
  0xc3   :  { %5158 = vmatpush1.bf16.msra.mxu1 %v8064_v38  ;;  %5118 = vmatprep.subr.bf16.mxu0 %v8069_v39  ;;  %v8147_v38 = vld [vmem:[#allocation2 + $0x6ec] ss:$40 sps:$4 sm:$0xff]  }
  0xc4   :  { %5159 = vmatprep.subr.bf16.mxu1 %v8072_v41  ;;  %v8150_v39 = vld [vmem:[#allocation2 + $0xbec] ss:$40 sps:$4 sm:$0xff]   ;;  %v8145_v41 = vld [vmem:[#allocation2 + $0x6e8] ss:$40 sps:$4 sm:$0xff]  }
  0xc6   :  { %5119 = vmatpush1.bf16.msra.mxu0 %v8067_v42  ;;  %v8148_v42 = vld [vmem:[#allocation2 + $0xbe8] ss:$40 sps:$4 sm:$0xff]  }
  0xc7   :  { %5160 = vmatpush1.bf16.msra.mxu1 %v8070_v43  ;;  %5120 = vmatprep.subr.bf16.mxu0 %v8075_v44  ;;  %v8153_v43 = vld [vmem:[#allocation2 + $0x69c] ss:$40 sps:$4 sm:$0xff]  }
  0xc8   :  { %5161 = vmatprep.subr.bf16.mxu1 %v8078_v45  ;;  %v8156_v44 = vld [vmem:[#allocation2 + $0xb9c] ss:$40 sps:$4 sm:$0xff]   ;;  %v8151_v45 = vld [vmem:[#allocation2 + $0x698] ss:$40 sps:$4 sm:$0xff]  }
  0xca   :  { %5121 = vmatpush1.bf16.msra.mxu0 %v8073_v46  ;;  %v8154_v46 = vld [vmem:[#allocation2 + $0xb98] ss:$40 sps:$4 sm:$0xff]  }
  0xcb   :  { %5162 = vmatpush1.bf16.msra.mxu1 %v8076_v47  ;;  %5122 = vmatprep.subr.bf16.mxu0 %v8081_v49  ;;  %v8159_v47 = vld [vmem:[#allocation2 + $0x64c] ss:$40 sps:$4 sm:$0xff]  }
  0xcc   :  { %5163 = vmatprep.subr.bf16.mxu1 %v8084_v50  ;;  %v8162_v49 = vld [vmem:[#allocation2 + $0xb4c] ss:$40 sps:$4 sm:$0xff]   ;;  %v8157_v50 = vld [vmem:[#allocation2 + $0x648] ss:$40 sps:$4 sm:$0xff]  }
  0xce   :  { %5123 = vmatpush1.bf16.msra.mxu0 %v8079_v51  ;;  %v8160_v51 = vld [vmem:[#allocation2 + $0xb48] ss:$40 sps:$4 sm:$0xff]  }
  0xcf   :  { %5164 = vmatpush1.bf16.msra.mxu1 %v8082_v53  ;;  %5124 = vmatprep.subr.bf16.mxu0 %v8087_v54  ;;  %v8165_v53 = vld [vmem:[#allocation2 + $0x5fc] ss:$40 sps:$4 sm:$0xff]  }
  0xd0   :  { %5165 = vmatprep.subr.bf16.mxu1 %v8090_v55  ;;  %v8168_v54 = vld [vmem:[#allocation2 + $0xafc] ss:$40 sps:$4 sm:$0xff]   ;;  %v8163_v55 = vld [vmem:[#allocation2 + $0x5f8] ss:$40 sps:$4 sm:$0xff]  }
  0xd2   :  { %5125 = vmatpush1.bf16.msra.mxu0 %v8085_v56  ;;  %v8166_v56 = vld [vmem:[#allocation2 + $0xaf8] ss:$40 sps:$4 sm:$0xff]  }
  0xd3   :  { %5166 = vmatpush1.bf16.msra.mxu1 %v8088_v57  ;;  %5126 = vmatprep.subr.bf16.mxu0 %v8093_v58  ;;  %v8171_v57 = vld [vmem:[#allocation2 + $0x5ac] ss:$40 sps:$4 sm:$0xff]  }
  0xd4   :  { %5167 = vmatprep.subr.bf16.mxu1 %v8096_v59  ;;  %v8174_v58 = vld [vmem:[#allocation2 + $0xaac] ss:$40 sps:$4 sm:$0xff]   ;;  %v8169_v59 = vld [vmem:[#allocation2 + $0x5a8] ss:$40 sps:$4 sm:$0xff]  }
  0xd6   :  { %5127 = vmatpush2.bf16.msra.mxu0 %v8091_v60  ;;  %v8172_v60 = vld [vmem:[#allocation2 + $0xaa8] ss:$40 sps:$4 sm:$0xff]  }
  0xd7   :  { %5168 = vmatpush2.bf16.msra.mxu1 %v8094_v61  ;;  %5128 = vmatprep.subr.bf16.mxu0 %v8099_v62  ;;  %v8177_v61 = vld [vmem:[#allocation2 + $0x55c] ss:$40 sps:$4 sm:$0xff]  }
  0xd8   :  { %5169 = vmatprep.subr.bf16.mxu1 %v8102_v63  ;;  %v8180_v62 = vld [vmem:[#allocation2 + $0xa5c] ss:$40 sps:$4 sm:$0xff]   ;;  %v8175_v63 = vld [vmem:[#allocation2 + $0x558] ss:$40 sps:$4 sm:$0xff]  }
  0xda   :  { %5129 = vmatpush2.bf16.msra.mxu0 %v8097_v0  ;;  %v8178_v0 = vld [vmem:[#allocation2 + $0xa58] ss:$40 sps:$4 sm:$0xff]  }
  0xdb   :  { %5170 = vmatpush2.bf16.msra.mxu1 %v8100_v1  ;;  %5130 = vmatprep.subr.bf16.mxu0 %v8105_v2  ;;  %v8183_v1 = vld [vmem:[#allocation2 + $0x50c] ss:$40 sps:$4 sm:$0xff]  }
  0xdc   :  { %5171 = vmatprep.subr.bf16.mxu1 %v8108_v3  ;;  %v8186_v2 = vld [vmem:[#allocation2 + $0xa0c] ss:$40 sps:$4 sm:$0xff]   ;;  %v8181_v3 = vld [vmem:[#allocation2 + $0x508] ss:$40 sps:$4 sm:$0xff]  }
  0xde   :  { %5131 = vmatpush2.bf16.msra.mxu0 %v8103_v4  ;;  %v8184_v4 = vld [vmem:[#allocation2 + $0xa08] ss:$40 sps:$4 sm:$0xff]  }
  0xdf   :  { %5172 = vmatpush2.bf16.msra.mxu1 %v8106_v5  ;;  %5132 = vmatprep.subr.bf16.mxu0 %v8111_v6  ;;  %v8189_v5 = vld [vmem:[#allocation2 + $0x9bc] ss:$40 sps:$4 sm:$0xff]  }
  0xe0   :  { %5173 = vmatprep.subr.bf16.mxu1 %v8114_v7  ;;  %v8192_v6 = vld [vmem:[#allocation2 + $0xebc] ss:$40 sps:$4 sm:$0xff]   ;;  %v8187_v7 = vld [vmem:[#allocation2 + $0x9b8] ss:$40 sps:$4 sm:$0xff]  }
  0xe2   :  { %5133 = vmatpush2.bf16.msra.mxu0 %v8109_v9  ;;  %v8190_v9 = vld [vmem:[#allocation2 + $0xeb8] ss:$40 sps:$4 sm:$0xff]  }
  0xe3   :  { %5174 = vmatpush2.bf16.msra.mxu1 %v8112_v10  ;;  %5134 = vmatprep.subr.bf16.mxu0 %v8117_v12  ;;  %v8195_v10 = vld [vmem:[#allocation2 + $0x96c] ss:$40 sps:$4 sm:$0xff]  }
  0xe4   :  { %5175 = vmatprep.subr.bf16.mxu1 %v8120_v13  ;;  %v8198_v12 = vld [vmem:[#allocation2 + $0xe6c] ss:$40 sps:$4 sm:$0xff]   ;;  %v8193_v13 = vld [vmem:[#allocation2 + $0x968] ss:$40 sps:$4 sm:$0xff]  }
  0xe6   :  { %5135 = vmatpush2.bf16.msra.mxu0 %v8115_v14  ;;  %v8196_v14 = vld [vmem:[#allocation2 + $0xe68] ss:$40 sps:$4 sm:$0xff]  }
  0xe7   :  { %5176 = vmatpush2.bf16.msra.mxu1 %v8118_v15  ;;  %5136 = vmatprep.subr.bf16.mxu0 %v8123_v16  ;;  %v8201_v15 = vld [vmem:[#allocation2 + $0x91c] ss:$40 sps:$4 sm:$0xff]  }
  0xe8   :  { %5177 = vmatprep.subr.bf16.mxu1 %v8126_v17  ;;  %v8204_v16 = vld [vmem:[#allocation2 + $0xe1c] ss:$40 sps:$4 sm:$0xff]   ;;  %v8199_v17 = vld [vmem:[#allocation2 + $0x918] ss:$40 sps:$4 sm:$0xff]  }
  0xea   :  { %5137 = vmatpush2.bf16.msra.mxu0 %v8121_v18  ;;  %v8202_v18 = vld [vmem:[#allocation2 + $0xe18] ss:$40 sps:$4 sm:$0xff]  }
  0xeb   :  { %5178 = vmatpush2.bf16.msra.mxu1 %v8124_v19  ;;  %5138 = vmatprep.subr.bf16.mxu0 %v8129_v21  ;;  %v8207_v19 = vld [vmem:[#allocation2 + $0x8cc] ss:$40 sps:$4 sm:$0xff]  }
  0xec   :  { %5179 = vmatprep.subr.bf16.mxu1 %v8132_v22  ;;  %v8210_v21 = vld [vmem:[#allocation2 + $0xdcc] ss:$40 sps:$4 sm:$0xff]   ;;  %v8205_v22 = vld [vmem:[#allocation2 + $0x8c8] ss:$40 sps:$4 sm:$0xff]  }
  0xee   :  { %5139 = vmatpush2.bf16.msra.mxu0 %v8127_v24  ;;  %v8208_v24 = vld [vmem:[#allocation2 + $0xdc8] ss:$40 sps:$4 sm:$0xff]  }
  0xef   :  { %5180 = vmatpush2.bf16.msra.mxu1 %v8130_v25  ;;  %5140 = vmatprep.subr.bf16.mxu0 %v8135_v26  ;;  %v8213_v25 = vld [vmem:[#allocation2 + $0x87c] ss:$40 sps:$4 sm:$0xff]  }
  0xf0   :  { %5181 = vmatprep.subr.bf16.mxu1 %v8138_v28  ;;  %v8216_v26 = vld [vmem:[#allocation2 + $0xd7c] ss:$40 sps:$4 sm:$0xff]   ;;  %v8211_v28 = vld [vmem:[#allocation2 + $0x878] ss:$40 sps:$4 sm:$0xff]  }
  0xf2   :  { %5141 = vmatpush2.bf16.msra.mxu0 %v8133_v29  ;;  %v8214_v29 = vld [vmem:[#allocation2 + $0xd78] ss:$40 sps:$4 sm:$0xff]  }
  0xf3   :  { %5182 = vmatpush2.bf16.msra.mxu1 %v8136_v30  ;;  %5192 = vmatprep.subr.bf16.mxu0 %v8141_v32  ;;  %v8219_v30 = vld [vmem:[#allocation2 + $0x82c] ss:$40 sps:$4 sm:$0xff]   ;;  %v8217_v32 = vld [vmem:[#allocation2 + $0x828] ss:$40 sps:$4 sm:$0xff]  }
  0xf4   :  { %5233 = vmatprep.subr.bf16.mxu1 %v8144_v33  ;;  %v8220_v33 = vld [vmem:[#allocation2 + $0xd28] ss:$40 sps:$4 sm:$0xff]  }
  0xf5   :  { %5143 = vmatmul.mubr.bf16.vlgmr.msra.gmra.mxu0 %v9330_v34 }
  0xf6   :  { %5184 = vmatmul.mubr.bf16.vlgmr.msra.gmra.mxu1 %v9290_v8  ;;  %5193 = vmatpush1.bf16.msra.mxu0 %v8139_v35  ;;  %v8225_v35 = vld [vmem:[#allocation2 + $0x7dc] ss:$40 sps:$4 sm:$0xff]  }
  0xf7   :  { %5234 = vmatpush1.bf16.msra.mxu1 %v8142_v37  ;;  %5194 = vmatprep.subr.bf16.mxu0 %v8147_v38  ;;  %v896_v37 = vlaneseq  ;;  %v8228_v38 = vld [vmem:[#allocation2 + $0xcdc] ss:$40 sps:$4 sm:$0xff]  }
  0xf8   :  { %5235 = vmatprep.subr.bf16.mxu1 %v8150_v39  ;;  %5224 = vmatprep.mubr.bf16.mxu0 %v9280_v52  ;;  %v8223_v39 = vld [vmem:[#allocation2 + $0x7d8] ss:$40 sps:$4 sm:$0xff]  }
  0xf9   :  { %5265 = vmatprep.mubr.bf16.mxu1 %v9299_v36 }
  0xfa   :  { %5195 = vmatpush1.bf16.msra.mxu0 %v8145_v41  ;;  %v8226_v41 = vld [vmem:[#allocation2 + $0xcd8] ss:$40 sps:$4 sm:$0xff]  }
  0xfb   :  { %5236 = vmatpush1.bf16.msra.mxu1 %v8148_v42  ;;  %5196 = vmatprep.subr.bf16.mxu0 %v8153_v43  ;;  %v8231_v42 = vld [vmem:[#allocation2 + $0x78c] ss:$40 sps:$4 sm:$0xff]   ;;  %v9336_v43 = vshrl.u32 %v896_v37, 7 }
  0xfc   :  { %5237 = vmatprep.subr.bf16.mxu1 %v8156_v44  ;;  %v8234_v44 = vld [vmem:[#allocation2 + $0xc8c] ss:$40 sps:$4 sm:$0xff]  }
  0xfd   :  { %v8279_v37 = vld [vmem:[#allocation2 + $0xf0c] ss:$40 sps:$4 sm:$0xff]  }
  0xfe   :  { %5197 = vmatpush1.bf16.msra.mxu0 %v8151_v45  ;;  %v8229_v45 = vld [vmem:[#allocation2 + $0x788] ss:$40 sps:$4 sm:$0xff]  }
  0xff   :  { %5238 = vmatpush1.bf16.msra.mxu1 %v8154_v46  ;;  %5198 = vmatprep.subr.bf16.mxu0 %v8159_v47  ;;  %v8232_v46 = vld [vmem:[#allocation2 + $0xc88] ss:$40 sps:$4 sm:$0xff]   ;;  %v892_v47 = vld [vmem:[#allocation4] sm:$0xff] }
 0x100   :  { %5239 = vmatprep.subr.bf16.mxu1 %v8162_v49  ;;  %v898_v49 = vsub.s32 0, %v9336_v43 }
 0x102   :  { %5199 = vmatpush1.bf16.msra.mxu0 %v8157_v50  ;;  %v8237_v50 = vld [vmem:[#allocation2 + $0x113c] ss:$40 sps:$4 sm:$0xff]  }
 0x103   :  { %5240 = vmatpush1.bf16.msra.mxu1 %v8160_v51  ;;  %5200 = vmatprep.subr.bf16.mxu0 %v8165_v53  ;;  %v8240_v51 = vld [vmem:[#allocation2 + $0x163c] ss:$40 sps:$4 sm:$0xff]   ;;  %v902_v53 = vsub.s32 1, %v9336_v43 }
 0x104   :  { %5241 = vmatprep.subr.bf16.mxu1 %v8168_v54  ;;  %v8235_v54 = vld [vmem:[#allocation2 + $0x1138] ss:$40 sps:$4 sm:$0xff]  }
 0x106   :  { %5201 = vmatpush1.bf16.msra.mxu0 %v8163_v55  ;;  %v899_v55 = vrot.slane %v892_v47, %v898_v49 }
 0x107   :  { %5242 = vmatpush1.bf16.msra.mxu1 %v8166_v56  ;;  %5202 = vmatprep.subr.bf16.mxu0 %v8171_v57  ;;  %v8238_v56 = vld [vmem:[#allocation2 + $0x1638] ss:$40 sps:$4 sm:$0xff]   ;;  %v8243_v57 = vld [vmem:[#allocation2 + $0x10ec] ss:$40 sps:$4 sm:$0xff]  }
 0x108   :  { %5243 = vmatprep.subr.bf16.mxu1 %v8174_v58  ;;  %v8246_v58 = vld [vmem:[#allocation2 + $0x15ec] ss:$40 sps:$4 sm:$0xff]  }
 0x10a   :  { %5203 = vmatpush1.bf16.msra.mxu0 %v8169_v59  ;;  %v903_v59 = vrot.slane %v892_v47, %v902_v53  ;;  %v8291_v47 = vld [vmem:[#allocation2 + $0x136c] ss:$40 sps:$4 sm:$0xff]  }
 0x10b   :  { %5244 = vmatpush1.bf16.msra.mxu1 %v8172_v60  ;;  %5204 = vmatprep.subr.bf16.mxu0 %v8177_v61 }
 0x10c   :  { %5245 = vmatprep.subr.bf16.mxu1 %v8180_v62  ;;  %v8241_v62 = vld [vmem:[#allocation2 + $0x10e8] ss:$40 sps:$4 sm:$0xff]  }
 0x10e   :  { %5205 = vmatpush1.bf16.msra.mxu0 %v8175_v63 }
 0x10f   :  { %5246 = vmatpush1.bf16.msra.mxu1 %v8178_v0  ;;  %5206 = vmatprep.subr.bf16.mxu0 %v8183_v1  ;;  %v8244_v0 = vld [vmem:[#allocation2 + $0x15e8] ss:$40 sps:$4 sm:$0xff]   ;;  %v8249_v1 = vld [vmem:[#allocation2 + $0x109c] ss:$40 sps:$4 sm:$0xff]  }
 0x110   :  { %5247 = vmatprep.subr.bf16.mxu1 %v8186_v2 }
 0x112   :  { %5207 = vmatpush1.bf16.msra.mxu0 %v8181_v3 }
 0x113   :  { %5248 = vmatpush1.bf16.msra.mxu1 %v8184_v4  ;;  %5208 = vmatprep.subr.bf16.mxu0 %v8189_v5  ;;  %v8252_v4 = vld [vmem:[#allocation2 + $0x159c] ss:$40 sps:$4 sm:$0xff]  }
 0x114   :  { %5249 = vmatprep.subr.bf16.mxu1 %v8192_v6 }
 0x116   :  { %5209 = vmatpush2.bf16.msra.mxu0 %v8187_v7 }
 0x117   :  { %5250 = vmatpush2.bf16.msra.mxu1 %v8190_v9  ;;  %5210 = vmatprep.subr.bf16.mxu0 %v8195_v10  ;;  %v8247_v9 = vld [vmem:[#allocation2 + $0x1098] ss:$40 sps:$4 sm:$0xff]  }
 0x118   :  { %5251 = vmatprep.subr.bf16.mxu1 %v8198_v12 }
 0x11a   :  { %5211 = vmatpush2.bf16.msra.mxu0 %v8193_v13  ;;  %v8250_v13 = vld [vmem:[#allocation2 + $0x1598] ss:$40 sps:$4 sm:$0xff]  }
 0x11b   :  { %5252 = vmatpush2.bf16.msra.mxu1 %v8196_v14  ;;  %5212 = vmatprep.subr.bf16.mxu0 %v8201_v15  ;;  %v8255_v14 = vld [vmem:[#allocation2 + $0x104c] ss:$40 sps:$4 sm:$0xff]  }
 0x11c   :  { %5253 = vmatprep.subr.bf16.mxu1 %v8204_v16  ;;  %v8258_v16 = vld [vmem:[#allocation2 + $0x154c] ss:$40 sps:$4 sm:$0xff]  }
 0x11e   :  { %5213 = vmatpush2.bf16.msra.mxu0 %v8199_v17 }
 0x11f   :  { %5254 = vmatpush2.bf16.msra.mxu1 %v8202_v18  ;;  %5214 = vmatprep.subr.bf16.mxu0 %v8207_v19  ;;  %v8253_v18 = vld [vmem:[#allocation2 + $0x1048] ss:$40 sps:$4 sm:$0xff]  }
 0x120   :  { %5255 = vmatprep.subr.bf16.mxu1 %v8210_v21  ;;  %v8256_v19 = vld [vmem:[#allocation2 + $0x1548] ss:$40 sps:$4 sm:$0xff]   ;;  %v8261_v21 = vld [vmem:[#allocation2 + $0xffc] ss:$40 sps:$4 sm:$0xff]  }
 0x122   :  { %5215 = vmatpush2.bf16.msra.mxu0 %v8205_v22  ;;  %v8264_v22 = vld [vmem:[#allocation2 + $0x14fc] ss:$40 sps:$4 sm:$0xff]  }
 0x123   :  { %5256 = vmatpush2.bf16.msra.mxu1 %v8208_v24  ;;  %5216 = vmatprep.subr.bf16.mxu0 %v8213_v25  ;;  %v8259_v24 = vld [vmem:[#allocation2 + $0xff8] ss:$40 sps:$4 sm:$0xff]  }
 0x124   :  { %5257 = vmatprep.subr.bf16.mxu1 %v8216_v26  ;;  %v8262_v25 = vld [vmem:[#allocation2 + $0x14f8] ss:$40 sps:$4 sm:$0xff]   ;;  %v8267_v26 = vld [vmem:[#allocation2 + $0xfac] ss:$40 sps:$4 sm:$0xff]  }
 0x126   :  { %5217 = vmatpush2.bf16.msra.mxu0 %v8211_v28  ;;  %v8270_v28 = vld [vmem:[#allocation2 + $0x14ac] ss:$40 sps:$4 sm:$0xff]  }
 0x127   :  { %5258 = vmatpush2.bf16.msra.mxu1 %v8214_v29  ;;  %5218 = vmatprep.subr.bf16.mxu0 %v8219_v30  ;;  %v8265_v29 = vld [vmem:[#allocation2 + $0xfa8] ss:$40 sps:$4 sm:$0xff]  }
 0x128   :  { %5259 = vmatprep.subr.bf16.mxu1 %v8222_v31  ;;  %v8268_v30 = vld [vmem:[#allocation2 + $0x14a8] ss:$40 sps:$4 sm:$0xff]   ;;  %v8273_v31 = vld [vmem:[#allocation2 + $0xf5c] ss:$40 sps:$4 sm:$0xff]  }
 0x12a   :  { %5219 = vmatpush2.bf16.msra.mxu0 %v8217_v32  ;;  %v8276_v32 = vld [vmem:[#allocation2 + $0x145c] ss:$40 sps:$4 sm:$0xff]  }
 0x12b   :  { %5260 = vmatpush2.bf16.msra.mxu1 %v8220_v33  ;;  %5220 = vmatprep.subr.bf16.mxu0 %v8225_v35  ;;  %v8271_v33 = vld [vmem:[#allocation2 + $0xf58] ss:$40 sps:$4 sm:$0xff]  }
 0x12c   :  { %5261 = vmatprep.subr.bf16.mxu1 %v8228_v38  ;;  %v8274_v35 = vld [vmem:[#allocation2 + $0x1458] ss:$40 sps:$4 sm:$0xff]   ;;  %v8282_v38 = vld [vmem:[#allocation2 + $0x140c] ss:$40 sps:$4 sm:$0xff]  }
 0x12e   :  { %5221 = vmatpush2.bf16.msra.mxu0 %v8223_v39  ;;  %v8277_v39 = vld [vmem:[#allocation2 + $0xf08] ss:$40 sps:$4 sm:$0xff]  }
 0x12f   :  { %5262 = vmatpush2.bf16.msra.mxu1 %v8226_v41  ;;  %5222 = vmatprep.subr.bf16.mxu0 %v8231_v42  ;;  %v8280_v41 = vld [vmem:[#allocation2 + $0x1408] ss:$40 sps:$4 sm:$0xff]   ;;  %v8285_v42 = vld [vmem:[#allocation2 + $0x13bc] ss:$40 sps:$4 sm:$0xff]  }
 0x130   :  { %5263 = vmatprep.subr.bf16.mxu1 %v8234_v44  ;;  %v8288_v44 = vld [vmem:[#allocation2 + $0x18bc] ss:$40 sps:$4 sm:$0xff]  }
 0x132   :  { %5223 = vmatpush2.bf16.msra.mxu0 %v8229_v45  ;;  %v8283_v45 = vld [vmem:[#allocation2 + $0x13b8] ss:$40 sps:$4 sm:$0xff]  }
 0x133   :  { %5264 = vmatpush2.bf16.msra.mxu1 %v8232_v46  ;;  %5274 = vmatprep.subr.bf16.mxu0 %v8237_v50  ;;  %v8286_v46 = vld [vmem:[#allocation2 + $0x18b8] ss:$40 sps:$4 sm:$0xff]   ;;  %v8294_v50 = vld [vmem:[#allocation2 + $0x186c] ss:$40 sps:$4 sm:$0xff]  }
 0x134   :  { %5315 = vmatprep.subr.bf16.mxu1 %v8240_v51  ;;  %v8289_v51 = vld [vmem:[#allocation2 + $0x1368] ss:$40 sps:$4 sm:$0xff]  }
 0x135   :  { %v4980_v60 = vpop.f32.mrf.mxu0  ;;  %5225 = vmatmul.mubr.bf16.vlgmr.msra.gmra.mxu0 %v9292_v11 }
 0x136   :  { %5266 = vmatmul.mubr.bf16.vlgmr.msra.gmra.mxu1 %v9314_v20  ;;  %v5021_v61 = vpop.f32.mrf.mxu1  ;;  %v4981_v63 = vadd.f32 %v4980_v60, %v899_v55  ;;  %5275 = vmatpush1.bf16.msra.mxu0 %v8235_v54  ;;  %v8292_v54 = vld [vmem:[#allocation2 + $0x1868] ss:$40 sps:$4 sm:$0xff]   ;;  %v8297_v55 = vld [vmem:[#allocation2 + $0x131c] ss:$40 sps:$4 sm:$0xff]   ;;  %v8306_v60 = vld [vmem:[#allocation2 + $0x17cc] ss:$40 sps:$4 sm:$0xff]  }
 0x137   :  { %5316 = vmatpush1.bf16.msra.mxu1 %v8238_v56  ;;  %v4982_v2 = vpop.f32.mrf.mxu0  ;;  %5276 = vmatprep.subr.bf16.mxu0 %v8243_v57  ;;  %v8300_v56 = vld [vmem:[#allocation2 + $0x181c] ss:$40 sps:$4 sm:$0xff]   ;;  %v8295_v57 = vld [vmem:[#allocation2 + $0x1318] ss:$40 sps:$4 sm:$0xff]  }
 0x138   :  { %v5023_v3 = vpop.f32.mrf.mxu1  ;;  %5317 = vmatprep.subr.bf16.mxu1 %v8246_v58  ;;  %v4983_v5 = vadd.f32 %v4982_v2, %v903_v59  ;;  %v9346_v6 = vadd.f32 %v5021_v61, %v4981_v63  ;;  %5306 = vmatprep.mubr.bf16.mxu0 %v9304_v40  ;;  %v8298_v58 = vld [vmem:[#allocation2 + $0x1818] ss:$40 sps:$4 sm:$0xff]   ;;  %v8303_v59 = vld [vmem:[#allocation2 + $0x12cc] ss:$40 sps:$4 sm:$0xff]   ;;  %v8301_v61 = vld [vmem:[#allocation2 + $0x12c8] ss:$40 sps:$4 sm:$0xff]  }
 0x139   :  { %5347 = vmatprep.mubr.bf16.mxu1 %v9323_v27  ;;  %v4984_v7 = vpop.f32.mrf.mxu0  ;;  %v8309_v63 = vld [vmem:[#allocation2 + $0x127c] ss:$40 sps:$4 sm:$0xff]   ;;  %v8310_v2 = vld [vmem:[#allocation2 + $0x1778] ss:$40 sps:$4 sm:$0xff]  }
 0x13a   :  { %v5025_v10 = vpop.f32.mrf.mxu1  ;;  %v9350_v12 = vadd.f32 %v5023_v3, %v4983_v5  ;;  %5277 = vmatpush1.bf16.msra.mxu0 %v8241_v62  ;;  %v8304_v62 = vld [vmem:[#allocation2 + $0x17c8] ss:$40 sps:$4 sm:$0xff]   ;;  %v8315_v3 = vld [vmem:[#allocation2 + $0x122c] ss:$40 sps:$4 sm:$0xff]  }
 0x13b   :  { %5318 = vmatpush1.bf16.msra.mxu1 %v8244_v0  ;;  %v4985_v15 = vpop.f32.mrf.mxu0  ;;  %5278 = vmatprep.subr.bf16.mxu0 %v8249_v1  ;;  %v8312_v0 = vld [vmem:[#allocation2 + $0x177c] ss:$40 sps:$4 sm:$0xff]   ;;  %v8307_v1 = vld [vmem:[#allocation2 + $0x1278] ss:$40 sps:$4 sm:$0xff]   ;;  %v8313_v5 = vld [vmem:[#allocation2 + $0x1228] ss:$40 sps:$4 sm:$0xff]  }
 0x13c   :  { %5319 = vmatprep.subr.bf16.mxu1 %v8252_v4  ;;  %v5026_v17 = vpop.f32.mrf.mxu1  ;;  %v8318_v4 = vld [vmem:[#allocation2 + $0x172c] ss:$40 sps:$4 sm:$0xff]   ;;  %v8316_v7 = vld [vmem:[#allocation2 + $0x1728] ss:$40 sps:$4 sm:$0xff]   ;;  %v8324_v10 = vld [vmem:[#allocation2 + $0x16dc] ss:$40 sps:$4 sm:$0xff]  }
 0x13d   :  { %v8327_v15 = vld [vmem:[#allocation2 + $0x118c] ss:$40 sps:$4 sm:$0xff]   ;;  %v8325_v17 = vld [vmem:[#allocation2 + $0x1188] ss:$40 sps:$4 sm:$0xff]  }
 0x13e   :  { %5279 = vmatpush1.bf16.msra.mxu0 %v8247_v9  ;;  %v8321_v9 = vld [vmem:[#allocation2 + $0x11dc] ss:$40 sps:$4 sm:$0xff]  }
 0x13f   :  { %5320 = vmatpush1.bf16.msra.mxu1 %v8250_v13  ;;  %5280 = vmatprep.subr.bf16.mxu0 %v8255_v14  ;;  %v8319_v13 = vld [vmem:[#allocation2 + $0x11d8] ss:$40 sps:$4 sm:$0xff]  }
 0x140   :  { %5321 = vmatprep.subr.bf16.mxu1 %v8258_v16  ;;  %v8322_v14 = vld [vmem:[#allocation2 + $0x16d8] ss:$40 sps:$4 sm:$0xff]   ;;  %v8330_v16 = vld [vmem:[#allocation2 + $0x168c] ss:$40 sps:$4 sm:$0xff]  }
 0x142   :  { %5281 = vmatpush1.bf16.msra.mxu0 %v8253_v18  ;;  %v8328_v18 = vld [vmem:[#allocation2 + $0x1688] ss:$40 sps:$4 sm:$0xff]  }
 0x143   :  { %5322 = vmatpush1.bf16.msra.mxu1 %v8256_v19  ;;  %5282 = vmatprep.subr.bf16.mxu0 %v8261_v21  ;;  %v8333_v19 = vld [vmem:[#allocation2 + $0x244] ss:$40 sps:$4 sm:$0xff]  }
 0x144   :  { %5323 = vmatprep.subr.bf16.mxu1 %v8264_v22  ;;  %v8336_v21 = vld [vmem:[#allocation2 + $0x744] ss:$40 sps:$4 sm:$0xff]   ;;  %v8331_v22 = vld [vmem:[#allocation2 + $0x240] ss:$40 sps:$4 sm:$0xff]  }
 0x146   :  { %5283 = vmatpush1.bf16.msra.mxu0 %v8259_v24  ;;  %v8334_v24 = vld [vmem:[#allocation2 + $0x740] ss:$40 sps:$4 sm:$0xff]  }
 0x147   :  { %5324 = vmatpush1.bf16.msra.mxu1 %v8262_v25  ;;  %5284 = vmatprep.subr.bf16.mxu0 %v8267_v26  ;;  %v8339_v25 = vld [vmem:[#allocation2 + $0x1f4] ss:$40 sps:$4 sm:$0xff]  }
 0x148   :  { %5325 = vmatprep.subr.bf16.mxu1 %v8270_v28  ;;  %v8342_v26 = vld [vmem:[#allocation2 + $0x6f4] ss:$40 sps:$4 sm:$0xff]   ;;  %v8337_v28 = vld [vmem:[#allocation2 + $0x1f0] ss:$40 sps:$4 sm:$0xff]  }
 0x14a   :  { %5285 = vmatpush1.bf16.msra.mxu0 %v8265_v29  ;;  %v8340_v29 = vld [vmem:[#allocation2 + $0x6f0] ss:$40 sps:$4 sm:$0xff]  }
 0x14b   :  { %5326 = vmatpush1.bf16.msra.mxu1 %v8268_v30  ;;  %5286 = vmatprep.subr.bf16.mxu0 %v8273_v31 }
 0x14c   :  { %5327 = vmatprep.subr.bf16.mxu1 %v8276_v32 }
 0x14e   :  { %5287 = vmatpush1.bf16.msra.mxu0 %v8271_v33 }
 0x14f   :  { %5328 = vmatpush1.bf16.msra.mxu1 %v8274_v35  ;;  %5288 = vmatprep.subr.bf16.mxu0 %v8279_v37  ;;  %v8345_v37 = vld [vmem:[#allocation2 + $0x1a4] ss:$40 sps:$4 sm:$0xff]  }
 0x150   :  { %5329 = vmatprep.subr.bf16.mxu1 %v8282_v38  ;;  %v8348_v38 = vld [vmem:[#allocation2 + $0x6a4] ss:$40 sps:$4 sm:$0xff]  }
 0x152   :  { %5289 = vmatpush1.bf16.msra.mxu0 %v8277_v39 }
 0x153   :  { %5330 = vmatpush1.bf16.msra.mxu1 %v8280_v41  ;;  %5290 = vmatprep.subr.bf16.mxu0 %v8285_v42  ;;  %v8343_v42 = vld [vmem:[#allocation2 + $0x1a0] ss:$40 sps:$4 sm:$0xff]  }
 0x154   :  { %5331 = vmatprep.subr.bf16.mxu1 %v8288_v44  ;;  %v8346_v44 = vld [vmem:[#allocation2 + $0x6a0] ss:$40 sps:$4 sm:$0xff]  }
 0x156   :  { %5291 = vmatpush2.bf16.msra.mxu0 %v8283_v45 }
 0x157   :  { %5332 = vmatpush2.bf16.msra.mxu1 %v8286_v46  ;;  %5292 = vmatprep.subr.bf16.mxu0 %v8291_v47 }
 0x158   :  { %5333 = vmatprep.subr.bf16.mxu1 %v8294_v50  ;;  %v8351_v50 = vld [vmem:[#allocation2 + $0x154] ss:$40 sps:$4 sm:$0xff]  }
 0x15a   :  { %5293 = vmatpush2.bf16.msra.mxu0 %v8289_v51  ;;  %v8354_v51 = vld [vmem:[#allocation2 + $0x654] ss:$40 sps:$4 sm:$0xff]  }
 0x15b   :  { %5334 = vmatpush2.bf16.msra.mxu1 %v8292_v54  ;;  %5294 = vmatprep.subr.bf16.mxu0 %v8297_v55  ;;  %v8349_v54 = vld [vmem:[#allocation2 + $0x150] ss:$40 sps:$4 sm:$0xff]  }
 0x15c   :  { %5335 = vmatprep.subr.bf16.mxu1 %v8300_v56  ;;  %v8352_v55 = vld [vmem:[#allocation2 + $0x650] ss:$40 sps:$4 sm:$0xff]   ;;  %v8357_v56 = vld [vmem:[#allocation2 + $0x104] ss:$40 sps:$4 sm:$0xff]  }
 0x15e   :  { %5295 = vmatpush2.bf16.msra.mxu0 %v8295_v57  ;;  %v8360_v57 = vld [vmem:[#allocation2 + $0x604] ss:$40 sps:$4 sm:$0xff]  }
 0x15f   :  { %5336 = vmatpush2.bf16.msra.mxu1 %v8298_v58  ;;  %5296 = vmatprep.subr.bf16.mxu0 %v8303_v59  ;;  %v8355_v58 = vld [vmem:[#allocation2 + $0x100] ss:$40 sps:$4 sm:$0xff]  }
 0x160   :  { %5337 = vmatprep.subr.bf16.mxu1 %v8306_v60  ;;  %v8358_v59 = vld [vmem:[#allocation2 + $0x600] ss:$40 sps:$4 sm:$0xff]   ;;  %v8363_v60 = vld [vmem:[#allocation2 + $0xb4] ss:$40 sps:$4 sm:$0xff]  }
 0x162   :  { %5297 = vmatpush2.bf16.msra.mxu0 %v8301_v61  ;;  %v8366_v61 = vld [vmem:[#allocation2 + $0x5b4] ss:$40 sps:$4 sm:$0xff]  }
 0x163   :  { %5338 = vmatpush2.bf16.msra.mxu1 %v8304_v62  ;;  %5298 = vmatprep.subr.bf16.mxu0 %v8309_v63  ;;  %v8361_v62 = vld [vmem:[#allocation2 + $0xb0] ss:$40 sps:$4 sm:$0xff]  }
 0x164   :  { %5339 = vmatprep.subr.bf16.mxu1 %v8312_v0  ;;  %v8364_v63 = vld [vmem:[#allocation2 + $0x5b0] ss:$40 sps:$4 sm:$0xff]   ;;  %v8369_v0 = vld [vmem:[#allocation2 + $0x64] ss:$40 sps:$4 sm:$0xff]  }
 0x166   :  { %5299 = vmatpush2.bf16.msra.mxu0 %v8307_v1  ;;  %v8372_v1 = vld [vmem:[#allocation2 + $0x564] ss:$40 sps:$4 sm:$0xff]  }
 0x167   :  { %5340 = vmatpush2.bf16.msra.mxu1 %v8310_v2  ;;  %5300 = vmatprep.subr.bf16.mxu0 %v8315_v3  ;;  %v8367_v2 = vld [vmem:[#allocation2 + $0x60] ss:$40 sps:$4 sm:$0xff]  }
 0x168   :  { %5341 = vmatprep.subr.bf16.mxu1 %v8318_v4  ;;  %v8370_v3 = vld [vmem:[#allocation2 + $0x560] ss:$40 sps:$4 sm:$0xff]   ;;  %v8375_v4 = vld [vmem:[#allocation2 + $0x14] ss:$40 sps:$4 sm:$0xff]  }
 0x16a   :  { %5301 = vmatpush2.bf16.msra.mxu0 %v8313_v5  ;;  %v8378_v5 = vld [vmem:[#allocation2 + $0x514] ss:$40 sps:$4 sm:$0xff]  }
 0x16b   :  { %5342 = vmatpush2.bf16.msra.mxu1 %v8316_v7  ;;  %5302 = vmatprep.subr.bf16.mxu0 %v8321_v9  ;;  %v8373_v7 = vld [vmem:[#allocation2 + $0x10] ss:$40 sps:$4 sm:$0xff]  }
 0x16c   :  { %5343 = vmatprep.subr.bf16.mxu1 %v8324_v10  ;;  %v8376_v9 = vld [vmem:[#allocation2 + $0x510] ss:$40 sps:$4 sm:$0xff]   ;;  %v8381_v10 = vld [vmem:[#allocation2 + $0x4c4] ss:$40 sps:$4 sm:$0xff]  }
 0x16e   :  { %5303 = vmatpush2.bf16.msra.mxu0 %v8319_v13  ;;  %v8384_v13 = vld [vmem:[#allocation2 + $0x9c4] ss:$40 sps:$4 sm:$0xff]  }
 0x16f   :  { %5344 = vmatpush2.bf16.msra.mxu1 %v8322_v14  ;;  %5304 = vmatprep.subr.bf16.mxu0 %v8327_v15  ;;  %v8379_v14 = vld [vmem:[#allocation2 + $0x4c0] ss:$40 sps:$4 sm:$0xff]  }
 0x170   :  { %5345 = vmatprep.subr.bf16.mxu1 %v8330_v16  ;;  %v8382_v15 = vld [vmem:[#allocation2 + $0x9c0] ss:$40 sps:$4 sm:$0xff]   ;;  %v8387_v16 = vld [vmem:[#allocation2 + $0x474] ss:$40 sps:$4 sm:$0xff]  }
 0x172   :  { %5305 = vmatpush2.bf16.msra.mxu0 %v8325_v17  ;;  %v8390_v17 = vld [vmem:[#allocation2 + $0x974] ss:$40 sps:$4 sm:$0xff]  }
 0x173   :  { %5346 = vmatpush2.bf16.msra.mxu1 %v8328_v18  ;;  %5356 = vmatprep.subr.bf16.mxu0 %v8333_v19  ;;  %v8385_v18 = vld [vmem:[#allocation2 + $0x470] ss:$40 sps:$4 sm:$0xff]  }
 0x174   :  { %5397 = vmatprep.subr.bf16.mxu1 %v8336_v21  ;;  %v8388_v19 = vld [vmem:[#allocation2 + $0x970] ss:$40 sps:$4 sm:$0xff]   ;;  %v8393_v21 = vld [vmem:[#allocation2 + $0x424] ss:$40 sps:$4 sm:$0xff]  }
 0x175   :  { %v5062_v30 = vpop.f32.mrf.mxu0  ;;  %5307 = vmatmul.mubr.bf16.vlgmr.msra.gmra.mxu0 %v9316_v23 }
 0x176   :  { %5348 = vmatmul.mubr.bf16.vlgmr.msra.gmra.mxu1 %v9330_v34  ;;  %v5103_v31 = vpop.f32.mrf.mxu1  ;;  %v5063_v32 = vadd.f32 %v5062_v30, %v9346_v6  ;;  %5357 = vmatpush1.bf16.msra.mxu0 %v8331_v22  ;;  %v8396_v22 = vld [vmem:[#allocation2 + $0x924] ss:$40 sps:$4 sm:$0xff]   ;;  %v8400_v30 = vld [vmem:[#allocation2 + $0x8d0] ss:$40 sps:$4 sm:$0xff]  }
 0x177   :  { %5398 = vmatpush1.bf16.msra.mxu1 %v8334_v24  ;;  %v5064_v33 = vpop.f32.mrf.mxu0  ;;  %5358 = vmatprep.subr.bf16.mxu0 %v8339_v25  ;;  %v8391_v24 = vld [vmem:[#allocation2 + $0x420] ss:$40 sps:$4 sm:$0xff]  }
 0x178   :  { %v5105_v35 = vpop.f32.mrf.mxu1  ;;  %5399 = vmatprep.subr.bf16.mxu1 %v8342_v26  ;;  %v5065_v39 = vadd.f32 %v5064_v33, %v9350_v12  ;;  %v9356_v41 = vadd.f32 %v5103_v31, %v5063_v32  ;;  %5388 = vmatprep.mubr.bf16.mxu0 %v9275_v48  ;;  %v8394_v25 = vld [vmem:[#allocation2 + $0x920] ss:$40 sps:$4 sm:$0xff]   ;;  %v8399_v26 = vld [vmem:[#allocation2 + $0x3d4] ss:$40 sps:$4 sm:$0xff]   ;;  %v8405_v31 = vld [vmem:[#allocation2 + $0x384] ss:$40 sps:$4 sm:$0xff]  }
 0x179   :  { %5429 = vmatprep.mubr.bf16.mxu1 %v9280_v52  ;;  %v5066_v45 = vpop.f32.mrf.mxu0  ;;  %v8408_v32 = vld [vmem:[#allocation2 + $0x884] ss:$40 sps:$4 sm:$0xff]   ;;  %v8403_v33 = vld [vmem:[#allocation2 + $0x380] ss:$40 sps:$4 sm:$0xff]  }
 0x17a   :  { %v5107_v6 = vpop.f32.mrf.mxu1  ;;  %v9360_v46 = vadd.f32 %v5105_v35, %v5065_v39  ;;  %5359 = vmatpush1.bf16.msra.mxu0 %v8337_v28  ;;  %v8402_v28 = vld [vmem:[#allocation2 + $0x8d4] ss:$40 sps:$4 sm:$0xff]   ;;  %v8406_v35 = vld [vmem:[#allocation2 + $0x880] ss:$40 sps:$4 sm:$0xff]   ;;  %v8409_v39 = vld [vmem:[#allocation2 + $0x330] ss:$40 sps:$4 sm:$0xff]  }
 0x17b   :  { %5400 = vmatpush1.bf16.msra.mxu1 %v8340_v29  ;;  %v5067_v47 = vpop.f32.mrf.mxu0  ;;  %5360 = vmatprep.subr.bf16.mxu0 %v8345_v37  ;;  %v8397_v29 = vld [vmem:[#allocation2 + $0x3d0] ss:$40 sps:$4 sm:$0xff]   ;;  %v8411_v37 = vld [vmem:[#allocation2 + $0x334] ss:$40 sps:$4 sm:$0xff]   ;;  %v8420_v45 = vld [vmem:[#allocation2 + $0x7e4] ss:$40 sps:$4 sm:$0xff]  }
 0x17c   :  { %5401 = vmatprep.subr.bf16.mxu1 %v8348_v38  ;;  %v5108_v12 = vpop.f32.mrf.mxu1  ;;  %v8414_v38 = vld [vmem:[#allocation2 + $0x834] ss:$40 sps:$4 sm:$0xff]   ;;  %v8415_v6 = vld [vmem:[#allocation2 + $0x2e0] ss:$40 sps:$4 sm:$0xff]  }
 0x17d   :  { %v8418_v47 = vld [vmem:[#allocation2 + $0x7e0] ss:$40 sps:$4 sm:$0xff]   ;;  %v8421_v12 = vld [vmem:[#allocation2 + $0x290] ss:$40 sps:$4 sm:$0xff]  }
 0x17e   :  { %5361 = vmatpush1.bf16.msra.mxu0 %v8343_v42  ;;  %v8412_v42 = vld [vmem:[#allocation2 + $0x830] ss:$40 sps:$4 sm:$0xff]  }
 0x17f   :  { %5402 = vmatpush1.bf16.msra.mxu1 %v8346_v44  ;;  %5362 = vmatprep.subr.bf16.mxu0 %v8351_v50  ;;  %v8417_v44 = vld [vmem:[#allocation2 + $0x2e4] ss:$40 sps:$4 sm:$0xff]   ;;  %v8423_v50 = vld [vmem:[#allocation2 + $0x294] ss:$40 sps:$4 sm:$0xff]  }
 0x180   :  { %5403 = vmatprep.subr.bf16.mxu1 %v8354_v51  ;;  %v8426_v51 = vld [vmem:[#allocation2 + $0x794] ss:$40 sps:$4 sm:$0xff]  }
 0x182   :  { %5363 = vmatpush1.bf16.msra.mxu0 %v8349_v54  ;;  %v8424_v54 = vld [vmem:[#allocation2 + $0x790] ss:$40 sps:$4 sm:$0xff]  }
 0x183   :  { %5404 = vmatpush1.bf16.msra.mxu1 %v8352_v55  ;;  %5364 = vmatprep.subr.bf16.mxu0 %v8357_v56  ;;  %v8429_v55 = vld [vmem:[#allocation2 + $0xc44] ss:$40 sps:$4 sm:$0xff]  }
 0x184   :  { %5405 = vmatprep.subr.bf16.mxu1 %v8360_v57  ;;  %v8432_v56 = vld [vmem:[#allocation2 + $0x1144] ss:$40 sps:$4 sm:$0xff]   ;;  %v8427_v57 = vld [vmem:[#allocation2 + $0xc40] ss:$40 sps:$4 sm:$0xff]  }
 0x186   :  { %5365 = vmatpush1.bf16.msra.mxu0 %v8355_v58  ;;  %v8430_v58 = vld [vmem:[#allocation2 + $0x1140] ss:$40 sps:$4 sm:$0xff]  }
 0x187   :  { %5406 = vmatpush1.bf16.msra.mxu1 %v8358_v59  ;;  %5366 = vmatprep.subr.bf16.mxu0 %v8363_v60  ;;  %v8435_v59 = vld [vmem:[#allocation2 + $0xbf4] ss:$40 sps:$4 sm:$0xff]  }
 0x188   :  { %5407 = vmatprep.subr.bf16.mxu1 %v8366_v61  ;;  %v8438_v60 = vld [vmem:[#allocation2 + $0x10f4] ss:$40 sps:$4 sm:$0xff]   ;;  %v8433_v61 = vld [vmem:[#allocation2 + $0xbf0] ss:$40 sps:$4 sm:$0xff]  }
 0x18a   :  { %5367 = vmatpush1.bf16.msra.mxu0 %v8361_v62  ;;  %v8436_v62 = vld [vmem:[#allocation2 + $0x10f0] ss:$40 sps:$4 sm:$0xff]  }
 0x18b   :  { %5408 = vmatpush1.bf16.msra.mxu1 %v8364_v63  ;;  %5368 = vmatprep.subr.bf16.mxu0 %v8369_v0 }
 0x18c   :  { %5409 = vmatprep.subr.bf16.mxu1 %v8372_v1 }
 0x18e   :  { %5369 = vmatpush1.bf16.msra.mxu0 %v8367_v2 }
 0x18f   :  { %5410 = vmatpush1.bf16.msra.mxu1 %v8370_v3  ;;  %5370 = vmatprep.subr.bf16.mxu0 %v8375_v4  ;;  %v8441_v3 = vld [vmem:[#allocation2 + $0xba4] ss:$40 sps:$4 sm:$0xff]  }
 0x190   :  { %5411 = vmatprep.subr.bf16.mxu1 %v8378_v5  ;;  %v8444_v4 = vld [vmem:[#allocation2 + $0x10a4] ss:$40 sps:$4 sm:$0xff]  }
 0x192   :  { %5371 = vmatpush1.bf16.msra.mxu0 %v8373_v7 }
 0x193   :  { %5412 = vmatpush1.bf16.msra.mxu1 %v8376_v9  ;;  %5372 = vmatprep.subr.bf16.mxu0 %v8381_v10  ;;  %v8439_v9 = vld [vmem:[#allocation2 + $0xba0] ss:$40 sps:$4 sm:$0xff]  }
 0x194   :  { %5413 = vmatprep.subr.bf16.mxu1 %v8384_v13  ;;  %v8442_v10 = vld [vmem:[#allocation2 + $0x10a0] ss:$40 sps:$4 sm:$0xff]  }
 0x196   :  { %5373 = vmatpush2.bf16.msra.mxu0 %v8379_v14 }
 0x197   :  { %5414 = vmatpush2.bf16.msra.mxu1 %v8382_v15  ;;  %5374 = vmatprep.subr.bf16.mxu0 %v8387_v16  ;;  %v8447_v15 = vld [vmem:[#allocation2 + $0xb54] ss:$40 sps:$4 sm:$0xff]  }
 0x198   :  { %5415 = vmatprep.subr.bf16.mxu1 %v8390_v17  ;;  %v8450_v16 = vld [vmem:[#allocation2 + $0x1054] ss:$40 sps:$4 sm:$0xff]  }
 0x19a   :  { %5375 = vmatpush2.bf16.msra.mxu0 %v8385_v18  ;;  %v8448_v18 = vld [vmem:[#allocation2 + $0x1050] ss:$40 sps:$4 sm:$0xff]  }
 0x19b   :  { %5416 = vmatpush2.bf16.msra.mxu1 %v8388_v19  ;;  %5376 = vmatprep.subr.bf16.mxu0 %v8393_v21  ;;  %v8453_v19 = vld [vmem:[#allocation2 + $0xb04] ss:$40 sps:$4 sm:$0xff]  }
 0x19c   :  { %5417 = vmatprep.subr.bf16.mxu1 %v8396_v22  ;;  %v8456_v21 = vld [vmem:[#allocation2 + $0x1004] ss:$40 sps:$4 sm:$0xff]   ;;  %v8451_v22 = vld [vmem:[#allocation2 + $0xb00] ss:$40 sps:$4 sm:$0xff]  }
 0x19e   :  { %5377 = vmatpush2.bf16.msra.mxu0 %v8391_v24  ;;  %v8454_v24 = vld [vmem:[#allocation2 + $0x1000] ss:$40 sps:$4 sm:$0xff]  }
 0x19f   :  { %5418 = vmatpush2.bf16.msra.mxu1 %v8394_v25  ;;  %5378 = vmatprep.subr.bf16.mxu0 %v8399_v26  ;;  %v8459_v25 = vld [vmem:[#allocation2 + $0xab4] ss:$40 sps:$4 sm:$0xff]  }
 0x1a0   :  { %5419 = vmatprep.subr.bf16.mxu1 %v8402_v28  ;;  %v8462_v26 = vld [vmem:[#allocation2 + $0xfb4] ss:$40 sps:$4 sm:$0xff]   ;;  %v8457_v28 = vld [vmem:[#allocation2 + $0xab0] ss:$40 sps:$4 sm:$0xff]  }
 0x1a2   :  { %5379 = vmatpush2.bf16.msra.mxu0 %v8397_v29  ;;  %v8460_v29 = vld [vmem:[#allocation2 + $0xfb0] ss:$40 sps:$4 sm:$0xff]  }
 0x1a3   :  { %5420 = vmatpush2.bf16.msra.mxu1 %v8400_v30  ;;  %5380 = vmatprep.subr.bf16.mxu0 %v8405_v31  ;;  %v8465_v30 = vld [vmem:[#allocation2 + $0xa64] ss:$40 sps:$4 sm:$0xff]  }
 0x1a4   :  { %5421 = vmatprep.subr.bf16.mxu1 %v8408_v32  ;;  %v8468_v31 = vld [vmem:[#allocation2 + $0xf64] ss:$40 sps:$4 sm:$0xff]   ;;  %v8463_v32 = vld [vmem:[#allocation2 + $0xa60] ss:$40 sps:$4 sm:$0xff]  }
 0x1a6   :  { %5381 = vmatpush2.bf16.msra.mxu0 %v8403_v33  ;;  %v8466_v33 = vld [vmem:[#allocation2 + $0xf60] ss:$40 sps:$4 sm:$0xff]  }
 0x1a7   :  { %5422 = vmatpush2.bf16.msra.mxu1 %v8406_v35  ;;  %5382 = vmatprep.subr.bf16.mxu0 %v8411_v37  ;;  %v8471_v35 = vld [vmem:[#allocation2 + $0xa14] ss:$40 sps:$4 sm:$0xff]  }
 0x1a8   :  { %5423 = vmatprep.subr.bf16.mxu1 %v8414_v38  ;;  %v8474_v37 = vld [vmem:[#allocation2 + $0xf14] ss:$40 sps:$4 sm:$0xff]   ;;  %v8469_v38 = vld [vmem:[#allocation2 + $0xa10] ss:$40 sps:$4 sm:$0xff]  }
 0x1aa   :  { %5383 = vmatpush2.bf16.msra.mxu0 %v8409_v39  ;;  %v8472_v39 = vld [vmem:[#allocation2 + $0xf10] ss:$40 sps:$4 sm:$0xff]  }
 0x1ab   :  { %5424 = vmatpush2.bf16.msra.mxu1 %v8412_v42  ;;  %5384 = vmatprep.subr.bf16.mxu0 %v8417_v44  ;;  %v8477_v42 = vld [vmem:[#allocation2 + $0xec4] ss:$40 sps:$4 sm:$0xff]  }
 0x1ac   :  { %5425 = vmatprep.subr.bf16.mxu1 %v8420_v45  ;;  %v8480_v44 = vld [vmem:[#allocation2 + $0x13c4] ss:$40 sps:$4 sm:$0xff]   ;;  %v8475_v45 = vld [vmem:[#allocation2 + $0xec0] ss:$40 sps:$4 sm:$0xff]  }
 0x1ae   :  { %5385 = vmatpush2.bf16.msra.mxu0 %v8415_v6  ;;  %v8478_v6 = vld [vmem:[#allocation2 + $0x13c0] ss:$40 sps:$4 sm:$0xff]  }
 0x1af   :  { %5426 = vmatpush2.bf16.msra.mxu1 %v8418_v47  ;;  %5386 = vmatprep.subr.bf16.mxu0 %v8423_v50  ;;  %v8483_v47 = vld [vmem:[#allocation2 + $0xe74] ss:$40 sps:$4 sm:$0xff]  }
 0x1b0   :  { %5427 = vmatprep.subr.bf16.mxu1 %v8426_v51  ;;  %v8486_v50 = vld [vmem:[#allocation2 + $0x1374] ss:$40 sps:$4 sm:$0xff]   ;;  %v8481_v51 = vld [vmem:[#allocation2 + $0xe70] ss:$40 sps:$4 sm:$0xff]  }
 0x1b2   :  { %5387 = vmatpush2.bf16.msra.mxu0 %v8421_v12  ;;  %v8484_v12 = vld [vmem:[#allocation2 + $0x1370] ss:$40 sps:$4 sm:$0xff]  }
 0x1b3   :  { %5428 = vmatpush2.bf16.msra.mxu1 %v8424_v54  ;;  %5438 = vmatprep.subr.bf16.mxu0 %v8429_v55  ;;  %v8489_v54 = vld [vmem:[#allocation2 + $0xe24] ss:$40 sps:$4 sm:$0xff]  }
 0x1b4   :  { %5479 = vmatprep.subr.bf16.mxu1 %v8432_v56  ;;  %v8492_v55 = vld [vmem:[#allocation2 + $0x1324] ss:$40 sps:$4 sm:$0xff]   ;;  %v8487_v56 = vld [vmem:[#allocation2 + $0xe20] ss:$40 sps:$4 sm:$0xff]  }
 0x1b5   :  { %v5144_v63 = vpop.f32.mrf.mxu0  ;;  %5389 = vmatmul.mubr.bf16.vlgmr.msra.gmra.mxu0 %v9290_v8 }
 0x1b6   :  { %5430 = vmatmul.mubr.bf16.vlgmr.msra.gmra.mxu1 %v9292_v11  ;;  %v9364_v0 = vpop.f32.mrf.mxu1  ;;  %v9367_v1 = vadd.f32 %v5144_v63, %v9356_v41  ;;  %5439 = vmatpush1.bf16.msra.mxu0 %v8427_v57  ;;  %v8490_v57 = vld [vmem:[#allocation2 + $0x1320] ss:$40 sps:$4 sm:$0xff]   ;;  %v8504_v63 = vld [vmem:[#allocation2 + $0x1284] ss:$40 sps:$4 sm:$0xff]  }
 0x1b7   :  { %5480 = vmatpush1.bf16.msra.mxu1 %v8430_v58  ;;  %v5146_v2 = vpop.f32.mrf.mxu0  ;;  %5440 = vmatprep.subr.bf16.mxu0 %v8435_v59  ;;  %v8495_v58 = vld [vmem:[#allocation2 + $0xdd4] ss:$40 sps:$4 sm:$0xff]  }
 0x1b8   :  { %5481 = vmatprep.subr.bf16.mxu1 %v8438_v60  ;;  %v9369_v5 = vpop.f32.mrf.mxu1  ;;  %v9372_v7 = vadd.f32 %v5146_v2, %v9360_v46  ;;  %5470 = vmatprep.mubr.bf16.mxu0 %v9299_v36  ;;  %v8445_v46 = vld [vmem:[#allocation2 + $0xb50] ss:$40 sps:$4 sm:$0xff]   ;;  %v8498_v59 = vld [vmem:[#allocation2 + $0x12d4] ss:$40 sps:$4 sm:$0xff]   ;;  %v8499_v2 = vld [vmem:[#allocation2 + $0xd80] ss:$40 sps:$4 sm:$0xff]  }
 0x1b9   :  { %5511 = vmatprep.mubr.bf16.mxu1 %v9304_v40  ;;  %v5148_v41 = vpop.f32.mrf.mxu0  ;;  %v8493_v60 = vld [vmem:[#allocation2 + $0xdd0] ss:$40 sps:$4 sm:$0xff]  }
 0x1ba   :  { %v5189_v13 = vpop.f32.mrf.mxu1  ;;  %5441 = vmatpush1.bf16.msra.mxu0 %v8433_v61  ;;  %v8496_v61 = vld [vmem:[#allocation2 + $0x12d0] ss:$40 sps:$4 sm:$0xff]  }
 0x1bb   :  { %5482 = vmatpush1.bf16.msra.mxu1 %v8436_v62  ;;  %v5149_v14 = vpop.f32.mrf.mxu0  ;;  %5442 = vmatprep.subr.bf16.mxu0 %v8441_v3  ;;  %v8501_v62 = vld [vmem:[#allocation2 + $0xd84] ss:$40 sps:$4 sm:$0xff]   ;;  %v8502_v3 = vld [vmem:[#allocation2 + $0x1280] ss:$40 sps:$4 sm:$0xff]   ;;  %v8508_v41 = vld [vmem:[#allocation2 + $0x1230] ss:$40 sps:$4 sm:$0xff]  }
 0x1bc   :  { %5483 = vmatprep.subr.bf16.mxu1 %v8444_v4  ;;  %v5190_v17 = vpop.f32.mrf.mxu1  ;;  %v8507_v4 = vld [vmem:[#allocation2 + $0xd34] ss:$40 sps:$4 sm:$0xff]   ;;  %v8513_v13 = vld [vmem:[#allocation2 + $0xce4] ss:$40 sps:$4 sm:$0xff]  }
 0x1bd   :  { %v8516_v14 = vld [vmem:[#allocation2 + $0x11e4] ss:$40 sps:$4 sm:$0xff]   ;;  %v906_v17 = vsub.s32 2, %v9336_v43 }
 0x1be   :  { %5443 = vmatpush1.bf16.msra.mxu0 %v8439_v9  ;;  %v8510_v9 = vld [vmem:[#allocation2 + $0x1234] ss:$40 sps:$4 sm:$0xff]  }
 0x1bf   :  { %5484 = vmatpush1.bf16.msra.mxu1 %v8442_v10  ;;  %5444 = vmatprep.subr.bf16.mxu0 %v8447_v15  ;;  %v8505_v10 = vld [vmem:[#allocation2 + $0xd30] ss:$40 sps:$4 sm:$0xff]   ;;  %v8511_v15 = vld [vmem:[#allocation2 + $0xce0] ss:$40 sps:$4 sm:$0xff]  }
 0x1c0   :  { %5485 = vmatprep.subr.bf16.mxu1 %v8450_v16  ;;  %v8514_v16 = vld [vmem:[#allocation2 + $0x11e0] ss:$40 sps:$4 sm:$0xff]  }
 0x1c2   :  { %5445 = vmatpush1.bf16.msra.mxu0 %v8445_v46  ;;  %v8519_v46 = vld [vmem:[#allocation2 + $0xc94] ss:$40 sps:$4 sm:$0xff]  }
 0x1c3   :  { %5486 = vmatpush1.bf16.msra.mxu1 %v8448_v18  ;;  %5446 = vmatprep.subr.bf16.mxu0 %v8453_v19  ;;  %v8522_v18 = vld [vmem:[#allocation2 + $0x1194] ss:$40 sps:$4 sm:$0xff]   ;;  %v910_v19 = vsub.s32 3, %v9336_v43 }
 0x1c4   :  { %5487 = vmatprep.subr.bf16.mxu1 %v8456_v21  ;;  %v9133_v21 = vld [vmem:[#allocation4] sm:$0xff] }
 0x1c6   :  { %5447 = vmatpush1.bf16.msra.mxu0 %v8451_v22  ;;  %v907_v22 = vrot.slane %v9133_v21, %v906_v17  ;;  %v8559_v17 = vld [vmem:[#allocation2 + $0x1460] ss:$40 sps:$4 sm:$0xff]  }
 0x1c7   :  { %5488 = vmatpush1.bf16.msra.mxu1 %v8454_v24  ;;  %5448 = vmatprep.subr.bf16.mxu0 %v8459_v25  ;;  %v8517_v24 = vld [vmem:[#allocation2 + $0xc90] ss:$40 sps:$4 sm:$0xff]  }
 0x1c8   :  { %5489 = vmatprep.subr.bf16.mxu1 %v8462_v26  ;;  %v8520_v25 = vld [vmem:[#allocation2 + $0x1190] ss:$40 sps:$4 sm:$0xff]   ;;  %v8525_v26 = vld [vmem:[#allocation2 + $0x1644] ss:$40 sps:$4 sm:$0xff]  }
 0x1ca   :  { %5449 = vmatpush1.bf16.msra.mxu0 %v8457_v28  ;;  %v8528_v28 = vld [vmem:[#allocation2 + $0x24c] ss:$40 sps:$4 sm:$0xff]  }
 0x1cb   :  { %5490 = vmatpush1.bf16.msra.mxu1 %v8460_v29  ;;  %5450 = vmatprep.subr.bf16.mxu0 %v8465_v30  ;;  %v911_v29 = vrot.slane %v9133_v21, %v910_v19  ;;  %v8523_v30 = vld [vmem:[#allocation2 + $0x1640] ss:$40 sps:$4 sm:$0xff]   ;;  %v8570_v19 = vld [vmem:[#allocation2 + $0x1c] ss:$40 sps:$4 sm:$0xff]   ;;  %v8565_v21 = vld [vmem:[#allocation2 + $0x1410] ss:$40 sps:$4 sm:$0xff]  }
 0x1cc   :  { %5491 = vmatprep.subr.bf16.mxu1 %v8468_v31  ;;  %v8526_v31 = vld [vmem:[#allocation2 + $0x248] ss:$40 sps:$4 sm:$0xff]  }
 0x1ce   :  { %5451 = vmatpush1.bf16.msra.mxu0 %v8463_v32  ;;  %v5186_v32 = vadd.f32 %v9364_v0, %v907_v22  ;;  %v8568_v22 = vld [vmem:[#allocation2 + $0x18] ss:$40 sps:$4 sm:$0xff]  }
 0x1cf   :  { %5492 = vmatpush1.bf16.msra.mxu1 %v8466_v33  ;;  %5452 = vmatprep.subr.bf16.mxu0 %v8471_v35  ;;  %v8531_v33 = vld [vmem:[#allocation2 + $0x15f4] ss:$40 sps:$4 sm:$0xff]  }
 0x1d0   :  { %5493 = vmatprep.subr.bf16.mxu1 %v8474_v37  ;;  %v8534_v35 = vld [vmem:[#allocation2 + $0x1fc] ss:$40 sps:$4 sm:$0xff]   ;;  %v5188_v37 = vadd.f32 %v9369_v5, %v911_v29  ;;  %v8535_v5 = vld [vmem:[#allocation2 + $0x15a0] ss:$40 sps:$4 sm:$0xff]  }
 0x1d1   :  { %v8579_v29 = vld [vmem:[#allocation2 + $0x1874] ss:$40 sps:$4 sm:$0xff]  }
 0x1d2   :  { %5453 = vmatpush1.bf16.msra.mxu0 %v8469_v38  ;;  %v8529_v38 = vld [vmem:[#allocation2 + $0x15f0] ss:$40 sps:$4 sm:$0xff]  }
 0x1d3   :  { %5494 = vmatpush1.bf16.msra.mxu1 %v8472_v39  ;;  %5454 = vmatprep.subr.bf16.mxu0 %v8477_v42  ;;  %v8532_v39 = vld [vmem:[#allocation2 + $0x1f8] ss:$40 sps:$4 sm:$0xff]  }
 0x1d4   :  { %5495 = vmatprep.subr.bf16.mxu1 %v8480_v44 }
 0x1d6   :  { %5455 = vmatpush2.bf16.msra.mxu0 %v8475_v45 }
 0x1d7   :  { %5496 = vmatpush2.bf16.msra.mxu1 %v8478_v6  ;;  %5456 = vmatprep.subr.bf16.mxu0 %v8483_v47  ;;  %v8537_v47 = vld [vmem:[#allocation2 + $0x15a4] ss:$40 sps:$4 sm:$0xff]  }
 0x1d8   :  { %5497 = vmatprep.subr.bf16.mxu1 %v8486_v50  ;;  %v8540_v50 = vld [vmem:[#allocation2 + $0x1ac] ss:$40 sps:$4 sm:$0xff]  }
 0x1da   :  { %5457 = vmatpush2.bf16.msra.mxu0 %v8481_v51 }
 0x1db   :  { %5498 = vmatpush2.bf16.msra.mxu1 %v8484_v12  ;;  %5458 = vmatprep.subr.bf16.mxu0 %v8489_v54  ;;  %v8538_v54 = vld [vmem:[#allocation2 + $0x1a8] ss:$40 sps:$4 sm:$0xff]  }
 0x1dc   :  { %5499 = vmatprep.subr.bf16.mxu1 %v8492_v55 }
 0x1de   :  { %5459 = vmatpush2.bf16.msra.mxu0 %v8487_v56 }
 0x1df   :  { %5500 = vmatpush2.bf16.msra.mxu1 %v8490_v57  ;;  %5460 = vmatprep.subr.bf16.mxu0 %v8495_v58 }
 0x1e0   :  { %5501 = vmatprep.subr.bf16.mxu1 %v8498_v59  ;;  %v8543_v59 = vld [vmem:[#allocation2 + $0x1554] ss:$40 sps:$4 sm:$0xff]  }
 0x1e2   :  { %5461 = vmatpush2.bf16.msra.mxu0 %v8493_v60  ;;  %v8546_v60 = vld [vmem:[#allocation2 + $0x15c] ss:$40 sps:$4 sm:$0xff]  }
 0x1e3   :  { %5502 = vmatpush2.bf16.msra.mxu1 %v8496_v61  ;;  %5462 = vmatprep.subr.bf16.mxu0 %v8501_v62  ;;  %v8541_v62 = vld [vmem:[#allocation2 + $0x1550] ss:$40 sps:$4 sm:$0xff]  }
 0x1e4   :  { %5503 = vmatprep.subr.bf16.mxu1 %v8504_v63  ;;  %v8544_v63 = vld [vmem:[#allocation2 + $0x158] ss:$40 sps:$4 sm:$0xff]  }
 0x1e6   :  { %5463 = vmatpush2.bf16.msra.mxu0 %v8499_v2  ;;  %v8549_v2 = vld [vmem:[#allocation2 + $0x1504] ss:$40 sps:$4 sm:$0xff]  }
 0x1e7   :  { %5504 = vmatpush2.bf16.msra.mxu1 %v8502_v3  ;;  %5464 = vmatprep.subr.bf16.mxu0 %v8507_v4  ;;  %v8552_v3 = vld [vmem:[#allocation2 + $0x10c] ss:$40 sps:$4 sm:$0xff]   ;;  %v8547_v4 = vld [vmem:[#allocation2 + $0x1500] ss:$40 sps:$4 sm:$0xff]  }
 0x1e8   :  { %5505 = vmatprep.subr.bf16.mxu1 %v8510_v9  ;;  %v8550_v9 = vld [vmem:[#allocation2 + $0x108] ss:$40 sps:$4 sm:$0xff]  }
 0x1ea   :  { %5465 = vmatpush2.bf16.msra.mxu0 %v8505_v10  ;;  %v8555_v10 = vld [vmem:[#allocation2 + $0x14b4] ss:$40 sps:$4 sm:$0xff]  }
 0x1eb   :  { %5506 = vmatpush2.bf16.msra.mxu1 %v8508_v41  ;;  %5466 = vmatprep.subr.bf16.mxu0 %v8513_v13  ;;  %v8558_v41 = vld [vmem:[#allocation2 + $0xbc] ss:$40 sps:$4 sm:$0xff]   ;;  %v8553_v13 = vld [vmem:[#allocation2 + $0x14b0] ss:$40 sps:$4 sm:$0xff]  }
 0x1ec   :  { %5507 = vmatprep.subr.bf16.mxu1 %v8516_v14  ;;  %v8556_v14 = vld [vmem:[#allocation2 + $0xb8] ss:$40 sps:$4 sm:$0xff]  }
 0x1ee   :  { %5467 = vmatpush2.bf16.msra.mxu0 %v8511_v15  ;;  %v8561_v15 = vld [vmem:[#allocation2 + $0x1464] ss:$40 sps:$4 sm:$0xff]  }
 0x1ef   :  { %5508 = vmatpush2.bf16.msra.mxu1 %v8514_v16  ;;  %5468 = vmatprep.subr.bf16.mxu0 %v8519_v46  ;;  %v8564_v16 = vld [vmem:[#allocation2 + $0x6c] ss:$40 sps:$4 sm:$0xff]   ;;  %v8562_v46 = vld [vmem:[#allocation2 + $0x68] ss:$40 sps:$4 sm:$0xff]  }
 0x1f0   :  { %5509 = vmatprep.subr.bf16.mxu1 %v8522_v18  ;;  %v8567_v18 = vld [vmem:[#allocation2 + $0x1414] ss:$40 sps:$4 sm:$0xff]  }
 0x1f2   :  { %5469 = vmatpush2.bf16.msra.mxu0 %v8517_v24  ;;  %v8573_v24 = vld [vmem:[#allocation2 + $0x18c4] ss:$40 sps:$4 sm:$0xff]  }
 0x1f3   :  { %5510 = vmatpush2.bf16.msra.mxu1 %v8520_v25  ;;  %5520 = vmatprep.subr.bf16.mxu0 %v8525_v26  ;;  %v8576_v25 = vld [vmem:[#allocation2 + $0x4cc] ss:$40 sps:$4 sm:$0xff]   ;;  %v8571_v26 = vld [vmem:[#allocation2 + $0x18c0] ss:$40 sps:$4 sm:$0xff]  }
 0x1f4   :  { %5561 = vmatprep.subr.bf16.mxu1 %v8528_v28  ;;  %v8574_v28 = vld [vmem:[#allocation2 + $0x4c8] ss:$40 sps:$4 sm:$0xff]  }
 0x1f5   :  { %v5226_v42 = vpop.f32.mrf.mxu0  ;;  %5471 = vmatmul.mubr.bf16.vlgmr.msra.gmra.mxu0 %v9314_v20 }
 0x1f6   :  { %5512 = vmatmul.mubr.bf16.vlgmr.msra.gmra.mxu1 %v9316_v23  ;;  %v5267_v44 = vpop.f32.mrf.mxu1  ;;  %v5227_v45 = vadd.f32 %v5226_v42, %v5186_v32  ;;  %5521 = vmatpush1.bf16.msra.mxu0 %v8523_v30  ;;  %v8582_v30 = vld [vmem:[#allocation2 + $0x47c] ss:$40 sps:$4 sm:$0xff]   ;;  %v8580_v32 = vld [vmem:[#allocation2 + $0x478] ss:$40 sps:$4 sm:$0xff]  }
 0x1f7   :  { %5562 = vmatpush1.bf16.msra.mxu1 %v8526_v31  ;;  %v5228_v0 = vpop.f32.mrf.mxu0  ;;  %5522 = vmatprep.subr.bf16.mxu0 %v8531_v33  ;;  %v8577_v31 = vld [vmem:[#allocation2 + $0x1870] ss:$40 sps:$4 sm:$0xff]   ;;  %v8585_v33 = vld [vmem:[#allocation2 + $0x1824] ss:$40 sps:$4 sm:$0xff]  }
 0x1f8   :  { %v5269_v6 = vpop.f32.mrf.mxu1  ;;  %5563 = vmatprep.subr.bf16.mxu1 %v8534_v35  ;;  %v5229_v51 = vadd.f32 %v5228_v0, %v5188_v37  ;;  %v9382_v12 = vadd.f32 %v5267_v44, %v5227_v45  ;;  %5552 = vmatprep.mubr.bf16.mxu0 %v9323_v27  ;;  %v8588_v35 = vld [vmem:[#allocation2 + $0x42c] ss:$40 sps:$4 sm:$0xff]   ;;  %v8583_v37 = vld [vmem:[#allocation2 + $0x1820] ss:$40 sps:$4 sm:$0xff]   ;;  %v8594_v42 = vld [vmem:[#allocation2 + $0x3dc] ss:$40 sps:$4 sm:$0xff]  }
 0x1f9   :  { %5593 = vmatprep.mubr.bf16.mxu1 %v9275_v48  ;;  %v5230_v55 = vpop.f32.mrf.mxu0  ;;  %v8589_v44 = vld [vmem:[#allocation2 + $0x17d0] ss:$40 sps:$4 sm:$0xff]   ;;  %v8597_v0 = vld [vmem:[#allocation2 + $0x1784] ss:$40 sps:$4 sm:$0xff]  }
 0x1fa   :  { %v5271_v56 = vpop.f32.mrf.mxu1  ;;  %v9386_v57 = vadd.f32 %v5269_v6, %v5229_v51  ;;  %5523 = vmatpush1.bf16.msra.mxu0 %v8529_v38  ;;  %v8586_v38 = vld [vmem:[#allocation2 + $0x428] ss:$40 sps:$4 sm:$0xff]   ;;  %v8592_v45 = vld [vmem:[#allocation2 + $0x3d8] ss:$40 sps:$4 sm:$0xff]   ;;  %v8600_v6 = vld [vmem:[#allocation2 + $0x38c] ss:$40 sps:$4 sm:$0xff]  }
 0x1fb   :  { %5564 = vmatpush1.bf16.msra.mxu1 %v8532_v39  ;;  %v5231_v58 = vpop.f32.mrf.mxu0  ;;  %5524 = vmatprep.subr.bf16.mxu0 %v8537_v47  ;;  %v8591_v39 = vld [vmem:[#allocation2 + $0x17d4] ss:$40 sps:$4 sm:$0xff]   ;;  %v8595_v47 = vld [vmem:[#allocation2 + $0x1780] ss:$40 sps:$4 sm:$0xff]   ;;  %v8609_v56 = vld [vmem:[#allocation2 + $0x16e4] ss:$40 sps:$4 sm:$0xff]  }
 0x1fc   :  { %5565 = vmatprep.subr.bf16.mxu1 %v8540_v50  ;;  %v5272_v61 = vpop.f32.mrf.mxu1  ;;  %v8598_v50 = vld [vmem:[#allocation2 + $0x388] ss:$40 sps:$4 sm:$0xff]   ;;  %v8603_v51 = vld [vmem:[#allocation2 + $0x1734] ss:$40 sps:$4 sm:$0xff]   ;;  %v8604_v55 = vld [vmem:[#allocation2 + $0x338] ss:$40 sps:$4 sm:$0xff]  }
 0x1fd   :  { %v8612_v58 = vld [vmem:[#allocation2 + $0x2ec] ss:$40 sps:$4 sm:$0xff]  }
 0x1fe   :  { %5525 = vmatpush1.bf16.msra.mxu0 %v8535_v5  ;;  %v8606_v5 = vld [vmem:[#allocation2 + $0x33c] ss:$40 sps:$4 sm:$0xff]  }
 0x1ff   :  { %5566 = vmatpush1.bf16.msra.mxu1 %v8538_v54  ;;  %5526 = vmatprep.subr.bf16.mxu0 %v8543_v59  ;;  %v8601_v54 = vld [vmem:[#allocation2 + $0x1730] ss:$40 sps:$4 sm:$0xff]   ;;  %v8607_v59 = vld [vmem:[#allocation2 + $0x16e0] ss:$40 sps:$4 sm:$0xff]   ;;  %v8615_v61 = vld [vmem:[#allocation2 + $0x1694] ss:$40 sps:$4 sm:$0xff]  }
 0x200   :  { %5567 = vmatprep.subr.bf16.mxu1 %v8546_v60  ;;  %v8610_v60 = vld [vmem:[#allocation2 + $0x2e8] ss:$40 sps:$4 sm:$0xff]  }
 0x202   :  { %5527 = vmatpush1.bf16.msra.mxu0 %v8541_v62  ;;  %v8618_v62 = vld [vmem:[#allocation2 + $0x29c] ss:$40 sps:$4 sm:$0xff]  }
 0x203   :  { %5568 = vmatpush1.bf16.msra.mxu1 %v8544_v63  ;;  %5528 = vmatprep.subr.bf16.mxu0 %v8549_v2  ;;  %v8613_v63 = vld [vmem:[#allocation2 + $0x1690] ss:$40 sps:$4 sm:$0xff]  }
 0x204   :  { %5569 = vmatprep.subr.bf16.mxu1 %v8552_v3  ;;  %v8616_v2 = vld [vmem:[#allocation2 + $0x298] ss:$40 sps:$4 sm:$0xff]   ;;  %v8621_v3 = vld [vmem:[#allocation2 + $0x74c] ss:$40 sps:$4 sm:$0xff]  }
 0x206   :  { %5529 = vmatpush1.bf16.msra.mxu0 %v8547_v4  ;;  %v8624_v4 = vld [vmem:[#allocation2 + $0xc4c] ss:$40 sps:$4 sm:$0xff]  }
 0x207   :  { %5570 = vmatpush1.bf16.msra.mxu1 %v8550_v9  ;;  %5530 = vmatprep.subr.bf16.mxu0 %v8555_v10  ;;  %v8619_v9 = vld [vmem:[#allocation2 + $0x748] ss:$40 sps:$4 sm:$0xff]  }
 0x208   :  { %5571 = vmatprep.subr.bf16.mxu1 %v8558_v41  ;;  %v8622_v10 = vld [vmem:[#allocation2 + $0xc48] ss:$40 sps:$4 sm:$0xff]   ;;  %v8627_v41 = vld [vmem:[#allocation2 + $0x6fc] ss:$40 sps:$4 sm:$0xff]  }
 0x20a   :  { %5531 = vmatpush1.bf16.msra.mxu0 %v8553_v13  ;;  %v8630_v13 = vld [vmem:[#allocation2 + $0xbfc] ss:$40 sps:$4 sm:$0xff]  }
 0x20b   :  { %5572 = vmatpush1.bf16.msra.mxu1 %v8556_v14  ;;  %5532 = vmatprep.subr.bf16.mxu0 %v8561_v15  ;;  %v8625_v14 = vld [vmem:[#allocation2 + $0x6f8] ss:$40 sps:$4 sm:$0xff]  }
 0x20c   :  { %5573 = vmatprep.subr.bf16.mxu1 %v8564_v16  ;;  %v8628_v15 = vld [vmem:[#allocation2 + $0xbf8] ss:$40 sps:$4 sm:$0xff]  }
 0x20e   :  { %5533 = vmatpush1.bf16.msra.mxu0 %v8559_v17 }
 0x20f   :  { %5574 = vmatpush1.bf16.msra.mxu1 %v8562_v46  ;;  %5534 = vmatprep.subr.bf16.mxu0 %v8567_v18 }
 0x210   :  { %5575 = vmatprep.subr.bf16.mxu1 %v8570_v19 }
 0x212   :  { %5535 = vmatpush1.bf16.msra.mxu0 %v8565_v21  ;;  %v8633_v21 = vld [vmem:[#allocation2 + $0x6ac] ss:$40 sps:$4 sm:$0xff]  }
 0x213   :  { %5576 = vmatpush1.bf16.msra.mxu1 %v8568_v22  ;;  %5536 = vmatprep.subr.bf16.mxu0 %v8573_v24  ;;  %v8636_v22 = vld [vmem:[#allocation2 + $0xbac] ss:$40 sps:$4 sm:$0xff]  }
 0x214   :  { %5577 = vmatprep.subr.bf16.mxu1 %v8576_v25 }
 0x216   :  { %5537 = vmatpush2.bf16.msra.mxu0 %v8571_v26  ;;  %v8631_v26 = vld [vmem:[#allocation2 + $0x6a8] ss:$40 sps:$4 sm:$0xff]  }
 0x217   :  { %5578 = vmatpush2.bf16.msra.mxu1 %v8574_v28  ;;  %5538 = vmatprep.subr.bf16.mxu0 %v8579_v29 }
 0x218   :  { %5579 = vmatprep.subr.bf16.mxu1 %v8582_v30  ;;  %v8634_v30 = vld [vmem:[#allocation2 + $0xba8] ss:$40 sps:$4 sm:$0xff]  }
 0x21a   :  { %5539 = vmatpush2.bf16.msra.mxu0 %v8577_v31 }
 0x21b   :  { %5580 = vmatpush2.bf16.msra.mxu1 %v8580_v32  ;;  %5540 = vmatprep.subr.bf16.mxu0 %v8585_v33  ;;  %v8639_v32 = vld [vmem:[#allocation2 + $0x65c] ss:$40 sps:$4 sm:$0xff]  }
 0x21c   :  { %5581 = vmatprep.subr.bf16.mxu1 %v8588_v35  ;;  %v8642_v33 = vld [vmem:[#allocation2 + $0xb5c] ss:$40 sps:$4 sm:$0xff]   ;;  %v8637_v35 = vld [vmem:[#allocation2 + $0x658] ss:$40 sps:$4 sm:$0xff]  }
 0x21e   :  { %5541 = vmatpush2.bf16.msra.mxu0 %v8583_v37  ;;  %v8640_v37 = vld [vmem:[#allocation2 + $0xb58] ss:$40 sps:$4 sm:$0xff]  }
 0x21f   :  { %5582 = vmatpush2.bf16.msra.mxu1 %v8586_v38  ;;  %5542 = vmatprep.subr.bf16.mxu0 %v8591_v39  ;;  %v8645_v38 = vld [vmem:[#allocation2 + $0x60c] ss:$40 sps:$4 sm:$0xff]  }
 0x220   :  { %5583 = vmatprep.subr.bf16.mxu1 %v8594_v42  ;;  %v8648_v39 = vld [vmem:[#allocation2 + $0xb0c] ss:$40 sps:$4 sm:$0xff]   ;;  %v8643_v42 = vld [vmem:[#allocation2 + $0x608] ss:$40 sps:$4 sm:$0xff]  }
 0x222   :  { %5543 = vmatpush2.bf16.msra.mxu0 %v8589_v44  ;;  %v8646_v44 = vld [vmem:[#allocation2 + $0xb08] ss:$40 sps:$4 sm:$0xff]  }
 0x223   :  { %5584 = vmatpush2.bf16.msra.mxu1 %v8592_v45  ;;  %5544 = vmatprep.subr.bf16.mxu0 %v8597_v0  ;;  %v8651_v45 = vld [vmem:[#allocation2 + $0x5bc] ss:$40 sps:$4 sm:$0xff]  }
 0x224   :  { %5585 = vmatprep.subr.bf16.mxu1 %v8600_v6  ;;  %v8654_v0 = vld [vmem:[#allocation2 + $0xabc] ss:$40 sps:$4 sm:$0xff]   ;;  %v8649_v6 = vld [vmem:[#allocation2 + $0x5b8] ss:$40 sps:$4 sm:$0xff]  }
 0x226   :  { %5545 = vmatpush2.bf16.msra.mxu0 %v8595_v47  ;;  %v8652_v47 = vld [vmem:[#allocation2 + $0xab8] ss:$40 sps:$4 sm:$0xff]  }
 0x227   :  { %5586 = vmatpush2.bf16.msra.mxu1 %v8598_v50  ;;  %5546 = vmatprep.subr.bf16.mxu0 %v8603_v51  ;;  %v8657_v50 = vld [vmem:[#allocation2 + $0x56c] ss:$40 sps:$4 sm:$0xff]  }
 0x228   :  { %5587 = vmatprep.subr.bf16.mxu1 %v8606_v5  ;;  %v8660_v51 = vld [vmem:[#allocation2 + $0xa6c] ss:$40 sps:$4 sm:$0xff]   ;;  %v8655_v5 = vld [vmem:[#allocation2 + $0x568] ss:$40 sps:$4 sm:$0xff]  }
 0x22a   :  { %5547 = vmatpush2.bf16.msra.mxu0 %v8601_v54  ;;  %v8658_v54 = vld [vmem:[#allocation2 + $0xa68] ss:$40 sps:$4 sm:$0xff]  }
 0x22b   :  { %5588 = vmatpush2.bf16.msra.mxu1 %v8604_v55  ;;  %5548 = vmatprep.subr.bf16.mxu0 %v8609_v56  ;;  %v8663_v55 = vld [vmem:[#allocation2 + $0x51c] ss:$40 sps:$4 sm:$0xff]  }
 0x22c   :  { %5589 = vmatprep.subr.bf16.mxu1 %v8612_v58  ;;  %v8666_v56 = vld [vmem:[#allocation2 + $0xa1c] ss:$40 sps:$4 sm:$0xff]   ;;  %v8661_v58 = vld [vmem:[#allocation2 + $0x518] ss:$40 sps:$4 sm:$0xff]  }
 0x22e   :  { %5549 = vmatpush2.bf16.msra.mxu0 %v8607_v59  ;;  %v8664_v59 = vld [vmem:[#allocation2 + $0xa18] ss:$40 sps:$4 sm:$0xff]  }
 0x22f   :  { %5590 = vmatpush2.bf16.msra.mxu1 %v8610_v60  ;;  %5550 = vmatprep.subr.bf16.mxu0 %v8615_v61  ;;  %v8669_v60 = vld [vmem:[#allocation2 + $0x9cc] ss:$40 sps:$4 sm:$0xff]  }
 0x230   :  { %5591 = vmatprep.subr.bf16.mxu1 %v8618_v62  ;;  %v8672_v61 = vld [vmem:[#allocation2 + $0xecc] ss:$40 sps:$4 sm:$0xff]   ;;  %v8667_v62 = vld [vmem:[#allocation2 + $0x9c8] ss:$40 sps:$4 sm:$0xff]  }
 0x232   :  { %5551 = vmatpush2.bf16.msra.mxu0 %v8613_v63  ;;  %v8670_v63 = vld [vmem:[#allocation2 + $0xec8] ss:$40 sps:$4 sm:$0xff]  }
 0x233   :  { %5592 = vmatpush2.bf16.msra.mxu1 %v8616_v2  ;;  %5602 = vmatprep.subr.bf16.mxu0 %v8621_v3  ;;  %v8675_v2 = vld [vmem:[#allocation2 + $0x97c] ss:$40 sps:$4 sm:$0xff]  }
 0x234   :  { %5643 = vmatprep.subr.bf16.mxu1 %v8624_v4  ;;  %v8678_v3 = vld [vmem:[#allocation2 + $0xe7c] ss:$40 sps:$4 sm:$0xff]   ;;  %v8673_v4 = vld [vmem:[#allocation2 + $0x978] ss:$40 sps:$4 sm:$0xff]  }
 0x235   :  { %v5308_v16 = vpop.f32.mrf.mxu0  ;;  %5553 = vmatmul.mubr.bf16.vlgmr.msra.gmra.mxu0 %v9330_v34 }
 0x236   :  { %5594 = vmatmul.mubr.bf16.vlgmr.msra.gmra.mxu1 %v9290_v8  ;;  %v5349_v17 = vpop.f32.mrf.mxu1  ;;  %v5309_v46 = vadd.f32 %v5308_v16, %v9382_v12  ;;  %5603 = vmatpush1.bf16.msra.mxu0 %v8619_v9  ;;  %v8676_v9 = vld [vmem:[#allocation2 + $0xe78] ss:$40 sps:$4 sm:$0xff]   ;;  %v8690_v16 = vld [vmem:[#allocation2 + $0xddc] ss:$40 sps:$4 sm:$0xff]  }
 0x237   :  { %5644 = vmatpush1.bf16.msra.mxu1 %v8622_v10  ;;  %v5310_v18 = vpop.f32.mrf.mxu0  ;;  %5604 = vmatprep.subr.bf16.mxu0 %v8627_v41  ;;  %v8681_v10 = vld [vmem:[#allocation2 + $0x92c] ss:$40 sps:$4 sm:$0xff]  }
 0x238   :  { %v5351_v19 = vpop.f32.mrf.mxu1  ;;  %5645 = vmatprep.subr.bf16.mxu1 %v8630_v13  ;;  %v5311_v24 = vadd.f32 %v5310_v18, %v9386_v57  ;;  %v9392_v25 = vadd.f32 %v5349_v17, %v5309_v46  ;;  %5634 = vmatprep.mubr.bf16.mxu0 %v9280_v52  ;;  %v8684_v41 = vld [vmem:[#allocation2 + $0xe2c] ss:$40 sps:$4 sm:$0xff]   ;;  %v8679_v13 = vld [vmem:[#allocation2 + $0x928] ss:$40 sps:$4 sm:$0xff]   ;;  %v8685_v17 = vld [vmem:[#allocation2 + $0x8d8] ss:$40 sps:$4 sm:$0xff]  }
 0x239   :  { %5675 = vmatprep.mubr.bf16.mxu1 %v9299_v36  ;;  %v5312_v28 = vpop.f32.mrf.mxu0  ;;  %v8688_v46 = vld [vmem:[#allocation2 + $0xdd8] ss:$40 sps:$4 sm:$0xff]   ;;  %v8693_v18 = vld [vmem:[#allocation2 + $0x88c] ss:$40 sps:$4 sm:$0xff]  }
 0x23a   :  { %v5353_v29 = vpop.f32.mrf.mxu1  ;;  %v9396_v12 = vadd.f32 %v5351_v19, %v5311_v24  ;;  %5605 = vmatpush1.bf16.msra.mxu0 %v8625_v14  ;;  %v8682_v14 = vld [vmem:[#allocation2 + $0xe28] ss:$40 sps:$4 sm:$0xff]   ;;  %v8696_v19 = vld [vmem:[#allocation2 + $0xd8c] ss:$40 sps:$4 sm:$0xff]   ;;  %v8699_v24 = vld [vmem:[#allocation2 + $0x83c] ss:$40 sps:$4 sm:$0xff]  }
 0x23b   :  { %5646 = vmatpush1.bf16.msra.mxu1 %v8628_v15  ;;  %v5313_v31 = vpop.f32.mrf.mxu0  ;;  %5606 = vmatprep.subr.bf16.mxu0 %v8633_v21  ;;  %v8687_v15 = vld [vmem:[#allocation2 + $0x8dc] ss:$40 sps:$4 sm:$0xff]   ;;  %v8691_v21 = vld [vmem:[#allocation2 + $0x888] ss:$40 sps:$4 sm:$0xff]   ;;  %v8697_v28 = vld [vmem:[#allocation2 + $0x838] ss:$40 sps:$4 sm:$0xff]  }
 0x23c   :  { %5647 = vmatprep.subr.bf16.mxu1 %v8636_v22  ;;  %v5354_v57 = vpop.f32.mrf.mxu1  ;;  %v8694_v22 = vld [vmem:[#allocation2 + $0xd88] ss:$40 sps:$4 sm:$0xff]   ;;  %v8700_v29 = vld [vmem:[#allocation2 + $0xd38] ss:$40 sps:$4 sm:$0xff]   ;;  %v8708_v31 = vld [vmem:[#allocation2 + $0xcec] ss:$40 sps:$4 sm:$0xff]  }
 0x23d   :  { %v8711_v57 = vld [vmem:[#allocation2 + $0x79c] ss:$40 sps:$4 sm:$0xff]  }
 0x23e   :  { %5607 = vmatpush1.bf16.msra.mxu0 %v8631_v26  ;;  %v8702_v26 = vld [vmem:[#allocation2 + $0xd3c] ss:$40 sps:$4 sm:$0xff]  }
 0x23f   :  { %5648 = vmatpush1.bf16.msra.mxu1 %v8634_v30  ;;  %5608 = vmatprep.subr.bf16.mxu0 %v8639_v32  ;;  %v8705_v30 = vld [vmem:[#allocation2 + $0x7ec] ss:$40 sps:$4 sm:$0xff]   ;;  %v8703_v32 = vld [vmem:[#allocation2 + $0x7e8] ss:$40 sps:$4 sm:$0xff]  }
 0x240   :  { %5649 = vmatprep.subr.bf16.mxu1 %v8642_v33  ;;  %v8706_v33 = vld [vmem:[#allocation2 + $0xce8] ss:$40 sps:$4 sm:$0xff]  }
 0x242   :  { %5609 = vmatpush1.bf16.msra.mxu0 %v8637_v35  ;;  %v8714_v35 = vld [vmem:[#allocation2 + $0xc9c] ss:$40 sps:$4 sm:$0xff]  }
 0x243   :  { %5650 = vmatpush1.bf16.msra.mxu1 %v8640_v37  ;;  %5610 = vmatprep.subr.bf16.mxu0 %v8645_v38  ;;  %v8709_v37 = vld [vmem:[#allocation2 + $0x798] ss:$40 sps:$4 sm:$0xff]  }
 0x244   :  { %5651 = vmatprep.subr.bf16.mxu1 %v8648_v39  ;;  %v8712_v38 = vld [vmem:[#allocation2 + $0xc98] ss:$40 sps:$4 sm:$0xff]   ;;  %v914_v39 = vsub.s32 4, %v9336_v43 }
 0x246   :  { %5611 = vmatpush1.bf16.msra.mxu0 %v8643_v42  ;;  %v8717_v42 = vld [vmem:[#allocation2 + $0x114c] ss:$40 sps:$4 sm:$0xff]  }
 0x247   :  { %5652 = vmatpush1.bf16.msra.mxu1 %v8646_v44  ;;  %5612 = vmatprep.subr.bf16.mxu0 %v8651_v45  ;;  %v8720_v44 = vld [vmem:[#allocation2 + $0x164c] ss:$40 sps:$4 sm:$0xff]   ;;  %v918_v45 = vsub.s32 5, %v9336_v43 }
 0x248   :  { %5653 = vmatprep.subr.bf16.mxu1 %v8654_v0  ;;  %v9400_v0 = vld [vmem:[#allocation4] sm:$0xff] }
 0x24a   :  { %5613 = vmatpush1.bf16.msra.mxu0 %v8649_v6  ;;  %v915_v6 = vrot.slane %v9400_v0, %v914_v39  ;;  %v8757_v39 = vld [vmem:[#allocation2 + $0xf18] ss:$40 sps:$4 sm:$0xff]  }
 0x24b   :  { %5654 = vmatpush1.bf16.msra.mxu1 %v8652_v47  ;;  %5614 = vmatprep.subr.bf16.mxu0 %v8657_v50  ;;  %v8715_v47 = vld [vmem:[#allocation2 + $0x1148] ss:$40 sps:$4 sm:$0xff]  }
 0x24c   :  { %5655 = vmatprep.subr.bf16.mxu1 %v8660_v51  ;;  %v8718_v50 = vld [vmem:[#allocation2 + $0x1648] ss:$40 sps:$4 sm:$0xff]   ;;  %v8723_v51 = vld [vmem:[#allocation2 + $0x10fc] ss:$40 sps:$4 sm:$0xff]  }
 0x24e   :  { %5615 = vmatpush1.bf16.msra.mxu0 %v8655_v5  ;;  %v8726_v5 = vld [vmem:[#allocation2 + $0x15fc] ss:$40 sps:$4 sm:$0xff]  }
 0x24f   :  { %5656 = vmatpush1.bf16.msra.mxu1 %v8658_v54  ;;  %5616 = vmatprep.subr.bf16.mxu0 %v8663_v55  ;;  %v919_v54 = vrot.slane %v9400_v0, %v918_v45  ;;  %v8768_v45 = vld [vmem:[#allocation2 + $0x18cc] ss:$40 sps:$4 sm:$0xff]  }
 0x250   :  { %5657 = vmatprep.subr.bf16.mxu1 %v8666_v56 }
 0x252   :  { %5617 = vmatpush1.bf16.msra.mxu0 %v8661_v58 }
 0x253   :  { %5658 = vmatpush1.bf16.msra.mxu1 %v8664_v59  ;;  %5618 = vmatprep.subr.bf16.mxu0 %v8669_v60  ;;  %v8721_v59 = vld [vmem:[#allocation2 + $0x10f8] ss:$40 sps:$4 sm:$0xff]  }
 0x254   :  { %5659 = vmatprep.subr.bf16.mxu1 %v8672_v61  ;;  %v8724_v60 = vld [vmem:[#allocation2 + $0x15f8] ss:$40 sps:$4 sm:$0xff]  }
 0x256   :  { %5619 = vmatpush2.bf16.msra.mxu0 %v8667_v62 }
 0x257   :  { %5660 = vmatpush2.bf16.msra.mxu1 %v8670_v63  ;;  %5620 = vmatprep.subr.bf16.mxu0 %v8675_v2  ;;  %v8729_v63 = vld [vmem:[#allocation2 + $0x10ac] ss:$40 sps:$4 sm:$0xff]  }
 0x258   :  { %5661 = vmatprep.subr.bf16.mxu1 %v8678_v3  ;;  %v8732_v2 = vld [vmem:[#allocation2 + $0x15ac] ss:$40 sps:$4 sm:$0xff]  }
 0x25a   :  { %5621 = vmatpush2.bf16.msra.mxu0 %v8673_v4 }
 0x25b   :  { %5662 = vmatpush2.bf16.msra.mxu1 %v8676_v9  ;;  %5622 = vmatprep.subr.bf16.mxu0 %v8681_v10 }
 0x25c   :  { %5663 = vmatprep.subr.bf16.mxu1 %v8684_v41 }
 0x25e   :  { %5623 = vmatpush2.bf16.msra.mxu0 %v8679_v13  ;;  %v8727_v13 = vld [vmem:[#allocation2 + $0x10a8] ss:$40 sps:$4 sm:$0xff]  }
 0x25f   :  { %5664 = vmatpush2.bf16.msra.mxu1 %v8682_v14  ;;  %5624 = vmatprep.subr.bf16.mxu0 %v8687_v15  ;;  %v8730_v14 = vld [vmem:[#allocation2 + $0x15a8] ss:$40 sps:$4 sm:$0xff]  }
 0x260   :  { %5665 = vmatprep.subr.bf16.mxu1 %v8690_v16  ;;  %v8735_v16 = vld [vmem:[#allocation2 + $0x105c] ss:$40 sps:$4 sm:$0xff]  }
 0x262   :  { %5625 = vmatpush2.bf16.msra.mxu0 %v8685_v17  ;;  %v8738_v17 = vld [vmem:[#allocation2 + $0x155c] ss:$40 sps:$4 sm:$0xff]  }
 0x263   :  { %5666 = vmatpush2.bf16.msra.mxu1 %v8688_v46  ;;  %5626 = vmatprep.subr.bf16.mxu0 %v8693_v18  ;;  %v8733_v18 = vld [vmem:[#allocation2 + $0x1058] ss:$40 sps:$4 sm:$0xff]  }
 0x264   :  { %5667 = vmatprep.subr.bf16.mxu1 %v8696_v19  ;;  %v8736_v19 = vld [vmem:[#allocation2 + $0x1558] ss:$40 sps:$4 sm:$0xff]  }
 0x266   :  { %5627 = vmatpush2.bf16.msra.mxu0 %v8691_v21  ;;  %v8741_v21 = vld [vmem:[#allocation2 + $0x100c] ss:$40 sps:$4 sm:$0xff]  }
 0x267   :  { %5668 = vmatpush2.bf16.msra.mxu1 %v8694_v22  ;;  %5628 = vmatprep.subr.bf16.mxu0 %v8699_v24  ;;  %v8744_v22 = vld [vmem:[#allocation2 + $0x150c] ss:$40 sps:$4 sm:$0xff]   ;;  %v8739_v24 = vld [vmem:[#allocation2 + $0x1008] ss:$40 sps:$4 sm:$0xff]  }
 0x268   :  { %5669 = vmatprep.subr.bf16.mxu1 %v8702_v26  ;;  %v8742_v26 = vld [vmem:[#allocation2 + $0x1508] ss:$40 sps:$4 sm:$0xff]  }
 0x26a   :  { %5629 = vmatpush2.bf16.msra.mxu0 %v8697_v28  ;;  %v8747_v28 = vld [vmem:[#allocation2 + $0xfbc] ss:$40 sps:$4 sm:$0xff]  }
 0x26b   :  { %5670 = vmatpush2.bf16.msra.mxu1 %v8700_v29  ;;  %5630 = vmatprep.subr.bf16.mxu0 %v8705_v30  ;;  %v8750_v29 = vld [vmem:[#allocation2 + $0x14bc] ss:$40 sps:$4 sm:$0xff]   ;;  %v8745_v30 = vld [vmem:[#allocation2 + $0xfb8] ss:$40 sps:$4 sm:$0xff]  }
 0x26c   :  { %5671 = vmatprep.subr.bf16.mxu1 %v8708_v31  ;;  %v8748_v31 = vld [vmem:[#allocation2 + $0x14b8] ss:$40 sps:$4 sm:$0xff]  }
 0x26e   :  { %5631 = vmatpush2.bf16.msra.mxu0 %v8703_v32  ;;  %v8753_v32 = vld [vmem:[#allocation2 + $0xf6c] ss:$40 sps:$4 sm:$0xff]  }
 0x26f   :  { %5672 = vmatpush2.bf16.msra.mxu1 %v8706_v33  ;;  %5632 = vmatprep.subr.bf16.mxu0 %v8711_v57  ;;  %v8756_v33 = vld [vmem:[#allocation2 + $0x146c] ss:$40 sps:$4 sm:$0xff]   ;;  %v8751_v57 = vld [vmem:[#allocation2 + $0xf68] ss:$40 sps:$4 sm:$0xff]  }
 0x270   :  { %5673 = vmatprep.subr.bf16.mxu1 %v8714_v35  ;;  %v8754_v35 = vld [vmem:[#allocation2 + $0x1468] ss:$40 sps:$4 sm:$0xff]  }
 0x272   :  { %5633 = vmatpush2.bf16.msra.mxu0 %v8709_v37  ;;  %v8759_v37 = vld [vmem:[#allocation2 + $0xf1c] ss:$40 sps:$4 sm:$0xff]  }
 0x273   :  { %5674 = vmatpush2.bf16.msra.mxu1 %v8712_v38  ;;  %5684 = vmatprep.subr.bf16.mxu0 %v8717_v42  ;;  %v8762_v38 = vld [vmem:[#allocation2 + $0x141c] ss:$40 sps:$4 sm:$0xff]   ;;  %v8760_v42 = vld [vmem:[#allocation2 + $0x1418] ss:$40 sps:$4 sm:$0xff]  }
 0x274   :  { %5725 = vmatprep.subr.bf16.mxu1 %v8720_v44  ;;  %v8765_v44 = vld [vmem:[#allocation2 + $0x13cc] ss:$40 sps:$4 sm:$0xff]  }
 0x275   :  { %v5390_v55 = vpop.f32.mrf.mxu0  ;;  %5635 = vmatmul.mubr.bf16.vlgmr.msra.gmra.mxu0 %v9292_v11 }
 0x276   :  { %5676 = vmatmul.mubr.bf16.vlgmr.msra.gmra.mxu1 %v9314_v20  ;;  %v5431_v56 = vpop.f32.mrf.mxu1  ;;  %v5391_v58 = vadd.f32 %v5390_v55, %v915_v6  ;;  %5685 = vmatpush1.bf16.msra.mxu0 %v8715_v47  ;;  %v8763_v6 = vld [vmem:[#allocation2 + $0x13c8] ss:$40 sps:$4 sm:$0xff]   ;;  %v8777_v55 = vld [vmem:[#allocation2 + $0x132c] ss:$40 sps:$4 sm:$0xff]  }
 0x277   :  { %5726 = vmatpush1.bf16.msra.mxu1 %v8718_v50  ;;  %v5392_v61 = vpop.f32.mrf.mxu0  ;;  %5686 = vmatprep.subr.bf16.mxu0 %v8723_v51  ;;  %v8766_v47 = vld [vmem:[#allocation2 + $0x18c8] ss:$40 sps:$4 sm:$0xff]   ;;  %v8771_v50 = vld [vmem:[#allocation2 + $0x137c] ss:$40 sps:$4 sm:$0xff]  }
 0x278   :  { %v5433_v62 = vpop.f32.mrf.mxu1  ;;  %5727 = vmatprep.subr.bf16.mxu1 %v8726_v5  ;;  %v5393_v3 = vadd.f32 %v5392_v61, %v919_v54  ;;  %v9406_v4 = vadd.f32 %v5431_v56, %v5391_v58  ;;  %5716 = vmatprep.mubr.bf16.mxu0 %v9304_v40  ;;  %v8774_v51 = vld [vmem:[#allocation2 + $0x187c] ss:$40 sps:$4 sm:$0xff]   ;;  %v8769_v5 = vld [vmem:[#allocation2 + $0x1378] ss:$40 sps:$4 sm:$0xff]   ;;  %v8780_v56 = vld [vmem:[#allocation2 + $0x182c] ss:$40 sps:$4 sm:$0xff]  }
 0x279   :  { %5757 = vmatprep.mubr.bf16.mxu1 %v9323_v27  ;;  %v5394_v9 = vpop.f32.mrf.mxu0  ;;  %v8772_v54 = vld [vmem:[#allocation2 + $0x1878] ss:$40 sps:$4 sm:$0xff]   ;;  %v8775_v58 = vld [vmem:[#allocation2 + $0x1328] ss:$40 sps:$4 sm:$0xff]   ;;  %v8786_v61 = vld [vmem:[#allocation2 + $0x17dc] ss:$40 sps:$4 sm:$0xff]  }
 0x27a   :  { %v5435_v10 = vpop.f32.mrf.mxu1  ;;  %v9410_v41 = vadd.f32 %v5433_v62, %v5393_v3  ;;  %5687 = vmatpush1.bf16.msra.mxu0 %v8721_v59  ;;  %v8778_v59 = vld [vmem:[#allocation2 + $0x1828] ss:$40 sps:$4 sm:$0xff]   ;;  %v8781_v62 = vld [vmem:[#allocation2 + $0x12d8] ss:$40 sps:$4 sm:$0xff]   ;;  %v8792_v3 = vld [vmem:[#allocation2 + $0x178c] ss:$40 sps:$4 sm:$0xff]  }
 0x27b   :  { %5728 = vmatpush1.bf16.msra.mxu1 %v8724_v60  ;;  %v5395_v15 = vpop.f32.mrf.mxu0  ;;  %5688 = vmatprep.subr.bf16.mxu0 %v8729_v63  ;;  %v8783_v60 = vld [vmem:[#allocation2 + $0x12dc] ss:$40 sps:$4 sm:$0xff]   ;;  %v8784_v63 = vld [vmem:[#allocation2 + $0x17d8] ss:$40 sps:$4 sm:$0xff]   ;;  %v8787_v9 = vld [vmem:[#allocation2 + $0x1288] ss:$40 sps:$4 sm:$0xff]  }
 0x27c   :  { %5729 = vmatprep.subr.bf16.mxu1 %v8732_v2  ;;  %v5436_v46 = vpop.f32.mrf.mxu1  ;;  %v8789_v2 = vld [vmem:[#allocation2 + $0x128c] ss:$40 sps:$4 sm:$0xff]   ;;  %v8790_v10 = vld [vmem:[#allocation2 + $0x1788] ss:$40 sps:$4 sm:$0xff]   ;;  %v8793_v15 = vld [vmem:[#allocation2 + $0x1238] ss:$40 sps:$4 sm:$0xff]  }
 0x27d   :  { %v8804_v46 = vld [vmem:[#allocation2 + $0x16ec] ss:$40 sps:$4 sm:$0xff]  }
 0x27e   :  { %5689 = vmatpush1.bf16.msra.mxu0 %v8727_v13  ;;  %v8795_v13 = vld [vmem:[#allocation2 + $0x123c] ss:$40 sps:$4 sm:$0xff]  }
 0x27f   :  { %5730 = vmatpush1.bf16.msra.mxu1 %v8730_v14  ;;  %5690 = vmatprep.subr.bf16.mxu0 %v8735_v16  ;;  %v8798_v14 = vld [vmem:[#allocation2 + $0x173c] ss:$40 sps:$4 sm:$0xff]   ;;  %v8796_v16 = vld [vmem:[#allocation2 + $0x1738] ss:$40 sps:$4 sm:$0xff]  }
 0x280   :  { %5731 = vmatprep.subr.bf16.mxu1 %v8738_v17  ;;  %v8801_v17 = vld [vmem:[#allocation2 + $0x11ec] ss:$40 sps:$4 sm:$0xff]  }
 0x282   :  { %5691 = vmatpush1.bf16.msra.mxu0 %v8733_v18  ;;  %v8799_v18 = vld [vmem:[#allocation2 + $0x11e8] ss:$40 sps:$4 sm:$0xff]  }
 0x283   :  { %5732 = vmatpush1.bf16.msra.mxu1 %v8736_v19  ;;  %5692 = vmatprep.subr.bf16.mxu0 %v8741_v21  ;;  %v8802_v19 = vld [vmem:[#allocation2 + $0x16e8] ss:$40 sps:$4 sm:$0xff]   ;;  %v8807_v21 = vld [vmem:[#allocation2 + $0x119c] ss:$40 sps:$4 sm:$0xff]  }
 0x284   :  { %5733 = vmatprep.subr.bf16.mxu1 %v8744_v22  ;;  %v8810_v22 = vld [vmem:[#allocation2 + $0x169c] ss:$40 sps:$4 sm:$0xff]  }
 0x286   :  { %5693 = vmatpush1.bf16.msra.mxu0 %v8739_v24  ;;  %v8805_v24 = vld [vmem:[#allocation2 + $0x1198] ss:$40 sps:$4 sm:$0xff]  }
 0x287   :  { %5734 = vmatpush1.bf16.msra.mxu1 %v8742_v26  ;;  %5694 = vmatprep.subr.bf16.mxu0 %v8747_v28  ;;  %v8808_v26 = vld [vmem:[#allocation2 + $0x1698] ss:$40 sps:$4 sm:$0xff]   ;;  %v8813_v28 = vld [vmem:[#allocation2 + $0x254] ss:$40 sps:$4 sm:$0xff]  }
 0x288   :  { %5735 = vmatprep.subr.bf16.mxu1 %v8750_v29  ;;  %v8816_v29 = vld [vmem:[#allocation2 + $0x754] ss:$40 sps:$4 sm:$0xff]  }
 0x28a   :  { %5695 = vmatpush1.bf16.msra.mxu0 %v8745_v30  ;;  %v8811_v30 = vld [vmem:[#allocation2 + $0x250] ss:$40 sps:$4 sm:$0xff]  }
 0x28b   :  { %5736 = vmatpush1.bf16.msra.mxu1 %v8748_v31  ;;  %5696 = vmatprep.subr.bf16.mxu0 %v8753_v32  ;;  %v8814_v31 = vld [vmem:[#allocation2 + $0x750] ss:$40 sps:$4 sm:$0xff]   ;;  %v8819_v32 = vld [vmem:[#allocation2 + $0x204] ss:$40 sps:$4 sm:$0xff]  }
 0x28c   :  { %5737 = vmatprep.subr.bf16.mxu1 %v8756_v33  ;;  %v8822_v33 = vld [vmem:[#allocation2 + $0x704] ss:$40 sps:$4 sm:$0xff]  }
 0x28e   :  { %5697 = vmatpush1.bf16.msra.mxu0 %v8751_v57 }
 0x28f   :  { %5738 = vmatpush1.bf16.msra.mxu1 %v8754_v35  ;;  %5698 = vmatprep.subr.bf16.mxu0 %v8759_v37 }
 0x290   :  { %5739 = vmatprep.subr.bf16.mxu1 %v8762_v38  ;;  %v8817_v38 = vld [vmem:[#allocation2 + $0x200] ss:$40 sps:$4 sm:$0xff]  }
 0x292   :  { %5699 = vmatpush1.bf16.msra.mxu0 %v8757_v39  ;;  %v8820_v39 = vld [vmem:[#allocation2 + $0x700] ss:$40 sps:$4 sm:$0xff]  }
 0x293   :  { %5740 = vmatpush1.bf16.msra.mxu1 %v8760_v42  ;;  %5700 = vmatprep.subr.bf16.mxu0 %v8765_v44 }
 0x294   :  { %5741 = vmatprep.subr.bf16.mxu1 %v8768_v45  ;;  %v8825_v45 = vld [vmem:[#allocation2 + $0x1b4] ss:$40 sps:$4 sm:$0xff]  }
 0x296   :  { %5701 = vmatpush2.bf16.msra.mxu0 %v8763_v6  ;;  %v8828_v6 = vld [vmem:[#allocation2 + $0x6b4] ss:$40 sps:$4 sm:$0xff]  }
 0x297   :  { %5742 = vmatpush2.bf16.msra.mxu1 %v8766_v47  ;;  %5702 = vmatprep.subr.bf16.mxu0 %v8771_v50 }
 0x298   :  { %5743 = vmatprep.subr.bf16.mxu1 %v8774_v51 }
 0x29a   :  { %5703 = vmatpush2.bf16.msra.mxu0 %v8769_v5 }
 0x29b   :  { %5744 = vmatpush2.bf16.msra.mxu1 %v8772_v54  ;;  %5704 = vmatprep.subr.bf16.mxu0 %v8777_v55  ;;  %v8823_v54 = vld [vmem:[#allocation2 + $0x1b0] ss:$40 sps:$4 sm:$0xff]  }
 0x29c   :  { %5745 = vmatprep.subr.bf16.mxu1 %v8780_v56  ;;  %v8826_v55 = vld [vmem:[#allocation2 + $0x6b0] ss:$40 sps:$4 sm:$0xff]  }
 0x29e   :  { %5705 = vmatpush2.bf16.msra.mxu0 %v8775_v58  ;;  %v8831_v58 = vld [vmem:[#allocation2 + $0x164] ss:$40 sps:$4 sm:$0xff]  }
 0x29f   :  { %5746 = vmatpush2.bf16.msra.mxu1 %v8778_v59  ;;  %5706 = vmatprep.subr.bf16.mxu0 %v8783_v60  ;;  %v8834_v59 = vld [vmem:[#allocation2 + $0x664] ss:$40 sps:$4 sm:$0xff]   ;;  %v8829_v60 = vld [vmem:[#allocation2 + $0x160] ss:$40 sps:$4 sm:$0xff]  }
 0x2a0   :  { %5747 = vmatprep.subr.bf16.mxu1 %v8786_v61  ;;  %v8840_v61 = vld [vmem:[#allocation2 + $0x614] ss:$40 sps:$4 sm:$0xff]  }
 0x2a2   :  { %5707 = vmatpush2.bf16.msra.mxu0 %v8781_v62  ;;  %v8835_v62 = vld [vmem:[#allocation2 + $0x110] ss:$40 sps:$4 sm:$0xff]  }
 0x2a3   :  { %5748 = vmatpush2.bf16.msra.mxu1 %v8784_v63  ;;  %5708 = vmatprep.subr.bf16.mxu0 %v8789_v2  ;;  %v8838_v63 = vld [vmem:[#allocation2 + $0x610] ss:$40 sps:$4 sm:$0xff]   ;;  %v8843_v2 = vld [vmem:[#allocation2 + $0xc4] ss:$40 sps:$4 sm:$0xff]  }
 0x2a4   :  { %5749 = vmatprep.subr.bf16.mxu1 %v8792_v3  ;;  %v8846_v3 = vld [vmem:[#allocation2 + $0x5c4] ss:$40 sps:$4 sm:$0xff]  }
 0x2a6   :  { %5709 = vmatpush2.bf16.msra.mxu0 %v8787_v9  ;;  %v8841_v9 = vld [vmem:[#allocation2 + $0xc0] ss:$40 sps:$4 sm:$0xff]  }
 0x2a7   :  { %5750 = vmatpush2.bf16.msra.mxu1 %v8790_v10  ;;  %5710 = vmatprep.subr.bf16.mxu0 %v8795_v13  ;;  %v8844_v10 = vld [vmem:[#allocation2 + $0x5c0] ss:$40 sps:$4 sm:$0xff]   ;;  %v8849_v13 = vld [vmem:[#allocation2 + $0x74] ss:$40 sps:$4 sm:$0xff]  }
 0x2a8   :  { %5751 = vmatprep.subr.bf16.mxu1 %v8798_v14  ;;  %v8852_v14 = vld [vmem:[#allocation2 + $0x574] ss:$40 sps:$4 sm:$0xff]  }
 0x2aa   :  { %5711 = vmatpush2.bf16.msra.mxu0 %v8793_v15  ;;  %v8847_v15 = vld [vmem:[#allocation2 + $0x70] ss:$40 sps:$4 sm:$0xff]  }
 0x2ab   :  { %5752 = vmatpush2.bf16.msra.mxu1 %v8796_v16  ;;  %5712 = vmatprep.subr.bf16.mxu0 %v8801_v17  ;;  %v8850_v16 = vld [vmem:[#allocation2 + $0x570] ss:$40 sps:$4 sm:$0xff]   ;;  %v8855_v17 = vld [vmem:[#allocation2 + $0x24] ss:$40 sps:$4 sm:$0xff]  }
 0x2ac   :  { %5753 = vmatprep.subr.bf16.mxu1 %v8804_v46  ;;  %v8858_v46 = vld [vmem:[#allocation2 + $0x524] ss:$40 sps:$4 sm:$0xff]  }
 0x2ae   :  { %5713 = vmatpush2.bf16.msra.mxu0 %v8799_v18  ;;  %v8853_v18 = vld [vmem:[#allocation2 + $0x20] ss:$40 sps:$4 sm:$0xff]  }
 0x2af   :  { %5754 = vmatpush2.bf16.msra.mxu1 %v8802_v19  ;;  %5714 = vmatprep.subr.bf16.mxu0 %v8807_v21  ;;  %v8856_v19 = vld [vmem:[#allocation2 + $0x520] ss:$40 sps:$4 sm:$0xff]   ;;  %v8861_v21 = vld [vmem:[#allocation2 + $0x4d4] ss:$40 sps:$4 sm:$0xff]  }
 0x2b0   :  { %5755 = vmatprep.subr.bf16.mxu1 %v8810_v22  ;;  %v8864_v22 = vld [vmem:[#allocation2 + $0x9d4] ss:$40 sps:$4 sm:$0xff]  }
 0x2b2   :  { %5715 = vmatpush2.bf16.msra.mxu0 %v8805_v24  ;;  %v8859_v24 = vld [vmem:[#allocation2 + $0x4d0] ss:$40 sps:$4 sm:$0xff]  }
 0x2b3   :  { %5756 = vmatpush2.bf16.msra.mxu1 %v8808_v26  ;;  %5766 = vmatprep.subr.bf16.mxu0 %v8813_v28  ;;  %v8862_v26 = vld [vmem:[#allocation2 + $0x9d0] ss:$40 sps:$4 sm:$0xff]   ;;  %v8867_v28 = vld [vmem:[#allocation2 + $0x484] ss:$40 sps:$4 sm:$0xff]  }
 0x2b4   :  { %5807 = vmatprep.subr.bf16.mxu1 %v8816_v29  ;;  %v8870_v29 = vld [vmem:[#allocation2 + $0x984] ss:$40 sps:$4 sm:$0xff]  }
 0x2b5   :  { %v5472_v57 = vpop.f32.mrf.mxu0  ;;  %5717 = vmatmul.mubr.bf16.vlgmr.msra.gmra.mxu0 %v9316_v23 }
 0x2b6   :  { %5758 = vmatmul.mubr.bf16.vlgmr.msra.gmra.mxu1 %v9330_v34  ;;  %v5513_v35 = vpop.f32.mrf.mxu1  ;;  %v5473_v37 = vadd.f32 %v5472_v57, %v9406_v4  ;;  %5767 = vmatpush1.bf16.msra.mxu0 %v8811_v30  ;;  %v8865_v30 = vld [vmem:[#allocation2 + $0x480] ss:$40 sps:$4 sm:$0xff]   ;;  %v8871_v57 = vld [vmem:[#allocation2 + $0x430] ss:$40 sps:$4 sm:$0xff]  }
 0x2b7   :  { %5808 = vmatpush1.bf16.msra.mxu1 %v8814_v31  ;;  %v5474_v42 = vpop.f32.mrf.mxu0  ;;  %5768 = vmatprep.subr.bf16.mxu0 %v8819_v32  ;;  %v8868_v31 = vld [vmem:[#allocation2 + $0x980] ss:$40 sps:$4 sm:$0xff]   ;;  %v8873_v32 = vld [vmem:[#allocation2 + $0x434] ss:$40 sps:$4 sm:$0xff]  }
 0x2b8   :  { %v5515_v44 = vpop.f32.mrf.mxu1  ;;  %5809 = vmatprep.subr.bf16.mxu1 %v8822_v33  ;;  %v5475_v47 = vadd.f32 %v5474_v42, %v9410_v41  ;;  %v9416_v50 = vadd.f32 %v5513_v35, %v5473_v37  ;;  %5798 = vmatprep.mubr.bf16.mxu0 %v9275_v48  ;;  %v8832_v48 = vld [vmem:[#allocation2 + $0x660] ss:$40 sps:$4 sm:$0xff]   ;;  %v8876_v33 = vld [vmem:[#allocation2 + $0x934] ss:$40 sps:$4 sm:$0xff]   ;;  %v8874_v35 = vld [vmem:[#allocation2 + $0x930] ss:$40 sps:$4 sm:$0xff]  }
 0x2b9   :  { %5839 = vmatprep.mubr.bf16.mxu1 %v9280_v52  ;;  %v5476_v51 = vpop.f32.mrf.mxu0  ;;  %v8837_v52 = vld [vmem:[#allocation2 + $0x114] ss:$40 sps:$4 sm:$0xff]   ;;  %v8879_v37 = vld [vmem:[#allocation2 + $0x3e4] ss:$40 sps:$4 sm:$0xff]   ;;  %v8880_v42 = vld [vmem:[#allocation2 + $0x8e0] ss:$40 sps:$4 sm:$0xff]  }
 0x2ba   :  { %v5517_v4 = vpop.f32.mrf.mxu1  ;;  %v9420_v5 = vadd.f32 %v5515_v44, %v5475_v47  ;;  %5769 = vmatpush1.bf16.msra.mxu0 %v8817_v38  ;;  %v8882_v38 = vld [vmem:[#allocation2 + $0x8e4] ss:$40 sps:$4 sm:$0xff]   ;;  %v8885_v44 = vld [vmem:[#allocation2 + $0x394] ss:$40 sps:$4 sm:$0xff]   ;;  %v8886_v47 = vld [vmem:[#allocation2 + $0x890] ss:$40 sps:$4 sm:$0xff]  }
 0x2bb   :  { %5810 = vmatpush1.bf16.msra.mxu1 %v8820_v39  ;;  %v5477_v56 = vpop.f32.mrf.mxu0  ;;  %5770 = vmatprep.subr.bf16.mxu0 %v8825_v45  ;;  %v8877_v39 = vld [vmem:[#allocation2 + $0x3e0] ss:$40 sps:$4 sm:$0xff]   ;;  %v8888_v45 = vld [vmem:[#allocation2 + $0x894] ss:$40 sps:$4 sm:$0xff]   ;;  %v8891_v51 = vld [vmem:[#allocation2 + $0x344] ss:$40 sps:$4 sm:$0xff]  }
 0x2bc   :  { %5811 = vmatprep.subr.bf16.mxu1 %v8828_v6  ;;  %v5518_v41 = vpop.f32.mrf.mxu1  ;;  %v8883_v6 = vld [vmem:[#allocation2 + $0x390] ss:$40 sps:$4 sm:$0xff]   ;;  %v8894_v4 = vld [vmem:[#allocation2 + $0x844] ss:$40 sps:$4 sm:$0xff]   ;;  %v8897_v56 = vld [vmem:[#allocation2 + $0x2f4] ss:$40 sps:$4 sm:$0xff]  }
 0x2bd   :  { %v8898_v41 = vld [vmem:[#allocation2 + $0x7f0] ss:$40 sps:$4 sm:$0xff]  }
 0x2be   :  { %5771 = vmatpush1.bf16.msra.mxu0 %v8823_v54  ;;  %v8889_v54 = vld [vmem:[#allocation2 + $0x340] ss:$40 sps:$4 sm:$0xff]  }
 0x2bf   :  { %5812 = vmatpush1.bf16.msra.mxu1 %v8826_v55  ;;  %5772 = vmatprep.subr.bf16.mxu0 %v8831_v58  ;;  %v8892_v55 = vld [vmem:[#allocation2 + $0x840] ss:$40 sps:$4 sm:$0xff]   ;;  %v8900_v58 = vld [vmem:[#allocation2 + $0x7f4] ss:$40 sps:$4 sm:$0xff]  }
 0x2c0   :  { %5813 = vmatprep.subr.bf16.mxu1 %v8834_v59  ;;  %v8895_v59 = vld [vmem:[#allocation2 + $0x2f0] ss:$40 sps:$4 sm:$0xff]  }
 0x2c2   :  { %5773 = vmatpush1.bf16.msra.mxu0 %v8829_v60  ;;  %v8903_v60 = vld [vmem:[#allocation2 + $0x2a4] ss:$40 sps:$4 sm:$0xff]  }
 0x2c3   :  { %5814 = vmatpush1.bf16.msra.mxu1 %v8832_v48  ;;  %5774 = vmatprep.subr.bf16.mxu0 %v8837_v52  ;;  %v8906_v48 = vld [vmem:[#allocation2 + $0x7a4] ss:$40 sps:$4 sm:$0xff]   ;;  %v8901_v52 = vld [vmem:[#allocation2 + $0x2a0] ss:$40 sps:$4 sm:$0xff]  }
 0x2c4   :  { %5815 = vmatprep.subr.bf16.mxu1 %v8840_v61  ;;  %v8904_v61 = vld [vmem:[#allocation2 + $0x7a0] ss:$40 sps:$4 sm:$0xff]  }
 0x2c6   :  { %5775 = vmatpush1.bf16.msra.mxu0 %v8835_v62  ;;  %v8909_v62 = vld [vmem:[#allocation2 + $0xc54] ss:$40 sps:$4 sm:$0xff]  }
 0x2c7   :  { %5816 = vmatpush1.bf16.msra.mxu1 %v8838_v63  ;;  %5776 = vmatprep.subr.bf16.mxu0 %v8843_v2  ;;  %v8912_v63 = vld [vmem:[#allocation2 + $0x1154] ss:$40 sps:$4 sm:$0xff]   ;;  %v8907_v2 = vld [vmem:[#allocation2 + $0xc50] ss:$40 sps:$4 sm:$0xff]  }
 0x2c8   :  { %5817 = vmatprep.subr.bf16.mxu1 %v8846_v3  ;;  %v8910_v3 = vld [vmem:[#allocation2 + $0x1150] ss:$40 sps:$4 sm:$0xff]  }
 0x2ca   :  { %5777 = vmatpush1.bf16.msra.mxu0 %v8841_v9  ;;  %v8915_v9 = vld [vmem:[#allocation2 + $0xc04] ss:$40 sps:$4 sm:$0xff]  }
 0x2cb   :  { %5818 = vmatpush1.bf16.msra.mxu1 %v8844_v10  ;;  %5778 = vmatprep.subr.bf16.mxu0 %v8849_v13  ;;  %v8918_v10 = vld [vmem:[#allocation2 + $0x1104] ss:$40 sps:$4 sm:$0xff]  }
 0x2cc   :  { %5819 = vmatprep.subr.bf16.mxu1 %v8852_v14 }
 0x2ce   :  { %5779 = vmatpush1.bf16.msra.mxu0 %v8847_v15 }
 0x2cf   :  { %5820 = vmatpush1.bf16.msra.mxu1 %v8850_v16  ;;  %5780 = vmatprep.subr.bf16.mxu0 %v8855_v17  ;;  %v8913_v16 = vld [vmem:[#allocation2 + $0xc00] ss:$40 sps:$4 sm:$0xff]  }
 0x2d0   :  { %5821 = vmatprep.subr.bf16.mxu1 %v8858_v46  ;;  %v8916_v17 = vld [vmem:[#allocation2 + $0x1100] ss:$40 sps:$4 sm:$0xff]  }
 0x2d2   :  { %5781 = vmatpush1.bf16.msra.mxu0 %v8853_v18  ;;  %v8921_v18 = vld [vmem:[#allocation2 + $0xbb4] ss:$40 sps:$4 sm:$0xff]  }
 0x2d3   :  { %5822 = vmatpush1.bf16.msra.mxu1 %v8856_v19  ;;  %5782 = vmatprep.subr.bf16.mxu0 %v8861_v21  ;;  %v8924_v19 = vld [vmem:[#allocation2 + $0x10b4] ss:$40 sps:$4 sm:$0xff]  }
 0x2d4   :  { %5823 = vmatprep.subr.bf16.mxu1 %v8864_v22  ;;  %v8919_v22 = vld [vmem:[#allocation2 + $0xbb0] ss:$40 sps:$4 sm:$0xff]  }
 0x2d6   :  { %5783 = vmatpush2.bf16.msra.mxu0 %v8859_v24  ;;  %v8922_v24 = vld [vmem:[#allocation2 + $0x10b0] ss:$40 sps:$4 sm:$0xff]  }
 0x2d7   :  { %5824 = vmatpush2.bf16.msra.mxu1 %v8862_v26  ;;  %5784 = vmatprep.subr.bf16.mxu0 %v8867_v28  ;;  %v8927_v28 = vld [vmem:[#allocation2 + $0xb64] ss:$40 sps:$4 sm:$0xff]  }
 0x2d8   :  { %5825 = vmatprep.subr.bf16.mxu1 %v8870_v29  ;;  %v8930_v29 = vld [vmem:[#allocation2 + $0x1064] ss:$40 sps:$4 sm:$0xff]  }
 0x2da   :  { %5785 = vmatpush2.bf16.msra.mxu0 %v8865_v30 }
 0x2db   :  { %5826 = vmatpush2.bf16.msra.mxu1 %v8868_v31  ;;  %5786 = vmatprep.subr.bf16.mxu0 %v8873_v32  ;;  %v8928_v31 = vld [vmem:[#allocation2 + $0x1060] ss:$40 sps:$4 sm:$0xff]   ;;  %v8931_v32 = vld [vmem:[#allocation2 + $0xb10] ss:$40 sps:$4 sm:$0xff]  }
 0x2dc   :  { %5827 = vmatprep.subr.bf16.mxu1 %v8876_v33  ;;  %v8934_v33 = vld [vmem:[#allocation2 + $0x1010] ss:$40 sps:$4 sm:$0xff]  }
 0x2de   :  { %5787 = vmatpush2.bf16.msra.mxu0 %v8871_v57  ;;  %v8939_v57 = vld [vmem:[#allocation2 + $0xac4] ss:$40 sps:$4 sm:$0xff]  }
 0x2df   :  { %5828 = vmatpush2.bf16.msra.mxu1 %v8874_v35  ;;  %5788 = vmatprep.subr.bf16.mxu0 %v8879_v37  ;;  %v8942_v35 = vld [vmem:[#allocation2 + $0xfc4] ss:$40 sps:$4 sm:$0xff]   ;;  %v8937_v37 = vld [vmem:[#allocation2 + $0xac0] ss:$40 sps:$4 sm:$0xff]  }
 0x2e0   :  { %5829 = vmatprep.subr.bf16.mxu1 %v8882_v38  ;;  %v8940_v38 = vld [vmem:[#allocation2 + $0xfc0] ss:$40 sps:$4 sm:$0xff]  }
 0x2e2   :  { %5789 = vmatpush2.bf16.msra.mxu0 %v8877_v39  ;;  %v8945_v39 = vld [vmem:[#allocation2 + $0xa74] ss:$40 sps:$4 sm:$0xff]  }
 0x2e3   :  { %5830 = vmatpush2.bf16.msra.mxu1 %v8880_v42  ;;  %5790 = vmatprep.subr.bf16.mxu0 %v8885_v44  ;;  %v8948_v42 = vld [vmem:[#allocation2 + $0xf74] ss:$40 sps:$4 sm:$0xff]   ;;  %v8943_v44 = vld [vmem:[#allocation2 + $0xa70] ss:$40 sps:$4 sm:$0xff]  }
 0x2e4   :  { %5831 = vmatprep.subr.bf16.mxu1 %v8888_v45  ;;  %v8946_v45 = vld [vmem:[#allocation2 + $0xf70] ss:$40 sps:$4 sm:$0xff]  }
 0x2e6   :  { %5791 = vmatpush2.bf16.msra.mxu0 %v8883_v6  ;;  %v8951_v6 = vld [vmem:[#allocation2 + $0xa24] ss:$40 sps:$4 sm:$0xff]  }
 0x2e7   :  { %5832 = vmatpush2.bf16.msra.mxu1 %v8886_v47  ;;  %5792 = vmatprep.subr.bf16.mxu0 %v8891_v51  ;;  %v8954_v47 = vld [vmem:[#allocation2 + $0xf24] ss:$40 sps:$4 sm:$0xff]   ;;  %v8949_v51 = vld [vmem:[#allocation2 + $0xa20] ss:$40 sps:$4 sm:$0xff]  }
 0x2e8   :  { %5833 = vmatprep.subr.bf16.mxu1 %v8894_v4  ;;  %v8952_v4 = vld [vmem:[#allocation2 + $0xf20] ss:$40 sps:$4 sm:$0xff]  }
 0x2ea   :  { %5793 = vmatpush2.bf16.msra.mxu0 %v8889_v54  ;;  %v8957_v54 = vld [vmem:[#allocation2 + $0xed4] ss:$40 sps:$4 sm:$0xff]  }
 0x2eb   :  { %5834 = vmatpush2.bf16.msra.mxu1 %v8892_v55  ;;  %5794 = vmatprep.subr.bf16.mxu0 %v8897_v56  ;;  %v8960_v55 = vld [vmem:[#allocation2 + $0x13d4] ss:$40 sps:$4 sm:$0xff]   ;;  %v8955_v56 = vld [vmem:[#allocation2 + $0xed0] ss:$40 sps:$4 sm:$0xff]  }
 0x2ec   :  { %5835 = vmatprep.subr.bf16.mxu1 %v8900_v58  ;;  %v8958_v58 = vld [vmem:[#allocation2 + $0x13d0] ss:$40 sps:$4 sm:$0xff]  }
 0x2ee   :  { %5795 = vmatpush2.bf16.msra.mxu0 %v8895_v59  ;;  %v8963_v59 = vld [vmem:[#allocation2 + $0xe84] ss:$40 sps:$4 sm:$0xff]  }
 0x2ef   :  { %5836 = vmatpush2.bf16.msra.mxu1 %v8898_v41  ;;  %5796 = vmatprep.subr.bf16.mxu0 %v8903_v60  ;;  %v8966_v41 = vld [vmem:[#allocation2 + $0x1384] ss:$40 sps:$4 sm:$0xff]   ;;  %v8961_v60 = vld [vmem:[#allocation2 + $0xe80] ss:$40 sps:$4 sm:$0xff]  }
 0x2f0   :  { %5837 = vmatprep.subr.bf16.mxu1 %v8906_v48  ;;  %v8964_v48 = vld [vmem:[#allocation2 + $0x1380] ss:$40 sps:$4 sm:$0xff]  }
 0x2f2   :  { %5797 = vmatpush2.bf16.msra.mxu0 %v8901_v52  ;;  %v8969_v52 = vld [vmem:[#allocation2 + $0xe34] ss:$40 sps:$4 sm:$0xff]  }
 0x2f3   :  { %5838 = vmatpush2.bf16.msra.mxu1 %v8904_v61  ;;  %5848 = vmatprep.subr.bf16.mxu0 %v8909_v62  ;;  %v8972_v61 = vld [vmem:[#allocation2 + $0x1334] ss:$40 sps:$4 sm:$0xff]   ;;  %v8967_v62 = vld [vmem:[#allocation2 + $0xe30] ss:$40 sps:$4 sm:$0xff]  }
 0x2f4   :  { %5889 = vmatprep.subr.bf16.mxu1 %v8912_v63  ;;  %v8970_v63 = vld [vmem:[#allocation2 + $0x1330] ss:$40 sps:$4 sm:$0xff]  }
 0x2f5   :  { %v5554_v13 = vpop.f32.mrf.mxu0  ;;  %5799 = vmatmul.mubr.bf16.vlgmr.msra.gmra.mxu0 %v9290_v8 }
 0x2f6   :  { %5840 = vmatmul.mubr.bf16.vlgmr.msra.gmra.mxu1 %v9292_v11  ;;  %v9424_v14 = vpop.f32.mrf.mxu1  ;;  %v9427_v15 = vadd.f32 %v5554_v13, %v9416_v50  ;;  %5849 = vmatpush1.bf16.msra.mxu0 %v8907_v2  ;;  %v8975_v2 = vld [vmem:[#allocation2 + $0xde4] ss:$40 sps:$4 sm:$0xff]   ;;  %v8981_v13 = vld [vmem:[#allocation2 + $0xd94] ss:$40 sps:$4 sm:$0xff]  }
 0x2f7   :  { %5890 = vmatpush1.bf16.msra.mxu1 %v8910_v3  ;;  %v5556_v46 = vpop.f32.mrf.mxu0  ;;  %5850 = vmatprep.subr.bf16.mxu0 %v8915_v9  ;;  %v8978_v3 = vld [vmem:[#allocation2 + $0x12e4] ss:$40 sps:$4 sm:$0xff]   ;;  %v8973_v9 = vld [vmem:[#allocation2 + $0xde0] ss:$40 sps:$4 sm:$0xff]  }
 0x2f8   :  { %5891 = vmatprep.subr.bf16.mxu1 %v8918_v10  ;;  %v9429_v21 = vpop.f32.mrf.mxu1  ;;  %v9432_v8 = vadd.f32 %v5556_v46, %v9420_v5  ;;  %5880 = vmatprep.mubr.bf16.mxu0 %v9299_v36  ;;  %v8925_v5 = vld [vmem:[#allocation2 + $0xb60] ss:$40 sps:$4 sm:$0xff]   ;;  %v8933_v36 = vld [vmem:[#allocation2 + $0xb14] ss:$40 sps:$4 sm:$0xff]   ;;  %v8982_v46 = vld [vmem:[#allocation2 + $0x1290] ss:$40 sps:$4 sm:$0xff]  }
 0x2f9   :  { %5921 = vmatprep.mubr.bf16.mxu1 %v9304_v40  ;;  %v5558_v11 = vpop.f32.mrf.mxu0  ;;  %v8936_v40 = vld [vmem:[#allocation2 + $0x1014] ss:$40 sps:$4 sm:$0xff]   ;;  %v8976_v10 = vld [vmem:[#allocation2 + $0x12e0] ss:$40 sps:$4 sm:$0xff]  }
 0x2fa   :  { %v5599_v50 = vpop.f32.mrf.mxu1  ;;  %5851 = vmatpush1.bf16.msra.mxu0 %v8913_v16  ;;  %v8984_v16 = vld [vmem:[#allocation2 + $0x1294] ss:$40 sps:$4 sm:$0xff]   ;;  %v8985_v11 = vld [vmem:[#allocation2 + $0xd40] ss:$40 sps:$4 sm:$0xff]  }
 0x2fb   :  { %5892 = vmatpush1.bf16.msra.mxu1 %v8916_v17  ;;  %v5559_v26 = vpop.f32.mrf.mxu0  ;;  %5852 = vmatprep.subr.bf16.mxu0 %v8921_v18  ;;  %v8979_v17 = vld [vmem:[#allocation2 + $0xd90] ss:$40 sps:$4 sm:$0xff]   ;;  %v8987_v18 = vld [vmem:[#allocation2 + $0xd44] ss:$40 sps:$4 sm:$0xff]   ;;  %v8988_v50 = vld [vmem:[#allocation2 + $0x1240] ss:$40 sps:$4 sm:$0xff]  }
 0x2fc   :  { %5893 = vmatprep.subr.bf16.mxu1 %v8924_v19  ;;  %v5600_v30 = vpop.f32.mrf.mxu1  ;;  %v8990_v19 = vld [vmem:[#allocation2 + $0x1244] ss:$40 sps:$4 sm:$0xff]   ;;  %v8991_v26 = vld [vmem:[#allocation2 + $0xcf0] ss:$40 sps:$4 sm:$0xff]  }
 0x2fd   :  { %v8999_v30 = vld [vmem:[#allocation2 + $0xca4] ss:$40 sps:$4 sm:$0xff]  }
 0x2fe   :  { %5853 = vmatpush1.bf16.msra.mxu0 %v8919_v22  ;;  %v8993_v22 = vld [vmem:[#allocation2 + $0xcf4] ss:$40 sps:$4 sm:$0xff]  }
 0x2ff   :  { %5894 = vmatpush1.bf16.msra.mxu1 %v8922_v24  ;;  %5854 = vmatprep.subr.bf16.mxu0 %v8927_v28  ;;  %v8996_v24 = vld [vmem:[#allocation2 + $0x11f4] ss:$40 sps:$4 sm:$0xff]   ;;  %v8994_v28 = vld [vmem:[#allocation2 + $0x11f0] ss:$40 sps:$4 sm:$0xff]  }
 0x300   :  { %5895 = vmatprep.subr.bf16.mxu1 %v8930_v29  ;;  %v922_v29 = vsub.s32 6, %v9336_v43 }
 0x302   :  { %5855 = vmatpush1.bf16.msra.mxu0 %v8925_v5  ;;  %v9002_v5 = vld [vmem:[#allocation2 + $0x11a4] ss:$40 sps:$4 sm:$0xff]  }
 0x303   :  { %5896 = vmatpush1.bf16.msra.mxu1 %v8928_v31  ;;  %5856 = vmatprep.subr.bf16.mxu0 %v8933_v36  ;;  %v923_v31 = vrot.slane %v9400_v0, %v922_v29  ;;  %v8997_v36 = vld [vmem:[#allocation2 + $0xca0] ss:$40 sps:$4 sm:$0xff]   ;;  %v5974_v29 = vmax.f32 %v9396_v12, 0.0  ;;  %v9053_v12 = vld [vmem:[#allocation2 + $0x1830] ss:$40 sps:$4 sm:$0xff]  }
 0x304   :  { %5897 = vmatprep.subr.bf16.mxu1 %v8936_v40  ;;  %v9000_v40 = vld [vmem:[#allocation2 + $0x11a0] ss:$40 sps:$4 sm:$0xff]  }
 0x305   :  { %v9011_v0 = vld [vmem:[#allocation6 + $0x70] sm:$0xff]  }
 0x306   :  { %5857 = vmatpush1.bf16.msra.mxu0 %v8931_v32  ;;  %v9005_v32 = vld [vmem:[#allocation2 + $0x1654] ss:$40 sps:$4 sm:$0xff]  }
 0x307   :  { %5898 = vmatpush1.bf16.msra.mxu1 %v8934_v33  ;;  %5858 = vmatprep.subr.bf16.mxu0 %v8939_v57  ;;  %v9006_v33 = vld [vmem:[#allocation6 + $0x78] sm:$0xff]   ;;  %v5972_v57 = vmax.f32 %v9372_v7, 0.0 }
 0x308   :  { %5899 = vmatprep.subr.bf16.mxu1 %v8942_v35  ;;  %v5596_v35 = vadd.f32 %v9424_v14, %v923_v31  ;;  %v9008_v7 = vld [vmem:[#allocation2 + $0x1600] ss:$40 sps:$4 sm:$0xff]  }
 0x309   :  { %v9012_v14 = vld [vmem:[#allocation6 + $0x30] sm:$0xff]  }
 0x30a   :  { %5859 = vmatpush1.bf16.msra.mxu0 %v8937_v37  ;;  %v9003_v37 = vld [vmem:[#allocation2 + $0x1650] ss:$40 sps:$4 sm:$0xff]  }
 0x30b   :  { %5900 = vmatpush1.bf16.msra.mxu1 %v8940_v38  ;;  %5860 = vmatprep.subr.bf16.mxu0 %v8945_v39  ;;  %v9007_v38 = vld [vmem:[#allocation6 + $0x38] sm:$0xff]  }
 0x30c   :  { %5901 = vmatprep.subr.bf16.mxu1 %v8948_v42  ;;  %v9010_v39 = vld [vmem:[#allocation2 + $0x1604] ss:$40 sps:$4 sm:$0xff]   ;;  %v5982_v42 = vpack.c.bf16 %v5972_v57, %v5972_v57  ;;  %v9055_v57 = vld [vmem:[#allocation2 + $0x1834] ss:$40 sps:$4 sm:$0xff]  }
 0x30e   :  { %5861 = vmatpush1.bf16.msra.mxu0 %v8943_v44 }
 0x30f   :  { %5902 = vmatpush1.bf16.msra.mxu1 %v8946_v45  ;;  %5862 = vmatprep.subr.bf16.mxu0 %v8951_v6 }
 0x310   :  { %5903 = vmatprep.subr.bf16.mxu1 %v8954_v47 }
 0x312   :  { %5863 = vmatpush1.bf16.msra.mxu0 %v8949_v51 }
 0x313   :  { %5904 = vmatpush1.bf16.msra.mxu1 %v8952_v4  ;;  %5864 = vmatprep.subr.bf16.mxu0 %v8957_v54  ;;  %v9015_v4 = vld [vmem:[#allocation2 + $0x15b4] ss:$40 sps:$4 sm:$0xff]  }
 0x314   :  { %5905 = vmatprep.subr.bf16.mxu1 %v8960_v55  ;;  %v9016_v54 = vld [vmem:[#allocation6 + $0x68] sm:$0xff]  }
 0x316   :  { %5865 = vmatpush2.bf16.msra.mxu0 %v8955_v56  ;;  %v9013_v56 = vld [vmem:[#allocation2 + $0x15b0] ss:$40 sps:$4 sm:$0xff]  }
 0x317   :  { %5906 = vmatpush2.bf16.msra.mxu1 %v8958_v58  ;;  %5866 = vmatprep.subr.bf16.mxu0 %v8963_v59  ;;  %v9017_v58 = vld [vmem:[#allocation6 + $0x28] sm:$0xff]  }
 0x318   :  { %5907 = vmatprep.subr.bf16.mxu1 %v8966_v41  ;;  %v9020_v41 = vld [vmem:[#allocation2 + $0x1564] ss:$40 sps:$4 sm:$0xff]  }
 0x31a   :  { %5867 = vmatpush2.bf16.msra.mxu0 %v8961_v60  ;;  %v9021_v60 = vld [vmem:[#allocation6 + $0x60] sm:$0xff]  }
 0x31b   :  { %5908 = vmatpush2.bf16.msra.mxu1 %v8964_v48  ;;  %5868 = vmatprep.subr.bf16.mxu0 %v8969_v52  ;;  %v9018_v52 = vld [vmem:[#allocation2 + $0x1560] ss:$40 sps:$4 sm:$0xff]  }
 0x31c   :  { %5909 = vmatprep.subr.bf16.mxu1 %v8972_v61  ;;  %v9022_v61 = vld [vmem:[#allocation6 + $0x20] sm:$0xff]  }
 0x31e   :  { %5869 = vmatpush2.bf16.msra.mxu0 %v8967_v62  ;;  %v9025_v62 = vld [vmem:[#allocation2 + $0x1514] ss:$40 sps:$4 sm:$0xff]  }
 0x31f   :  { %5910 = vmatpush2.bf16.msra.mxu1 %v8970_v63  ;;  %5870 = vmatprep.subr.bf16.mxu0 %v8975_v2  ;;  %v9023_v63 = vld [vmem:[#allocation2 + $0x1510] ss:$40 sps:$4 sm:$0xff]   ;;  %v9027_v2 = vld [vmem:[#allocation6 + $0x18] sm:$0xff]  }
 0x320   :  { %5911 = vmatprep.subr.bf16.mxu1 %v8978_v3  ;;  %v9030_v3 = vld [vmem:[#allocation2 + $0x14c4] ss:$40 sps:$4 sm:$0xff]  }
 0x322   :  { %5871 = vmatpush2.bf16.msra.mxu0 %v8973_v9  ;;  %v9031_v9 = vld [vmem:[#allocation6 + $0x50] sm:$0xff]  }
 0x323   :  { %5912 = vmatpush2.bf16.msra.mxu1 %v8976_v10  ;;  %5872 = vmatprep.subr.bf16.mxu0 %v8981_v13  ;;  %v9028_v10 = vld [vmem:[#allocation2 + $0x14c0] ss:$40 sps:$4 sm:$0xff]  }
 0x324   :  { %5913 = vmatprep.subr.bf16.mxu1 %v8984_v16  ;;  %v9032_v13 = vld [vmem:[#allocation6 + $0x10] sm:$0xff]  }
 0x325   :  { %v9035_v16 = vld [vmem:[#allocation2 + $0x1474] ss:$40 sps:$4 sm:$0xff]  }
 0x326   :  { %5873 = vmatpush2.bf16.msra.mxu0 %v8979_v17  ;;  %v9036_v17 = vld [vmem:[#allocation6 + $0x48] sm:$0xff]  }
 0x327   :  { %5914 = vmatpush2.bf16.msra.mxu1 %v8982_v46  ;;  %5874 = vmatprep.subr.bf16.mxu0 %v8987_v18  ;;  %v9033_v46 = vld [vmem:[#allocation2 + $0x1470] ss:$40 sps:$4 sm:$0xff]  }
 0x328   :  { %5915 = vmatprep.subr.bf16.mxu1 %v8990_v19  ;;  %v9037_v18 = vld [vmem:[#allocation6 + $0x8] sm:$0xff]   ;;  %v9040_v19 = vld [vmem:[#allocation2 + $0x1424] ss:$40 sps:$4 sm:$0xff]  }
 0x32a   :  { %5875 = vmatpush2.bf16.msra.mxu0 %v8985_v11  ;;  %v9041_v11 = vld [vmem:[#allocation6 + $0x40] sm:$0xff]  }
 0x32b   :  { %5916 = vmatpush2.bf16.msra.mxu1 %v8988_v50  ;;  %5876 = vmatprep.subr.bf16.mxu0 %v8993_v22  ;;  %v9038_v50 = vld [vmem:[#allocation2 + $0x1420] ss:$40 sps:$4 sm:$0xff]  }
 0x32c   :  { %5917 = vmatprep.subr.bf16.mxu1 %v8996_v24  ;;  %v9042_v22 = vld [vmem:[#allocation6] sm:$0xff]   ;;  %v5971_v24 = vmax.f32 %v9367_v1, 0.0 }
 0x32d   :  { %v9048_v1 = vld [vmem:[#allocation2 + $0x1880] ss:$40 sps:$4 sm:$0xff]  }
 0x32e   :  { %5877 = vmatpush2.bf16.msra.mxu0 %v8991_v26  ;;  %v9045_v26 = vld [vmem:[#allocation2 + $0x18d4] ss:$40 sps:$4 sm:$0xff]   ;;  %v5981_v31 = vpack.c.bf16 %v5971_v24, %v5971_v24 }
 0x32f   :  { %5918 = vmatpush2.bf16.msra.mxu1 %v8994_v28  ;;  %5878 = vmatprep.subr.bf16.mxu0 %v8999_v30  ;;  %v9046_v28 = vld [vmem:[#allocation6 + $0xf8] sm:$0xff]   ;;  %v9043_v30 = vld [vmem:[#allocation2 + $0x18d0] ss:$40 sps:$4 sm:$0xff]  }
 0x330   :  { %5919 = vmatprep.subr.bf16.mxu1 %v9002_v5  ;;  %v9047_v5 = vld [vmem:[#allocation6 + $0xb8] sm:$0xff]   ;;  %v9090_v24 = vld [vmem:[#allocation6 + $0x1b0] sm:$0xff]  }
 0x332   :  { %5879 = vmatpush2.bf16.msra.mxu0 %v8997_v36  ;;  %v9050_v36 = vld [vmem:[#allocation2 + $0x1884] ss:$40 sps:$4 sm:$0xff]  }
 0x333   :  { %5920 = vmatpush2.bf16.msra.mxu1 %v9000_v40  ;;  %5930 = vmatprep.subr.bf16.mxu0 %v9005_v32  ;;  %v9051_v40 = vld [vmem:[#allocation6 + $0xf0] sm:$0xff]   ;;  %v5984_v32 = vpack.c.bf16 %v5974_v29, %v5974_v29  ;;  %v9092_v29 = vld [vmem:[#allocation6 + $0x1e8] sm:$0xff]  }
 0x334   :  { %7733 = vmatprep.subr.bf16.mxu1 %v9006_v33  ;;  %v9052_v33 = vld [vmem:[#allocation6 + $0xb0] sm:$0xff]  }
 0x335   :  { %v5636_v44 = vpop.f32.mrf.mxu0  ;;  %5881 = vmatmul.mubr.bf16.vlgmr.msra.gmra.mxu0 %v9314_v20 }
 0x336   :  { %5922 = vmatmul.mubr.bf16.vlgmr.msra.gmra.mxu1 %v9316_v23  ;;  %v5677_v45 = vpop.f32.mrf.mxu1  ;;  %v5637_v6 = vadd.f32 %v5636_v44, %v5596_v35  ;;  %5931 = vmatpush1.bf16.msra.mxu0 %v9003_v37  ;;  %v9056_v35 = vld [vmem:[#allocation6 + $0xe8] sm:$0xff]  }
 0x337   :  { %7734 = vmatpush3.bf16.msra.mxu1 %v9007_v38  ;;  %6670 = vmatprep.mubr.bf16.mxu1 %v5982_v42  ;;  %v9442_v47 = vpop.f32.mrf.mxu0  ;;  %v9057_v37 = vld [vmem:[#allocation6 + $0xa8] sm:$0xff]   ;;  %v9060_v38 = vld [vmem:[#allocation2 + $0x17e4] ss:$40 sps:$4 sm:$0xff]  }
 0x338   :  { %v9444_v51 = vpop.f32.mrf.mxu1  ;;  %5932 = vmatprep.subr.bf16.mxu0 %v9010_v39  ;;  %v9446_v55 = vadd.f32 %v5677_v45, %v5637_v6  ;;  %7735 = vmatprep.subr.bf16.mxu1 %v9011_v0  ;;  %v9061_v39 = vld [vmem:[#allocation6 + $0xe0] sm:$0xff]   ;;  %v9065_v44 = vld [vmem:[#allocation2 + $0x1794] ss:$40 sps:$4 sm:$0xff]   ;;  %v9066_v45 = vld [vmem:[#allocation6 + $0xd8] sm:$0xff]  }
 0x339   :  { %5962 = vmatprep.mubr.bf16.mxu0 %v9323_v27  ;;  %v5640_v20 = vpop.f32.mrf.mxu0  ;;  %v9026_v27 = vld [vmem:[#allocation6 + $0x58] sm:$0xff]   ;;  %v9062_v42 = vld [vmem:[#allocation6 + $0xa0] sm:$0xff]  }
 0x33a   :  { %v5681_v23 = vpop.f32.mrf.mxu1  ;;  %5933 = vmatpush1.bf16.msra.mxu0 %v9008_v7  ;;  %v9058_v0 = vld [vmem:[#allocation2 + $0x17e0] ss:$40 sps:$4 sm:$0xff]   ;;  %v9063_v6 = vld [vmem:[#allocation2 + $0x1790] ss:$40 sps:$4 sm:$0xff]  }
 0x33b   :  { %7736 = vmatpush3.bf16.msra.mxu1 %v9012_v14  ;;  %v5641_v59 = vpop.f32.mrf.mxu0  ;;  %5934 = vmatprep.subr.bf16.mxu0 %v9015_v4  ;;  %v9067_v7 = vld [vmem:[#allocation6 + $0x98] sm:$0xff]   ;;  %v9071_v4 = vld [vmem:[#allocation6 + $0xd0] sm:$0xff]  }
 0x33c   :  { %7737 = vmatprep.subr.bf16.mxu1 %v9016_v54  ;;  %v5682_v48 = vpop.f32.mrf.mxu1  ;;  %v9070_v14 = vld [vmem:[#allocation2 + $0x1744] ss:$40 sps:$4 sm:$0xff]   ;;  %v926_v54 = vsub.s32 7, %v9336_v43  ;;  %v9068_v20 = vld [vmem:[#allocation2 + $0x1740] ss:$40 sps:$4 sm:$0xff]  }
 0x33d   :  { %v9072_v23 = vld [vmem:[#allocation6 + $0x90] sm:$0xff]   ;;  %v9077_v48 = vld [vmem:[#allocation6 + $0x88] sm:$0xff]  }
 0x33e   :  { %5935 = vmatpush1.bf16.msra.mxu0 %v9013_v56  ;;  %v9075_v56 = vld [vmem:[#allocation2 + $0x16f4] ss:$40 sps:$4 sm:$0xff]   ;;  %v9135_v59 = vld [vmem:[#allocation4] sm:$0xff] }
 0x33f   :  { %7738 = vmatpush3.bf16.msra.mxu1 %v9017_v58  ;;  %5936 = vmatprep.subr.bf16.mxu0 %v9020_v41  ;;  %v9076_v58 = vld [vmem:[#allocation6 + $0xc8] sm:$0xff]   ;;  %v927_v41 = vrot.slane %v9135_v59, %v926_v54  ;;  %v9113_v59 = vld [vmem:[#allocation6 + $0x100] sm:$0xff]  }
 0x340   :  { %7739 = vmatprep.subr.bf16.mxu1 %v9021_v60  ;;  %v9073_v60 = vld [vmem:[#allocation2 + $0x16f0] ss:$40 sps:$4 sm:$0xff]  }
 0x341   :  { %v9109_v54 = vld [vmem:[#allocation6 + $0x108] sm:$0xff]  }
 0x342   :  { %5937 = vmatpush1.bf16.msra.mxu0 %v9018_v52  ;;  %v9080_v52 = vld [vmem:[#allocation2 + $0x16a4] ss:$40 sps:$4 sm:$0xff]  }
 0x343   :  { %7740 = vmatpush3.bf16.msra.mxu1 %v9022_v61  ;;  %5938 = vmatprep.subr.bf16.mxu0 %v9025_v62  ;;  %v9081_v61 = vld [vmem:[#allocation6 + $0xc0] sm:$0xff]   ;;  %v5598_v62 = vadd.f32 %v9429_v21, %v927_v41  ;;  %v9086_v21 = vld [vmem:[#allocation6 + $0x1b8] sm:$0xff]   ;;  %v5975_v41 = vmax.f32 %v9427_v15, 0.0  ;;  %v9120_v15 = vld [vmem:[#allocation6 + $0x228] sm:$0xff]  }
 0x344   :  { %7741 = vmatprep.subr.bf16.mxu1 %v9026_v27  ;;  %v9078_v27 = vld [vmem:[#allocation2 + $0x16a0] ss:$40 sps:$4 sm:$0xff]  }
 0x346   :  { %5939 = vmatpush1.bf16.msra.mxu0 %v9023_v63  ;;  %v9082_v63 = vld [vmem:[#allocation6 + $0x80] sm:$0xff]  }
 0x347   :  { %7742 = vmatpush3.bf16.msra.mxu1 %v9027_v2  ;;  %5940 = vmatprep.subr.bf16.mxu0 %v9030_v3  ;;  %v5973_v2 = vmax.f32 %v9392_v25, 0.0  ;;  %v9083_v3 = vld [vmem:[#allocation6 + $0x178] sm:$0xff]  }
 0x348   :  { %7743 = vmatprep.subr.bf16.mxu1 %v9031_v9  ;;  %v9084_v9 = vld [vmem:[#allocation6 + $0x1f8] sm:$0xff]  }
 0x34a   :  { %5941 = vmatpush1.bf16.msra.mxu0 %v9028_v10  ;;  %v5976_v10 = vmax.f32 %v9432_v8, 0.0  ;;  %v9089_v8 = vld [vmem:[#allocation6 + $0x130] sm:$0xff]  }
 0x34b   :  { %7744 = vmatpush3.bf16.msra.mxu1 %v9032_v13  ;;  %5942 = vmatprep.subr.bf16.mxu0 %v9035_v16  ;;  %v5639_v13 = vadd.f32 %v9442_v47, %v5598_v62  ;;  %v9085_v16 = vld [vmem:[#allocation6 + $0x138] sm:$0xff]  }
 0x34c   :  { %7745 = vmatprep.subr.bf16.mxu1 %v9036_v17  ;;  %v5983_v17 = vpack.c.bf16 %v5973_v2, %v5973_v2  ;;  %v9116_v62 = vld [vmem:[#allocation6 + $0x238] sm:$0xff]   ;;  %v9119_v2 = vld [vmem:[#allocation6 + $0x268] sm:$0xff]  }
 0x34e   :  { %5943 = vmatpush1.bf16.msra.mxu0 %v9033_v46  ;;  %v9087_v46 = vld [vmem:[#allocation6 + $0x170] sm:$0xff]  }
 0x34f   :  { %7746 = vmatpush3.bf16.msra.mxu1 %v9037_v18  ;;  %5944 = vmatprep.subr.bf16.mxu0 %v9040_v19  ;;  %v5986_v18 = vpack.c.bf16 %v5976_v10, %v5976_v10  ;;  %v9088_v19 = vld [vmem:[#allocation6 + $0x1f0] sm:$0xff]   ;;  %v9123_v10 = vld [vmem:[#allocation6 + $0x258] sm:$0xff]  }
 0x350   :  { %7747 = vmatprep.subr.bf16.mxu1 %v9041_v11 }
 0x352   :  { %5945 = vmatpush1.bf16.msra.mxu0 %v9038_v50  ;;  %v5680_v50 = vadd.f32 %v9444_v51, %v5639_v13  ;;  %v9094_v51 = vld [vmem:[#allocation6 + $0x1a8] sm:$0xff]   ;;  %v9124_v13 = vld [vmem:[#allocation6 + $0x218] sm:$0xff]  }
 0x353   :  { %7748 = vmatpush3.bf16.msra.mxu1 %v9042_v22  ;;  %5946 = vmatprep.subr.bf16.mxu0 %v9045_v26  ;;  %v9091_v26 = vld [vmem:[#allocation6 + $0x168] sm:$0xff]  }
 0x354   :  { %7755 = vmatprep.subr.bf16.mxu1 %v9046_v28 }
 0x356   :  { %6671 = vmatmul.mubr.bf16.vlgmr.msra.gmra.mxu1 %v5981_v31  ;;  %5947 = vmatpush2.bf16.msra.mxu0 %v9043_v30 }
 0x357   :  { %7756 = vmatpush3.bf16.msra.mxu1 %v9047_v5  ;;  %6710 = vmatprep.mubr.bf16.mxu1 %v5984_v32 }
 0x358   :  { %5948 = vmatprep.subr.bf16.mxu0 %v9050_v36  ;;  %7757 = vmatprep.subr.bf16.mxu1 %v9051_v40  ;;  %v9095_v40 = vld [vmem:[#allocation6 + $0x160] sm:$0xff]  }
 0x35a   :  { %5949 = vmatpush2.bf16.msra.mxu0 %v9048_v1 }
 0x35b   :  { %7758 = vmatpush3.bf16.msra.mxu1 %v9052_v33  ;;  %5950 = vmatprep.subr.bf16.mxu0 %v9055_v57  ;;  %v9096_v33 = vld [vmem:[#allocation6 + $0x1e0] sm:$0xff]  }
 0x35c   :  { %7759 = vmatprep.subr.bf16.mxu1 %v9056_v35  ;;  %v9097_v35 = vld [vmem:[#allocation6 + $0x120] sm:$0xff]  }
 0x35e   :  { %5951 = vmatpush2.bf16.msra.mxu0 %v9053_v12  ;;  %v9098_v12 = vld [vmem:[#allocation6 + $0x1a0] sm:$0xff]  }
 0x35f   :  { %7760 = vmatpush3.bf16.msra.mxu1 %v9057_v37  ;;  %5952 = vmatprep.subr.bf16.mxu0 %v9060_v38  ;;  %v9099_v37 = vld [vmem:[#allocation6 + $0x158] sm:$0xff]  }
 0x360   :  { %7761 = vmatprep.subr.bf16.mxu1 %v9061_v39  ;;  %v9100_v38 = vld [vmem:[#allocation6 + $0x1d8] sm:$0xff]  }
 0x361   :  { %v9101_v39 = vld [vmem:[#allocation6 + $0x118] sm:$0xff]  }
 0x362   :  { %5953 = vmatpush2.bf16.msra.mxu0 %v9058_v0  ;;  %v9102_v0 = vld [vmem:[#allocation6 + $0x198] sm:$0xff]  }
 0x363   :  { %7762 = vmatpush3.bf16.msra.mxu1 %v9062_v42  ;;  %5954 = vmatprep.subr.bf16.mxu0 %v9065_v44  ;;  %v9103_v42 = vld [vmem:[#allocation6 + $0x150] sm:$0xff]  }
 0x364   :  { %7763 = vmatprep.subr.bf16.mxu1 %v9066_v45  ;;  %v9104_v44 = vld [vmem:[#allocation6 + $0x1d0] sm:$0xff]  }
 0x365   :  { %v9105_v45 = vld [vmem:[#allocation6 + $0x110] sm:$0xff]  }
 0x366   :  { %5955 = vmatpush2.bf16.msra.mxu0 %v9063_v6  ;;  %v9106_v6 = vld [vmem:[#allocation6 + $0x190] sm:$0xff]  }
 0x367   :  { %7764 = vmatpush3.bf16.msra.mxu1 %v9067_v7  ;;  %5956 = vmatprep.subr.bf16.mxu0 %v9070_v14  ;;  %v9107_v7 = vld [vmem:[#allocation6 + $0x148] sm:$0xff]  }
 0x368   :  { %7765 = vmatprep.subr.bf16.mxu1 %v9071_v4  ;;  %v9108_v4 = vld [vmem:[#allocation6 + $0x1c8] sm:$0xff]  }
 0x36a   :  { %5957 = vmatpush2.bf16.msra.mxu0 %v9068_v20  ;;  %v9110_v20 = vld [vmem:[#allocation6 + $0x188] sm:$0xff]  }
 0x36b   :  { %7766 = vmatpush3.bf16.msra.mxu1 %v9072_v23  ;;  %5958 = vmatprep.subr.bf16.mxu0 %v9075_v56  ;;  %v9111_v23 = vld [vmem:[#allocation6 + $0x140] sm:$0xff]  }
 0x36c   :  { %7767 = vmatprep.subr.bf16.mxu1 %v9076_v58  ;;  %v9112_v58 = vld [vmem:[#allocation6 + $0x1c0] sm:$0xff]  }
 0x36e   :  { %5959 = vmatpush2.bf16.msra.mxu0 %v9073_v60  ;;  %v9114_v60 = vld [vmem:[#allocation6 + $0x180] sm:$0xff]  }
 0x36f   :  { %7768 = vmatpush3.bf16.msra.mxu1 %v9077_v48  ;;  %5960 = vmatprep.subr.bf16.mxu0 %v9080_v52 }
 0x370   :  { %7769 = vmatprep.subr.bf16.mxu1 %v9081_v61  ;;  %v9115_v61 = vld [vmem:[#allocation6 + $0x278] sm:$0xff]  }
 0x372   :  { %5961 = vmatpush2.bf16.msra.mxu0 %v9078_v27  ;;  %v9117_v27 = vld [vmem:[#allocation6 + $0x270] sm:$0xff]  }
 0x373   :  { %7770 = vmatpush3.bf16.msra.mxu1 %v9082_v63  ;;  %7777 = vmatprep.subr.bf16.mxu0 %v9083_v3  ;;  %v9118_v63 = vld [vmem:[#allocation6 + $0x230] sm:$0xff]   ;;  %v9121_v3 = vld [vmem:[#allocation6 + $0x260] sm:$0xff]  }
 0x374   :  { %7799 = vmatprep.subr.bf16.mxu1 %v9084_v9  ;;  %v9122_v9 = vld [vmem:[#allocation6 + $0x220] sm:$0xff]  }
 0x375   :  { %v5718_v11 = vpop.f32.mrf.mxu0  ;;  %5963 = vmatmul.mubr.bf16.vlgmr.msra.gmra.mxu0 %v9330_v34  ;;  %v9093_v34 = vld [vmem:[#allocation6 + $0x128] sm:$0xff]  }
 0x376   :  { %6711 = vmatmul.mubr.bf16.vlgmr.msra.gmra.mxu1 %v5983_v17  ;;  %v5759_v25 = vpop.f32.mrf.mxu1  ;;  %7778 = vmatpush3.bf16.msra.mxu0 %v9085_v16  ;;  %v5719_v14 = vadd.f32 %v5718_v11, %v9446_v55  ;;  %v5985_v55 = vpack.c.bf16 %v5975_v41, %v5975_v41  ;;  %v9125_v16 = vld [vmem:[#allocation6 + $0x250] sm:$0xff]  }
 0x377   :  { %6750 = vmatprep.mubr.bf16.mxu0 %v5986_v18  ;;  %7800 = vmatpush3.bf16.msra.mxu1 %v9086_v21  ;;  %v5720_v47 = vpop.f32.mrf.mxu0  ;;  %v9126_v17 = vld [vmem:[#allocation6 + $0x210] sm:$0xff]   ;;  %v893_v21 = vld [vmem:[#allocation4 + $0x8] sm:$0x3] }
 0x378   :  { %v5761_v22 = vpop.f32.mrf.mxu1  ;;  %7779 = vmatprep.subr.bf16.mxu0 %v9087_v46  ;;  %v5721_v28 = vadd.f32 %v5720_v47, %v5680_v50  ;;  %7801 = vmatprep.subr.bf16.mxu1 %v9088_v19  ;;  %v5760_v56 = vadd.f32 %v5759_v25, %v5719_v14  ;;  %v931_v46 = vrot.slane %v893_v21, %v898_v49  ;;  %v9127_v50 = vld [vmem:[#allocation6 + $0x248] sm:$0xff]  }
 0x379   :  { %v5722_v30 = vpop.f32.mrf.mxu0  ;;  %v935_v18 = vrot.slane %v893_v21, %v902_v53 }
 0x37a   :  { %v5763_v5 = vpop.f32.mrf.mxu1  ;;  %v5762_v31 = vadd.f32 %v5761_v22, %v5721_v28  ;;  %7780 = vmatpush3.bf16.msra.mxu0 %v9089_v8  ;;  %v5977_v48 = vmax.f32 %v5760_v56, 0.0  ;;  %v9128_v22 = vld [vmem:[#allocation6 + $0x208] sm:$0xff]  }
 0x37b   :  { %7802 = vmatpush3.bf16.msra.mxu1 %v9090_v24  ;;  %v5723_v36 = vpop.f32.mrf.mxu0  ;;  %7781 = vmatprep.subr.bf16.mxu0 %v9091_v26  ;;  %v9129_v5 = vld [vmem:[#allocation6 + $0x240] sm:$0xff]  }
 0x37c   :  { %v5764_v32 = vpop.f32.mrf.mxu1  ;;  %v5978_v1 = vmax.f32 %v5762_v31, 0.0  ;;  %7803 = vmatprep.subr.bf16.mxu1 %v9092_v29  ;;  %v5987_v52 = vpack.c.bf16 %v5977_v48, %v5977_v48 }
 0x37e   :  { %v5988_v57 = vpack.c.bf16 %v5978_v1, %v5978_v1  ;;  %7782 = vmatpush3.bf16.msra.mxu0 %v9093_v34  ;;  %v9130_v34 = vld [vmem:[#allocation6 + $0x200] sm:$0xff]  }
 0x37f   :  { %7804 = vmatpush3.bf16.msra.mxu1 %v9094_v51  ;;  %7783 = vmatprep.subr.bf16.mxu0 %v9095_v40 }
 0x380   :  { %6790 = vmatprep.mubr.bf16.mxu1 %v5988_v57  ;;  %7805 = vmatprep.subr.bf16.mxu1 %v9096_v33 }
 0x382   :  { %7784 = vmatpush3.bf16.msra.mxu0 %v9097_v35 }
 0x383   :  { %7806 = vmatpush3.bf16.msra.mxu1 %v9098_v12  ;;  %7785 = vmatprep.subr.bf16.mxu0 %v9099_v37 }
 0x384   :  { %7807 = vmatprep.subr.bf16.mxu1 %v9100_v38 }
 0x386   :  { %7786 = vmatpush3.bf16.msra.mxu0 %v9101_v39 }
 0x387   :  { %7808 = vmatpush3.bf16.msra.mxu1 %v9102_v0  ;;  %7787 = vmatprep.subr.bf16.mxu0 %v9103_v42 }
 0x388   :  { %7809 = vmatprep.subr.bf16.mxu1 %v9104_v44  ;;  %v7652_v44 = vld [vmem:[#allocation7] ss:$0 sm:$0xff] }
 0x38a   :  { %7788 = vmatpush3.bf16.msra.mxu0 %v9105_v45 }
 0x38b   :  { %7810 = vmatpush3.bf16.msra.mxu1 %v9106_v6  ;;  %7789 = vmatprep.subr.bf16.mxu0 %v9107_v7 }
 0x38c   :  { %7811 = vmatprep.subr.bf16.mxu1 %v9108_v4 }
 0x38e   :  { %7790 = vmatpush3.bf16.msra.mxu0 %v9109_v54 }
 0x38f   :  { %7812 = vmatpush3.bf16.msra.mxu1 %v9110_v20  ;;  %7791 = vmatprep.subr.bf16.mxu0 %v9111_v23 }
 0x390   :  { %7813 = vmatprep.subr.bf16.mxu1 %v9112_v58 }
 0x392   :  { %7792 = vmatpush3.bf16.msra.mxu0 %v9113_v59 }
 0x393   :  { %7814 = vmatpush3.bf16.msra.mxu1 %v9114_v60  ;;  %7821 = vmatprep.subr.bf16.mxu0 %v9115_v61 }
 0x395   :  { %6751 = vmatmul.mubr.bf16.vlgmr.msra.gmra.mxu0 %v5985_v55 }
 0x396   :  { %6791 = vmatmul.mubr.bf16.vlgmr.msra.gmra.mxu1 %v5987_v52  ;;  %7822 = vmatpush3.bf16.msra.mxu0 %v9116_v62 }
 0x397   :  { %7823 = vmatprep.subr.bf16.mxu0 %v9117_v27 }
 0x39a   :  { %7824 = vmatpush3.bf16.msra.mxu0 %v9118_v63 }
 0x39b   :  { %7825 = vmatprep.subr.bf16.mxu0 %v9119_v2 }
 0x39e   :  { %7826 = vmatpush3.bf16.msra.mxu0 %v9120_v15 }
 0x39f   :  { %7827 = vmatprep.subr.bf16.mxu0 %v9121_v3 }
 0x3a2   :  { %7828 = vmatpush3.bf16.msra.mxu0 %v9122_v9 }
 0x3a3   :  { %7829 = vmatprep.subr.bf16.mxu0 %v9123_v10 }
 0x3a6   :  { %7830 = vmatpush3.bf16.msra.mxu0 %v9124_v13 }
 0x3a7   :  { %7831 = vmatprep.subr.bf16.mxu0 %v9125_v16 }
 0x3aa   :  { %7832 = vmatpush3.bf16.msra.mxu0 %v9126_v17 }
 0x3ab   :  { %7833 = vmatprep.subr.bf16.mxu0 %v9127_v50 }
 0x3ae   :  { %7834 = vmatpush3.bf16.msra.mxu0 %v9128_v22 }
 0x3af   :  { %7835 = vmatprep.subr.bf16.mxu0 %v9129_v5 }
 0x3b2   :  { %7836 = vmatpush3.bf16.msra.mxu0 %v9130_v34 }
 0x3b5   :  { %v5800_v19 = vpop.f32.mrf.mxu0 }
 0x3b6   :  { %v5841_v11 = vpop.f32.mrf.mxu1  ;;  %v5801_v25 = vadd.f32 %v5800_v19, %v931_v46 }
 0x3b7   :  { %v5802_v8 = vpop.f32.mrf.mxu0 }
 0x3b8   :  { %v5843_v47 = vpop.f32.mrf.mxu1  ;;  %v5803_v24 = vadd.f32 %v5802_v8, %v935_v18  ;;  %v5842_v26 = vadd.f32 %v5841_v11, %v5801_v25 }
 0x3b9   :  { %v5804_v28 = vpop.f32.mrf.mxu0 }
 0x3ba   :  { %v5845_v29 = vpop.f32.mrf.mxu1  ;;  %v5844_v30 = vadd.f32 %v5843_v47, %v5803_v24 }
 0x3bb   :  { %v5805_v49 = vpop.f32.mrf.mxu0 }
 0x3bc   :  { %v5846_v31 = vpop.f32.mrf.mxu1 }
 0x3f5   :  { %v5882_v43 = vpop.f32.mrf.mxu0 }
 0x3f6   :  { %v5923_v53 = vpop.f32.mrf.mxu1  ;;  %v5883_v36 = vadd.f32 %v5882_v43, %v5842_v26 }
 0x3f7   :  { %v5884_v51 = vpop.f32.mrf.mxu0 }
 0x3f8   :  { %v5925_v40 = vpop.f32.mrf.mxu1  ;;  %v5924_v32 = vadd.f32 %v5923_v53, %v5883_v36  ;;  %v5885_v42 = vadd.f32 %v5884_v51, %v5844_v30 }
 0x3f9   :  { %v5886_v1 = vpop.f32.mrf.mxu0 }
 0x3fa   :  { %v5927_v33 = vpop.f32.mrf.mxu1  ;;  %v5926_v7 = vadd.f32 %v5925_v40, %v5885_v42 }
 0x3fb   :  { %v5887_v57 = vpop.f32.mrf.mxu0 }
 0x3fc   :  { %v5928_v35 = vpop.f32.mrf.mxu1 }
 0x416   :  { %v7749_v12 = vpop.f32.mrf.mxu1 }
 0x418   :  { %v7750_v37 = vpop.f32.mrf.mxu1 }
 0x419   :  { %v7751_v38 = vadd.f32 %v7750_v37, %v7749_v12 }
 0x41a   :  { %v7752_v39 = vpop.f32.mrf.mxu1 }
 0x41b   :  { %v6673_v20 = vadd.f32 %v7751_v38, %v7652_v44 }
 0x41c   :  { %v7753_v0 = vpop.f32.mrf.mxu1 }
 0x435   :  { %v5964_v45 = vpop.f32.mrf.mxu0 }
 0x436   :  { %v7771_v6 = vpop.f32.mrf.mxu1  ;;  %v5965_v14 = vadd.f32 %v5964_v45, %v5924_v32 }
 0x437   :  { %v5966_v4 = vpop.f32.mrf.mxu0 }
 0x438   :  { %v7772_v54 = vpop.f32.mrf.mxu1  ;;  %v5967_v23 = vadd.f32 %v5966_v4, %v5926_v7  ;;  %v5979_v58 = vmax.f32 %v5965_v14, 0.0 }
 0x439   :  { %v7773_v56 = vadd.f32 %v7772_v54, %v7771_v6  ;;  %v5968_v59 = vpop.f32.mrf.mxu0 }
 0x43a   :  { %v7774_v41 = vpop.f32.mrf.mxu1  ;;  %v5980_v60 = vmax.f32 %v5967_v23, 0.0  ;;  %v5989_v62 = vpack.c.bf16 %v5979_v58, %v5979_v58 }
 0x43b   :  { %v6713_v48 = vadd.f32 %v7773_v56, %v6673_v20  ;;  %v5969_v55 = vpop.f32.mrf.mxu0 }
 0x43c   :  { %v7775_v52 = vpop.f32.mrf.mxu1  ;;  %v5990_v61 = vpack.c.bf16 %v5980_v60, %v5980_v60 }
 0x43e   :  { %6830 = vmatprep.mubr.bf16.mxu0 %v5990_v61 }
 0x43f   :  { %6831 = vmatmul.mubr.bf16.vlgmr.msra.gmra.mxu0 %v5989_v62 }
 0x455   :  { %v7793_v27 = vpop.f32.mrf.mxu0 }
 0x456   :  { %v7815_v63 = vpop.f32.mrf.mxu1 }
 0x457   :  { %v7794_v2 = vpop.f32.mrf.mxu0 }
 0x458   :  { %v7795_v15 = vadd.f32 %v7794_v2, %v7793_v27  ;;  %v7816_v3 = vpop.f32.mrf.mxu1 }
 0x459   :  { %v7817_v9 = vadd.f32 %v7816_v3, %v7815_v63  ;;  %v7796_v10 = vpop.f32.mrf.mxu0 }
 0x45a   :  { %v6753_v13 = vadd.f32 %v7795_v15, %v6713_v48  ;;  %v7818_v16 = vpop.f32.mrf.mxu1 }
 0x45b   :  { %v7797_v17 = vpop.f32.mrf.mxu0 }
 0x45c   :  { %v6793_v21 = vadd.f32 %v7817_v9, %v6753_v13  ;;  %v7819_v46 = vpop.f32.mrf.mxu1 }
 0x4ff   :  { %v7837_v18 = vpop.f32.mrf.mxu0 }
 0x501   :  { %v7838_v19 = vpop.f32.mrf.mxu0 }
 0x502   :  { %v7839_v11 = vadd.f32 %v7838_v19, %v7837_v18 }
 0x503   :  { %v7840_v25 = vpop.f32.mrf.mxu0 }
 0x504   :  { %v6833_v50 = vadd.f32 %v7839_v11, %v6793_v21 }
 0x505   :  { %v7841_v8 = vpop.f32.mrf.mxu0 }
 0x506   :  { %v6838_v47 = vmul.f32 %v6833_v50, %v6833_v50 }
 0x508   :  { %6839 = vadd.xlane.f32.xlu0 %v6838_v47 }
 0x591   :  { %v6840_v22 = vpop.xlane.xlu0 %6839 }
 0x592   :  { %v6841_v24 = vmax.f32 %v6840_v22, 1e-24 }
 0x594   :  { %9131 = vrsqrt.f32 %v6841_v24 }
 0x5a1   :  { %v9132_v26 = vpop.eup %9131 }
 0x5a2   :  { %v6843_v28 = vmul.f32 %v9132_v26, %v6833_v50 }
 0x5a4   :  { %6844 = vst [vmem:[%s9472_s5] sm:$0xff] %v6843_v28 }
 0x5a5   :  { %6849 = vsyncpa [#allocation3], 1 }
 0x5a6   :  { %6850 = vsyncpa [#allocation5], 1 }
 0x5a7   :  { %6851 = vsyncpa [#allocation8], 1 }

</bundles_post_ra>
